<compile_context>
chip_gen: v7x
topology: tpu7x:2x2x1
jax: 0.10.0
libtpu: 0.0.40
codegen_flags: <defaults>
</compile_context>

<pallas_src>
import functools

import numpy as np
import jax
import jax.numpy as jnp
from jax import lax
from jax.experimental import pallas as pl
from jax.experimental.pallas import tpu as pltpu

# 3x3 neighbor offsets in raster order (matches the torch _init_aff kernels).
_NEIGH8 = ((-1, -1), (-1, 0), (-1, 1), (0, -1), (0, 1), (1, -1), (1, 0), (1, 1))


def _round_up(a, b):
    return (a + b - 1) // b * b


def _offsets(dilations):
    return tuple((dy * d, dx * d) for d in dilations for (dy, dx) in _NEIGH8)


def _fast_recip(v):
    """EUP approximate reciprocal + one Newton step (~fp32 accurate)."""
    r = pl.reciprocal(v, approx=True)
    return r * (2.0 - v * r)


def _shift_cols(rows, dx, W, col):
    """rows[..., clamp(j + dx, 0, W-1)] via a lane roll + clamp select.

    rows: (N, R, Wp) with Wp a multiple of 128; col: int32 iota (1, 1, Wp).
    Lane-dense replacement for misaligned dx slices; exact for columns < W.
    """
    if dx == 0:
        return rows
    Wp = rows.shape[-1]
    rolled = pltpu.roll(rows, shift=(-dx) % Wp, axis=rows.ndim - 1)
    if dx > 0:
        edge = rows[..., W - 1:W]              # replicate right edge
        return jnp.where(col >= W - dx, edge, rolled)
    edge = rows[..., 0:1]                      # replicate left edge
    return jnp.where(col < -dx, edge, rolled)


# --------------------------- stage 1: affinity ---------------------------

def _affinity_kernel(x_ref, w_ref, logit_ref, diff_ref, *, dilations, W, TH, dmax):
    # x_ref:     (K, Hc + 2*dmax, Wp)  row-padded image (resident per batch)
    # w_ref:     (NN, TH, Wp)          output softmax weights tile
    # logit_ref: (NN, TH, Wp) f32      staging for logits / exp values
    # diff_ref:  (NN, K, TH, Wp) f32   cached neighbor differences
    K = x_ref.shape[0]
    Wp = x_ref.shape[-1]
    NN = 8 * len(dilations)
    n9 = float(9 * len(dilations))

    row_base = pl.multiple_of(pl.program_id(1) * TH, TH)
    row0 = row_base + dmax                      # padded-row index of tile row 0
    col = lax.broadcasted_iota(jnp.int32, (1, 1, Wp), 2)

    center = x_ref[:, pl.ds(row0, TH), :]       # (K, TH, Wp)

    # Pass 1: cache per-neighbor differences + one-pass variance sums
    # (shifted x windows are read exactly once).
    sd = jnp.zeros((K, TH, Wp), jnp.float32)
    sd2 = jnp.zeros((K, TH, Wp), jnp.float32)
    for di, d in enumerate(dilations):
        for dy_u in (-1, 0, 1):
            rows = center if dy_u == 0 else x_ref[:, pl.ds(row0 + dy_u * d, TH), :]
            for dx_u in (-1, 0, 1):
                if dy_u == 0 and dx_u == 0:
                    continue
                n = di * 8 + _NEIGH8.index((dy_u, dx_u))
                diff = _shift_cols(rows, dx_u * d, W, col) - center
                diff_ref[n] = diff
                sd = sd + diff
                sd2 = sd2 + diff * diff

    # LocalStDev: ddof=1 std of the 9*nd window values (centered formulation;
    # the nd center samples contribute zero to both sums).
    var = (sd2 - sd * sd * (1.0 / n9)) * (1.0 / (n9 - 1.0))
    x_std = jnp.sqrt(jnp.maximum(var, 0.0))
    inv_denom = _fast_recip(1e-8 + 0.1 * x_std)          # (K, TH, Wp)

    # Pass 2: logits = -mean_k(|diff_k| * inv_denom_k); running max fused in.
    neg_inv_k = -1.0 / float(K)
    mx = jnp.full((TH, Wp), -jnp.inf, jnp.float32)
    for n in range(NN):
        logit = jnp.sum(jnp.abs(diff_ref[n]) * inv_denom, axis=0) * neg_inv_k
        logit_ref[n] = logit
        mx = jnp.maximum(mx, logit)

    # Streamed softmax: exp + sum pass, then normalize + cast + store pass.
    z = jnp.zeros((TH, Wp), jnp.float32)
    for n in range(NN):
        e = jnp.exp(logit_ref[n] - mx)
        logit_ref[n] = e
        z = z + e
    inv_z = _fast_recip(z)
    for n in range(NN):
        w_ref[n] = (logit_ref[n] * inv_z).astype(w_ref.dtype)


# ------------------------- stage 2: propagation --------------------------

def _propagate_kernel(w_ref, m_ref, o_ref, state_ref, *,
                      dilations, num_iter, W, H, dmax):
    # w_ref:     (NN, Hc, Wp)          softmax weights (resident per batch)
    # m_ref:     (TC, Hc, Wp)          initial mask channel tile
    # o_ref:     (TC, Hc, Wp)          refined mask channel tile
    # state_ref: (TC, Hc + 2*dmax, Wp) row-padded fp32 mask state
    TC, Hc, Wp = m_ref.shape
    offsets = _offsets(dilations)
    col = lax.broadcasted_iota(jnp.int32, (1, 1, Wp), 2)

    def write_state(val):
        # Rows [0, H) are real.  Everything at/below row H (tile-rounding rows
        # plus the bottom halo) replicates row H-1 and the top halo replicates
        # row 0, so every dy-shifted read of a real row sees exact
        # replicate-pad values.  All stores are full lane width (no vst.msk).
        state_ref[:, dmax:dmax + H, :] = val[:, :H, :]
        top = val[:, 0:1, :]
        bot = val[:, H - 1:H, :]
        state_ref[:, 0:dmax, :] = jnp.broadcast_to(top, (TC, dmax, Wp))
        state_ref[:, dmax + H:Hc + 2 * dmax, :] = jnp.broadcast_to(
            bot, (TC, Hc + dmax - H, Wp))

    write_state(m_ref[...])

    @pl.loop(0, num_iter)
    def _(it):
        acc = jnp.zeros((TC, Hc, Wp), jnp.float32)        # fp32 accumulation
        for n, (dy, dx) in enumerate(offsets):
            w_n = w_ref[n].astype(jnp.float32)            # (Hc, Wp)
            rows = state_ref[:, dmax + dy:dmax + dy + Hc, :]
            acc = acc + _shift_cols(rows, dx, W, col) * w_n[None]

        @pl.when(it == num_iter - 1)
        def _():
            o_ref[...] = acc          # last iteration writes the output block

        @pl.when(it < num_iter - 1)
        def _():
            write_state(acc)


# ------------------------------ wrapper ----------------------------------

def _bilinear_align_corners(m, H, W):
    """F.interpolate(mode='bilinear', align_corners=True) equivalent (glue)."""
    B, C, h, w = m.shape
    if (h, w) == (H, W):
        return m
    ys = jnp.linspace(0.0, h - 1.0, H)
    xs = jnp.linspace(0.0, w - 1.0, W)
    y0 = jnp.floor(ys).astype(jnp.int32)
    y1 = jnp.minimum(y0 + 1, h - 1)
    x0 = jnp.floor(xs).astype(jnp.int32)
    x1 = jnp.minimum(x0 + 1, w - 1)
    wy = (ys - y0.astype(ys.dtype))[:, None]
    wx = (xs - x0.astype(xs.dtype))[None, :]
    g = lambda yi, xi: m[:, :, yi][:, :, :, xi]
    top = g(y0, x0) * (1 - wx) + g(y0, x1) * wx
    bot = g(y1, x0) * (1 - wx) + g(y1, x1) * wx
    return top * (1 - wy) + bot * wy


def _vmem_capacity_bytes():
    try:
        return int(pltpu.get_tpu_info().vmem_capacity_bytes)
    except Exception:
        return 64 * 1024 * 1024          # conservative (v7x per-core VMEM)


def _vmem_limit(required_bytes):
    cap = _vmem_capacity_bytes()
    limit = max(int(1.5 * required_bytes), 32 * 1024 * 1024)
    return int(min(limit, int(0.85 * cap)))


def pamr_pallas(x, mask, *, dilations=(1,), num_iter=1, row_tile=16,
                chan_tile=None, weights_dtype=jnp.float32):
    B, K, H, W = x.shape
    C = mask.shape[1]
    dilations = tuple(int(d) for d in dilations)
    dmax = max(dilations)
    nd = len(dilations)
    NN = 8 * nd

    x = x.astype(jnp.float32)
    mask = _bilinear_align_corners(mask.astype(jnp.float32), H, W)
    if int(num_iter) <= 0:
        return mask

    TH = _round_up(max(int(row_tile), 16), 16)       # bf16-friendly row tile
    TC = int(chan_tile) if chan_tile is not None else min(C, 8)

    Wp = _round_up(W, 128)                           # lane-dense width
    Hc = _round_up(H, TH)                            # row-tile-aligned height
    Cp = _round_up(C, TC)
    Hp = Hc + 2 * dmax

    # Replicate ("edge") pad rows by dmax (+ tile rounding) and cols to Wp.
    x_p = jnp.pad(x, ((0, 0), (0, 0), (dmax, dmax + Hc - H), (0, Wp - W)),
                  mode="edge")
    m_p = jnp.pad(mask, ((0, 0), (0, 0), (0, Hc - H), (0, Wp - W)), mode="edge")
    if Cp > C:
        m_p = jnp.pad(m_p, ((0, 0), (0, Cp - C), (0, 0), (0, 0)))

    esz = np.dtype(weights_dtype).itemsize

    # ------------------- stage 1: affinity weights -------------------
    aff_vmem = (2 * 4 * K * Hp * Wp              # resident image block (x2)
                + 2 * esz * NN * TH * Wp         # output weight tiles (x2)
                + 4 * NN * TH * Wp               # logit staging scratch
                + 4 * NN * K * TH * Wp           # cached neighbor diffs
                + 4 * 8 * K * TH * Wp)           # live temporaries headroom
    aff_kernel = functools.partial(
        _affinity_kernel, dilations=dilations, W=W, TH=TH, dmax=dmax)
    weights = pl.pallas_call(
        aff_kernel,
        out_shape=jax.ShapeDtypeStruct((B, NN, Hc, Wp), weights_dtype),
        grid=(B, Hc // TH),
        in_specs=[pl.BlockSpec((None, K, Hp, Wp), lambda b, i: (b, 0, 0, 0))],
        out_specs=pl.BlockSpec((None, NN, TH, Wp), lambda b, i: (b, 0, i, 0)),
        scratch_shapes=[
            pltpu.VMEM((NN, TH, Wp), jnp.float32),
            pltpu.VMEM((NN, K, TH, Wp), jnp.float32),
        ],
        compiler_params=pltpu.CompilerParams(
            dimension_semantics=("parallel", "parallel"),
            vmem_limit_bytes=_vmem_limit(aff_vmem)),
    )(x_p)

    # ---------------------- stage 2: propagation ----------------------
    prop_vmem = (2 * esz * NN * Hc * Wp          # resident weights block (x2)
                 + 4 * 4 * TC * Hc * Wp          # mask in/out blocks (x2 each)
                 + 4 * TC * (Hc + 2 * dmax) * Wp  # padded state scratch
                 + 4 * 4 * TC * Hc * Wp)         # accumulator / temporaries
    prop_kernel = functools.partial(
        _propagate_kernel, dilations=dilations, num_iter=int(num_iter),
        W=W, H=H, dmax=dmax)
    out = pl.pallas_call(
        prop_kernel,
        out_shape=jax.ShapeDtypeStruct((B, Cp, Hc, Wp), jnp.float32),
        grid=(B, Cp // TC),
        in_specs=[
            pl.BlockSpec((None, NN, Hc, Wp), lambda b, c: (b, 0, 0, 0)),
            pl.BlockSpec((None, TC, Hc, Wp), lambda b, c: (b, c, 0, 0)),
        ],
        out_specs=pl.BlockSpec((None, TC, Hc, Wp), lambda b, c: (b, c, 0, 0)),
        scratch_shapes=[pltpu.VMEM((TC, Hc + 2 * dmax, Wp), jnp.float32)],
        input_output_aliases={1: 0},
        compiler_params=pltpu.CompilerParams(
            dimension_semantics=("parallel", "parallel"),
            vmem_limit_bytes=_vmem_limit(prop_vmem)),
    )(weights, m_p)

    return out[:, :C, :H, :W]


# ------------------ pure-JAX reference (for checking) --------------------

def _make_weights():
    """Deterministic weights, exactly as the torch _init_aff methods build them."""
    w_x = np.zeros((8, 1, 3, 3), np.float32)   # LocalAffinityAbs kernel
    w_m = np.zeros((8, 1, 3, 3), np.float32)   # LocalAffinityCopy kernel
    w_s = np.zeros((9, 1, 3, 3), np.float32)   # LocalStDev kernel
    pos8 = [(0, 0), (0, 1), (0, 2), (1, 0), (1, 2), (2, 0), (2, 1), (2, 2)]
    for i, (r, c) in enumerate(pos8):
        w_x[i, 0, 1, 1] = 1.0
        w_x[i, 0, r, c] = -1.0
        w_m[i, 0, r, c] = 1.0
    for i in range(9):
        w_s[i, 0, i // 3, i % 3] = 1.0
    return jnp.asarray(w_x), jnp.asarray(w_m), jnp.asarray(w_s)


def _local_aff_ref(inp, weight, dilations):
    B, K, H, W = inp.shape
    xi = inp.reshape(B * K, 1, H, W)
    outs = []
    for d in dilations:
        xp = jnp.pad(xi, ((0, 0), (0, 0), (d, d), (d, d)), mode="edge")
        outs.append(lax.conv_general_dilated(
            xp, weight, window_strides=(1, 1), padding="VALID",
            rhs_dilation=(d, d), dimension_numbers=("NCHW", "OIHW", "NCHW"),
            precision=lax.Precision.HIGHEST))
    o = jnp.concatenate(outs, axis=1)
    return o.reshape(B, K, -1, H, W)


def pamr_ref(x, mask, *, dilations=(1,), num_iter=1):
    B, K, H, W = x.shape
    x = x.astype(jnp.float32)
    mask = _bilinear_align_corners(mask.astype(jnp.float32), H, W)
    w_x, w_m, w_s = _make_weights()
    x_std = jnp.std(_local_aff_ref(x, w_s, dilations), axis=2, ddof=1, keepdims=True)
    xa = -jnp.abs(_local_aff_ref(x, w_x, dilations)) / (1e-8 + 0.1 * x_std)
    xa = jnp.mean(xa, axis=1, keepdims=True)
    xa = jax.nn.softmax(xa, axis=2)
    for _ in range(num_iter):
        m = _local_aff_ref(mask, w_m, dilations)
        mask = jnp.sum(m * xa, axis=2)
    return mask


if __name__ == "__main__":
    key = jax.random.PRNGKey(0)
    kx, km = jax.random.split(key)
    # Small shapes that still exercise W-padding (24 -> 128), H tile rounding
    # (24 -> 32, two row tiles), channel tiling (3 -> 2x2) and the resize.
    B, K, H, W, C = 2, 4, 24, 24, 3
    x = jax.random.normal(kx, (B, K, H, W), jnp.float32)
    mask = jax.random.uniform(km, (B, C, 12, 12), jnp.float32)

    dilations = (1, 2)
    num_iter = 2

    ref = jax.block_until_ready(
        pamr_ref(x, mask, dilations=dilations, num_iter=num_iter))

    # fp32 weight storage (default; tight check against the reference).
    run_f32 = jax.jit(functools.partial(
        pamr_pallas, dilations=dilations, num_iter=num_iter,
        row_tile=16, chan_tile=2, weights_dtype=jnp.float32))
    out = jax.block_until_ready(run_f32(x, mask))
    np.testing.assert_allclose(np.asarray(out), np.asarray(ref),
                               rtol=2e-4, atol=2e-5)

    # bf16 weight storage (v6e/v7x lever; fp32 accumulation; looser check).
    run_bf16 = jax.jit(functools.partial(
        pamr_pallas, dilations=dilations, num_iter=num_iter,
        row_tile=16, chan_tile=2, weights_dtype=jnp.bfloat16))
    out_bf16 = jax.block_until_ready(run_bf16(x, mask))
    np.testing.assert_allclose(np.asarray(out_bf16), np.asarray(ref),
                               rtol=0, atol=2e-2)

    print("KERNEL_OK")
</pallas_src>

<mosaic_0001>
module attributes {stable_mosaic.version = 11 : i64} {
  func.func @_propagate_kernel(%arg0: i32, %arg1: i32, %arg2: memref<1x16x32x128xf32, #tpu.memory_space<vmem>>, %arg3: memref<1x2x32x128xf32, #tpu.memory_space<vmem>>, %arg4: memref<1x2x32x128xf32, #tpu.memory_space<vmem>>, %arg5: memref<2x36x128xf32, #tpu.memory_space<vmem>>) attributes {dimension_semantics = [#tpu.dimension_semantics<parallel>, #tpu.dimension_semantics<parallel>], iteration_bounds = array<i64: 2, 2>, scalar_prefetch = 0 : i64, scratch_operands = 1 : i64, tpu.core_type = #tpu.core_type<tc>, window_params = [{transform_indices = @transform_0, window_bounds = array<i64: 1, 16, 32, 128>}, {transform_indices = @transform_1, window_bounds = array<i64: 1, 2, 32, 128>}, {transform_indices = @transform_2, window_bounds = array<i64: 1, 2, 32, 128>}]} {
    %0 = tpu.iota {dimensions = array<i32: 2>} : vector<1x1x128xi32>
    %c0 = arith.constant 0 : index
    %c0_0 = arith.constant 0 : index
    %c0_1 = arith.constant 0 : index
    %c0_2 = arith.constant 0 : index
    %1 = vector.load %arg3[%c0, %c0_0, %c0_1, %c0_2] : memref<1x2x32x128xf32, #tpu.memory_space<vmem>>, vector<1x2x32x128xf32>
    %2 = vector.shape_cast %1 : vector<1x2x32x128xf32> to vector<2x32x128xf32>
    %3 = vector.extract_strided_slice %2 {offsets = [0, 0, 0], sizes = [2, 24, 128], strides = [1, 1, 1]} : vector<2x32x128xf32> to vector<2x24x128xf32>
    %c0_3 = arith.constant 0 : index
    %c2 = arith.constant 2 : index
    %c0_4 = arith.constant 0 : index
    %4 = vector.load %arg5[%c0_3, %c2, %c0_4] : memref<2x36x128xf32, #tpu.memory_space<vmem>>, vector<2x24x128xf32>
    tpu.vector_store %arg5[%c0_3, %c2, %c0_4], %3 {strides = array<i32>} : memref<2x36x128xf32, #tpu.memory_space<vmem>>, vector<2x24x128xf32>,
    %5 = vector.extract_strided_slice %2 {offsets = [0, 0, 0], sizes = [2, 1, 128], strides = [1, 1, 1]} : vector<2x32x128xf32> to vector<2x1x128xf32>
    %6 = vector.extract_strided_slice %2 {offsets = [0, 23, 0], sizes = [2, 1, 128], strides = [1, 1, 1]} : vector<2x32x128xf32> to vector<2x1x128xf32>
    %7 = vector.shape_cast %5 : vector<2x1x128xf32> to vector<2x1x128xf32>
    %8 = vector.broadcast %7 : vector<2x1x128xf32> to vector<2x2x128xf32>
    %c0_5 = arith.constant 0 : index
    %c0_6 = arith.constant 0 : index
    %c0_7 = arith.constant 0 : index
    %9 = vector.load %arg5[%c0_5, %c0_6, %c0_7] : memref<2x36x128xf32, #tpu.memory_space<vmem>>, vector<2x2x128xf32>
    tpu.vector_store %arg5[%c0_5, %c0_6, %c0_7], %8 {strides = array<i32>} : memref<2x36x128xf32, #tpu.memory_space<vmem>>, vector<2x2x128xf32>,
    %10 = vector.shape_cast %6 : vector<2x1x128xf32> to vector<2x1x128xf32>
    %11 = vector.broadcast %10 : vector<2x1x128xf32> to vector<2x10x128xf32>
    %c0_8 = arith.constant 0 : index
    %c26 = arith.constant 26 : index
    %c0_9 = arith.constant 0 : index
    %12 = vector.load %arg5[%c0_8, %c26, %c0_9] : memref<2x36x128xf32, #tpu.memory_space<vmem>>, vector<2x10x128xf32>
    tpu.vector_store %arg5[%c0_8, %c26, %c0_9], %11 {strides = array<i32>} : memref<2x36x128xf32, #tpu.memory_space<vmem>>, vector<2x10x128xf32>,
    %c0_i32 = arith.constant 0 : i32
    %c2_i32 = arith.constant 2 : i32
    %13 = arith.addi %c0_i32, %c2_i32 : i32
    %c1_i32 = arith.constant 1 : i32
    scf.for %arg6 = %c0_i32 to %13 step %c1_i32  : i32 {
      %c1_i32_11 = arith.constant 1 : i32
      %14 = arith.muli %arg6, %c1_i32_11 : i32
      %c0_i32_12 = arith.constant 0 : i32
      %15 = arith.addi %c0_i32_12, %14 : i32
      %cst = arith.constant 0.000000e+00 : f32
      %16 = vector.broadcast %cst : f32 to vector<2x32x128xf32>
      %c0_13 = arith.constant 0 : index
      %c0_14 = arith.constant 0 : index
      %c0_15 = arith.constant 0 : index
      %c0_16 = arith.constant 0 : index
      %17 = vector.load %arg2[%c0_13, %c0_14, %c0_15, %c0_16] : memref<1x16x32x128xf32, #tpu.memory_space<vmem>>, vector<1x1x32x128xf32>
      %18 = vector.shape_cast %17 : vector<1x1x32x128xf32> to vector<32x128xf32>
      %c0_17 = arith.constant 0 : index
      %c1 = arith.constant 1 : index
      %c0_18 = arith.constant 0 : index
      %19 = vector.load %arg5[%c0_17, %c1, %c0_18] : memref<2x36x128xf32, #tpu.memory_space<vmem>>, vector<2x32x128xf32>
      %c1_i32_19 = arith.constant 1 : i32
      %20 = tpu.dynamic_rotate %19 by %c1_i32_19 dim 2 : vector<2x32x128xf32>, i32 -> vector<2x32x128xf32>
      %21 = vector.extract_strided_slice %19 {offsets = [0, 0, 0], sizes = [2, 32, 1], strides = [1, 1, 1]} : vector<2x32x128xf32> to vector<2x32x1xf32>
      %c1_i32_20 = arith.constant 1 : i32
      %22 = vector.broadcast %c1_i32_20 : i32 to vector<1x1x128xi32>
      %23 = arith.cmpi slt, %0, %22 : vector<1x1x128xi32>
      %24 = vector.shape_cast %23 : vector<1x1x128xi1> to vector<1x1x128xi1>
      %25 = vector.broadcast %24 : vector<1x1x128xi1> to vector<2x32x128xi1>
      %26 = vector.shape_cast %21 : vector<2x32x1xf32> to vector<2x32x1xf32>
      %27 = vector.broadcast %26 : vector<2x32x1xf32> to vector<2x32x128xf32>
      %28 = arith.select %25, %27, %20 : vector<2x32x128xi1>, vector<2x32x128xf32>
      %29 = vector.shape_cast %18 : vector<32x128xf32> to vector<1x32x128xf32>
      %30 = vector.broadcast %29 : vector<1x32x128xf32> to vector<2x32x128xf32>
      %31 = arith.mulf %28, %30 : vector<2x32x128xf32>
      %32 = arith.addf %16, %31 : vector<2x32x128xf32>
      %c0_21 = arith.constant 0 : index
      %c1_22 = arith.constant 1 : index
      %c0_23 = arith.constant 0 : index
      %c0_24 = arith.constant 0 : index
      %33 = vector.load %arg2[%c0_21, %c1_22, %c0_23, %c0_24] : memref<1x16x32x128xf32, #tpu.memory_space<vmem>>, vector<1x1x32x128xf32>
      %34 = vector.shape_cast %33 : vector<1x1x32x128xf32> to vector<32x128xf32>
      %c0_25 = arith.constant 0 : index
      %c1_26 = arith.constant 1 : index
      %c0_27 = arith.constant 0 : index
      %35 = vector.load %arg5[%c0_25, %c1_26, %c0_27] : memref<2x36x128xf32, #tpu.memory_space<vmem>>, vector<2x32x128xf32>
      %36 = vector.shape_cast %34 : vector<32x128xf32> to vector<1x32x128xf32>
      %37 = vector.broadcast %36 : vector<1x32x128xf32> to vector<2x32x128xf32>
      %38 = arith.mulf %35, %37 : vector<2x32x128xf32>
      %39 = arith.addf %32, %38 : vector<2x32x128xf32>
      %c0_28 = arith.constant 0 : index
      %c2_29 = arith.constant 2 : index
      %c0_30 = arith.constant 0 : index
      %c0_31 = arith.constant 0 : index
      %40 = vector.load %arg2[%c0_28, %c2_29, %c0_30, %c0_31] : memref<1x16x32x128xf32, #tpu.memory_space<vmem>>, vector<1x1x32x128xf32>
      %41 = vector.shape_cast %40 : vector<1x1x32x128xf32> to vector<32x128xf32>
      %c0_32 = arith.constant 0 : index
      %c1_33 = arith.constant 1 : index
      %c0_34 = arith.constant 0 : index
      %42 = vector.load %arg5[%c0_32, %c1_33, %c0_34] : memref<2x36x128xf32, #tpu.memory_space<vmem>>, vector<2x32x128xf32>
      %c127_i32 = arith.constant 127 : i32
      %43 = tpu.dynamic_rotate %42 by %c127_i32 dim 2 : vector<2x32x128xf32>, i32 -> vector<2x32x128xf32>
      %44 = vector.extract_strided_slice %42 {offsets = [0, 0, 23], sizes = [2, 32, 1], strides = [1, 1, 1]} : vector<2x32x128xf32> to vector<2x32x1xf32>
      %c23_i32 = arith.constant 23 : i32
      %45 = vector.broadcast %c23_i32 : i32 to vector<1x1x128xi32>
      %46 = arith.cmpi sge, %0, %45 : vector<1x1x128xi32>
      %47 = vector.shape_cast %46 : vector<1x1x128xi1> to vector<1x1x128xi1>
      %48 = vector.broadcast %47 : vector<1x1x128xi1> to vector<2x32x128xi1>
      %49 = vector.shape_cast %44 : vector<2x32x1xf32> to vector<2x32x1xf32>
      %50 = vector.broadcast %49 : vector<2x32x1xf32> to vector<2x32x128xf32>
      %51 = arith.select %48, %50, %43 : vector<2x32x128xi1>, vector<2x32x128xf32>
      %52 = vector.shape_cast %41 : vector<32x128xf32> to vector<1x32x128xf32>
      %53 = vector.broadcast %52 : vector<1x32x128xf32> to vector<2x32x128xf32>
      %54 = arith.mulf %51, %53 : vector<2x32x128xf32>
      %55 = arith.addf %39, %54 : vector<2x32x128xf32>
      %c0_35 = arith.constant 0 : index
      %c3 = arith.constant 3 : index
      %c0_36 = arith.constant 0 : index
      %c0_37 = arith.constant 0 : index
      %56 = vector.load %arg2[%c0_35, %c3, %c0_36, %c0_37] : memref<1x16x32x128xf32, #tpu.memory_space<vmem>>, vector<1x1x32x128xf32>
      %57 = vector.shape_cast %56 : vector<1x1x32x128xf32> to vector<32x128xf32>
      %c0_38 = arith.constant 0 : index
      %c2_39 = arith.constant 2 : index
      %c0_40 = arith.constant 0 : index
      %58 = vector.load %arg5[%c0_38, %c2_39, %c0_40] : memref<2x36x128xf32, #tpu.memory_space<vmem>>, vector<2x32x128xf32>
      %c1_i32_41 = arith.constant 1 : i32
      %59 = tpu.dynamic_rotate %58 by %c1_i32_41 dim 2 : vector<2x32x128xf32>, i32 -> vector<2x32x128xf32>
      %60 = vector.extract_strided_slice %58 {offsets = [0, 0, 0], sizes = [2, 32, 1], strides = [1, 1, 1]} : vector<2x32x128xf32> to vector<2x32x1xf32>
      %c1_i32_42 = arith.constant 1 : i32
      %61 = vector.broadcast %c1_i32_42 : i32 to vector<1x1x128xi32>
      %62 = arith.cmpi slt, %0, %61 : vector<1x1x128xi32>
      %63 = vector.shape_cast %62 : vector<1x1x128xi1> to vector<1x1x128xi1>
      %64 = vector.broadcast %63 : vector<1x1x128xi1> to vector<2x32x128xi1>
      %65 = vector.shape_cast %60 : vector<2x32x1xf32> to vector<2x32x1xf32>
      %66 = vector.broadcast %65 : vector<2x32x1xf32> to vector<2x32x128xf32>
      %67 = arith.select %64, %66, %59 : vector<2x32x128xi1>, vector<2x32x128xf32>
      %68 = vector.shape_cast %57 : vector<32x128xf32> to vector<1x32x128xf32>
      %69 = vector.broadcast %68 : vector<1x32x128xf32> to vector<2x32x128xf32>
      %70 = arith.mulf %67, %69 : vector<2x32x128xf32>
      %71 = arith.addf %55, %70 : vector<2x32x128xf32>
      %c0_43 = arith.constant 0 : index
      %c4 = arith.constant 4 : index
      %c0_44 = arith.constant 0 : index
      %c0_45 = arith.constant 0 : index
      %72 = vector.load %arg2[%c0_43, %c4, %c0_44, %c0_45] : memref<1x16x32x128xf32, #tpu.memory_space<vmem>>, vector<1x1x32x128xf32>
      %73 = vector.shape_cast %72 : vector<1x1x32x128xf32> to vector<32x128xf32>
      %c0_46 = arith.constant 0 : index
      %c2_47 = arith.constant 2 : index
      %c0_48 = arith.constant 0 : index
      %74 = vector.load %arg5[%c0_46, %c2_47, %c0_48] : memref<2x36x128xf32, #tpu.memory_space<vmem>>, vector<2x32x128xf32>
      %c127_i32_49 = arith.constant 127 : i32
      %75 = tpu.dynamic_rotate %74 by %c127_i32_49 dim 2 : vector<2x32x128xf32>, i32 -> vector<2x32x128xf32>
      %76 = vector.extract_strided_slice %74 {offsets = [0, 0, 23], sizes = [2, 32, 1], strides = [1, 1, 1]} : vector<2x32x128xf32> to vector<2x32x1xf32>
      %c23_i32_50 = arith.constant 23 : i32
      %77 = vector.broadcast %c23_i32_50 : i32 to vector<1x1x128xi32>
      %78 = arith.cmpi sge, %0, %77 : vector<1x1x128xi32>
      %79 = vector.shape_cast %78 : vector<1x1x128xi1> to vector<1x1x128xi1>
      %80 = vector.broadcast %79 : vector<1x1x128xi1> to vector<2x32x128xi1>
      %81 = vector.shape_cast %76 : vector<2x32x1xf32> to vector<2x32x1xf32>
      %82 = vector.broadcast %81 : vector<2x32x1xf32> to vector<2x32x128xf32>
      %83 = arith.select %80, %82, %75 : vector<2x32x128xi1>, vector<2x32x128xf32>
      %84 = vector.shape_cast %73 : vector<32x128xf32> to vector<1x32x128xf32>
      %85 = vector.broadcast %84 : vector<1x32x128xf32> to vector<2x32x128xf32>
      %86 = arith.mulf %83, %85 : vector<2x32x128xf32>
      %87 = arith.addf %71, %86 : vector<2x32x128xf32>
      %c0_51 = arith.constant 0 : index
      %c5 = arith.constant 5 : index
      %c0_52 = arith.constant 0 : index
      %c0_53 = arith.constant 0 : index
      %88 = vector.load %arg2[%c0_51, %c5, %c0_52, %c0_53] : memref<1x16x32x128xf32, #tpu.memory_space<vmem>>, vector<1x1x32x128xf32>
      %89 = vector.shape_cast %88 : vector<1x1x32x128xf32> to vector<32x128xf32>
      %c0_54 = arith.constant 0 : index
      %c3_55 = arith.constant 3 : index
      %c0_56 = arith.constant 0 : index
      %90 = vector.load %arg5[%c0_54, %c3_55, %c0_56] : memref<2x36x128xf32, #tpu.memory_space<vmem>>, vector<2x32x128xf32>
      %c1_i32_57 = arith.constant 1 : i32
      %91 = tpu.dynamic_rotate %90 by %c1_i32_57 dim 2 : vector<2x32x128xf32>, i32 -> vector<2x32x128xf32>
      %92 = vector.extract_strided_slice %90 {offsets = [0, 0, 0], sizes = [2, 32, 1], strides = [1, 1, 1]} : vector<2x32x128xf32> to vector<2x32x1xf32>
      %c1_i32_58 = arith.constant 1 : i32
      %93 = vector.broadcast %c1_i32_58 : i32 to vector<1x1x128xi32>
      %94 = arith.cmpi slt, %0, %93 : vector<1x1x128xi32>
      %95 = vector.shape_cast %94 : vector<1x1x128xi1> to vector<1x1x128xi1>
      %96 = vector.broadcast %95 : vector<1x1x128xi1> to vector<2x32x128xi1>
      %97 = vector.shape_cast %92 : vector<2x32x1xf32> to vector<2x32x1xf32>
      %98 = vector.broadcast %97 : vector<2x32x1xf32> to vector<2x32x128xf32>
      %99 = arith.select %96, %98, %91 : vector<2x32x128xi1>, vector<2x32x128xf32>
      %100 = vector.shape_cast %89 : vector<32x128xf32> to vector<1x32x128xf32>
      %101 = vector.broadcast %100 : vector<1x32x128xf32> to vector<2x32x128xf32>
      %102 = arith.mulf %99, %101 : vector<2x32x128xf32>
      %103 = arith.addf %87, %102 : vector<2x32x128xf32>
      %c0_59 = arith.constant 0 : index
      %c6 = arith.constant 6 : index
      %c0_60 = arith.constant 0 : index
      %c0_61 = arith.constant 0 : index
      %104 = vector.load %arg2[%c0_59, %c6, %c0_60, %c0_61] : memref<1x16x32x128xf32, #tpu.memory_space<vmem>>, vector<1x1x32x128xf32>
      %105 = vector.shape_cast %104 : vector<1x1x32x128xf32> to vector<32x128xf32>
      %c0_62 = arith.constant 0 : index
      %c3_63 = arith.constant 3 : index
      %c0_64 = arith.constant 0 : index
      %106 = vector.load %arg5[%c0_62, %c3_63, %c0_64] : memref<2x36x128xf32, #tpu.memory_space<vmem>>, vector<2x32x128xf32>
      %107 = vector.shape_cast %105 : vector<32x128xf32> to vector<1x32x128xf32>
      %108 = vector.broadcast %107 : vector<1x32x128xf32> to vector<2x32x128xf32>
      %109 = arith.mulf %106, %108 : vector<2x32x128xf32>
      %110 = arith.addf %103, %109 : vector<2x32x128xf32>
      %c0_65 = arith.constant 0 : index
      %c7 = arith.constant 7 : index
      %c0_66 = arith.constant 0 : index
      %c0_67 = arith.constant 0 : index
      %111 = vector.load %arg2[%c0_65, %c7, %c0_66, %c0_67] : memref<1x16x32x128xf32, #tpu.memory_space<vmem>>, vector<1x1x32x128xf32>
      %112 = vector.shape_cast %111 : vector<1x1x32x128xf32> to vector<32x128xf32>
      %c0_68 = arith.constant 0 : index
      %c3_69 = arith.constant 3 : index
      %c0_70 = arith.constant 0 : index
      %113 = vector.load %arg5[%c0_68, %c3_69, %c0_70] : memref<2x36x128xf32, #tpu.memory_space<vmem>>, vector<2x32x128xf32>
      %c127_i32_71 = arith.constant 127 : i32
      %114 = tpu.dynamic_rotate %113 by %c127_i32_71 dim 2 : vector<2x32x128xf32>, i32 -> vector<2x32x128xf32>
      %115 = vector.extract_strided_slice %113 {offsets = [0, 0, 23], sizes = [2, 32, 1], strides = [1, 1, 1]} : vector<2x32x128xf32> to vector<2x32x1xf32>
      %c23_i32_72 = arith.constant 23 : i32
      %116 = vector.broadcast %c23_i32_72 : i32 to vector<1x1x128xi32>
      %117 = arith.cmpi sge, %0, %116 : vector<1x1x128xi32>
      %118 = vector.shape_cast %117 : vector<1x1x128xi1> to vector<1x1x128xi1>
      %119 = vector.broadcast %118 : vector<1x1x128xi1> to vector<2x32x128xi1>
      %120 = vector.shape_cast %115 : vector<2x32x1xf32> to vector<2x32x1xf32>
      %121 = vector.broadcast %120 : vector<2x32x1xf32> to vector<2x32x128xf32>
      %122 = arith.select %119, %121, %114 : vector<2x32x128xi1>, vector<2x32x128xf32>
      %123 = vector.shape_cast %112 : vector<32x128xf32> to vector<1x32x128xf32>
      %124 = vector.broadcast %123 : vector<1x32x128xf32> to vector<2x32x128xf32>
      %125 = arith.mulf %122, %124 : vector<2x32x128xf32>
      %126 = arith.addf %110, %125 : vector<2x32x128xf32>
      %c0_73 = arith.constant 0 : index
      %c8 = arith.constant 8 : index
      %c0_74 = arith.constant 0 : index
      %c0_75 = arith.constant 0 : index
      %127 = vector.load %arg2[%c0_73, %c8, %c0_74, %c0_75] : memref<1x16x32x128xf32, #tpu.memory_space<vmem>>, vector<1x1x32x128xf32>
      %128 = vector.shape_cast %127 : vector<1x1x32x128xf32> to vector<32x128xf32>
      %c0_76 = arith.constant 0 : index
      %c0_77 = arith.constant 0 : index
      %c0_78 = arith.constant 0 : index
      %129 = vector.load %arg5[%c0_76, %c0_77, %c0_78] : memref<2x36x128xf32, #tpu.memory_space<vmem>>, vector<2x32x128xf32>
      %c2_i32_79 = arith.constant 2 : i32
      %130 = tpu.dynamic_rotate %129 by %c2_i32_79 dim 2 : vector<2x32x128xf32>, i32 -> vector<2x32x128xf32>
      %131 = vector.extract_strided_slice %129 {offsets = [0, 0, 0], sizes = [2, 32, 1], strides = [1, 1, 1]} : vector<2x32x128xf32> to vector<2x32x1xf32>
      %c2_i32_80 = arith.constant 2 : i32
      %132 = vector.broadcast %c2_i32_80 : i32 to vector<1x1x128xi32>
      %133 = arith.cmpi slt, %0, %132 : vector<1x1x128xi32>
      %134 = vector.shape_cast %133 : vector<1x1x128xi1> to vector<1x1x128xi1>
      %135 = vector.broadcast %134 : vector<1x1x128xi1> to vector<2x32x128xi1>
      %136 = vector.shape_cast %131 : vector<2x32x1xf32> to vector<2x32x1xf32>
      %137 = vector.broadcast %136 : vector<2x32x1xf32> to vector<2x32x128xf32>
      %138 = arith.select %135, %137, %130 : vector<2x32x128xi1>, vector<2x32x128xf32>
      %139 = vector.shape_cast %128 : vector<32x128xf32> to vector<1x32x128xf32>
      %140 = vector.broadcast %139 : vector<1x32x128xf32> to vector<2x32x128xf32>
      %141 = arith.mulf %138, %140 : vector<2x32x128xf32>
      %142 = arith.addf %126, %141 : vector<2x32x128xf32>
      %c0_81 = arith.constant 0 : index
      %c9 = arith.constant 9 : index
      %c0_82 = arith.constant 0 : index
      %c0_83 = arith.constant 0 : index
      %143 = vector.load %arg2[%c0_81, %c9, %c0_82, %c0_83] : memref<1x16x32x128xf32, #tpu.memory_space<vmem>>, vector<1x1x32x128xf32>
      %144 = vector.shape_cast %143 : vector<1x1x32x128xf32> to vector<32x128xf32>
      %c0_84 = arith.constant 0 : index
      %c0_85 = arith.constant 0 : index
      %c0_86 = arith.constant 0 : index
      %145 = vector.load %arg5[%c0_84, %c0_85, %c0_86] : memref<2x36x128xf32, #tpu.memory_space<vmem>>, vector<2x32x128xf32>
      %146 = vector.shape_cast %144 : vector<32x128xf32> to vector<1x32x128xf32>
      %147 = vector.broadcast %146 : vector<1x32x128xf32> to vector<2x32x128xf32>
      %148 = arith.mulf %145, %147 : vector<2x32x128xf32>
      %149 = arith.addf %142, %148 : vector<2x32x128xf32>
      %c0_87 = arith.constant 0 : index
      %c10 = arith.constant 10 : index
      %c0_88 = arith.constant 0 : index
      %c0_89 = arith.constant 0 : index
      %150 = vector.load %arg2[%c0_87, %c10, %c0_88, %c0_89] : memref<1x16x32x128xf32, #tpu.memory_space<vmem>>, vector<1x1x32x128xf32>
      %151 = vector.shape_cast %150 : vector<1x1x32x128xf32> to vector<32x128xf32>
      %c0_90 = arith.constant 0 : index
      %c0_91 = arith.constant 0 : index
      %c0_92 = arith.constant 0 : index
      %152 = vector.load %arg5[%c0_90, %c0_91, %c0_92] : memref<2x36x128xf32, #tpu.memory_space<vmem>>, vector<2x32x128xf32>
      %c126_i32 = arith.constant 126 : i32
      %153 = tpu.dynamic_rotate %152 by %c126_i32 dim 2 : vector<2x32x128xf32>, i32 -> vector<2x32x128xf32>
      %154 = vector.extract_strided_slice %152 {offsets = [0, 0, 23], sizes = [2, 32, 1], strides = [1, 1, 1]} : vector<2x32x128xf32> to vector<2x32x1xf32>
      %c22_i32 = arith.constant 22 : i32
      %155 = vector.broadcast %c22_i32 : i32 to vector<1x1x128xi32>
      %156 = arith.cmpi sge, %0, %155 : vector<1x1x128xi32>
      %157 = vector.shape_cast %156 : vector<1x1x128xi1> to vector<1x1x128xi1>
      %158 = vector.broadcast %157 : vector<1x1x128xi1> to vector<2x32x128xi1>
      %159 = vector.shape_cast %154 : vector<2x32x1xf32> to vector<2x32x1xf32>
      %160 = vector.broadcast %159 : vector<2x32x1xf32> to vector<2x32x128xf32>
      %161 = arith.select %158, %160, %153 : vector<2x32x128xi1>, vector<2x32x128xf32>
      %162 = vector.shape_cast %151 : vector<32x128xf32> to vector<1x32x128xf32>
      %163 = vector.broadcast %162 : vector<1x32x128xf32> to vector<2x32x128xf32>
      %164 = arith.mulf %161, %163 : vector<2x32x128xf32>
      %165 = arith.addf %149, %164 : vector<2x32x128xf32>
      %c0_93 = arith.constant 0 : index
      %c11 = arith.constant 11 : index
      %c0_94 = arith.constant 0 : index
      %c0_95 = arith.constant 0 : index
      %166 = vector.load %arg2[%c0_93, %c11, %c0_94, %c0_95] : memref<1x16x32x128xf32, #tpu.memory_space<vmem>>, vector<1x1x32x128xf32>
      %167 = vector.shape_cast %166 : vector<1x1x32x128xf32> to vector<32x128xf32>
      %c0_96 = arith.constant 0 : index
      %c2_97 = arith.constant 2 : index
      %c0_98 = arith.constant 0 : index
      %168 = vector.load %arg5[%c0_96, %c2_97, %c0_98] : memref<2x36x128xf32, #tpu.memory_space<vmem>>, vector<2x32x128xf32>
      %c2_i32_99 = arith.constant 2 : i32
      %169 = tpu.dynamic_rotate %168 by %c2_i32_99 dim 2 : vector<2x32x128xf32>, i32 -> vector<2x32x128xf32>
      %170 = vector.extract_strided_slice %168 {offsets = [0, 0, 0], sizes = [2, 32, 1], strides = [1, 1, 1]} : vector<2x32x128xf32> to vector<2x32x1xf32>
      %c2_i32_100 = arith.constant 2 : i32
      %171 = vector.broadcast %c2_i32_100 : i32 to vector<1x1x128xi32>
      %172 = arith.cmpi slt, %0, %171 : vector<1x1x128xi32>
      %173 = vector.shape_cast %172 : vector<1x1x128xi1> to vector<1x1x128xi1>
      %174 = vector.broadcast %173 : vector<1x1x128xi1> to vector<2x32x128xi1>
      %175 = vector.shape_cast %170 : vector<2x32x1xf32> to vector<2x32x1xf32>
      %176 = vector.broadcast %175 : vector<2x32x1xf32> to vector<2x32x128xf32>
      %177 = arith.select %174, %176, %169 : vector<2x32x128xi1>, vector<2x32x128xf32>
      %178 = vector.shape_cast %167 : vector<32x128xf32> to vector<1x32x128xf32>
      %179 = vector.broadcast %178 : vector<1x32x128xf32> to vector<2x32x128xf32>
      %180 = arith.mulf %177, %179 : vector<2x32x128xf32>
      %181 = arith.addf %165, %180 : vector<2x32x128xf32>
      %c0_101 = arith.constant 0 : index
      %c12 = arith.constant 12 : index
      %c0_102 = arith.constant 0 : index
      %c0_103 = arith.constant 0 : index
      %182 = vector.load %arg2[%c0_101, %c12, %c0_102, %c0_103] : memref<1x16x32x128xf32, #tpu.memory_space<vmem>>, vector<1x1x32x128xf32>
      %183 = vector.shape_cast %182 : vector<1x1x32x128xf32> to vector<32x128xf32>
      %c0_104 = arith.constant 0 : index
      %c2_105 = arith.constant 2 : index
      %c0_106 = arith.constant 0 : index
      %184 = vector.load %arg5[%c0_104, %c2_105, %c0_106] : memref<2x36x128xf32, #tpu.memory_space<vmem>>, vector<2x32x128xf32>
      %c126_i32_107 = arith.constant 126 : i32
      %185 = tpu.dynamic_rotate %184 by %c126_i32_107 dim 2 : vector<2x32x128xf32>, i32 -> vector<2x32x128xf32>
      %186 = vector.extract_strided_slice %184 {offsets = [0, 0, 23], sizes = [2, 32, 1], strides = [1, 1, 1]} : vector<2x32x128xf32> to vector<2x32x1xf32>
      %c22_i32_108 = arith.constant 22 : i32
      %187 = vector.broadcast %c22_i32_108 : i32 to vector<1x1x128xi32>
      %188 = arith.cmpi sge, %0, %187 : vector<1x1x128xi32>
      %189 = vector.shape_cast %188 : vector<1x1x128xi1> to vector<1x1x128xi1>
      %190 = vector.broadcast %189 : vector<1x1x128xi1> to vector<2x32x128xi1>
      %191 = vector.shape_cast %186 : vector<2x32x1xf32> to vector<2x32x1xf32>
      %192 = vector.broadcast %191 : vector<2x32x1xf32> to vector<2x32x128xf32>
      %193 = arith.select %190, %192, %185 : vector<2x32x128xi1>, vector<2x32x128xf32>
      %194 = vector.shape_cast %183 : vector<32x128xf32> to vector<1x32x128xf32>
      %195 = vector.broadcast %194 : vector<1x32x128xf32> to vector<2x32x128xf32>
      %196 = arith.mulf %193, %195 : vector<2x32x128xf32>
      %197 = arith.addf %181, %196 : vector<2x32x128xf32>
      %c0_109 = arith.constant 0 : index
      %c13 = arith.constant 13 : index
      %c0_110 = arith.constant 0 : index
      %c0_111 = arith.constant 0 : index
      %198 = vector.load %arg2[%c0_109, %c13, %c0_110, %c0_111] : memref<1x16x32x128xf32, #tpu.memory_space<vmem>>, vector<1x1x32x128xf32>
      %199 = vector.shape_cast %198 : vector<1x1x32x128xf32> to vector<32x128xf32>
      %c0_112 = arith.constant 0 : index
      %c4_113 = arith.constant 4 : index
      %c0_114 = arith.constant 0 : index
      %200 = vector.load %arg5[%c0_112, %c4_113, %c0_114] : memref<2x36x128xf32, #tpu.memory_space<vmem>>, vector<2x32x128xf32>
      %c2_i32_115 = arith.constant 2 : i32
      %201 = tpu.dynamic_rotate %200 by %c2_i32_115 dim 2 : vector<2x32x128xf32>, i32 -> vector<2x32x128xf32>
      %202 = vector.extract_strided_slice %200 {offsets = [0, 0, 0], sizes = [2, 32, 1], strides = [1, 1, 1]} : vector<2x32x128xf32> to vector<2x32x1xf32>
      %c2_i32_116 = arith.constant 2 : i32
      %203 = vector.broadcast %c2_i32_116 : i32 to vector<1x1x128xi32>
      %204 = arith.cmpi slt, %0, %203 : vector<1x1x128xi32>
      %205 = vector.shape_cast %204 : vector<1x1x128xi1> to vector<1x1x128xi1>
      %206 = vector.broadcast %205 : vector<1x1x128xi1> to vector<2x32x128xi1>
      %207 = vector.shape_cast %202 : vector<2x32x1xf32> to vector<2x32x1xf32>
      %208 = vector.broadcast %207 : vector<2x32x1xf32> to vector<2x32x128xf32>
      %209 = arith.select %206, %208, %201 : vector<2x32x128xi1>, vector<2x32x128xf32>
      %210 = vector.shape_cast %199 : vector<32x128xf32> to vector<1x32x128xf32>
      %211 = vector.broadcast %210 : vector<1x32x128xf32> to vector<2x32x128xf32>
      %212 = arith.mulf %209, %211 : vector<2x32x128xf32>
      %213 = arith.addf %197, %212 : vector<2x32x128xf32>
      %c0_117 = arith.constant 0 : index
      %c14 = arith.constant 14 : index
      %c0_118 = arith.constant 0 : index
      %c0_119 = arith.constant 0 : index
      %214 = vector.load %arg2[%c0_117, %c14, %c0_118, %c0_119] : memref<1x16x32x128xf32, #tpu.memory_space<vmem>>, vector<1x1x32x128xf32>
      %215 = vector.shape_cast %214 : vector<1x1x32x128xf32> to vector<32x128xf32>
      %c0_120 = arith.constant 0 : index
      %c4_121 = arith.constant 4 : index
      %c0_122 = arith.constant 0 : index
      %216 = vector.load %arg5[%c0_120, %c4_121, %c0_122] : memref<2x36x128xf32, #tpu.memory_space<vmem>>, vector<2x32x128xf32>
      %217 = vector.shape_cast %215 : vector<32x128xf32> to vector<1x32x128xf32>
      %218 = vector.broadcast %217 : vector<1x32x128xf32> to vector<2x32x128xf32>
      %219 = arith.mulf %216, %218 : vector<2x32x128xf32>
      %220 = arith.addf %213, %219 : vector<2x32x128xf32>
      %c0_123 = arith.constant 0 : index
      %c15 = arith.constant 15 : index
      %c0_124 = arith.constant 0 : index
      %c0_125 = arith.constant 0 : index
      %221 = vector.load %arg2[%c0_123, %c15, %c0_124, %c0_125] : memref<1x16x32x128xf32, #tpu.memory_space<vmem>>, vector<1x1x32x128xf32>
      %222 = vector.shape_cast %221 : vector<1x1x32x128xf32> to vector<32x128xf32>
      %c0_126 = arith.constant 0 : index
      %c4_127 = arith.constant 4 : index
      %c0_128 = arith.constant 0 : index
      %223 = vector.load %arg5[%c0_126, %c4_127, %c0_128] : memref<2x36x128xf32, #tpu.memory_space<vmem>>, vector<2x32x128xf32>
      %c126_i32_129 = arith.constant 126 : i32
      %224 = tpu.dynamic_rotate %223 by %c126_i32_129 dim 2 : vector<2x32x128xf32>, i32 -> vector<2x32x128xf32>
      %225 = vector.extract_strided_slice %223 {offsets = [0, 0, 23], sizes = [2, 32, 1], strides = [1, 1, 1]} : vector<2x32x128xf32> to vector<2x32x1xf32>
      %c22_i32_130 = arith.constant 22 : i32
      %226 = vector.broadcast %c22_i32_130 : i32 to vector<1x1x128xi32>
      %227 = arith.cmpi sge, %0, %226 : vector<1x1x128xi32>
      %228 = vector.shape_cast %227 : vector<1x1x128xi1> to vector<1x1x128xi1>
      %229 = vector.broadcast %228 : vector<1x1x128xi1> to vector<2x32x128xi1>
      %230 = vector.shape_cast %225 : vector<2x32x1xf32> to vector<2x32x1xf32>
      %231 = vector.broadcast %230 : vector<2x32x1xf32> to vector<2x32x128xf32>
      %232 = arith.select %229, %231, %224 : vector<2x32x128xi1>, vector<2x32x128xf32>
      %233 = vector.shape_cast %222 : vector<32x128xf32> to vector<1x32x128xf32>
      %234 = vector.broadcast %233 : vector<1x32x128xf32> to vector<2x32x128xf32>
      %235 = arith.mulf %232, %234 : vector<2x32x128xf32>
      %236 = arith.addf %220, %235 : vector<2x32x128xf32>
      %c1_i32_131 = arith.constant 1 : i32
      %237 = arith.cmpi eq, %15, %c1_i32_131 : i32
      %238 = arith.extui %237 : i1 to i32
      %c0_i32_132 = arith.constant 0 : i32
      %239 = arith.cmpi ne, %238, %c0_i32_132 : i32
      scf.if %239 {
        %c0_135 = arith.constant 0 : index
        %c0_136 = arith.constant 0 : index
        %c0_137 = arith.constant 0 : index
        %c0_138 = arith.constant 0 : index
        %243 = vector.load %arg4[%c0_135, %c0_136, %c0_137, %c0_138] : memref<1x2x32x128xf32, #tpu.memory_space<vmem>>, vector<1x2x32x128xf32>
        %244 = vector.shape_cast %243 : vector<1x2x32x128xf32> to vector<2x32x128xf32>
        %245 = vector.shape_cast %236 : vector<2x32x128xf32> to vector<1x2x32x128xf32>
        tpu.vector_store %arg4[%c0_135, %c0_136, %c0_137, %c0_138], %245 {strides = array<i32>} : memref<1x2x32x128xf32, #tpu.memory_space<vmem>>, vector<1x2x32x128xf32>,
      } else {
      }
      %c1_i32_133 = arith.constant 1 : i32
      %240 = arith.cmpi slt, %15, %c1_i32_133 : i32
      %241 = arith.extui %240 : i1 to i32
      %c0_i32_134 = arith.constant 0 : i32
      %242 = arith.cmpi ne, %241, %c0_i32_134 : i32
      scf.if %242 {
        %243 = vector.extract_strided_slice %236 {offsets = [0, 0, 0], sizes = [2, 24, 128], strides = [1, 1, 1]} : vector<2x32x128xf32> to vector<2x24x128xf32>
        %c0_135 = arith.constant 0 : index
        %c2_136 = arith.constant 2 : index
        %c0_137 = arith.constant 0 : index
        %244 = vector.load %arg5[%c0_135, %c2_136, %c0_137] : memref<2x36x128xf32, #tpu.memory_space<vmem>>, vector<2x24x128xf32>
        tpu.vector_store %arg5[%c0_135, %c2_136, %c0_137], %243 {strides = array<i32>} : memref<2x36x128xf32, #tpu.memory_space<vmem>>, vector<2x24x128xf32>,
        %245 = vector.extract_strided_slice %236 {offsets = [0, 0, 0], sizes = [2, 1, 128], strides = [1, 1, 1]} : vector<2x32x128xf32> to vector<2x1x128xf32>
        %246 = vector.extract_strided_slice %236 {offsets = [0, 23, 0], sizes = [2, 1, 128], strides = [1, 1, 1]} : vector<2x32x128xf32> to vector<2x1x128xf32>
        %247 = vector.shape_cast %245 : vector<2x1x128xf32> to vector<2x1x128xf32>
        %248 = vector.broadcast %247 : vector<2x1x128xf32> to vector<2x2x128xf32>
        %c0_138 = arith.constant 0 : index
        %c0_139 = arith.constant 0 : index
        %c0_140 = arith.constant 0 : index
        %249 = vector.load %arg5[%c0_138, %c0_139, %c0_140] : memref<2x36x128xf32, #tpu.memory_space<vmem>>, vector<2x2x128xf32>
        tpu.vector_store %arg5[%c0_138, %c0_139, %c0_140], %248 {strides = array<i32>} : memref<2x36x128xf32, #tpu.memory_space<vmem>>, vector<2x2x128xf32>,
        %250 = vector.shape_cast %246 : vector<2x1x128xf32> to vector<2x1x128xf32>
        %251 = vector.broadcast %250 : vector<2x1x128xf32> to vector<2x10x128xf32>
        %c0_141 = arith.constant 0 : index
        %c26_142 = arith.constant 26 : index
        %c0_143 = arith.constant 0 : index
        %252 = vector.load %arg5[%c0_141, %c26_142, %c0_143] : memref<2x36x128xf32, #tpu.memory_space<vmem>>, vector<2x10x128xf32>
        tpu.vector_store %arg5[%c0_141, %c26_142, %c0_143], %251 {strides = array<i32>} : memref<2x36x128xf32, #tpu.memory_space<vmem>>, vector<2x10x128xf32>,
      } else {
      }
    }
    %c2_i32_10 = arith.constant 2 : i32
    return
  }
  func.func @transform_0(%arg0: i32, %arg1: i32) -> (i32, i32, i32, i32) {
    %c0_i32 = arith.constant 0 : i32
    %c0_i32_0 = arith.constant 0 : i32
    %c0_i32_1 = arith.constant 0 : i32
    %c0_i32_2 = arith.constant 0 : i32
    return %arg0, %c0_i32, %c0_i32_0, %c0_i32_1 : i32, i32, i32, i32
  }
  func.func @transform_1(%arg0: i32, %arg1: i32) -> (i32, i32, i32, i32) {
    %c0_i32 = arith.constant 0 : i32
    %c0_i32_0 = arith.constant 0 : i32
    %c0_i32_1 = arith.constant 0 : i32
    return %arg0, %arg1, %c0_i32, %c0_i32_0 : i32, i32, i32, i32
  }
  func.func @transform_2(%arg0: i32, %arg1: i32) -> (i32, i32, i32, i32) {
    %c0_i32 = arith.constant 0 : i32
    %c0_i32_0 = arith.constant 0 : i32
    %c0_i32_1 = arith.constant 0 : i32
    return %arg0, %arg1, %c0_i32, %c0_i32_0 : i32, i32, i32, i32
  }
}

module attributes {stable_mosaic.version = 11 : i64} {
  func.func @_affinity_kernel(%arg0: i32, %arg1: i32, %arg2: memref<1x4x36x128xf32, #tpu.memory_space<vmem>>, %arg3: memref<1x16x16x128xf32, #tpu.memory_space<vmem>>, %arg4: memref<16x16x128xf32, #tpu.memory_space<vmem>>, %arg5: memref<16x4x16x128xf32, #tpu.memory_space<vmem>>) attributes {dimension_semantics = [#tpu.dimension_semantics<parallel>, #tpu.dimension_semantics<parallel>], iteration_bounds = array<i64: 2, 2>, scalar_prefetch = 0 : i64, scratch_operands = 2 : i64, tpu.core_type = #tpu.core_type<tc>, window_params = [{transform_indices = @transform_0, window_bounds = array<i64: 1, 4, 36, 128>}, {transform_indices = @transform_1, window_bounds = array<i64: 1, 16, 16, 128>}]} {
    %c16_i32 = arith.constant 16 : i32
    %0 = arith.muli %arg1, %c16_i32 : i32
    %1 = tpu.assume_multiple %0, 16 : i32
    %c2_i32 = arith.constant 2 : i32
    %2 = arith.addi %1, %c2_i32 : i32
    %3 = tpu.iota {dimensions = array<i32: 2>} : vector<1x1x128xi32>
    %c0 = arith.constant 0 : index
    %c0_0 = arith.constant 0 : index
    %4 = arith.index_cast %2 : i32 to index
    %c0_1 = arith.constant 0 : index
    %5 = vector.load %arg2[%c0, %c0_0, %4, %c0_1] : memref<1x4x36x128xf32, #tpu.memory_space<vmem>>, vector<1x4x16x128xf32>
    %6 = vector.shape_cast %5 : vector<1x4x16x128xf32> to vector<4x16x128xf32>
    %cst = arith.constant 0.000000e+00 : f32
    %7 = vector.broadcast %cst : f32 to vector<4x16x128xf32>
    %cst_2 = arith.constant 0.000000e+00 : f32
    %8 = vector.broadcast %cst_2 : f32 to vector<4x16x128xf32>
    %c-1_i32 = arith.constant -1 : i32
    %9 = arith.addi %2, %c-1_i32 : i32
    %c0_3 = arith.constant 0 : index
    %c0_4 = arith.constant 0 : index
    %10 = arith.index_cast %9 : i32 to index
    %c0_5 = arith.constant 0 : index
    %11 = vector.load %arg2[%c0_3, %c0_4, %10, %c0_5] : memref<1x4x36x128xf32, #tpu.memory_space<vmem>>, vector<1x4x16x128xf32>
    %12 = vector.shape_cast %11 : vector<1x4x16x128xf32> to vector<4x16x128xf32>
    %c1_i32 = arith.constant 1 : i32
    %13 = tpu.dynamic_rotate %12 by %c1_i32 dim 2 : vector<4x16x128xf32>, i32 -> vector<4x16x128xf32>
    %14 = vector.extract_strided_slice %12 {offsets = [0, 0, 0], sizes = [4, 16, 1], strides = [1, 1, 1]} : vector<4x16x128xf32> to vector<4x16x1xf32>
    %c1_i32_6 = arith.constant 1 : i32
    %15 = vector.broadcast %c1_i32_6 : i32 to vector<1x1x128xi32>
    %16 = arith.cmpi slt, %3, %15 : vector<1x1x128xi32>
    %17 = vector.shape_cast %16 : vector<1x1x128xi1> to vector<1x1x128xi1>
    %18 = vector.broadcast %17 : vector<1x1x128xi1> to vector<4x16x128xi1>
    %19 = vector.shape_cast %14 : vector<4x16x1xf32> to vector<4x16x1xf32>
    %20 = vector.broadcast %19 : vector<4x16x1xf32> to vector<4x16x128xf32>
    %21 = arith.select %18, %20, %13 : vector<4x16x128xi1>, vector<4x16x128xf32>
    %22 = arith.subf %21, %6 : vector<4x16x128xf32>
    %c0_7 = arith.constant 0 : index
    %c0_8 = arith.constant 0 : index
    %c0_9 = arith.constant 0 : index
    %c0_10 = arith.constant 0 : index
    %23 = vector.load %arg5[%c0_7, %c0_8, %c0_9, %c0_10] : memref<16x4x16x128xf32, #tpu.memory_space<vmem>>, vector<1x4x16x128xf32>
    %24 = vector.shape_cast %23 : vector<1x4x16x128xf32> to vector<4x16x128xf32>
    %25 = vector.shape_cast %22 : vector<4x16x128xf32> to vector<1x4x16x128xf32>
    tpu.vector_store %arg5[%c0_7, %c0_8, %c0_9, %c0_10], %25 {strides = array<i32>} : memref<16x4x16x128xf32, #tpu.memory_space<vmem>>, vector<1x4x16x128xf32>,
    %26 = arith.addf %7, %22 : vector<4x16x128xf32>
    %27 = arith.mulf %22, %22 : vector<4x16x128xf32>
    %28 = arith.addf %8, %27 : vector<4x16x128xf32>
    %29 = arith.subf %12, %6 : vector<4x16x128xf32>
    %c1 = arith.constant 1 : index
    %c0_11 = arith.constant 0 : index
    %c0_12 = arith.constant 0 : index
    %c0_13 = arith.constant 0 : index
    %30 = vector.load %arg5[%c1, %c0_11, %c0_12, %c0_13] : memref<16x4x16x128xf32, #tpu.memory_space<vmem>>, vector<1x4x16x128xf32>
    %31 = vector.shape_cast %30 : vector<1x4x16x128xf32> to vector<4x16x128xf32>
    %32 = vector.shape_cast %29 : vector<4x16x128xf32> to vector<1x4x16x128xf32>
    tpu.vector_store %arg5[%c1, %c0_11, %c0_12, %c0_13], %32 {strides = array<i32>} : memref<16x4x16x128xf32, #tpu.memory_space<vmem>>, vector<1x4x16x128xf32>,
    %33 = arith.addf %26, %29 : vector<4x16x128xf32>
    %34 = arith.mulf %29, %29 : vector<4x16x128xf32>
    %35 = arith.addf %28, %34 : vector<4x16x128xf32>
    %c127_i32 = arith.constant 127 : i32
    %36 = tpu.dynamic_rotate %12 by %c127_i32 dim 2 : vector<4x16x128xf32>, i32 -> vector<4x16x128xf32>
    %37 = vector.extract_strided_slice %12 {offsets = [0, 0, 23], sizes = [4, 16, 1], strides = [1, 1, 1]} : vector<4x16x128xf32> to vector<4x16x1xf32>
    %c23_i32 = arith.constant 23 : i32
    %38 = vector.broadcast %c23_i32 : i32 to vector<1x1x128xi32>
    %39 = arith.cmpi sge, %3, %38 : vector<1x1x128xi32>
    %40 = vector.shape_cast %39 : vector<1x1x128xi1> to vector<1x1x128xi1>
    %41 = vector.broadcast %40 : vector<1x1x128xi1> to vector<4x16x128xi1>
    %42 = vector.shape_cast %37 : vector<4x16x1xf32> to vector<4x16x1xf32>
    %43 = vector.broadcast %42 : vector<4x16x1xf32> to vector<4x16x128xf32>
    %44 = arith.select %41, %43, %36 : vector<4x16x128xi1>, vector<4x16x128xf32>
    %45 = arith.subf %44, %6 : vector<4x16x128xf32>
    %c2 = arith.constant 2 : index
    %c0_14 = arith.constant 0 : index
    %c0_15 = arith.constant 0 : index
    %c0_16 = arith.constant 0 : index
    %46 = vector.load %arg5[%c2, %c0_14, %c0_15, %c0_16] : memref<16x4x16x128xf32, #tpu.memory_space<vmem>>, vector<1x4x16x128xf32>
    %47 = vector.shape_cast %46 : vector<1x4x16x128xf32> to vector<4x16x128xf32>
    %48 = vector.shape_cast %45 : vector<4x16x128xf32> to vector<1x4x16x128xf32>
    tpu.vector_store %arg5[%c2, %c0_14, %c0_15, %c0_16], %48 {strides = array<i32>} : memref<16x4x16x128xf32, #tpu.memory_space<vmem>>, vector<1x4x16x128xf32>,
    %49 = arith.addf %33, %45 : vector<4x16x128xf32>
    %50 = arith.mulf %45, %45 : vector<4x16x128xf32>
    %51 = arith.addf %35, %50 : vector<4x16x128xf32>
    %c1_i32_17 = arith.constant 1 : i32
    %52 = tpu.dynamic_rotate %6 by %c1_i32_17 dim 2 : vector<4x16x128xf32>, i32 -> vector<4x16x128xf32>
    %53 = vector.extract_strided_slice %6 {offsets = [0, 0, 0], sizes = [4, 16, 1], strides = [1, 1, 1]} : vector<4x16x128xf32> to vector<4x16x1xf32>
    %c1_i32_18 = arith.constant 1 : i32
    %54 = vector.broadcast %c1_i32_18 : i32 to vector<1x1x128xi32>
    %55 = arith.cmpi slt, %3, %54 : vector<1x1x128xi32>
    %56 = vector.shape_cast %55 : vector<1x1x128xi1> to vector<1x1x128xi1>
    %57 = vector.broadcast %56 : vector<1x1x128xi1> to vector<4x16x128xi1>
    %58 = vector.shape_cast %53 : vector<4x16x1xf32> to vector<4x16x1xf32>
    %59 = vector.broadcast %58 : vector<4x16x1xf32> to vector<4x16x128xf32>
    %60 = arith.select %57, %59, %52 : vector<4x16x128xi1>, vector<4x16x128xf32>
    %61 = arith.subf %60, %6 : vector<4x16x128xf32>
    %c3 = arith.constant 3 : index
    %c0_19 = arith.constant 0 : index
    %c0_20 = arith.constant 0 : index
    %c0_21 = arith.constant 0 : index
    %62 = vector.load %arg5[%c3, %c0_19, %c0_20, %c0_21] : memref<16x4x16x128xf32, #tpu.memory_space<vmem>>, vector<1x4x16x128xf32>
    %63 = vector.shape_cast %62 : vector<1x4x16x128xf32> to vector<4x16x128xf32>
    %64 = vector.shape_cast %61 : vector<4x16x128xf32> to vector<1x4x16x128xf32>
    tpu.vector_store %arg5[%c3, %c0_19, %c0_20, %c0_21], %64 {strides = array<i32>} : memref<16x4x16x128xf32, #tpu.memory_space<vmem>>, vector<1x4x16x128xf32>,
    %65 = arith.addf %49, %61 : vector<4x16x128xf32>
    %66 = arith.mulf %61, %61 : vector<4x16x128xf32>
    %67 = arith.addf %51, %66 : vector<4x16x128xf32>
    %c127_i32_22 = arith.constant 127 : i32
    %68 = tpu.dynamic_rotate %6 by %c127_i32_22 dim 2 : vector<4x16x128xf32>, i32 -> vector<4x16x128xf32>
    %69 = vector.extract_strided_slice %6 {offsets = [0, 0, 23], sizes = [4, 16, 1], strides = [1, 1, 1]} : vector<4x16x128xf32> to vector<4x16x1xf32>
    %c23_i32_23 = arith.constant 23 : i32
    %70 = vector.broadcast %c23_i32_23 : i32 to vector<1x1x128xi32>
    %71 = arith.cmpi sge, %3, %70 : vector<1x1x128xi32>
    %72 = vector.shape_cast %71 : vector<1x1x128xi1> to vector<1x1x128xi1>
    %73 = vector.broadcast %72 : vector<1x1x128xi1> to vector<4x16x128xi1>
    %74 = vector.shape_cast %69 : vector<4x16x1xf32> to vector<4x16x1xf32>
    %75 = vector.broadcast %74 : vector<4x16x1xf32> to vector<4x16x128xf32>
    %76 = arith.select %73, %75, %68 : vector<4x16x128xi1>, vector<4x16x128xf32>
    %77 = arith.subf %76, %6 : vector<4x16x128xf32>
    %c4 = arith.constant 4 : index
    %c0_24 = arith.constant 0 : index
    %c0_25 = arith.constant 0 : index
    %c0_26 = arith.constant 0 : index
    %78 = vector.load %arg5[%c4, %c0_24, %c0_25, %c0_26] : memref<16x4x16x128xf32, #tpu.memory_space<vmem>>, vector<1x4x16x128xf32>
    %79 = vector.shape_cast %78 : vector<1x4x16x128xf32> to vector<4x16x128xf32>
    %80 = vector.shape_cast %77 : vector<4x16x128xf32> to vector<1x4x16x128xf32>
    tpu.vector_store %arg5[%c4, %c0_24, %c0_25, %c0_26], %80 {strides = array<i32>} : memref<16x4x16x128xf32, #tpu.memory_space<vmem>>, vector<1x4x16x128xf32>,
    %81 = arith.addf %65, %77 : vector<4x16x128xf32>
    %82 = arith.mulf %77, %77 : vector<4x16x128xf32>
    %83 = arith.addf %67, %82 : vector<4x16x128xf32>
    %c1_i32_27 = arith.constant 1 : i32
    %84 = arith.addi %2, %c1_i32_27 : i32
    %c0_28 = arith.constant 0 : index
    %c0_29 = arith.constant 0 : index
    %85 = arith.index_cast %84 : i32 to index
    %c0_30 = arith.constant 0 : index
    %86 = vector.load %arg2[%c0_28, %c0_29, %85, %c0_30] : memref<1x4x36x128xf32, #tpu.memory_space<vmem>>, vector<1x4x16x128xf32>
    %87 = vector.shape_cast %86 : vector<1x4x16x128xf32> to vector<4x16x128xf32>
    %c1_i32_31 = arith.constant 1 : i32
    %88 = tpu.dynamic_rotate %87 by %c1_i32_31 dim 2 : vector<4x16x128xf32>, i32 -> vector<4x16x128xf32>
    %89 = vector.extract_strided_slice %87 {offsets = [0, 0, 0], sizes = [4, 16, 1], strides = [1, 1, 1]} : vector<4x16x128xf32> to vector<4x16x1xf32>
    %c1_i32_32 = arith.constant 1 : i32
    %90 = vector.broadcast %c1_i32_32 : i32 to vector<1x1x128xi32>
    %91 = arith.cmpi slt, %3, %90 : vector<1x1x128xi32>
    %92 = vector.shape_cast %91 : vector<1x1x128xi1> to vector<1x1x128xi1>
    %93 = vector.broadcast %92 : vector<1x1x128xi1> to vector<4x16x128xi1>
    %94 = vector.shape_cast %89 : vector<4x16x1xf32> to vector<4x16x1xf32>
    %95 = vector.broadcast %94 : vector<4x16x1xf32> to vector<4x16x128xf32>
    %96 = arith.select %93, %95, %88 : vector<4x16x128xi1>, vector<4x16x128xf32>
    %97 = arith.subf %96, %6 : vector<4x16x128xf32>
    %c5 = arith.constant 5 : index
    %c0_33 = arith.constant 0 : index
    %c0_34 = arith.constant 0 : index
    %c0_35 = arith.constant 0 : index
    %98 = vector.load %arg5[%c5, %c0_33, %c0_34, %c0_35] : memref<16x4x16x128xf32, #tpu.memory_space<vmem>>, vector<1x4x16x128xf32>
    %99 = vector.shape_cast %98 : vector<1x4x16x128xf32> to vector<4x16x128xf32>
    %100 = vector.shape_cast %97 : vector<4x16x128xf32> to vector<1x4x16x128xf32>
    tpu.vector_store %arg5[%c5, %c0_33, %c0_34, %c0_35], %100 {strides = array<i32>} : memref<16x4x16x128xf32, #tpu.memory_space<vmem>>, vector<1x4x16x128xf32>,
    %101 = arith.addf %81, %97 : vector<4x16x128xf32>
    %102 = arith.mulf %97, %97 : vector<4x16x128xf32>
    %103 = arith.addf %83, %102 : vector<4x16x128xf32>
    %104 = arith.subf %87, %6 : vector<4x16x128xf32>
    %c6 = arith.constant 6 : index
    %c0_36 = arith.constant 0 : index
    %c0_37 = arith.constant 0 : index
    %c0_38 = arith.constant 0 : index
    %105 = vector.load %arg5[%c6, %c0_36, %c0_37, %c0_38] : memref<16x4x16x128xf32, #tpu.memory_space<vmem>>, vector<1x4x16x128xf32>
    %106 = vector.shape_cast %105 : vector<1x4x16x128xf32> to vector<4x16x128xf32>
    %107 = vector.shape_cast %104 : vector<4x16x128xf32> to vector<1x4x16x128xf32>
    tpu.vector_store %arg5[%c6, %c0_36, %c0_37, %c0_38], %107 {strides = array<i32>} : memref<16x4x16x128xf32, #tpu.memory_space<vmem>>, vector<1x4x16x128xf32>,
    %108 = arith.addf %101, %104 : vector<4x16x128xf32>
    %109 = arith.mulf %104, %104 : vector<4x16x128xf32>
    %110 = arith.addf %103, %109 : vector<4x16x128xf32>
    %c127_i32_39 = arith.constant 127 : i32
    %111 = tpu.dynamic_rotate %87 by %c127_i32_39 dim 2 : vector<4x16x128xf32>, i32 -> vector<4x16x128xf32>
    %112 = vector.extract_strided_slice %87 {offsets = [0, 0, 23], sizes = [4, 16, 1], strides = [1, 1, 1]} : vector<4x16x128xf32> to vector<4x16x1xf32>
    %c23_i32_40 = arith.constant 23 : i32
    %113 = vector.broadcast %c23_i32_40 : i32 to vector<1x1x128xi32>
    %114 = arith.cmpi sge, %3, %113 : vector<1x1x128xi32>
    %115 = vector.shape_cast %114 : vector<1x1x128xi1> to vector<1x1x128xi1>
    %116 = vector.broadcast %115 : vector<1x1x128xi1> to vector<4x16x128xi1>
    %117 = vector.shape_cast %112 : vector<4x16x1xf32> to vector<4x16x1xf32>
    %118 = vector.broadcast %117 : vector<4x16x1xf32> to vector<4x16x128xf32>
    %119 = arith.select %116, %118, %111 : vector<4x16x128xi1>, vector<4x16x128xf32>
    %120 = arith.subf %119, %6 : vector<4x16x128xf32>
    %c7 = arith.constant 7 : index
    %c0_41 = arith.constant 0 : index
    %c0_42 = arith.constant 0 : index
    %c0_43 = arith.constant 0 : index
    %121 = vector.load %arg5[%c7, %c0_41, %c0_42, %c0_43] : memref<16x4x16x128xf32, #tpu.memory_space<vmem>>, vector<1x4x16x128xf32>
    %122 = vector.shape_cast %121 : vector<1x4x16x128xf32> to vector<4x16x128xf32>
    %123 = vector.shape_cast %120 : vector<4x16x128xf32> to vector<1x4x16x128xf32>
    tpu.vector_store %arg5[%c7, %c0_41, %c0_42, %c0_43], %123 {strides = array<i32>} : memref<16x4x16x128xf32, #tpu.memory_space<vmem>>, vector<1x4x16x128xf32>,
    %124 = arith.addf %108, %120 : vector<4x16x128xf32>
    %125 = arith.mulf %120, %120 : vector<4x16x128xf32>
    %126 = arith.addf %110, %125 : vector<4x16x128xf32>
    %c-2_i32 = arith.constant -2 : i32
    %127 = arith.addi %2, %c-2_i32 : i32
    %c0_44 = arith.constant 0 : index
    %c0_45 = arith.constant 0 : index
    %128 = arith.index_cast %127 : i32 to index
    %c0_46 = arith.constant 0 : index
    %129 = vector.load %arg2[%c0_44, %c0_45, %128, %c0_46] : memref<1x4x36x128xf32, #tpu.memory_space<vmem>>, vector<1x4x16x128xf32>
    %130 = vector.shape_cast %129 : vector<1x4x16x128xf32> to vector<4x16x128xf32>
    %c2_i32_47 = arith.constant 2 : i32
    %131 = tpu.dynamic_rotate %130 by %c2_i32_47 dim 2 : vector<4x16x128xf32>, i32 -> vector<4x16x128xf32>
    %132 = vector.extract_strided_slice %130 {offsets = [0, 0, 0], sizes = [4, 16, 1], strides = [1, 1, 1]} : vector<4x16x128xf32> to vector<4x16x1xf32>
    %c2_i32_48 = arith.constant 2 : i32
    %133 = vector.broadcast %c2_i32_48 : i32 to vector<1x1x128xi32>
    %134 = arith.cmpi slt, %3, %133 : vector<1x1x128xi32>
    %135 = vector.shape_cast %134 : vector<1x1x128xi1> to vector<1x1x128xi1>
    %136 = vector.broadcast %135 : vector<1x1x128xi1> to vector<4x16x128xi1>
    %137 = vector.shape_cast %132 : vector<4x16x1xf32> to vector<4x16x1xf32>
    %138 = vector.broadcast %137 : vector<4x16x1xf32> to vector<4x16x128xf32>
    %139 = arith.select %136, %138, %131 : vector<4x16x128xi1>, vector<4x16x128xf32>
    %140 = arith.subf %139, %6 : vector<4x16x128xf32>
    %c8 = arith.constant 8 : index
    %c0_49 = arith.constant 0 : index
    %c0_50 = arith.constant 0 : index
    %c0_51 = arith.constant 0 : index
    %141 = vector.load %arg5[%c8, %c0_49, %c0_50, %c0_51] : memref<16x4x16x128xf32, #tpu.memory_space<vmem>>, vector<1x4x16x128xf32>
    %142 = vector.shape_cast %141 : vector<1x4x16x128xf32> to vector<4x16x128xf32>
    %143 = vector.shape_cast %140 : vector<4x16x128xf32> to vector<1x4x16x128xf32>
    tpu.vector_store %arg5[%c8, %c0_49, %c0_50, %c0_51], %143 {strides = array<i32>} : memref<16x4x16x128xf32, #tpu.memory_space<vmem>>, vector<1x4x16x128xf32>,
    %144 = arith.addf %124, %140 : vector<4x16x128xf32>
    %145 = arith.mulf %140, %140 : vector<4x16x128xf32>
    %146 = arith.addf %126, %145 : vector<4x16x128xf32>
    %147 = arith.subf %130, %6 : vector<4x16x128xf32>
    %c9 = arith.constant 9 : index
    %c0_52 = arith.constant 0 : index
    %c0_53 = arith.constant 0 : index
    %c0_54 = arith.constant 0 : index
    %148 = vector.load %arg5[%c9, %c0_52, %c0_53, %c0_54] : memref<16x4x16x128xf32, #tpu.memory_space<vmem>>, vector<1x4x16x128xf32>
    %149 = vector.shape_cast %148 : vector<1x4x16x128xf32> to vector<4x16x128xf32>
    %150 = vector.shape_cast %147 : vector<4x16x128xf32> to vector<1x4x16x128xf32>
    tpu.vector_store %arg5[%c9, %c0_52, %c0_53, %c0_54], %150 {strides = array<i32>} : memref<16x4x16x128xf32, #tpu.memory_space<vmem>>, vector<1x4x16x128xf32>,
    %151 = arith.addf %144, %147 : vector<4x16x128xf32>
    %152 = arith.mulf %147, %147 : vector<4x16x128xf32>
    %153 = arith.addf %146, %152 : vector<4x16x128xf32>
    %c126_i32 = arith.constant 126 : i32
    %154 = tpu.dynamic_rotate %130 by %c126_i32 dim 2 : vector<4x16x128xf32>, i32 -> vector<4x16x128xf32>
    %155 = vector.extract_strided_slice %130 {offsets = [0, 0, 23], sizes = [4, 16, 1], strides = [1, 1, 1]} : vector<4x16x128xf32> to vector<4x16x1xf32>
    %c22_i32 = arith.constant 22 : i32
    %156 = vector.broadcast %c22_i32 : i32 to vector<1x1x128xi32>
    %157 = arith.cmpi sge, %3, %156 : vector<1x1x128xi32>
    %158 = vector.shape_cast %157 : vector<1x1x128xi1> to vector<1x1x128xi1>
    %159 = vector.broadcast %158 : vector<1x1x128xi1> to vector<4x16x128xi1>
    %160 = vector.shape_cast %155 : vector<4x16x1xf32> to vector<4x16x1xf32>
    %161 = vector.broadcast %160 : vector<4x16x1xf32> to vector<4x16x128xf32>
    %162 = arith.select %159, %161, %154 : vector<4x16x128xi1>, vector<4x16x128xf32>
    %163 = arith.subf %162, %6 : vector<4x16x128xf32>
    %c10 = arith.constant 10 : index
    %c0_55 = arith.constant 0 : index
    %c0_56 = arith.constant 0 : index
    %c0_57 = arith.constant 0 : index
    %164 = vector.load %arg5[%c10, %c0_55, %c0_56, %c0_57] : memref<16x4x16x128xf32, #tpu.memory_space<vmem>>, vector<1x4x16x128xf32>
    %165 = vector.shape_cast %164 : vector<1x4x16x128xf32> to vector<4x16x128xf32>
    %166 = vector.shape_cast %163 : vector<4x16x128xf32> to vector<1x4x16x128xf32>
    tpu.vector_store %arg5[%c10, %c0_55, %c0_56, %c0_57], %166 {strides = array<i32>} : memref<16x4x16x128xf32, #tpu.memory_space<vmem>>, vector<1x4x16x128xf32>,
    %167 = arith.addf %151, %163 : vector<4x16x128xf32>
    %168 = arith.mulf %163, %163 : vector<4x16x128xf32>
    %169 = arith.addf %153, %168 : vector<4x16x128xf32>
    %c2_i32_58 = arith.constant 2 : i32
    %170 = tpu.dynamic_rotate %6 by %c2_i32_58 dim 2 : vector<4x16x128xf32>, i32 -> vector<4x16x128xf32>
    %171 = vector.extract_strided_slice %6 {offsets = [0, 0, 0], sizes = [4, 16, 1], strides = [1, 1, 1]} : vector<4x16x128xf32> to vector<4x16x1xf32>
    %c2_i32_59 = arith.constant 2 : i32
    %172 = vector.broadcast %c2_i32_59 : i32 to vector<1x1x128xi32>
    %173 = arith.cmpi slt, %3, %172 : vector<1x1x128xi32>
    %174 = vector.shape_cast %173 : vector<1x1x128xi1> to vector<1x1x128xi1>
    %175 = vector.broadcast %174 : vector<1x1x128xi1> to vector<4x16x128xi1>
    %176 = vector.shape_cast %171 : vector<4x16x1xf32> to vector<4x16x1xf32>
    %177 = vector.broadcast %176 : vector<4x16x1xf32> to vector<4x16x128xf32>
    %178 = arith.select %175, %177, %170 : vector<4x16x128xi1>, vector<4x16x128xf32>
    %179 = arith.subf %178, %6 : vector<4x16x128xf32>
    %c11 = arith.constant 11 : index
    %c0_60 = arith.constant 0 : index
    %c0_61 = arith.constant 0 : index
    %c0_62 = arith.constant 0 : index
    %180 = vector.load %arg5[%c11, %c0_60, %c0_61, %c0_62] : memref<16x4x16x128xf32, #tpu.memory_space<vmem>>, vector<1x4x16x128xf32>
    %181 = vector.shape_cast %180 : vector<1x4x16x128xf32> to vector<4x16x128xf32>
    %182 = vector.shape_cast %179 : vector<4x16x128xf32> to vector<1x4x16x128xf32>
    tpu.vector_store %arg5[%c11, %c0_60, %c0_61, %c0_62], %182 {strides = array<i32>} : memref<16x4x16x128xf32, #tpu.memory_space<vmem>>, vector<1x4x16x128xf32>,
    %183 = arith.addf %167, %179 : vector<4x16x128xf32>
    %184 = arith.mulf %179, %179 : vector<4x16x128xf32>
    %185 = arith.addf %169, %184 : vector<4x16x128xf32>
    %c126_i32_63 = arith.constant 126 : i32
    %186 = tpu.dynamic_rotate %6 by %c126_i32_63 dim 2 : vector<4x16x128xf32>, i32 -> vector<4x16x128xf32>
    %187 = vector.extract_strided_slice %6 {offsets = [0, 0, 23], sizes = [4, 16, 1], strides = [1, 1, 1]} : vector<4x16x128xf32> to vector<4x16x1xf32>
    %c22_i32_64 = arith.constant 22 : i32
    %188 = vector.broadcast %c22_i32_64 : i32 to vector<1x1x128xi32>
    %189 = arith.cmpi sge, %3, %188 : vector<1x1x128xi32>
    %190 = vector.shape_cast %189 : vector<1x1x128xi1> to vector<1x1x128xi1>
    %191 = vector.broadcast %190 : vector<1x1x128xi1> to vector<4x16x128xi1>
    %192 = vector.shape_cast %187 : vector<4x16x1xf32> to vector<4x16x1xf32>
    %193 = vector.broadcast %192 : vector<4x16x1xf32> to vector<4x16x128xf32>
    %194 = arith.select %191, %193, %186 : vector<4x16x128xi1>, vector<4x16x128xf32>
    %195 = arith.subf %194, %6 : vector<4x16x128xf32>
    %c12 = arith.constant 12 : index
    %c0_65 = arith.constant 0 : index
    %c0_66 = arith.constant 0 : index
    %c0_67 = arith.constant 0 : index
    %196 = vector.load %arg5[%c12, %c0_65, %c0_66, %c0_67] : memref<16x4x16x128xf32, #tpu.memory_space<vmem>>, vector<1x4x16x128xf32>
    %197 = vector.shape_cast %196 : vector<1x4x16x128xf32> to vector<4x16x128xf32>
    %198 = vector.shape_cast %195 : vector<4x16x128xf32> to vector<1x4x16x128xf32>
    tpu.vector_store %arg5[%c12, %c0_65, %c0_66, %c0_67], %198 {strides = array<i32>} : memref<16x4x16x128xf32, #tpu.memory_space<vmem>>, vector<1x4x16x128xf32>,
    %199 = arith.addf %183, %195 : vector<4x16x128xf32>
    %200 = arith.mulf %195, %195 : vector<4x16x128xf32>
    %201 = arith.addf %185, %200 : vector<4x16x128xf32>
    %c2_i32_68 = arith.constant 2 : i32
    %202 = arith.addi %2, %c2_i32_68 : i32
    %c0_69 = arith.constant 0 : index
    %c0_70 = arith.constant 0 : index
    %203 = arith.index_cast %202 : i32 to index
    %c0_71 = arith.constant 0 : index
    %204 = vector.load %arg2[%c0_69, %c0_70, %203, %c0_71] : memref<1x4x36x128xf32, #tpu.memory_space<vmem>>, vector<1x4x16x128xf32>
    %205 = vector.shape_cast %204 : vector<1x4x16x128xf32> to vector<4x16x128xf32>
    %c2_i32_72 = arith.constant 2 : i32
    %206 = tpu.dynamic_rotate %205 by %c2_i32_72 dim 2 : vector<4x16x128xf32>, i32 -> vector<4x16x128xf32>
    %207 = vector.extract_strided_slice %205 {offsets = [0, 0, 0], sizes = [4, 16, 1], strides = [1, 1, 1]} : vector<4x16x128xf32> to vector<4x16x1xf32>
    %c2_i32_73 = arith.constant 2 : i32
    %208 = vector.broadcast %c2_i32_73 : i32 to vector<1x1x128xi32>
    %209 = arith.cmpi slt, %3, %208 : vector<1x1x128xi32>
    %210 = vector.shape_cast %209 : vector<1x1x128xi1> to vector<1x1x128xi1>
    %211 = vector.broadcast %210 : vector<1x1x128xi1> to vector<4x16x128xi1>
    %212 = vector.shape_cast %207 : vector<4x16x1xf32> to vector<4x16x1xf32>
    %213 = vector.broadcast %212 : vector<4x16x1xf32> to vector<4x16x128xf32>
    %214 = arith.select %211, %213, %206 : vector<4x16x128xi1>, vector<4x16x128xf32>
    %215 = arith.subf %214, %6 : vector<4x16x128xf32>
    %c13 = arith.constant 13 : index
    %c0_74 = arith.constant 0 : index
    %c0_75 = arith.constant 0 : index
    %c0_76 = arith.constant 0 : index
    %216 = vector.load %arg5[%c13, %c0_74, %c0_75, %c0_76] : memref<16x4x16x128xf32, #tpu.memory_space<vmem>>, vector<1x4x16x128xf32>
    %217 = vector.shape_cast %216 : vector<1x4x16x128xf32> to vector<4x16x128xf32>
    %218 = vector.shape_cast %215 : vector<4x16x128xf32> to vector<1x4x16x128xf32>
    tpu.vector_store %arg5[%c13, %c0_74, %c0_75, %c0_76], %218 {strides = array<i32>} : memref<16x4x16x128xf32, #tpu.memory_space<vmem>>, vector<1x4x16x128xf32>,
    %219 = arith.addf %199, %215 : vector<4x16x128xf32>
    %220 = arith.mulf %215, %215 : vector<4x16x128xf32>
    %221 = arith.addf %201, %220 : vector<4x16x128xf32>
    %222 = arith.subf %205, %6 : vector<4x16x128xf32>
    %c14 = arith.constant 14 : index
    %c0_77 = arith.constant 0 : index
    %c0_78 = arith.constant 0 : index
    %c0_79 = arith.constant 0 : index
    %223 = vector.load %arg5[%c14, %c0_77, %c0_78, %c0_79] : memref<16x4x16x128xf32, #tpu.memory_space<vmem>>, vector<1x4x16x128xf32>
    %224 = vector.shape_cast %223 : vector<1x4x16x128xf32> to vector<4x16x128xf32>
    %225 = vector.shape_cast %222 : vector<4x16x128xf32> to vector<1x4x16x128xf32>
    tpu.vector_store %arg5[%c14, %c0_77, %c0_78, %c0_79], %225 {strides = array<i32>} : memref<16x4x16x128xf32, #tpu.memory_space<vmem>>, vector<1x4x16x128xf32>,
    %226 = arith.addf %219, %222 : vector<4x16x128xf32>
    %227 = arith.mulf %222, %222 : vector<4x16x128xf32>
    %228 = arith.addf %221, %227 : vector<4x16x128xf32>
    %c126_i32_80 = arith.constant 126 : i32
    %229 = tpu.dynamic_rotate %205 by %c126_i32_80 dim 2 : vector<4x16x128xf32>, i32 -> vector<4x16x128xf32>
    %230 = vector.extract_strided_slice %205 {offsets = [0, 0, 23], sizes = [4, 16, 1], strides = [1, 1, 1]} : vector<4x16x128xf32> to vector<4x16x1xf32>
    %c22_i32_81 = arith.constant 22 : i32
    %231 = vector.broadcast %c22_i32_81 : i32 to vector<1x1x128xi32>
    %232 = arith.cmpi sge, %3, %231 : vector<1x1x128xi32>
    %233 = vector.shape_cast %232 : vector<1x1x128xi1> to vector<1x1x128xi1>
    %234 = vector.broadcast %233 : vector<1x1x128xi1> to vector<4x16x128xi1>
    %235 = vector.shape_cast %230 : vector<4x16x1xf32> to vector<4x16x1xf32>
    %236 = vector.broadcast %235 : vector<4x16x1xf32> to vector<4x16x128xf32>
    %237 = arith.select %234, %236, %229 : vector<4x16x128xi1>, vector<4x16x128xf32>
    %238 = arith.subf %237, %6 : vector<4x16x128xf32>
    %c15 = arith.constant 15 : index
    %c0_82 = arith.constant 0 : index
    %c0_83 = arith.constant 0 : index
    %c0_84 = arith.constant 0 : index
    %239 = vector.load %arg5[%c15, %c0_82, %c0_83, %c0_84] : memref<16x4x16x128xf32, #tpu.memory_space<vmem>>, vector<1x4x16x128xf32>
    %240 = vector.shape_cast %239 : vector<1x4x16x128xf32> to vector<4x16x128xf32>
    %241 = vector.shape_cast %238 : vector<4x16x128xf32> to vector<1x4x16x128xf32>
    tpu.vector_store %arg5[%c15, %c0_82, %c0_83, %c0_84], %241 {strides = array<i32>} : memref<16x4x16x128xf32, #tpu.memory_space<vmem>>, vector<1x4x16x128xf32>,
    %242 = arith.addf %226, %238 : vector<4x16x128xf32>
    %243 = arith.mulf %238, %238 : vector<4x16x128xf32>
    %244 = arith.addf %228, %243 : vector<4x16x128xf32>
    %245 = arith.mulf %242, %242 : vector<4x16x128xf32>
    %cst_85 = arith.constant 0.055555556 : f32
    %246 = vector.broadcast %cst_85 : f32 to vector<4x16x128xf32>
    %247 = arith.mulf %245, %246 : vector<4x16x128xf32>
    %248 = arith.subf %244, %247 : vector<4x16x128xf32>
    %cst_86 = arith.constant 0.0588235296 : f32
    %249 = vector.broadcast %cst_86 : f32 to vector<4x16x128xf32>
    %250 = arith.mulf %248, %249 : vector<4x16x128xf32>
    %cst_87 = arith.constant 0.000000e+00 : f32
    %251 = vector.broadcast %cst_87 : f32 to vector<4x16x128xf32>
    %252 = arith.maximumf %250, %251 : vector<4x16x128xf32>
    %253 = math.sqrt %252 : vector<4x16x128xf32>
    %cst_88 = arith.constant 1.000000e-01 : f32
    %254 = vector.broadcast %cst_88 : f32 to vector<4x16x128xf32>
    %255 = arith.mulf %254, %253 : vector<4x16x128xf32>
    %cst_89 = arith.constant 9.99999993E-9 : f32
    %256 = vector.broadcast %cst_89 : f32 to vector<4x16x128xf32>
    %257 = arith.addf %256, %255 : vector<4x16x128xf32>
    %258 = tpu.reciprocal %257 {approx = true} : vector<4x16x128xf32> -> vector<4x16x128xf32>
    %259 = arith.mulf %257, %258 : vector<4x16x128xf32>
    %cst_90 = arith.constant 2.000000e+00 : f32
    %260 = vector.broadcast %cst_90 : f32 to vector<4x16x128xf32>
    %261 = arith.subf %260, %259 : vector<4x16x128xf32>
    %262 = arith.mulf %258, %261 : vector<4x16x128xf32>
    %cst_91 = arith.constant 0xFF800000 : f32
    %263 = vector.broadcast %cst_91 : f32 to vector<16x128xf32>
    %c0_92 = arith.constant 0 : index
    %c0_93 = arith.constant 0 : index
    %c0_94 = arith.constant 0 : index
    %c0_95 = arith.constant 0 : index
    %264 = vector.load %arg5[%c0_92, %c0_93, %c0_94, %c0_95] : memref<16x4x16x128xf32, #tpu.memory_space<vmem>>, vector<1x4x16x128xf32>
    %265 = vector.shape_cast %264 : vector<1x4x16x128xf32> to vector<4x16x128xf32>
    %266 = math.absf %265 : vector<4x16x128xf32>
    %267 = arith.mulf %266, %262 : vector<4x16x128xf32>
    %cst_96 = arith.constant dense<0.000000e+00> : vector<16x128xf32>
    %268 = vector.multi_reduction <add>, %267, %cst_96 [0] : vector<4x16x128xf32> to vector<16x128xf32>
    %cst_97 = arith.constant -2.500000e-01 : f32
    %269 = vector.broadcast %cst_97 : f32 to vector<16x128xf32>
    %270 = arith.mulf %268, %269 : vector<16x128xf32>
    %c0_98 = arith.constant 0 : index
    %c0_99 = arith.constant 0 : index
    %c0_100 = arith.constant 0 : index
    %271 = vector.load %arg4[%c0_98, %c0_99, %c0_100] : memref<16x16x128xf32, #tpu.memory_space<vmem>>, vector<1x16x128xf32>
    %272 = vector.shape_cast %271 : vector<1x16x128xf32> to vector<16x128xf32>
    %273 = vector.shape_cast %270 : vector<16x128xf32> to vector<1x16x128xf32>
    tpu.vector_store %arg4[%c0_98, %c0_99, %c0_100], %273 {strides = array<i32>} : memref<16x16x128xf32, #tpu.memory_space<vmem>>, vector<1x16x128xf32>,
    %274 = arith.maximumf %263, %270 : vector<16x128xf32>
    %c1_101 = arith.constant 1 : index
    %c0_102 = arith.constant 0 : index
    %c0_103 = arith.constant 0 : index
    %c0_104 = arith.constant 0 : index
    %275 = vector.load %arg5[%c1_101, %c0_102, %c0_103, %c0_104] : memref<16x4x16x128xf32, #tpu.memory_space<vmem>>, vector<1x4x16x128xf32>
    %276 = vector.shape_cast %275 : vector<1x4x16x128xf32> to vector<4x16x128xf32>
    %277 = math.absf %276 : vector<4x16x128xf32>
    %278 = arith.mulf %277, %262 : vector<4x16x128xf32>
    %cst_105 = arith.constant dense<0.000000e+00> : vector<16x128xf32>
    %279 = vector.multi_reduction <add>, %278, %cst_105 [0] : vector<4x16x128xf32> to vector<16x128xf32>
    %cst_106 = arith.constant -2.500000e-01 : f32
    %280 = vector.broadcast %cst_106 : f32 to vector<16x128xf32>
    %281 = arith.mulf %279, %280 : vector<16x128xf32>
    %c1_107 = arith.constant 1 : index
    %c0_108 = arith.constant 0 : index
    %c0_109 = arith.constant 0 : index
    %282 = vector.load %arg4[%c1_107, %c0_108, %c0_109] : memref<16x16x128xf32, #tpu.memory_space<vmem>>, vector<1x16x128xf32>
    %283 = vector.shape_cast %282 : vector<1x16x128xf32> to vector<16x128xf32>
    %284 = vector.shape_cast %281 : vector<16x128xf32> to vector<1x16x128xf32>
    tpu.vector_store %arg4[%c1_107, %c0_108, %c0_109], %284 {strides = array<i32>} : memref<16x16x128xf32, #tpu.memory_space<vmem>>, vector<1x16x128xf32>,
    %285 = arith.maximumf %274, %281 : vector<16x128xf32>
    %c2_110 = arith.constant 2 : index
    %c0_111 = arith.constant 0 : index
    %c0_112 = arith.constant 0 : index
    %c0_113 = arith.constant 0 : index
    %286 = vector.load %arg5[%c2_110, %c0_111, %c0_112, %c0_113] : memref<16x4x16x128xf32, #tpu.memory_space<vmem>>, vector<1x4x16x128xf32>
    %287 = vector.shape_cast %286 : vector<1x4x16x128xf32> to vector<4x16x128xf32>
    %288 = math.absf %287 : vector<4x16x128xf32>
    %289 = arith.mulf %288, %262 : vector<4x16x128xf32>
    %cst_114 = arith.constant dense<0.000000e+00> : vector<16x128xf32>
    %290 = vector.multi_reduction <add>, %289, %cst_114 [0] : vector<4x16x128xf32> to vector<16x128xf32>
    %cst_115 = arith.constant -2.500000e-01 : f32
    %291 = vector.broadcast %cst_115 : f32 to vector<16x128xf32>
    %292 = arith.mulf %290, %291 : vector<16x128xf32>
    %c2_116 = arith.constant 2 : index
    %c0_117 = arith.constant 0 : index
    %c0_118 = arith.constant 0 : index
    %293 = vector.load %arg4[%c2_116, %c0_117, %c0_118] : memref<16x16x128xf32, #tpu.memory_space<vmem>>, vector<1x16x128xf32>
    %294 = vector.shape_cast %293 : vector<1x16x128xf32> to vector<16x128xf32>
    %295 = vector.shape_cast %292 : vector<16x128xf32> to vector<1x16x128xf32>
    tpu.vector_store %arg4[%c2_116, %c0_117, %c0_118], %295 {strides = array<i32>} : memref<16x16x128xf32, #tpu.memory_space<vmem>>, vector<1x16x128xf32>,
    %296 = arith.maximumf %285, %292 : vector<16x128xf32>
    %c3_119 = arith.constant 3 : index
    %c0_120 = arith.constant 0 : index
    %c0_121 = arith.constant 0 : index
    %c0_122 = arith.constant 0 : index
    %297 = vector.load %arg5[%c3_119, %c0_120, %c0_121, %c0_122] : memref<16x4x16x128xf32, #tpu.memory_space<vmem>>, vector<1x4x16x128xf32>
    %298 = vector.shape_cast %297 : vector<1x4x16x128xf32> to vector<4x16x128xf32>
    %299 = math.absf %298 : vector<4x16x128xf32>
    %300 = arith.mulf %299, %262 : vector<4x16x128xf32>
    %cst_123 = arith.constant dense<0.000000e+00> : vector<16x128xf32>
    %301 = vector.multi_reduction <add>, %300, %cst_123 [0] : vector<4x16x128xf32> to vector<16x128xf32>
    %cst_124 = arith.constant -2.500000e-01 : f32
    %302 = vector.broadcast %cst_124 : f32 to vector<16x128xf32>
    %303 = arith.mulf %301, %302 : vector<16x128xf32>
    %c3_125 = arith.constant 3 : index
    %c0_126 = arith.constant 0 : index
    %c0_127 = arith.constant 0 : index
    %304 = vector.load %arg4[%c3_125, %c0_126, %c0_127] : memref<16x16x128xf32, #tpu.memory_space<vmem>>, vector<1x16x128xf32>
    %305 = vector.shape_cast %304 : vector<1x16x128xf32> to vector<16x128xf32>
    %306 = vector.shape_cast %303 : vector<16x128xf32> to vector<1x16x128xf32>
    tpu.vector_store %arg4[%c3_125, %c0_126, %c0_127], %306 {strides = array<i32>} : memref<16x16x128xf32, #tpu.memory_space<vmem>>, vector<1x16x128xf32>,
    %307 = arith.maximumf %296, %303 : vector<16x128xf32>
    %c4_128 = arith.constant 4 : index
    %c0_129 = arith.constant 0 : index
    %c0_130 = arith.constant 0 : index
    %c0_131 = arith.constant 0 : index
    %308 = vector.load %arg5[%c4_128, %c0_129, %c0_130, %c0_131] : memref<16x4x16x128xf32, #tpu.memory_space<vmem>>, vector<1x4x16x128xf32>
    %309 = vector.shape_cast %308 : vector<1x4x16x128xf32> to vector<4x16x128xf32>
    %310 = math.absf %309 : vector<4x16x128xf32>
    %311 = arith.mulf %310, %262 : vector<4x16x128xf32>
    %cst_132 = arith.constant dense<0.000000e+00> : vector<16x128xf32>
    %312 = vector.multi_reduction <add>, %311, %cst_132 [0] : vector<4x16x128xf32> to vector<16x128xf32>
    %cst_133 = arith.constant -2.500000e-01 : f32
    %313 = vector.broadcast %cst_133 : f32 to vector<16x128xf32>
    %314 = arith.mulf %312, %313 : vector<16x128xf32>
    %c4_134 = arith.constant 4 : index
    %c0_135 = arith.constant 0 : index
    %c0_136 = arith.constant 0 : index
    %315 = vector.load %arg4[%c4_134, %c0_135, %c0_136] : memref<16x16x128xf32, #tpu.memory_space<vmem>>, vector<1x16x128xf32>
    %316 = vector.shape_cast %315 : vector<1x16x128xf32> to vector<16x128xf32>
    %317 = vector.shape_cast %314 : vector<16x128xf32> to vector<1x16x128xf32>
    tpu.vector_store %arg4[%c4_134, %c0_135, %c0_136], %317 {strides = array<i32>} : memref<16x16x128xf32, #tpu.memory_space<vmem>>, vector<1x16x128xf32>,
    %318 = arith.maximumf %307, %314 : vector<16x128xf32>
    %c5_137 = arith.constant 5 : index
    %c0_138 = arith.constant 0 : index
    %c0_139 = arith.constant 0 : index
    %c0_140 = arith.constant 0 : index
    %319 = vector.load %arg5[%c5_137, %c0_138, %c0_139, %c0_140] : memref<16x4x16x128xf32, #tpu.memory_space<vmem>>, vector<1x4x16x128xf32>
    %320 = vector.shape_cast %319 : vector<1x4x16x128xf32> to vector<4x16x128xf32>
    %321 = math.absf %320 : vector<4x16x128xf32>
    %322 = arith.mulf %321, %262 : vector<4x16x128xf32>
    %cst_141 = arith.constant dense<0.000000e+00> : vector<16x128xf32>
    %323 = vector.multi_reduction <add>, %322, %cst_141 [0] : vector<4x16x128xf32> to vector<16x128xf32>
    %cst_142 = arith.constant -2.500000e-01 : f32
    %324 = vector.broadcast %cst_142 : f32 to vector<16x128xf32>
    %325 = arith.mulf %323, %324 : vector<16x128xf32>
    %c5_143 = arith.constant 5 : index
    %c0_144 = arith.constant 0 : index
    %c0_145 = arith.constant 0 : index
    %326 = vector.load %arg4[%c5_143, %c0_144, %c0_145] : memref<16x16x128xf32, #tpu.memory_space<vmem>>, vector<1x16x128xf32>
    %327 = vector.shape_cast %326 : vector<1x16x128xf32> to vector<16x128xf32>
    %328 = vector.shape_cast %325 : vector<16x128xf32> to vector<1x16x128xf32>
    tpu.vector_store %arg4[%c5_143, %c0_144, %c0_145], %328 {strides = array<i32>} : memref<16x16x128xf32, #tpu.memory_space<vmem>>, vector<1x16x128xf32>,
    %329 = arith.maximumf %318, %325 : vector<16x128xf32>
    %c6_146 = arith.constant 6 : index
    %c0_147 = arith.constant 0 : index
    %c0_148 = arith.constant 0 : index
    %c0_149 = arith.constant 0 : index
    %330 = vector.load %arg5[%c6_146, %c0_147, %c0_148, %c0_149] : memref<16x4x16x128xf32, #tpu.memory_space<vmem>>, vector<1x4x16x128xf32>
    %331 = vector.shape_cast %330 : vector<1x4x16x128xf32> to vector<4x16x128xf32>
    %332 = math.absf %331 : vector<4x16x128xf32>
    %333 = arith.mulf %332, %262 : vector<4x16x128xf32>
    %cst_150 = arith.constant dense<0.000000e+00> : vector<16x128xf32>
    %334 = vector.multi_reduction <add>, %333, %cst_150 [0] : vector<4x16x128xf32> to vector<16x128xf32>
    %cst_151 = arith.constant -2.500000e-01 : f32
    %335 = vector.broadcast %cst_151 : f32 to vector<16x128xf32>
    %336 = arith.mulf %334, %335 : vector<16x128xf32>
    %c6_152 = arith.constant 6 : index
    %c0_153 = arith.constant 0 : index
    %c0_154 = arith.constant 0 : index
    %337 = vector.load %arg4[%c6_152, %c0_153, %c0_154] : memref<16x16x128xf32, #tpu.memory_space<vmem>>, vector<1x16x128xf32>
    %338 = vector.shape_cast %337 : vector<1x16x128xf32> to vector<16x128xf32>
    %339 = vector.shape_cast %336 : vector<16x128xf32> to vector<1x16x128xf32>
    tpu.vector_store %arg4[%c6_152, %c0_153, %c0_154], %339 {strides = array<i32>} : memref<16x16x128xf32, #tpu.memory_space<vmem>>, vector<1x16x128xf32>,
    %340 = arith.maximumf %329, %336 : vector<16x128xf32>
    %c7_155 = arith.constant 7 : index
    %c0_156 = arith.constant 0 : index
    %c0_157 = arith.constant 0 : index
    %c0_158 = arith.constant 0 : index
    %341 = vector.load %arg5[%c7_155, %c0_156, %c0_157, %c0_158] : memref<16x4x16x128xf32, #tpu.memory_space<vmem>>, vector<1x4x16x128xf32>
    %342 = vector.shape_cast %341 : vector<1x4x16x128xf32> to vector<4x16x128xf32>
    %343 = math.absf %342 : vector<4x16x128xf32>
    %344 = arith.mulf %343, %262 : vector<4x16x128xf32>
    %cst_159 = arith.constant dense<0.000000e+00> : vector<16x128xf32>
    %345 = vector.multi_reduction <add>, %344, %cst_159 [0] : vector<4x16x128xf32> to vector<16x128xf32>
    %cst_160 = arith.constant -2.500000e-01 : f32
    %346 = vector.broadcast %cst_160 : f32 to vector<16x128xf32>
    %347 = arith.mulf %345, %346 : vector<16x128xf32>
    %c7_161 = arith.constant 7 : index
    %c0_162 = arith.constant 0 : index
    %c0_163 = arith.constant 0 : index
    %348 = vector.load %arg4[%c7_161, %c0_162, %c0_163] : memref<16x16x128xf32, #tpu.memory_space<vmem>>, vector<1x16x128xf32>
    %349 = vector.shape_cast %348 : vector<1x16x128xf32> to vector<16x128xf32>
    %350 = vector.shape_cast %347 : vector<16x128xf32> to vector<1x16x128xf32>
    tpu.vector_store %arg4[%c7_161, %c0_162, %c0_163], %350 {strides = array<i32>} : memref<16x16x128xf32, #tpu.memory_space<vmem>>, vector<1x16x128xf32>,
    %351 = arith.maximumf %340, %347 : vector<16x128xf32>
    %c8_164 = arith.constant 8 : index
    %c0_165 = arith.constant 0 : index
    %c0_166 = arith.constant 0 : index
    %c0_167 = arith.constant 0 : index
    %352 = vector.load %arg5[%c8_164, %c0_165, %c0_166, %c0_167] : memref<16x4x16x128xf32, #tpu.memory_space<vmem>>, vector<1x4x16x128xf32>
    %353 = vector.shape_cast %352 : vector<1x4x16x128xf32> to vector<4x16x128xf32>
    %354 = math.absf %353 : vector<4x16x128xf32>
    %355 = arith.mulf %354, %262 : vector<4x16x128xf32>
    %cst_168 = arith.constant dense<0.000000e+00> : vector<16x128xf32>
    %356 = vector.multi_reduction <add>, %355, %cst_168 [0] : vector<4x16x128xf32> to vector<16x128xf32>
    %cst_169 = arith.constant -2.500000e-01 : f32
    %357 = vector.broadcast %cst_169 : f32 to vector<16x128xf32>
    %358 = arith.mulf %356, %357 : vector<16x128xf32>
    %c8_170 = arith.constant 8 : index
    %c0_171 = arith.constant 0 : index
    %c0_172 = arith.constant 0 : index
    %359 = vector.load %arg4[%c8_170, %c0_171, %c0_172] : memref<16x16x128xf32, #tpu.memory_space<vmem>>, vector<1x16x128xf32>
    %360 = vector.shape_cast %359 : vector<1x16x128xf32> to vector<16x128xf32>
    %361 = vector.shape_cast %358 : vector<16x128xf32> to vector<1x16x128xf32>
    tpu.vector_store %arg4[%c8_170, %c0_171, %c0_172], %361 {strides = array<i32>} : memref<16x16x128xf32, #tpu.memory_space<vmem>>, vector<1x16x128xf32>,
    %362 = arith.maximumf %351, %358 : vector<16x128xf32>
    %c9_173 = arith.constant 9 : index
    %c0_174 = arith.constant 0 : index
    %c0_175 = arith.constant 0 : index
    %c0_176 = arith.constant 0 : index
    %363 = vector.load %arg5[%c9_173, %c0_174, %c0_175, %c0_176] : memref<16x4x16x128xf32, #tpu.memory_space<vmem>>, vector<1x4x16x128xf32>
    %364 = vector.shape_cast %363 : vector<1x4x16x128xf32> to vector<4x16x128xf32>
    %365 = math.absf %364 : vector<4x16x128xf32>
    %366 = arith.mulf %365, %262 : vector<4x16x128xf32>
    %cst_177 = arith.constant dense<0.000000e+00> : vector<16x128xf32>
    %367 = vector.multi_reduction <add>, %366, %cst_177 [0] : vector<4x16x128xf32> to vector<16x128xf32>
    %cst_178 = arith.constant -2.500000e-01 : f32
    %368 = vector.broadcast %cst_178 : f32 to vector<16x128xf32>
    %369 = arith.mulf %367, %368 : vector<16x128xf32>
    %c9_179 = arith.constant 9 : index
    %c0_180 = arith.constant 0 : index
    %c0_181 = arith.constant 0 : index
    %370 = vector.load %arg4[%c9_179, %c0_180, %c0_181] : memref<16x16x128xf32, #tpu.memory_space<vmem>>, vector<1x16x128xf32>
    %371 = vector.shape_cast %370 : vector<1x16x128xf32> to vector<16x128xf32>
    %372 = vector.shape_cast %369 : vector<16x128xf32> to vector<1x16x128xf32>
    tpu.vector_store %arg4[%c9_179, %c0_180, %c0_181], %372 {strides = array<i32>} : memref<16x16x128xf32, #tpu.memory_space<vmem>>, vector<1x16x128xf32>,
    %373 = arith.maximumf %362, %369 : vector<16x128xf32>
    %c10_182 = arith.constant 10 : index
    %c0_183 = arith.constant 0 : index
    %c0_184 = arith.constant 0 : index
    %c0_185 = arith.constant 0 : index
    %374 = vector.load %arg5[%c10_182, %c0_183, %c0_184, %c0_185] : memref<16x4x16x128xf32, #tpu.memory_space<vmem>>, vector<1x4x16x128xf32>
    %375 = vector.shape_cast %374 : vector<1x4x16x128xf32> to vector<4x16x128xf32>
    %376 = math.absf %375 : vector<4x16x128xf32>
    %377 = arith.mulf %376, %262 : vector<4x16x128xf32>
    %cst_186 = arith.constant dense<0.000000e+00> : vector<16x128xf32>
    %378 = vector.multi_reduction <add>, %377, %cst_186 [0] : vector<4x16x128xf32> to vector<16x128xf32>
    %cst_187 = arith.constant -2.500000e-01 : f32
    %379 = vector.broadcast %cst_187 : f32 to vector<16x128xf32>
    %380 = arith.mulf %378, %379 : vector<16x128xf32>
    %c10_188 = arith.constant 10 : index
    %c0_189 = arith.constant 0 : index
    %c0_190 = arith.constant 0 : index
    %381 = vector.load %arg4[%c10_188, %c0_189, %c0_190] : memref<16x16x128xf32, #tpu.memory_space<vmem>>, vector<1x16x128xf32>
    %382 = vector.shape_cast %381 : vector<1x16x128xf32> to vector<16x128xf32>
    %383 = vector.shape_cast %380 : vector<16x128xf32> to vector<1x16x128xf32>
    tpu.vector_store %arg4[%c10_188, %c0_189, %c0_190], %383 {strides = array<i32>} : memref<16x16x128xf32, #tpu.memory_space<vmem>>, vector<1x16x128xf32>,
    %384 = arith.maximumf %373, %380 : vector<16x128xf32>
    %c11_191 = arith.constant 11 : index
    %c0_192 = arith.constant 0 : index
    %c0_193 = arith.constant 0 : index
    %c0_194 = arith.constant 0 : index
    %385 = vector.load %arg5[%c11_191, %c0_192, %c0_193, %c0_194] : memref<16x4x16x128xf32, #tpu.memory_space<vmem>>, vector<1x4x16x128xf32>
    %386 = vector.shape_cast %385 : vector<1x4x16x128xf32> to vector<4x16x128xf32>
    %387 = math.absf %386 : vector<4x16x128xf32>
    %388 = arith.mulf %387, %262 : vector<4x16x128xf32>
    %cst_195 = arith.constant dense<0.000000e+00> : vector<16x128xf32>
    %389 = vector.multi_reduction <add>, %388, %cst_195 [0] : vector<4x16x128xf32> to vector<16x128xf32>
    %cst_196 = arith.constant -2.500000e-01 : f32
    %390 = vector.broadcast %cst_196 : f32 to vector<16x128xf32>
    %391 = arith.mulf %389, %390 : vector<16x128xf32>
    %c11_197 = arith.constant 11 : index
    %c0_198 = arith.constant 0 : index
    %c0_199 = arith.constant 0 : index
    %392 = vector.load %arg4[%c11_197, %c0_198, %c0_199] : memref<16x16x128xf32, #tpu.memory_space<vmem>>, vector<1x16x128xf32>
    %393 = vector.shape_cast %392 : vector<1x16x128xf32> to vector<16x128xf32>
    %394 = vector.shape_cast %391 : vector<16x128xf32> to vector<1x16x128xf32>
    tpu.vector_store %arg4[%c11_197, %c0_198, %c0_199], %394 {strides = array<i32>} : memref<16x16x128xf32, #tpu.memory_space<vmem>>, vector<1x16x128xf32>,
    %395 = arith.maximumf %384, %391 : vector<16x128xf32>
    %c12_200 = arith.constant 12 : index
    %c0_201 = arith.constant 0 : index
    %c0_202 = arith.constant 0 : index
    %c0_203 = arith.constant 0 : index
    %396 = vector.load %arg5[%c12_200, %c0_201, %c0_202, %c0_203] : memref<16x4x16x128xf32, #tpu.memory_space<vmem>>, vector<1x4x16x128xf32>
    %397 = vector.shape_cast %396 : vector<1x4x16x128xf32> to vector<4x16x128xf32>
    %398 = math.absf %397 : vector<4x16x128xf32>
    %399 = arith.mulf %398, %262 : vector<4x16x128xf32>
    %cst_204 = arith.constant dense<0.000000e+00> : vector<16x128xf32>
    %400 = vector.multi_reduction <add>, %399, %cst_204 [0] : vector<4x16x128xf32> to vector<16x128xf32>
    %cst_205 = arith.constant -2.500000e-01 : f32
    %401 = vector.broadcast %cst_205 : f32 to vector<16x128xf32>
    %402 = arith.mulf %400, %401 : vector<16x128xf32>
    %c12_206 = arith.constant 12 : index
    %c0_207 = arith.constant 0 : index
    %c0_208 = arith.constant 0 : index
    %403 = vector.load %arg4[%c12_206, %c0_207, %c0_208] : memref<16x16x128xf32, #tpu.memory_space<vmem>>, vector<1x16x128xf32>
    %404 = vector.shape_cast %403 : vector<1x16x128xf32> to vector<16x128xf32>
    %405 = vector.shape_cast %402 : vector<16x128xf32> to vector<1x16x128xf32>
    tpu.vector_store %arg4[%c12_206, %c0_207, %c0_208], %405 {strides = array<i32>} : memref<16x16x128xf32, #tpu.memory_space<vmem>>, vector<1x16x128xf32>,
    %406 = arith.maximumf %395, %402 : vector<16x128xf32>
    %c13_209 = arith.constant 13 : index
    %c0_210 = arith.constant 0 : index
    %c0_211 = arith.constant 0 : index
    %c0_212 = arith.constant 0 : index
    %407 = vector.load %arg5[%c13_209, %c0_210, %c0_211, %c0_212] : memref<16x4x16x128xf32, #tpu.memory_space<vmem>>, vector<1x4x16x128xf32>
    %408 = vector.shape_cast %407 : vector<1x4x16x128xf32> to vector<4x16x128xf32>
    %409 = math.absf %408 : vector<4x16x128xf32>
    %410 = arith.mulf %409, %262 : vector<4x16x128xf32>
    %cst_213 = arith.constant dense<0.000000e+00> : vector<16x128xf32>
    %411 = vector.multi_reduction <add>, %410, %cst_213 [0] : vector<4x16x128xf32> to vector<16x128xf32>
    %cst_214 = arith.constant -2.500000e-01 : f32
    %412 = vector.broadcast %cst_214 : f32 to vector<16x128xf32>
    %413 = arith.mulf %411, %412 : vector<16x128xf32>
    %c13_215 = arith.constant 13 : index
    %c0_216 = arith.constant 0 : index
    %c0_217 = arith.constant 0 : index
    %414 = vector.load %arg4[%c13_215, %c0_216, %c0_217] : memref<16x16x128xf32, #tpu.memory_space<vmem>>, vector<1x16x128xf32>
    %415 = vector.shape_cast %414 : vector<1x16x128xf32> to vector<16x128xf32>
    %416 = vector.shape_cast %413 : vector<16x128xf32> to vector<1x16x128xf32>
    tpu.vector_store %arg4[%c13_215, %c0_216, %c0_217], %416 {strides = array<i32>} : memref<16x16x128xf32, #tpu.memory_space<vmem>>, vector<1x16x128xf32>,
    %417 = arith.maximumf %406, %413 : vector<16x128xf32>
    %c14_218 = arith.constant 14 : index
    %c0_219 = arith.constant 0 : index
    %c0_220 = arith.constant 0 : index
    %c0_221 = arith.constant 0 : index
    %418 = vector.load %arg5[%c14_218, %c0_219, %c0_220, %c0_221] : memref<16x4x16x128xf32, #tpu.memory_space<vmem>>, vector<1x4x16x128xf32>
    %419 = vector.shape_cast %418 : vector<1x4x16x128xf32> to vector<4x16x128xf32>
    %420 = math.absf %419 : vector<4x16x128xf32>
    %421 = arith.mulf %420, %262 : vector<4x16x128xf32>
    %cst_222 = arith.constant dense<0.000000e+00> : vector<16x128xf32>
    %422 = vector.multi_reduction <add>, %421, %cst_222 [0] : vector<4x16x128xf32> to vector<16x128xf32>
    %cst_223 = arith.constant -2.500000e-01 : f32
    %423 = vector.broadcast %cst_223 : f32 to vector<16x128xf32>
    %424 = arith.mulf %422, %423 : vector<16x128xf32>
    %c14_224 = arith.constant 14 : index
    %c0_225 = arith.constant 0 : index
    %c0_226 = arith.constant 0 : index
    %425 = vector.load %arg4[%c14_224, %c0_225, %c0_226] : memref<16x16x128xf32, #tpu.memory_space<vmem>>, vector<1x16x128xf32>
    %426 = vector.shape_cast %425 : vector<1x16x128xf32> to vector<16x128xf32>
    %427 = vector.shape_cast %424 : vector<16x128xf32> to vector<1x16x128xf32>
    tpu.vector_store %arg4[%c14_224, %c0_225, %c0_226], %427 {strides = array<i32>} : memref<16x16x128xf32, #tpu.memory_space<vmem>>, vector<1x16x128xf32>,
    %428 = arith.maximumf %417, %424 : vector<16x128xf32>
    %c15_227 = arith.constant 15 : index
    %c0_228 = arith.constant 0 : index
    %c0_229 = arith.constant 0 : index
    %c0_230 = arith.constant 0 : index
    %429 = vector.load %arg5[%c15_227, %c0_228, %c0_229, %c0_230] : memref<16x4x16x128xf32, #tpu.memory_space<vmem>>, vector<1x4x16x128xf32>
    %430 = vector.shape_cast %429 : vector<1x4x16x128xf32> to vector<4x16x128xf32>
    %431 = math.absf %430 : vector<4x16x128xf32>
    %432 = arith.mulf %431, %262 : vector<4x16x128xf32>
    %cst_231 = arith.constant dense<0.000000e+00> : vector<16x128xf32>
    %433 = vector.multi_reduction <add>, %432, %cst_231 [0] : vector<4x16x128xf32> to vector<16x128xf32>
    %cst_232 = arith.constant -2.500000e-01 : f32
    %434 = vector.broadcast %cst_232 : f32 to vector<16x128xf32>
    %435 = arith.mulf %433, %434 : vector<16x128xf32>
    %c15_233 = arith.constant 15 : index
    %c0_234 = arith.constant 0 : index
    %c0_235 = arith.constant 0 : index
    %436 = vector.load %arg4[%c15_233, %c0_234, %c0_235] : memref<16x16x128xf32, #tpu.memory_space<vmem>>, vector<1x16x128xf32>
    %437 = vector.shape_cast %436 : vector<1x16x128xf32> to vector<16x128xf32>
    %438 = vector.shape_cast %435 : vector<16x128xf32> to vector<1x16x128xf32>
    tpu.vector_store %arg4[%c15_233, %c0_234, %c0_235], %438 {strides = array<i32>} : memref<16x16x128xf32, #tpu.memory_space<vmem>>, vector<1x16x128xf32>,
    %439 = arith.maximumf %428, %435 : vector<16x128xf32>
    %cst_236 = arith.constant 0.000000e+00 : f32
    %440 = vector.broadcast %cst_236 : f32 to vector<16x128xf32>
    %c0_237 = arith.constant 0 : index
    %c0_238 = arith.constant 0 : index
    %c0_239 = arith.constant 0 : index
    %441 = vector.load %arg4[%c0_237, %c0_238, %c0_239] : memref<16x16x128xf32, #tpu.memory_space<vmem>>, vector<1x16x128xf32>
    %442 = vector.shape_cast %441 : vector<1x16x128xf32> to vector<16x128xf32>
    %443 = arith.subf %442, %439 : vector<16x128xf32>
    %444 = math.exp %443 : vector<16x128xf32>
    %c0_240 = arith.constant 0 : index
    %c0_241 = arith.constant 0 : index
    %c0_242 = arith.constant 0 : index
    %445 = vector.load %arg4[%c0_240, %c0_241, %c0_242] : memref<16x16x128xf32, #tpu.memory_space<vmem>>, vector<1x16x128xf32>
    %446 = vector.shape_cast %445 : vector<1x16x128xf32> to vector<16x128xf32>
    %447 = vector.shape_cast %444 : vector<16x128xf32> to vector<1x16x128xf32>
    tpu.vector_store %arg4[%c0_240, %c0_241, %c0_242], %447 {strides = array<i32>} : memref<16x16x128xf32, #tpu.memory_space<vmem>>, vector<1x16x128xf32>,
    %448 = arith.addf %440, %444 : vector<16x128xf32>
    %c1_243 = arith.constant 1 : index
    %c0_244 = arith.constant 0 : index
    %c0_245 = arith.constant 0 : index
    %449 = vector.load %arg4[%c1_243, %c0_244, %c0_245] : memref<16x16x128xf32, #tpu.memory_space<vmem>>, vector<1x16x128xf32>
    %450 = vector.shape_cast %449 : vector<1x16x128xf32> to vector<16x128xf32>
    %451 = arith.subf %450, %439 : vector<16x128xf32>
    %452 = math.exp %451 : vector<16x128xf32>
    %c1_246 = arith.constant 1 : index
    %c0_247 = arith.constant 0 : index
    %c0_248 = arith.constant 0 : index
    %453 = vector.load %arg4[%c1_246, %c0_247, %c0_248] : memref<16x16x128xf32, #tpu.memory_space<vmem>>, vector<1x16x128xf32>
    %454 = vector.shape_cast %453 : vector<1x16x128xf32> to vector<16x128xf32>
    %455 = vector.shape_cast %452 : vector<16x128xf32> to vector<1x16x128xf32>
    tpu.vector_store %arg4[%c1_246, %c0_247, %c0_248], %455 {strides = array<i32>} : memref<16x16x128xf32, #tpu.memory_space<vmem>>, vector<1x16x128xf32>,
    %456 = arith.addf %448, %452 : vector<16x128xf32>
    %c2_249 = arith.constant 2 : index
    %c0_250 = arith.constant 0 : index
    %c0_251 = arith.constant 0 : index
    %457 = vector.load %arg4[%c2_249, %c0_250, %c0_251] : memref<16x16x128xf32, #tpu.memory_space<vmem>>, vector<1x16x128xf32>
    %458 = vector.shape_cast %457 : vector<1x16x128xf32> to vector<16x128xf32>
    %459 = arith.subf %458, %439 : vector<16x128xf32>
    %460 = math.exp %459 : vector<16x128xf32>
    %c2_252 = arith.constant 2 : index
    %c0_253 = arith.constant 0 : index
    %c0_254 = arith.constant 0 : index
    %461 = vector.load %arg4[%c2_252, %c0_253, %c0_254] : memref<16x16x128xf32, #tpu.memory_space<vmem>>, vector<1x16x128xf32>
    %462 = vector.shape_cast %461 : vector<1x16x128xf32> to vector<16x128xf32>
    %463 = vector.shape_cast %460 : vector<16x128xf32> to vector<1x16x128xf32>
    tpu.vector_store %arg4[%c2_252, %c0_253, %c0_254], %463 {strides = array<i32>} : memref<16x16x128xf32, #tpu.memory_space<vmem>>, vector<1x16x128xf32>,
    %464 = arith.addf %456, %460 : vector<16x128xf32>
    %c3_255 = arith.constant 3 : index
    %c0_256 = arith.constant 0 : index
    %c0_257 = arith.constant 0 : index
    %465 = vector.load %arg4[%c3_255, %c0_256, %c0_257] : memref<16x16x128xf32, #tpu.memory_space<vmem>>, vector<1x16x128xf32>
    %466 = vector.shape_cast %465 : vector<1x16x128xf32> to vector<16x128xf32>
    %467 = arith.subf %466, %439 : vector<16x128xf32>
    %468 = math.exp %467 : vector<16x128xf32>
    %c3_258 = arith.constant 3 : index
    %c0_259 = arith.constant 0 : index
    %c0_260 = arith.constant 0 : index
    %469 = vector.load %arg4[%c3_258, %c0_259, %c0_260] : memref<16x16x128xf32, #tpu.memory_space<vmem>>, vector<1x16x128xf32>
    %470 = vector.shape_cast %469 : vector<1x16x128xf32> to vector<16x128xf32>
    %471 = vector.shape_cast %468 : vector<16x128xf32> to vector<1x16x128xf32>
    tpu.vector_store %arg4[%c3_258, %c0_259, %c0_260], %471 {strides = array<i32>} : memref<16x16x128xf32, #tpu.memory_space<vmem>>, vector<1x16x128xf32>,
    %472 = arith.addf %464, %468 : vector<16x128xf32>
    %c4_261 = arith.constant 4 : index
    %c0_262 = arith.constant 0 : index
    %c0_263 = arith.constant 0 : index
    %473 = vector.load %arg4[%c4_261, %c0_262, %c0_263] : memref<16x16x128xf32, #tpu.memory_space<vmem>>, vector<1x16x128xf32>
    %474 = vector.shape_cast %473 : vector<1x16x128xf32> to vector<16x128xf32>
    %475 = arith.subf %474, %439 : vector<16x128xf32>
    %476 = math.exp %475 : vector<16x128xf32>
    %c4_264 = arith.constant 4 : index
    %c0_265 = arith.constant 0 : index
    %c0_266 = arith.constant 0 : index
    %477 = vector.load %arg4[%c4_264, %c0_265, %c0_266] : memref<16x16x128xf32, #tpu.memory_space<vmem>>, vector<1x16x128xf32>
    %478 = vector.shape_cast %477 : vector<1x16x128xf32> to vector<16x128xf32>
    %479 = vector.shape_cast %476 : vector<16x128xf32> to vector<1x16x128xf32>
    tpu.vector_store %arg4[%c4_264, %c0_265, %c0_266], %479 {strides = array<i32>} : memref<16x16x128xf32, #tpu.memory_space<vmem>>, vector<1x16x128xf32>,
    %480 = arith.addf %472, %476 : vector<16x128xf32>
    %c5_267 = arith.constant 5 : index
    %c0_268 = arith.constant 0 : index
    %c0_269 = arith.constant 0 : index
    %481 = vector.load %arg4[%c5_267, %c0_268, %c0_269] : memref<16x16x128xf32, #tpu.memory_space<vmem>>, vector<1x16x128xf32>
    %482 = vector.shape_cast %481 : vector<1x16x128xf32> to vector<16x128xf32>
    %483 = arith.subf %482, %439 : vector<16x128xf32>
    %484 = math.exp %483 : vector<16x128xf32>
    %c5_270 = arith.constant 5 : index
    %c0_271 = arith.constant 0 : index
    %c0_272 = arith.constant 0 : index
    %485 = vector.load %arg4[%c5_270, %c0_271, %c0_272] : memref<16x16x128xf32, #tpu.memory_space<vmem>>, vector<1x16x128xf32>
    %486 = vector.shape_cast %485 : vector<1x16x128xf32> to vector<16x128xf32>
    %487 = vector.shape_cast %484 : vector<16x128xf32> to vector<1x16x128xf32>
    tpu.vector_store %arg4[%c5_270, %c0_271, %c0_272], %487 {strides = array<i32>} : memref<16x16x128xf32, #tpu.memory_space<vmem>>, vector<1x16x128xf32>,
    %488 = arith.addf %480, %484 : vector<16x128xf32>
    %c6_273 = arith.constant 6 : index
    %c0_274 = arith.constant 0 : index
    %c0_275 = arith.constant 0 : index
    %489 = vector.load %arg4[%c6_273, %c0_274, %c0_275] : memref<16x16x128xf32, #tpu.memory_space<vmem>>, vector<1x16x128xf32>
    %490 = vector.shape_cast %489 : vector<1x16x128xf32> to vector<16x128xf32>
    %491 = arith.subf %490, %439 : vector<16x128xf32>
    %492 = math.exp %491 : vector<16x128xf32>
    %c6_276 = arith.constant 6 : index
    %c0_277 = arith.constant 0 : index
    %c0_278 = arith.constant 0 : index
    %493 = vector.load %arg4[%c6_276, %c0_277, %c0_278] : memref<16x16x128xf32, #tpu.memory_space<vmem>>, vector<1x16x128xf32>
    %494 = vector.shape_cast %493 : vector<1x16x128xf32> to vector<16x128xf32>
    %495 = vector.shape_cast %492 : vector<16x128xf32> to vector<1x16x128xf32>
    tpu.vector_store %arg4[%c6_276, %c0_277, %c0_278], %495 {strides = array<i32>} : memref<16x16x128xf32, #tpu.memory_space<vmem>>, vector<1x16x128xf32>,
    %496 = arith.addf %488, %492 : vector<16x128xf32>
    %c7_279 = arith.constant 7 : index
    %c0_280 = arith.constant 0 : index
    %c0_281 = arith.constant 0 : index
    %497 = vector.load %arg4[%c7_279, %c0_280, %c0_281] : memref<16x16x128xf32, #tpu.memory_space<vmem>>, vector<1x16x128xf32>
    %498 = vector.shape_cast %497 : vector<1x16x128xf32> to vector<16x128xf32>
    %499 = arith.subf %498, %439 : vector<16x128xf32>
    %500 = math.exp %499 : vector<16x128xf32>
    %c7_282 = arith.constant 7 : index
    %c0_283 = arith.constant 0 : index
    %c0_284 = arith.constant 0 : index
    %501 = vector.load %arg4[%c7_282, %c0_283, %c0_284] : memref<16x16x128xf32, #tpu.memory_space<vmem>>, vector<1x16x128xf32>
    %502 = vector.shape_cast %501 : vector<1x16x128xf32> to vector<16x128xf32>
    %503 = vector.shape_cast %500 : vector<16x128xf32> to vector<1x16x128xf32>
    tpu.vector_store %arg4[%c7_282, %c0_283, %c0_284], %503 {strides = array<i32>} : memref<16x16x128xf32, #tpu.memory_space<vmem>>, vector<1x16x128xf32>,
    %504 = arith.addf %496, %500 : vector<16x128xf32>
    %c8_285 = arith.constant 8 : index
    %c0_286 = arith.constant 0 : index
    %c0_287 = arith.constant 0 : index
    %505 = vector.load %arg4[%c8_285, %c0_286, %c0_287] : memref<16x16x128xf32, #tpu.memory_space<vmem>>, vector<1x16x128xf32>
    %506 = vector.shape_cast %505 : vector<1x16x128xf32> to vector<16x128xf32>
    %507 = arith.subf %506, %439 : vector<16x128xf32>
    %508 = math.exp %507 : vector<16x128xf32>
    %c8_288 = arith.constant 8 : index
    %c0_289 = arith.constant 0 : index
    %c0_290 = arith.constant 0 : index
    %509 = vector.load %arg4[%c8_288, %c0_289, %c0_290] : memref<16x16x128xf32, #tpu.memory_space<vmem>>, vector<1x16x128xf32>
    %510 = vector.shape_cast %509 : vector<1x16x128xf32> to vector<16x128xf32>
    %511 = vector.shape_cast %508 : vector<16x128xf32> to vector<1x16x128xf32>
    tpu.vector_store %arg4[%c8_288, %c0_289, %c0_290], %511 {strides = array<i32>} : memref<16x16x128xf32, #tpu.memory_space<vmem>>, vector<1x16x128xf32>,
    %512 = arith.addf %504, %508 : vector<16x128xf32>
    %c9_291 = arith.constant 9 : index
    %c0_292 = arith.constant 0 : index
    %c0_293 = arith.constant 0 : index
    %513 = vector.load %arg4[%c9_291, %c0_292, %c0_293] : memref<16x16x128xf32, #tpu.memory_space<vmem>>, vector<1x16x128xf32>
    %514 = vector.shape_cast %513 : vector<1x16x128xf32> to vector<16x128xf32>
    %515 = arith.subf %514, %439 : vector<16x128xf32>
    %516 = math.exp %515 : vector<16x128xf32>
    %c9_294 = arith.constant 9 : index
    %c0_295 = arith.constant 0 : index
    %c0_296 = arith.constant 0 : index
    %517 = vector.load %arg4[%c9_294, %c0_295, %c0_296] : memref<16x16x128xf32, #tpu.memory_space<vmem>>, vector<1x16x128xf32>
    %518 = vector.shape_cast %517 : vector<1x16x128xf32> to vector<16x128xf32>
    %519 = vector.shape_cast %516 : vector<16x128xf32> to vector<1x16x128xf32>
    tpu.vector_store %arg4[%c9_294, %c0_295, %c0_296], %519 {strides = array<i32>} : memref<16x16x128xf32, #tpu.memory_space<vmem>>, vector<1x16x128xf32>,
    %520 = arith.addf %512, %516 : vector<16x128xf32>
    %c10_297 = arith.constant 10 : index
    %c0_298 = arith.constant 0 : index
    %c0_299 = arith.constant 0 : index
    %521 = vector.load %arg4[%c10_297, %c0_298, %c0_299] : memref<16x16x128xf32, #tpu.memory_space<vmem>>, vector<1x16x128xf32>
    %522 = vector.shape_cast %521 : vector<1x16x128xf32> to vector<16x128xf32>
    %523 = arith.subf %522, %439 : vector<16x128xf32>
    %524 = math.exp %523 : vector<16x128xf32>
    %c10_300 = arith.constant 10 : index
    %c0_301 = arith.constant 0 : index
    %c0_302 = arith.constant 0 : index
    %525 = vector.load %arg4[%c10_300, %c0_301, %c0_302] : memref<16x16x128xf32, #tpu.memory_space<vmem>>, vector<1x16x128xf32>
    %526 = vector.shape_cast %525 : vector<1x16x128xf32> to vector<16x128xf32>
    %527 = vector.shape_cast %524 : vector<16x128xf32> to vector<1x16x128xf32>
    tpu.vector_store %arg4[%c10_300, %c0_301, %c0_302], %527 {strides = array<i32>} : memref<16x16x128xf32, #tpu.memory_space<vmem>>, vector<1x16x128xf32>,
    %528 = arith.addf %520, %524 : vector<16x128xf32>
    %c11_303 = arith.constant 11 : index
    %c0_304 = arith.constant 0 : index
    %c0_305 = arith.constant 0 : index
    %529 = vector.load %arg4[%c11_303, %c0_304, %c0_305] : memref<16x16x128xf32, #tpu.memory_space<vmem>>, vector<1x16x128xf32>
    %530 = vector.shape_cast %529 : vector<1x16x128xf32> to vector<16x128xf32>
    %531 = arith.subf %530, %439 : vector<16x128xf32>
    %532 = math.exp %531 : vector<16x128xf32>
    %c11_306 = arith.constant 11 : index
    %c0_307 = arith.constant 0 : index
    %c0_308 = arith.constant 0 : index
    %533 = vector.load %arg4[%c11_306, %c0_307, %c0_308] : memref<16x16x128xf32, #tpu.memory_space<vmem>>, vector<1x16x128xf32>
    %534 = vector.shape_cast %533 : vector<1x16x128xf32> to vector<16x128xf32>
    %535 = vector.shape_cast %532 : vector<16x128xf32> to vector<1x16x128xf32>
    tpu.vector_store %arg4[%c11_306, %c0_307, %c0_308], %535 {strides = array<i32>} : memref<16x16x128xf32, #tpu.memory_space<vmem>>, vector<1x16x128xf32>,
    %536 = arith.addf %528, %532 : vector<16x128xf32>
    %c12_309 = arith.constant 12 : index
    %c0_310 = arith.constant 0 : index
    %c0_311 = arith.constant 0 : index
    %537 = vector.load %arg4[%c12_309, %c0_310, %c0_311] : memref<16x16x128xf32, #tpu.memory_space<vmem>>, vector<1x16x128xf32>
    %538 = vector.shape_cast %537 : vector<1x16x128xf32> to vector<16x128xf32>
    %539 = arith.subf %538, %439 : vector<16x128xf32>
    %540 = math.exp %539 : vector<16x128xf32>
    %c12_312 = arith.constant 12 : index
    %c0_313 = arith.constant 0 : index
    %c0_314 = arith.constant 0 : index
    %541 = vector.load %arg4[%c12_312, %c0_313, %c0_314] : memref<16x16x128xf32, #tpu.memory_space<vmem>>, vector<1x16x128xf32>
    %542 = vector.shape_cast %541 : vector<1x16x128xf32> to vector<16x128xf32>
    %543 = vector.shape_cast %540 : vector<16x128xf32> to vector<1x16x128xf32>
    tpu.vector_store %arg4[%c12_312, %c0_313, %c0_314], %543 {strides = array<i32>} : memref<16x16x128xf32, #tpu.memory_space<vmem>>, vector<1x16x128xf32>,
    %544 = arith.addf %536, %540 : vector<16x128xf32>
    %c13_315 = arith.constant 13 : index
    %c0_316 = arith.constant 0 : index
    %c0_317 = arith.constant 0 : index
    %545 = vector.load %arg4[%c13_315, %c0_316, %c0_317] : memref<16x16x128xf32, #tpu.memory_space<vmem>>, vector<1x16x128xf32>
    %546 = vector.shape_cast %545 : vector<1x16x128xf32> to vector<16x128xf32>
    %547 = arith.subf %546, %439 : vector<16x128xf32>
    %548 = math.exp %547 : vector<16x128xf32>
    %c13_318 = arith.constant 13 : index
    %c0_319 = arith.constant 0 : index
    %c0_320 = arith.constant 0 : index
    %549 = vector.load %arg4[%c13_318, %c0_319, %c0_320] : memref<16x16x128xf32, #tpu.memory_space<vmem>>, vector<1x16x128xf32>
    %550 = vector.shape_cast %549 : vector<1x16x128xf32> to vector<16x128xf32>
    %551 = vector.shape_cast %548 : vector<16x128xf32> to vector<1x16x128xf32>
    tpu.vector_store %arg4[%c13_318, %c0_319, %c0_320], %551 {strides = array<i32>} : memref<16x16x128xf32, #tpu.memory_space<vmem>>, vector<1x16x128xf32>,
    %552 = arith.addf %544, %548 : vector<16x128xf32>
    %c14_321 = arith.constant 14 : index
    %c0_322 = arith.constant 0 : index
    %c0_323 = arith.constant 0 : index
    %553 = vector.load %arg4[%c14_321, %c0_322, %c0_323] : memref<16x16x128xf32, #tpu.memory_space<vmem>>, vector<1x16x128xf32>
    %554 = vector.shape_cast %553 : vector<1x16x128xf32> to vector<16x128xf32>
    %555 = arith.subf %554, %439 : vector<16x128xf32>
    %556 = math.exp %555 : vector<16x128xf32>
    %c14_324 = arith.constant 14 : index
    %c0_325 = arith.constant 0 : index
    %c0_326 = arith.constant 0 : index
    %557 = vector.load %arg4[%c14_324, %c0_325, %c0_326] : memref<16x16x128xf32, #tpu.memory_space<vmem>>, vector<1x16x128xf32>
    %558 = vector.shape_cast %557 : vector<1x16x128xf32> to vector<16x128xf32>
    %559 = vector.shape_cast %556 : vector<16x128xf32> to vector<1x16x128xf32>
    tpu.vector_store %arg4[%c14_324, %c0_325, %c0_326], %559 {strides = array<i32>} : memref<16x16x128xf32, #tpu.memory_space<vmem>>, vector<1x16x128xf32>,
    %560 = arith.addf %552, %556 : vector<16x128xf32>
    %c15_327 = arith.constant 15 : index
    %c0_328 = arith.constant 0 : index
    %c0_329 = arith.constant 0 : index
    %561 = vector.load %arg4[%c15_327, %c0_328, %c0_329] : memref<16x16x128xf32, #tpu.memory_space<vmem>>, vector<1x16x128xf32>
    %562 = vector.shape_cast %561 : vector<1x16x128xf32> to vector<16x128xf32>
    %563 = arith.subf %562, %439 : vector<16x128xf32>
    %564 = math.exp %563 : vector<16x128xf32>
    %c15_330 = arith.constant 15 : index
    %c0_331 = arith.constant 0 : index
    %c0_332 = arith.constant 0 : index
    %565 = vector.load %arg4[%c15_330, %c0_331, %c0_332] : memref<16x16x128xf32, #tpu.memory_space<vmem>>, vector<1x16x128xf32>
    %566 = vector.shape_cast %565 : vector<1x16x128xf32> to vector<16x128xf32>
    %567 = vector.shape_cast %564 : vector<16x128xf32> to vector<1x16x128xf32>
    tpu.vector_store %arg4[%c15_330, %c0_331, %c0_332], %567 {strides = array<i32>} : memref<16x16x128xf32, #tpu.memory_space<vmem>>, vector<1x16x128xf32>,
    %568 = arith.addf %560, %564 : vector<16x128xf32>
    %569 = tpu.reciprocal %568 {approx = true} : vector<16x128xf32> -> vector<16x128xf32>
    %570 = arith.mulf %568, %569 : vector<16x128xf32>
    %cst_333 = arith.constant 2.000000e+00 : f32
    %571 = vector.broadcast %cst_333 : f32 to vector<16x128xf32>
    %572 = arith.subf %571, %570 : vector<16x128xf32>
    %573 = arith.mulf %569, %572 : vector<16x128xf32>
    %c0_334 = arith.constant 0 : index
    %c0_335 = arith.constant 0 : index
    %c0_336 = arith.constant 0 : index
    %574 = vector.load %arg4[%c0_334, %c0_335, %c0_336] : memref<16x16x128xf32, #tpu.memory_space<vmem>>, vector<1x16x128xf32>
    %575 = vector.shape_cast %574 : vector<1x16x128xf32> to vector<16x128xf32>
    %576 = arith.mulf %575, %573 : vector<16x128xf32>
    %c0_337 = arith.constant 0 : index
    %c0_338 = arith.constant 0 : index
    %c0_339 = arith.constant 0 : index
    %c0_340 = arith.constant 0 : index
    %577 = vector.load %arg3[%c0_337, %c0_338, %c0_339, %c0_340] : memref<1x16x16x128xf32, #tpu.memory_space<vmem>>, vector<1x1x16x128xf32>
    %578 = vector.shape_cast %577 : vector<1x1x16x128xf32> to vector<16x128xf32>
    %579 = vector.shape_cast %576 : vector<16x128xf32> to vector<1x1x16x128xf32>
    tpu.vector_store %arg3[%c0_337, %c0_338, %c0_339, %c0_340], %579 {strides = array<i32>} : memref<1x16x16x128xf32, #tpu.memory_space<vmem>>, vector<1x1x16x128xf32>,
    %c1_341 = arith.constant 1 : index
    %c0_342 = arith.constant 0 : index
    %c0_343 = arith.constant 0 : index
    %580 = vector.load %arg4[%c1_341, %c0_342, %c0_343] : memref<16x16x128xf32, #tpu.memory_space<vmem>>, vector<1x16x128xf32>
    %581 = vector.shape_cast %580 : vector<1x16x128xf32> to vector<16x128xf32>
    %582 = arith.mulf %581, %573 : vector<16x128xf32>
    %c0_344 = arith.constant 0 : index
    %c1_345 = arith.constant 1 : index
    %c0_346 = arith.constant 0 : index
    %c0_347 = arith.constant 0 : index
    %583 = vector.load %arg3[%c0_344, %c1_345, %c0_346, %c0_347] : memref<1x16x16x128xf32, #tpu.memory_space<vmem>>, vector<1x1x16x128xf32>
    %584 = vector.shape_cast %583 : vector<1x1x16x128xf32> to vector<16x128xf32>
    %585 = vector.shape_cast %582 : vector<16x128xf32> to vector<1x1x16x128xf32>
    tpu.vector_store %arg3[%c0_344, %c1_345, %c0_346, %c0_347], %585 {strides = array<i32>} : memref<1x16x16x128xf32, #tpu.memory_space<vmem>>, vector<1x1x16x128xf32>,
    %c2_348 = arith.constant 2 : index
    %c0_349 = arith.constant 0 : index
    %c0_350 = arith.constant 0 : index
    %586 = vector.load %arg4[%c2_348, %c0_349, %c0_350] : memref<16x16x128xf32, #tpu.memory_space<vmem>>, vector<1x16x128xf32>
    %587 = vector.shape_cast %586 : vector<1x16x128xf32> to vector<16x128xf32>
    %588 = arith.mulf %587, %573 : vector<16x128xf32>
    %c0_351 = arith.constant 0 : index
    %c2_352 = arith.constant 2 : index
    %c0_353 = arith.constant 0 : index
    %c0_354 = arith.constant 0 : index
    %589 = vector.load %arg3[%c0_351, %c2_352, %c0_353, %c0_354] : memref<1x16x16x128xf32, #tpu.memory_space<vmem>>, vector<1x1x16x128xf32>
    %590 = vector.shape_cast %589 : vector<1x1x16x128xf32> to vector<16x128xf32>
    %591 = vector.shape_cast %588 : vector<16x128xf32> to vector<1x1x16x128xf32>
    tpu.vector_store %arg3[%c0_351, %c2_352, %c0_353, %c0_354], %591 {strides = array<i32>} : memref<1x16x16x128xf32, #tpu.memory_space<vmem>>, vector<1x1x16x128xf32>,
    %c3_355 = arith.constant 3 : index
    %c0_356 = arith.constant 0 : index
    %c0_357 = arith.constant 0 : index
    %592 = vector.load %arg4[%c3_355, %c0_356, %c0_357] : memref<16x16x128xf32, #tpu.memory_space<vmem>>, vector<1x16x128xf32>
    %593 = vector.shape_cast %592 : vector<1x16x128xf32> to vector<16x128xf32>
    %594 = arith.mulf %593, %573 : vector<16x128xf32>
    %c0_358 = arith.constant 0 : index
    %c3_359 = arith.constant 3 : index
    %c0_360 = arith.constant 0 : index
    %c0_361 = arith.constant 0 : index
    %595 = vector.load %arg3[%c0_358, %c3_359, %c0_360, %c0_361] : memref<1x16x16x128xf32, #tpu.memory_space<vmem>>, vector<1x1x16x128xf32>
    %596 = vector.shape_cast %595 : vector<1x1x16x128xf32> to vector<16x128xf32>
    %597 = vector.shape_cast %594 : vector<16x128xf32> to vector<1x1x16x128xf32>
    tpu.vector_store %arg3[%c0_358, %c3_359, %c0_360, %c0_361], %597 {strides = array<i32>} : memref<1x16x16x128xf32, #tpu.memory_space<vmem>>, vector<1x1x16x128xf32>,
    %c4_362 = arith.constant 4 : index
    %c0_363 = arith.constant 0 : index
    %c0_364 = arith.constant 0 : index
    %598 = vector.load %arg4[%c4_362, %c0_363, %c0_364] : memref<16x16x128xf32, #tpu.memory_space<vmem>>, vector<1x16x128xf32>
    %599 = vector.shape_cast %598 : vector<1x16x128xf32> to vector<16x128xf32>
    %600 = arith.mulf %599, %573 : vector<16x128xf32>
    %c0_365 = arith.constant 0 : index
    %c4_366 = arith.constant 4 : index
    %c0_367 = arith.constant 0 : index
    %c0_368 = arith.constant 0 : index
    %601 = vector.load %arg3[%c0_365, %c4_366, %c0_367, %c0_368] : memref<1x16x16x128xf32, #tpu.memory_space<vmem>>, vector<1x1x16x128xf32>
    %602 = vector.shape_cast %601 : vector<1x1x16x128xf32> to vector<16x128xf32>
    %603 = vector.shape_cast %600 : vector<16x128xf32> to vector<1x1x16x128xf32>
    tpu.vector_store %arg3[%c0_365, %c4_366, %c0_367, %c0_368], %603 {strides = array<i32>} : memref<1x16x16x128xf32, #tpu.memory_space<vmem>>, vector<1x1x16x128xf32>,
    %c5_369 = arith.constant 5 : index
    %c0_370 = arith.constant 0 : index
    %c0_371 = arith.constant 0 : index
    %604 = vector.load %arg4[%c5_369, %c0_370, %c0_371] : memref<16x16x128xf32, #tpu.memory_space<vmem>>, vector<1x16x128xf32>
    %605 = vector.shape_cast %604 : vector<1x16x128xf32> to vector<16x128xf32>
    %606 = arith.mulf %605, %573 : vector<16x128xf32>
    %c0_372 = arith.constant 0 : index
    %c5_373 = arith.constant 5 : index
    %c0_374 = arith.constant 0 : index
    %c0_375 = arith.constant 0 : index
    %607 = vector.load %arg3[%c0_372, %c5_373, %c0_374, %c0_375] : memref<1x16x16x128xf32, #tpu.memory_space<vmem>>, vector<1x1x16x128xf32>
    %608 = vector.shape_cast %607 : vector<1x1x16x128xf32> to vector<16x128xf32>
    %609 = vector.shape_cast %606 : vector<16x128xf32> to vector<1x1x16x128xf32>
    tpu.vector_store %arg3[%c0_372, %c5_373, %c0_374, %c0_375], %609 {strides = array<i32>} : memref<1x16x16x128xf32, #tpu.memory_space<vmem>>, vector<1x1x16x128xf32>,
    %c6_376 = arith.constant 6 : index
    %c0_377 = arith.constant 0 : index
    %c0_378 = arith.constant 0 : index
    %610 = vector.load %arg4[%c6_376, %c0_377, %c0_378] : memref<16x16x128xf32, #tpu.memory_space<vmem>>, vector<1x16x128xf32>
    %611 = vector.shape_cast %610 : vector<1x16x128xf32> to vector<16x128xf32>
    %612 = arith.mulf %611, %573 : vector<16x128xf32>
    %c0_379 = arith.constant 0 : index
    %c6_380 = arith.constant 6 : index
    %c0_381 = arith.constant 0 : index
    %c0_382 = arith.constant 0 : index
    %613 = vector.load %arg3[%c0_379, %c6_380, %c0_381, %c0_382] : memref<1x16x16x128xf32, #tpu.memory_space<vmem>>, vector<1x1x16x128xf32>
    %614 = vector.shape_cast %613 : vector<1x1x16x128xf32> to vector<16x128xf32>
    %615 = vector.shape_cast %612 : vector<16x128xf32> to vector<1x1x16x128xf32>
    tpu.vector_store %arg3[%c0_379, %c6_380, %c0_381, %c0_382], %615 {strides = array<i32>} : memref<1x16x16x128xf32, #tpu.memory_space<vmem>>, vector<1x1x16x128xf32>,
    %c7_383 = arith.constant 7 : index
    %c0_384 = arith.constant 0 : index
    %c0_385 = arith.constant 0 : index
    %616 = vector.load %arg4[%c7_383, %c0_384, %c0_385] : memref<16x16x128xf32, #tpu.memory_space<vmem>>, vector<1x16x128xf32>
    %617 = vector.shape_cast %616 : vector<1x16x128xf32> to vector<16x128xf32>
    %618 = arith.mulf %617, %573 : vector<16x128xf32>
    %c0_386 = arith.constant 0 : index
    %c7_387 = arith.constant 7 : index
    %c0_388 = arith.constant 0 : index
    %c0_389 = arith.constant 0 : index
    %619 = vector.load %arg3[%c0_386, %c7_387, %c0_388, %c0_389] : memref<1x16x16x128xf32, #tpu.memory_space<vmem>>, vector<1x1x16x128xf32>
    %620 = vector.shape_cast %619 : vector<1x1x16x128xf32> to vector<16x128xf32>
    %621 = vector.shape_cast %618 : vector<16x128xf32> to vector<1x1x16x128xf32>
    tpu.vector_store %arg3[%c0_386, %c7_387, %c0_388, %c0_389], %621 {strides = array<i32>} : memref<1x16x16x128xf32, #tpu.memory_space<vmem>>, vector<1x1x16x128xf32>,
    %c8_390 = arith.constant 8 : index
    %c0_391 = arith.constant 0 : index
    %c0_392 = arith.constant 0 : index
    %622 = vector.load %arg4[%c8_390, %c0_391, %c0_392] : memref<16x16x128xf32, #tpu.memory_space<vmem>>, vector<1x16x128xf32>
    %623 = vector.shape_cast %622 : vector<1x16x128xf32> to vector<16x128xf32>
    %624 = arith.mulf %623, %573 : vector<16x128xf32>
    %c0_393 = arith.constant 0 : index
    %c8_394 = arith.constant 8 : index
    %c0_395 = arith.constant 0 : index
    %c0_396 = arith.constant 0 : index
    %625 = vector.load %arg3[%c0_393, %c8_394, %c0_395, %c0_396] : memref<1x16x16x128xf32, #tpu.memory_space<vmem>>, vector<1x1x16x128xf32>
    %626 = vector.shape_cast %625 : vector<1x1x16x128xf32> to vector<16x128xf32>
    %627 = vector.shape_cast %624 : vector<16x128xf32> to vector<1x1x16x128xf32>
    tpu.vector_store %arg3[%c0_393, %c8_394, %c0_395, %c0_396], %627 {strides = array<i32>} : memref<1x16x16x128xf32, #tpu.memory_space<vmem>>, vector<1x1x16x128xf32>,
    %c9_397 = arith.constant 9 : index
    %c0_398 = arith.constant 0 : index
    %c0_399 = arith.constant 0 : index
    %628 = vector.load %arg4[%c9_397, %c0_398, %c0_399] : memref<16x16x128xf32, #tpu.memory_space<vmem>>, vector<1x16x128xf32>
    %629 = vector.shape_cast %628 : vector<1x16x128xf32> to vector<16x128xf32>
    %630 = arith.mulf %629, %573 : vector<16x128xf32>
    %c0_400 = arith.constant 0 : index
    %c9_401 = arith.constant 9 : index
    %c0_402 = arith.constant 0 : index
    %c0_403 = arith.constant 0 : index
    %631 = vector.load %arg3[%c0_400, %c9_401, %c0_402, %c0_403] : memref<1x16x16x128xf32, #tpu.memory_space<vmem>>, vector<1x1x16x128xf32>
    %632 = vector.shape_cast %631 : vector<1x1x16x128xf32> to vector<16x128xf32>
    %633 = vector.shape_cast %630 : vector<16x128xf32> to vector<1x1x16x128xf32>
    tpu.vector_store %arg3[%c0_400, %c9_401, %c0_402, %c0_403], %633 {strides = array<i32>} : memref<1x16x16x128xf32, #tpu.memory_space<vmem>>, vector<1x1x16x128xf32>,
    %c10_404 = arith.constant 10 : index
    %c0_405 = arith.constant 0 : index
    %c0_406 = arith.constant 0 : index
    %634 = vector.load %arg4[%c10_404, %c0_405, %c0_406] : memref<16x16x128xf32, #tpu.memory_space<vmem>>, vector<1x16x128xf32>
    %635 = vector.shape_cast %634 : vector<1x16x128xf32> to vector<16x128xf32>
    %636 = arith.mulf %635, %573 : vector<16x128xf32>
    %c0_407 = arith.constant 0 : index
    %c10_408 = arith.constant 10 : index
    %c0_409 = arith.constant 0 : index
    %c0_410 = arith.constant 0 : index
    %637 = vector.load %arg3[%c0_407, %c10_408, %c0_409, %c0_410] : memref<1x16x16x128xf32, #tpu.memory_space<vmem>>, vector<1x1x16x128xf32>
    %638 = vector.shape_cast %637 : vector<1x1x16x128xf32> to vector<16x128xf32>
    %639 = vector.shape_cast %636 : vector<16x128xf32> to vector<1x1x16x128xf32>
    tpu.vector_store %arg3[%c0_407, %c10_408, %c0_409, %c0_410], %639 {strides = array<i32>} : memref<1x16x16x128xf32, #tpu.memory_space<vmem>>, vector<1x1x16x128xf32>,
    %c11_411 = arith.constant 11 : index
    %c0_412 = arith.constant 0 : index
    %c0_413 = arith.constant 0 : index
    %640 = vector.load %arg4[%c11_411, %c0_412, %c0_413] : memref<16x16x128xf32, #tpu.memory_space<vmem>>, vector<1x16x128xf32>
    %641 = vector.shape_cast %640 : vector<1x16x128xf32> to vector<16x128xf32>
    %642 = arith.mulf %641, %573 : vector<16x128xf32>
    %c0_414 = arith.constant 0 : index
    %c11_415 = arith.constant 11 : index
    %c0_416 = arith.constant 0 : index
    %c0_417 = arith.constant 0 : index
    %643 = vector.load %arg3[%c0_414, %c11_415, %c0_416, %c0_417] : memref<1x16x16x128xf32, #tpu.memory_space<vmem>>, vector<1x1x16x128xf32>
    %644 = vector.shape_cast %643 : vector<1x1x16x128xf32> to vector<16x128xf32>
    %645 = vector.shape_cast %642 : vector<16x128xf32> to vector<1x1x16x128xf32>
    tpu.vector_store %arg3[%c0_414, %c11_415, %c0_416, %c0_417], %645 {strides = array<i32>} : memref<1x16x16x128xf32, #tpu.memory_space<vmem>>, vector<1x1x16x128xf32>,
    %c12_418 = arith.constant 12 : index
    %c0_419 = arith.constant 0 : index
    %c0_420 = arith.constant 0 : index
    %646 = vector.load %arg4[%c12_418, %c0_419, %c0_420] : memref<16x16x128xf32, #tpu.memory_space<vmem>>, vector<1x16x128xf32>
    %647 = vector.shape_cast %646 : vector<1x16x128xf32> to vector<16x128xf32>
    %648 = arith.mulf %647, %573 : vector<16x128xf32>
    %c0_421 = arith.constant 0 : index
    %c12_422 = arith.constant 12 : index
    %c0_423 = arith.constant 0 : index
    %c0_424 = arith.constant 0 : index
    %649 = vector.load %arg3[%c0_421, %c12_422, %c0_423, %c0_424] : memref<1x16x16x128xf32, #tpu.memory_space<vmem>>, vector<1x1x16x128xf32>
    %650 = vector.shape_cast %649 : vector<1x1x16x128xf32> to vector<16x128xf32>
    %651 = vector.shape_cast %648 : vector<16x128xf32> to vector<1x1x16x128xf32>
    tpu.vector_store %arg3[%c0_421, %c12_422, %c0_423, %c0_424], %651 {strides = array<i32>} : memref<1x16x16x128xf32, #tpu.memory_space<vmem>>, vector<1x1x16x128xf32>,
    %c13_425 = arith.constant 13 : index
    %c0_426 = arith.constant 0 : index
    %c0_427 = arith.constant 0 : index
    %652 = vector.load %arg4[%c13_425, %c0_426, %c0_427] : memref<16x16x128xf32, #tpu.memory_space<vmem>>, vector<1x16x128xf32>
    %653 = vector.shape_cast %652 : vector<1x16x128xf32> to vector<16x128xf32>
    %654 = arith.mulf %653, %573 : vector<16x128xf32>
    %c0_428 = arith.constant 0 : index
    %c13_429 = arith.constant 13 : index
    %c0_430 = arith.constant 0 : index
    %c0_431 = arith.constant 0 : index
    %655 = vector.load %arg3[%c0_428, %c13_429, %c0_430, %c0_431] : memref<1x16x16x128xf32, #tpu.memory_space<vmem>>, vector<1x1x16x128xf32>
    %656 = vector.shape_cast %655 : vector<1x1x16x128xf32> to vector<16x128xf32>
    %657 = vector.shape_cast %654 : vector<16x128xf32> to vector<1x1x16x128xf32>
    tpu.vector_store %arg3[%c0_428, %c13_429, %c0_430, %c0_431], %657 {strides = array<i32>} : memref<1x16x16x128xf32, #tpu.memory_space<vmem>>, vector<1x1x16x128xf32>,
    %c14_432 = arith.constant 14 : index
    %c0_433 = arith.constant 0 : index
    %c0_434 = arith.constant 0 : index
    %658 = vector.load %arg4[%c14_432, %c0_433, %c0_434] : memref<16x16x128xf32, #tpu.memory_space<vmem>>, vector<1x16x128xf32>
    %659 = vector.shape_cast %658 : vector<1x16x128xf32> to vector<16x128xf32>
    %660 = arith.mulf %659, %573 : vector<16x128xf32>
    %c0_435 = arith.constant 0 : index
    %c14_436 = arith.constant 14 : index
    %c0_437 = arith.constant 0 : index
    %c0_438 = arith.constant 0 : index
    %661 = vector.load %arg3[%c0_435, %c14_436, %c0_437, %c0_438] : memref<1x16x16x128xf32, #tpu.memory_space<vmem>>, vector<1x1x16x128xf32>
    %662 = vector.shape_cast %661 : vector<1x1x16x128xf32> to vector<16x128xf32>
    %663 = vector.shape_cast %660 : vector<16x128xf32> to vector<1x1x16x128xf32>
    tpu.vector_store %arg3[%c0_435, %c14_436, %c0_437, %c0_438], %663 {strides = array<i32>} : memref<1x16x16x128xf32, #tpu.memory_space<vmem>>, vector<1x1x16x128xf32>,
    %c15_439 = arith.constant 15 : index
    %c0_440 = arith.constant 0 : index
    %c0_441 = arith.constant 0 : index
    %664 = vector.load %arg4[%c15_439, %c0_440, %c0_441] : memref<16x16x128xf32, #tpu.memory_space<vmem>>, vector<1x16x128xf32>
    %665 = vector.shape_cast %664 : vector<1x16x128xf32> to vector<16x128xf32>
    %666 = arith.mulf %665, %573 : vector<16x128xf32>
    %c0_442 = arith.constant 0 : index
    %c15_443 = arith.constant 15 : index
    %c0_444 = arith.constant 0 : index
    %c0_445 = arith.constant 0 : index
    %667 = vector.load %arg3[%c0_442, %c15_443, %c0_444, %c0_445] : memref<1x16x16x128xf32, #tpu.memory_space<vmem>>, vector<1x1x16x128xf32>
    %668 = vector.shape_cast %667 : vector<1x1x16x128xf32> to vector<16x128xf32>
    %669 = vector.shape_cast %666 : vector<16x128xf32> to vector<1x1x16x128xf32>
    tpu.vector_store %arg3[%c0_442, %c15_443, %c0_444, %c0_445], %669 {strides = array<i32>} : memref<1x16x16x128xf32, #tpu.memory_space<vmem>>, vector<1x1x16x128xf32>,
    return
  }
  func.func @transform_0(%arg0: i32, %arg1: i32) -> (i32, i32, i32, i32) {
    %c0_i32 = arith.constant 0 : i32
    %c0_i32_0 = arith.constant 0 : i32
    %c0_i32_1 = arith.constant 0 : i32
    %c0_i32_2 = arith.constant 0 : i32
    return %arg0, %c0_i32, %c0_i32_0, %c0_i32_1 : i32, i32, i32, i32
  }
  func.func @transform_1(%arg0: i32, %arg1: i32) -> (i32, i32, i32, i32) {
    %c0_i32 = arith.constant 0 : i32
    %c0_i32_0 = arith.constant 0 : i32
    %c0_i32_1 = arith.constant 0 : i32
    return %arg0, %c0_i32, %arg1, %c0_i32_0 : i32, i32, i32, i32
  }
}

</mosaic_0001>

<bundles_post_ra>
// kernel: pamr_pallas.3
= control target key start
LH: loop header
LB: loop body
LE: loop exit
PB: predicated region body
PF: predicated region fallthrough
CT: control target
= control target key end

     0   :  { %s1676_s9 = smov 0   ;;  %s1678_s10 = smov 0   ;;  %s3007_s0 = inlined_call_operand.vmem [shape: f32[2,16,32,128], index: 0, kind: input, shape index: {}]   ;;  %s3008_s1 = inlined_call_operand.vmem [shape: f32[2,4,32,128], index: 1, kind: input, shape index: {}, may-alias: {1,2}]   ;;  %s3009_s2 = inlined_call_operand.vmem [shape: f32[2,4,32,128], index: 2, kind: output, shape index: {}, may-alias: {1,2}]  }
   0x1   :  { %s1680_s11 = smov 0   ;;  %s1682_s12 = smov 0  }
   0x2   :  { %s1684_s13 = smov 0  }
   0x3 LB: > { %s21_s14 = sadd.s32 1, %s1641_s11  ;;  %s24_s15 = sadd.s32 1, %s1645_s12  ;;  %s1649_s13 = sphi %s1684_s13, %s12_s13   ;;  %s1645_s12 = sphi %s1682_s12, %s3262_s12   ;;  %s1641_s11 = sphi %s1680_s11, %s3261_s11   ;;  %s1637_s10 = sphi %s1678_s10, %s3260_s10   ;;  %s1633_s9 = sphi %s1676_s9, %s3259_s9  }
   0x4   : > { %p22_p0 = scmp.ge.s32.totalorder %s21_s14, 2  ;;  %p1449_p1 = scmp.ge.s32.totalorder %s1649_s13, 1 }
   0x5   : > { %p144_p2 = scmp.lt.s32.totalorder %s1649_s13, 5 }
   0x6   : > { %s3264_s14 = smov (%p22_p0, %s21_s14), 0  ;;  %s3266_s15 = smov (!%p22_p0, %s24_s15), %s1645_s12 }
   0x7   : > { %p145_p3 = pnand %p1449_p1, %p144_p2  ;;  %p26_p4 = scmp.ge.s32.totalorder %s3266_s15, 2 }
   0x8   : > { %p181_p5 = scmp.lt.s32.totalorder (!%p145_p3), %s1637_s10, 1  ;;  %s1452_s16 = sshll.u32 (!%p145_p3), %s1633_s9, 1  ;;  %v208_v0 = vlaneseq (!%p145_p3) }
   0x9   : > { %s3268_s15 = smov (%p26_p4, %s3266_s15), 0  ;;  %148 = sbr.rel (%p145_p3) target bundleno = 554 (0x22a), region = 28 }
   0xa   : > { %p189_p6 = scmp.lt.s32.totalorder (!%p145_p3), %s1452_s16, 3  ;;  %v1706_v1 = vand.u32 (!%p145_p3), 127, %v208_v0  ;;  %v223_v2 = vshrl.u32 (!%p145_p3), %v208_v0, 7  ;;  %s1729_s3 = smov (!%p145_p3), 0  }
   0xc   : > { %v1713_v3 = vsub.s32 (!%p145_p3), 0, %v223_v2  ;;  %v1715_v4 = vsub.s32 (!%p145_p3), 7, %v223_v2 }
   0xe   : > { %3068 = vst [vmem:[#allocation3_spill] sm:$0xff] (!%p145_p3), %v1713_v3  ;;  %3069 = vst [vmem:[#allocation4_spill] sm:$0xff] (!%p145_p3), %v1715_v4 }
  0x10   : > { %s3270_s10 = smov (!%p181_p5, %s1637_s10), 1  ;;  %s3272_s16 = smov (!%p189_p6, %s1452_s16), 3 }
  0x11   : > { %s1524_s17 = sshll.u32 %s3270_s10, 9  ;;  %s1454_s18 = sshll.u32 %s3270_s10, 4 }
  0x12   : > { %s1711_s21 = scalar_lea.vmem %s3007_s0, %s1524_s17  ;;  %s1453_s22 = sshll.u32 %s3272_s16, 2 }
  0x13   : > { %s193_s23 = sadd.s32 %s1454_s18, %s1453_s22 }
  0x14   : > { %s1455_s24 = sshll.u32 %s193_s23, 3 }
  0x15   : > { %s195_s27 = scalar_lea.vmem %s3008_s1, %s1455_s24  ;;  %s1723_s30 = scalar_lea.vmem %s3009_s2, %s1455_s24 }
  0x16   : > { %v210_v5 = vld [vmem:[%s195_s27] sm:$0xff]  ;;  %v211_v6 = vld [vmem:[%s195_s27 + $0x8] sm:$0xff]  ;;  %v212_v7 = vld [vmem:[%s195_s27 + $0x10] sm:$0xff] }
  0x17   : > { %216 = vst [vmem:[#allocation2 + $0x2] sm:$0xff] %v210_v5  ;;  %217 = vst [vmem:[#allocation2 + $0xa] sm:$0xff] %v211_v6  ;;  %v213_v8 = vld [vmem:[%s195_s27 + $0x20] sm:$0xff]  ;;  %v214_v9 = vld [vmem:[%s195_s27 + $0x28] sm:$0xff]  ;;  %v225_v11 = vrot.slane %v210_v5, %v1713_v3  ;;  %v235_v12 = vrot.slane %v212_v7, %v1715_v4 }
  0x18   : > { %218 = vst [vmem:[#allocation2 + $0x12] sm:$0xff] %v212_v7  ;;  %v215_v10 = vld [vmem:[%s195_s27 + $0x30] sm:$0xff]  ;;  %219 = vst [vmem:[#allocation2 + $0x2a] sm:$0xff] %v213_v8  ;;  %v229_v13 = vrot.slane %v213_v8, %v1713_v3 }
  0x19   : > { %220 = vst [vmem:[#allocation2 + $0x32] sm:$0xff] %v214_v9  ;;  %221 = vst [vmem:[#allocation2 + $0x3a] sm:$0xff] %v215_v10  ;;  %v239_v14 = vrot.slane %v215_v10, %v1715_v4 }
  0x1a   : > { %230 = vst [vmem:[#allocation2] sm:$0x3] %v225_v11  ;;  %240 = vst [vmem:[#allocation2 + $0x1a] sm:$0xff] %v235_v12 }
  0x1b   : > { %241 = vst [vmem:[#allocation2 + $0x22] sm:$0x3] %v235_v12  ;;  %231 = vst [vmem:[#allocation2 + $0x28] sm:$0x3] %v229_v13 }
  0x1c   : > { %242 = vst [vmem:[#allocation2 + $0x42] sm:$0xff] %v239_v14  ;;  %243 = vst [vmem:[#allocation2 + $0x4a] sm:$0x3] %v239_v14 }
  0x1d LB: >> { %s1655_s4 = smov 1   ;;  %v3012_v19 = vmov 0   ;;  %s1657_s5 = smov 127   ;;  %v3010_v24 = vmov 23   ;;  %vm836_vm0 = vcmp.lt.s32.totalorder %v1706_v1, 2  ;;  %vm278_vm1 = vcmp.lt.s32.totalorder %v1706_v1, 1  ;;  %s1653_s3 = sphi %s1729_s3, %s249_s3  }
  0x1e   : >> { %v1744_v18 = vld [vmem:[#allocation2 + $0x9] sm:$0xff]  ;;  %1580 = vset.pattern.permute.xlu1 %v3012_v19  ;;  %1579 = vset.pattern.permute.xlu0 %v3012_v19  ;;  %s1659_s6 = smov 2   ;;  %s1660_s7 = smov 126   ;;  %vm387_vm2 = vcmp.ge.s32.totalorder %v1706_v1, 23  ;;  %vm945_vm3 = vcmp.ge.s32.totalorder %v1706_v1, 22 }
  0x1f   : >> { %v1734_v15 = vld [vmem:[#allocation2 + $0x11] sm:$0xff]  ;;  %v1793_v25 = vld [vmem:[#allocation2 + $0x2] sm:$0xff]  ;;  %p1520_p7 = scmp.ne.s32.totalorder %s1653_s3, 1 }
  0x20   : >> { %266 = vrot.lane.b32.xlu1 %v1734_v15, %s1655_s4  ;;  %v1752_v20 = vld [vmem:[#allocation2 + $0x31] sm:$0xff]  ;;  %v1762_v23 = vld [vmem:[#allocation2 + $0x39] sm:$0xff]  ;;  %v1846_v33 = vld [vmem:[#allocation2 + $0x3] sm:$0xff] }
  0x21   : >> { %v1736_v16 = vld [vmem:[#allocation2 + $0x1] sm:$0xff]  ;;  %v1742_v17 = vld [vmem:[#allocation2 + $0x19] sm:$0xff]  ;;  %v1803_v27 = vld [vmem:[#allocation2 + $0x2a] sm:$0xff] }
  0x22   : >> { %262 = vrot.lane.b32.xlu0 %v1736_v16, %s1655_s4  ;;  %v1754_v21 = vld [vmem:[#allocation2 + $0x29] sm:$0xff]  ;;  %v1798_v26 = vld [vmem:[#allocation2 + $0x12] sm:$0xff]  ;;  %v1808_v28 = vld [vmem:[#allocation2 + $0x3a] sm:$0xff] }
  0x23   : >> { %v1760_v22 = vld [vmem:[#allocation2 + $0x41] sm:$0xff]  ;;  %v1815_v29 = vld [vmem:[#allocation2 + $0xa] sm:$0xff]  ;;  %v1822_v31 = vld [vmem:[#allocation2 + $0x32] sm:$0xff] }
  0x24   : >> { %268 = vrot.lane.b32.xlu1 %v1742_v17, %s1655_s4  ;;  %v1817_v30 = vld [vmem:[#allocation2 + $0x1a] sm:$0xff]  ;;  %v1828_v32 = vld [vmem:[#allocation2 + $0x42] sm:$0xff]  ;;  %v1857_v35 = vld [vmem:[#allocation2 + $0x2b] sm:$0xff] }
  0x25   : >> { %v1851_v34 = vld [vmem:[#allocation2 + $0x13] sm:$0xff]  ;;  %v1864_v36 = vld [vmem:[#allocation2 + $0x3b] sm:$0xff]  ;;  %v1885_v41 = vld [vmem:[#allocation2 + $0x43] sm:$0xff] }
  0x26   : >> { %264 = vrot.lane.b32.xlu0 %v1744_v18, %s1655_s4  ;;  %3070 = vst [vmem:[#allocation5_spill] sm:$0xff] %v1851_v34  ;;  %v1873_v37 = vld [vmem:[#allocation2 + $0x1b] sm:$0xff]  ;;  %v1877_v38 = vld [vmem:[#allocation2 + $0x33] sm:$0xff]  ;;  %3073 = vst [vmem:[#allocation8_spill] sm:$0xff] %v1885_v41 }
  0x27   : >> { %3071 = vst [vmem:[#allocation6_spill] sm:$0xff] %v1873_v37  ;;  %3072 = vst [vmem:[#allocation7_spill] sm:$0xff] %v1877_v38  ;;  %v1889_v42 = vld [vmem:[#allocation2 + $0xb] sm:$0xff]  ;;  %v1918_v49 = vld [vmem:[#allocation2] sm:$0xff] }
  0x28   : >> { %272 = vrot.lane.b32.xlu1 %v1752_v20, %s1655_s4  ;;  %3078 = vst [vmem:[#allocation13_spill] sm:$0xff] %v1918_v49  ;;  %v1928_v52 = vld [vmem:[#allocation2 + $0x10] sm:$0xff]  ;;  %v1938_v55 = vld [vmem:[#allocation2 + $0x28] sm:$0xff]  ;;  %v1947_v58 = vld [vmem:[#allocation2 + $0x38] sm:$0xff] }
  0x29   : >> { %3080 = vst [vmem:[#allocation15_spill] sm:$0xff] %v1928_v52  ;;  %v1962_v63 = vld [vmem:[#allocation2 + $0x18] sm:$0xff]  ;;  %v1970_v5 = vld [vmem:[#allocation2 + $0x30] sm:$0xff]  ;;  %v1979_v8 = vld [vmem:[#allocation2 + $0x40] sm:$0xff] }
  0x2a   : >> { %270 = vrot.lane.b32.xlu0 %v1754_v21, %s1655_s4  ;;  %3085 = vst [vmem:[#allocation20_spill] sm:$0xff] %v1962_v63  ;;  %3086 = vst [vmem:[#allocation21_spill] sm:$0xff] %v1970_v5  ;;  %v1989_v11 = vld [vmem:[#allocation2 + $0x8] sm:$0xff] }
  0x2b   : >> { %3088 = vst [vmem:[#allocation23_spill] sm:$0xff] %v1979_v8 }
  0x2c   : >> { %276 = vrot.lane.b32.xlu1 %v1760_v22, %s1655_s4 }
  0x2e   : >> { %274 = vrot.lane.b32.xlu0 %v1762_v23, %s1655_s4 }
  0x30   : >> { %288 = vperm.xlu1 %1580, %v1744_v18  }
  0x32   : >> { %283 = vperm.xlu0 %1579, %v1736_v16  }
  0x34   : >> { %293 = vperm.xlu1 %1580, %v1734_v15  }
  0x36   : >> { %298 = vperm.xlu0 %1579, %v1742_v17  }
  0x38   : >> { %303 = vperm.xlu1 %1580, %v1754_v21  }
  0x3a   : >> { %308 = vperm.xlu0 %1579, %v1752_v20  }
  0x3c   : >> { %313 = vperm.xlu1 %1580, %v1762_v23  }
  0x3e   : >> { %318 = vperm.xlu0 %1579, %v1760_v22  }
  0x40   : >> { %371 = vrot.lane.b32.xlu1 %v1736_v16, %s1657_s5 }
  0x41   : >> { %1581 = vset.pattern.permute.xlu1 %v3010_v24 }
  0x42   : >> { %373 = vrot.lane.b32.xlu0 %v1744_v18, %s1657_s5 }
  0x44   : >> { %375 = vrot.lane.b32.xlu1 %v1734_v15, %s1657_s5 }
  0x46   : >> { %377 = vrot.lane.b32.xlu0 %v1742_v17, %s1657_s5 }
  0x48   : >> { %379 = vrot.lane.b32.xlu1 %v1754_v21, %s1657_s5 }
  0x4a   : >> { %381 = vrot.lane.b32.xlu0 %v1752_v20, %s1657_s5 }
  0x4c   : >> { %383 = vrot.lane.b32.xlu1 %v1762_v23, %s1657_s5 }
  0x4e   : >> { %385 = vrot.lane.b32.xlu0 %v1760_v22, %s1657_s5 }
  0x50   : >> { %391 = vperm.xlu1 %1581, %v1736_v16  }
  0x52   : >> { %459 = vrot.lane.b32.xlu0 %v1793_v25, %s1655_s4 }
  0x54   : >> { %399 = vperm.xlu1 %1581, %v1734_v15  }
  0x56   : >> { %463 = vrot.lane.b32.xlu0 %v1798_v26, %s1655_s4 }
  0x58   : >> { %403 = vperm.xlu1 %1581, %v1742_v17  }
  0x5a   : >> { %467 = vrot.lane.b32.xlu0 %v1803_v27, %s1655_s4 }
  0x5c   : >> { %411 = vperm.xlu1 %1581, %v1752_v20  }
  0x5e   : >> { %471 = vrot.lane.b32.xlu0 %v1808_v28, %s1655_s4 }
  0x60   : >> { %419 = vperm.xlu1 %1581, %v1760_v22  }
  0x62   : >> { %477 = vperm.xlu0 %1579, %v1793_v25  }
  0x64   : >> { %461 = vrot.lane.b32.xlu1 %v1815_v29, %s1655_s4 }
  0x65   : >> { %1582 = vset.pattern.permute.xlu1 %v3012_v19 }
  0x66   : >> { %492 = vperm.xlu0 %1579, %v1817_v30  }
  0x68   : >> { %465 = vrot.lane.b32.xlu1 %v1817_v30, %s1655_s4 }
  0x6a   : >> { %502 = vperm.xlu0 %1579, %v1822_v31  }
  0x6c   : >> { %469 = vrot.lane.b32.xlu1 %v1822_v31, %s1655_s4 }
  0x6e   : >> { %512 = vperm.xlu0 %1579, %v1828_v32  }
  0x70   : >> { %473 = vrot.lane.b32.xlu1 %v1828_v32, %s1655_s4 }
  0x72   : >> { %546 = vrot.lane.b32.xlu0 %v1815_v29, %s1657_s5 }
  0x74   : >> { %482 = vperm.xlu1 %1582, %v1815_v29  }
  0x76   : >> { %550 = vrot.lane.b32.xlu0 %v1817_v30, %s1657_s5 }
  0x78   : >> { %487 = vperm.xlu1 %1582, %v1798_v26  }
  0x7a   : >> { %554 = vrot.lane.b32.xlu0 %v1822_v31, %s1657_s5 }
  0x7c   : >> { %497 = vperm.xlu1 %1582, %v1803_v27  }
  0x7e   : >> { %558 = vrot.lane.b32.xlu0 %v1828_v32, %s1657_s5 }
  0x80   : >> { %507 = vperm.xlu1 %1582, %v1808_v28  }
  0x82   : >> { %629 = vrot.lane.b32.xlu0 %v1846_v33, %s1655_s4 }
  0x84   : >> { %544 = vrot.lane.b32.xlu1 %v1793_v25, %s1657_s5 }
  0x85   : >> { %1583 = vset.pattern.permute.xlu1 %v3010_v24 }
  0x86   : >> { %633 = vrot.lane.b32.xlu0 %v1851_v34, %s1655_s4 }
  0x88   : >> { %548 = vrot.lane.b32.xlu1 %v1798_v26, %s1657_s5 }
  0x8a   : >> { %637 = vrot.lane.b32.xlu0 %v1857_v35, %s1655_s4 }
  0x8c   : >> { %552 = vrot.lane.b32.xlu1 %v1803_v27, %s1657_s5 }
  0x8e   : >> { %641 = vrot.lane.b32.xlu0 %v1864_v36, %s1655_s4 }
  0x90   : >> { %556 = vrot.lane.b32.xlu1 %v1808_v28, %s1657_s5 }
  0x92   : >> { %647 = vperm.xlu0 %1579, %v1846_v33   ;;  %v1883_v40 = vpop.permute.xlu1 %266 }
  0x94   : >> { %561 = vperm.xlu1 %1583, %v1793_v25   ;;  %v1879_v39 = vpop.permute.xlu0 %262 }
  0x96   : >> { %662 = vperm.xlu0 %1579, %v1873_v37   ;;  %v1893_v44 = vpop.permute.xlu1 %268 }
  0x98   : >> { %569 = vperm.xlu1 %1583, %v1798_v26   ;;  %v1891_v43 = vpop.permute.xlu0 %264 }
  0x99   : >> { %3074 = vst [vmem:[#allocation9_spill] sm:$0xff] %v1891_v43 }
  0x9a   : >> { %672 = vperm.xlu0 %1579, %v1877_v38   ;;  %v1903_v46 = vpop.permute.xlu1 %272 }
  0x9c   : >> { %573 = vperm.xlu1 %1583, %v1817_v30   ;;  %v1898_v45 = vpop.permute.xlu0 %270 }
  0x9d   : >> { %3075 = vst [vmem:[#allocation10_spill] sm:$0xff] %v1898_v45 }
  0x9e   : >> { %682 = vperm.xlu0 %1579, %v1885_v41   ;;  %v1912_v48 = vpop.permute.xlu1 %276 }
  0x9f   : >> { %3077 = vst [vmem:[#allocation12_spill] sm:$0xff] %v1912_v48 }
  0xa0   : >> { %581 = vperm.xlu1 %1583, %v1822_v31   ;;  %v1909_v47 = vpop.permute.xlu0 %274 }
  0xa1   : >> { %3076 = vst [vmem:[#allocation11_spill] sm:$0xff] %v1909_v47 }
  0xa2   : >> { %737 = vrot.lane.b32.xlu0 %v1889_v42, %s1657_s5 }
  0xa4   : >> { %589 = vperm.xlu1 %1583, %v1828_v32  }
  0xa6   : >> { %741 = vrot.lane.b32.xlu0 %v1873_v37, %s1657_s5 }
  0xa8   : >> { %631 = vrot.lane.b32.xlu1 %v1889_v42, %s1655_s4 }
  0xa9   : >> { %1584 = vset.pattern.permute.xlu1 %v3012_v19 }
  0xaa   : >> { %745 = vrot.lane.b32.xlu0 %v1877_v38, %s1657_s5 }
  0xac   : >> { %635 = vrot.lane.b32.xlu1 %v1873_v37, %s1655_s4 }
  0xae   : >> { %749 = vrot.lane.b32.xlu0 %v1885_v41, %s1657_s5 }
  0xaf   : >> { %v1920_v50 = vpop.permute.xlu1 %288 }
  0xb0   : >> { %3079 = vst [vmem:[#allocation14_spill] sm:$0xff] %v1920_v50  ;;  %639 = vrot.lane.b32.xlu1 %v1877_v38, %s1655_s4 }
  0xb1   : >> { %v1922_v51 = vpop.permute.xlu0 %283 }
  0xb2   : >> { %820 = vrot.lane.b32.xlu0 %v1918_v49, %s1659_s6 }
  0xb3   : >> { %v1930_v53 = vpop.permute.xlu1 %293 }
  0xb4   : >> { %643 = vrot.lane.b32.xlu1 %v1885_v41, %s1655_s4 }
  0xb5   : >> { %v1932_v54 = vpop.permute.xlu0 %298 }
  0xb6   : >> { %824 = vrot.lane.b32.xlu0 %v1928_v52, %s1659_s6 }
  0xb7   : >> { %v1940_v56 = vpop.permute.xlu1 %303 }
  0xb8   : >> { %3081 = vst [vmem:[#allocation16_spill] sm:$0xff] %v1940_v56  ;;  %652 = vperm.xlu1 %1584, %v1889_v42  }
  0xb9   : >> { %v1942_v57 = vpop.permute.xlu0 %308 }
  0xba   : >> { %828 = vrot.lane.b32.xlu0 %v1938_v55, %s1659_s6 }
  0xbb   : >> { %v1949_v59 = vpop.permute.xlu1 %313 }
  0xbc   : >> { %3082 = vst [vmem:[#allocation17_spill] sm:$0xff] %v1949_v59  ;;  %657 = vperm.xlu1 %1584, %v1851_v34  }
  0xbd   : >> { %v1951_v60 = vpop.permute.xlu0 %318 }
  0xbe   : >> { %3083 = vst [vmem:[#allocation18_spill] sm:$0xff] %v1951_v60  ;;  %832 = vrot.lane.b32.xlu0 %v1947_v58, %s1659_s6 }
  0xbf   : >> { %v1956_v61 = vpop.permute.xlu1 %371 }
  0xc0   : >> { %667 = vperm.xlu1 %1584, %v1857_v35  }
  0xc1   : >> { %v1958_v62 = vpop.permute.xlu0 %373 }
  0xc2   : >> { %3084 = vst [vmem:[#allocation19_spill] sm:$0xff] %v1958_v62  ;;  %841 = vperm.xlu0 %1579, %v1918_v49  }
  0xc3   : >> { %v1964_v0 = vpop.permute.xlu1 %375 }
  0xc4   : >> { %677 = vperm.xlu1 %1584, %v1864_v36  }
  0xc5   : >> { %v1966_v2 = vpop.permute.xlu0 %377 }
  0xc6   : >> { %856 = vperm.xlu0 %1579, %v1962_v63  }
  0xc7   : >> { %v1972_v6 = vpop.permute.xlu1 %379 }
  0xc8   : >> { %3087 = vst [vmem:[#allocation22_spill] sm:$0xff] %v1972_v6  ;;  %735 = vrot.lane.b32.xlu1 %v1846_v33, %s1657_s5 }
  0xc9   : >> { %v1974_v7 = vpop.permute.xlu0 %381  ;;  %1585 = vset.pattern.permute.xlu1 %v3010_v24 }
  0xca   : >> { %866 = vperm.xlu0 %1579, %v1970_v5  }
  0xcb   : >> { %v1982_v9 = vpop.permute.xlu1 %383 }
  0xcc   : >> { %3089 = vst [vmem:[#allocation24_spill] sm:$0xff] %v1982_v9  ;;  %739 = vrot.lane.b32.xlu1 %v1851_v34, %s1657_s5 }
  0xcd   : >> { %v1984_v10 = vpop.permute.xlu0 %385 }
  0xce   : >> { %3090 = vst [vmem:[#allocation25_spill] sm:$0xff] %v1984_v10  ;;  %876 = vperm.xlu0 %1579, %v1979_v8   ;;  %v2100_v10 = vld [vmem:[#allocation2 + $0x2c] sm:$0xff] }
  0xcf   : >> { %v1991_v12 = vpop.permute.xlu1 %391  ;;  %3111 = vst [vmem:[#allocation45_spill] sm:$0xff] %v2100_v10 }
  0xd0   : >> { %743 = vrot.lane.b32.xlu1 %v1857_v35, %s1657_s5 }
  0xd1   : >> { %v1993_v13 = vpop.permute.xlu0 %459 }
  0xd2   : >> { %931 = vrot.lane.b32.xlu0 %v1989_v11, %s1660_s7 }
  0xd3   : >> { %v1999_v14 = vpop.permute.xlu1 %399 }
  0xd4   : >> { %747 = vrot.lane.b32.xlu1 %v1864_v36, %s1657_s5 }
  0xd5   : >> { %v2001_v24 = vpop.permute.xlu0 %463 }
  0xd6   : >> { %935 = vrot.lane.b32.xlu0 %v1962_v63, %s1660_s7 }
  0xd7   : >> { %v2007_v19 = vpop.permute.xlu1 %403 }
  0xd8   : >> { %752 = vperm.xlu1 %1585, %v1846_v33  }
  0xd9   : >> { %v2009_v4 = vpop.permute.xlu0 %467 }
  0xda   : >> { %3091 = vst [vmem:[#allocation26_spill] sm:$0xff] %v2009_v4  ;;  %939 = vrot.lane.b32.xlu0 %v1970_v5, %s1660_s7 }
  0xdb   : >> { %v2014_v3 = vpop.permute.xlu1 %411 }
  0xdc   : >> { %760 = vperm.xlu1 %1585, %v1851_v34  }
  0xdd   : >> { %v2016_v9 = vpop.permute.xlu0 %471 }
  0xde   : >> { %3092 = vst [vmem:[#allocation27_spill] sm:$0xff] %v2016_v9  ;;  %943 = vrot.lane.b32.xlu0 %v1979_v8, %s1660_s7 }
  0xdf   : >> { %v2021_v59 = vpop.permute.xlu1 %419 }
  0xe0   : >> { %3093 = vst [vmem:[#allocation28_spill] sm:$0xff] %v2021_v59  ;;  %764 = vperm.xlu1 %1585, %v1873_v37   ;;  %v2091_v59 = vld [vmem:[#allocation2 + $0x14] sm:$0xff] }
  0xe1   : >> { %v2023_v47 = vpop.permute.xlu0 %477  ;;  %3109 = vst [vmem:[#allocation43_spill] sm:$0xff] %v2091_v59 }
  0xe2   : >> { %1009 = vrot.lane.b32.xlu0 %v1793_v25, %s1659_s6 }
  0xe3   : >> { %v2028_v4 = vpop.permute.xlu1 %461 }
  0xe4   : >> { %3094 = vst [vmem:[#allocation29_spill] sm:$0xff] %v2028_v4  ;;  %772 = vperm.xlu1 %1585, %v1877_v38   ;;  %v3099_v4 = vmov 0  }
  0xe5   : >> { %v2030_v6 = vpop.permute.xlu0 %492 }
  0xe6   : >> { %3095 = vst [vmem:[#allocation30_spill] sm:$0xff] %v2030_v6  ;;  %1013 = vrot.lane.b32.xlu0 %v1798_v26, %s1659_s6 }
  0xe7   : >> { %v2035_v9 = vpop.permute.xlu1 %465 }
  0xe8   : >> { %780 = vperm.xlu1 %1585, %v1885_v41  }
  0xe9   : >> { %v2037_v56 = vpop.permute.xlu0 %502 }
  0xea   : >> { %3096 = vst [vmem:[#allocation31_spill] sm:$0xff] %v2037_v56  ;;  %1017 = vrot.lane.b32.xlu0 %v1803_v27, %s1659_s6  ;;  %v2109_v56 = vld [vmem:[#allocation2 + $0x3c] sm:$0xff] }
  0xeb   : >> { %v2042_v45 = vpop.permute.xlu1 %469  ;;  %3113 = vst [vmem:[#allocation47_spill] sm:$0xff] %v2109_v56 }
  0xec   : >> { %3097 = vst [vmem:[#allocation32_spill] sm:$0xff] %v2042_v45  ;;  %822 = vrot.lane.b32.xlu1 %v1989_v11, %s1659_s6 }
  0xed   : >> { %v2044_v62 = vpop.permute.xlu0 %512  ;;  %1586 = vset.pattern.permute.xlu1 %v3099_v4 }
  0xee   : >> { %3098 = vst [vmem:[#allocation33_spill] sm:$0xff] %v2044_v62  ;;  %1021 = vrot.lane.b32.xlu0 %v1808_v28, %s1659_s6 }
  0xef   : >> { %v2051_v50 = vpop.permute.xlu1 %473 }
  0xf0   : >> { %3100 = vst [vmem:[#allocation34_spill] sm:$0xff] %v2051_v50  ;;  %826 = vrot.lane.b32.xlu1 %v1962_v63, %s1659_s6 }
  0xf1   : >> { %v2053_v43 = vpop.permute.xlu0 %546 }
  0xf2   : >> { %3101 = vst [vmem:[#allocation35_spill] sm:$0xff] %v2053_v43  ;;  %1054 = vrot.lane.b32.xlu0 %v1793_v25, %s1660_s7 }
  0xf3   : >> { %v2059_v41 = vpop.permute.xlu1 %482 }
  0xf4   : >> { %3102 = vst [vmem:[#allocation36_spill] sm:$0xff] %v2059_v41  ;;  %830 = vrot.lane.b32.xlu1 %v1970_v5, %s1659_s6 }
  0xf5   : >> { %v2061_v38 = vpop.permute.xlu0 %550 }
  0xf6   : >> { %3103 = vst [vmem:[#allocation37_spill] sm:$0xff] %v2061_v38  ;;  %1058 = vrot.lane.b32.xlu0 %v1798_v26, %s1660_s7  ;;  %v2082_v26 = vld [vmem:[#allocation2 + $0x4] sm:$0xff] }
  0xf7   : >> { %v2067_v62 = vpop.permute.xlu1 %487  ;;  %3107 = vst [vmem:[#allocation41_spill] sm:$0xff] %v2082_v26 }
  0xf8   : >> { %834 = vrot.lane.b32.xlu1 %v1979_v8, %s1659_s6 }
  0xf9   : >> { %v2069_v50 = vpop.permute.xlu0 %554 }
  0xfa   : >> { %3104 = vst [vmem:[#allocation38_spill] sm:$0xff] %v2069_v50  ;;  %1062 = vrot.lane.b32.xlu0 %v1803_v27, %s1660_s7 }
  0xfb   : >> { %v2075_v25 = vpop.permute.xlu1 %497 }
  0xfc   : >> { %3105 = vst [vmem:[#allocation39_spill] sm:$0xff] %v2075_v25  ;;  %846 = vperm.xlu1 %1586, %v1989_v11  }
  0xfd   : >> { %v2077_v43 = vpop.permute.xlu0 %558 }
  0xfe   : >> { %3106 = vst [vmem:[#allocation40_spill] sm:$0xff] %v2077_v43  ;;  %1066 = vrot.lane.b32.xlu0 %v1808_v28, %s1660_s7 }
  0xff   : >> { %v2084_v41 = vpop.permute.xlu1 %507 }
 0x100   : >> { %3108 = vst [vmem:[#allocation42_spill] sm:$0xff] %v2084_v41  ;;  %851 = vperm.xlu1 %1586, %v1928_v52  }
 0x101   : >> { %v2086_v50 = vpop.permute.xlu0 %629 }
 0x102   : >> { %1107 = vrot.lane.b32.xlu0 %v2082_v26, %s1659_s6 }
 0x103   : >> { %v2093_v25 = vpop.permute.xlu1 %544 }
 0x104   : >> { %861 = vperm.xlu1 %1586, %v1938_v55  }
 0x105   : >> { %v2095_v43 = vpop.permute.xlu0 %633 }
 0x106   : >> { %3110 = vst [vmem:[#allocation44_spill] sm:$0xff] %v2095_v43  ;;  %1111 = vrot.lane.b32.xlu0 %v2091_v59, %s1659_s6  ;;  %v3116_v59 = vmov 23  }
 0x107   : >> { %v2102_v41 = vpop.permute.xlu1 %548 }
 0x108   : >> { %871 = vperm.xlu1 %1586, %v1947_v58  }
 0x109   : >> { %v2104_v34 = vpop.permute.xlu0 %637 }
 0x10a   : >> { %3112 = vst [vmem:[#allocation46_spill] sm:$0xff] %v2104_v34  ;;  %1115 = vrot.lane.b32.xlu0 %v2100_v10, %s1659_s6 }
 0x10b   : >> { %v2111_v45 = vpop.permute.xlu1 %552 }
 0x10c   : >> { %3114 = vst [vmem:[#allocation48_spill] sm:$0xff] %v2111_v45  ;;  %929 = vrot.lane.b32.xlu1 %v1918_v49, %s1660_s7  ;;  %v2127_v45 = vld [vmem:[#allocation2 + $0x1c] sm:$0xff] }
 0x10d   : >> { %v2113_v38 = vpop.permute.xlu0 %641  ;;  %1587 = vset.pattern.permute.xlu1 %v3116_v59  ;;  %3118 = vst [vmem:[#allocation51_spill] sm:$0xff] %v2127_v45 }
 0x10e   : >> { %3115 = vst [vmem:[#allocation49_spill] sm:$0xff] %v2113_v38  ;;  %1119 = vrot.lane.b32.xlu0 %v2109_v56, %s1659_s6  ;;  %v2136_v56 = vld [vmem:[#allocation2 + $0x34] sm:$0xff] }
 0x10f   : >> { %v2120_v34 = vpop.permute.xlu1 %556  ;;  %3120 = vst [vmem:[#allocation53_spill] sm:$0xff] %v2136_v56 }
 0x110   : >> { %3117 = vst [vmem:[#allocation50_spill] sm:$0xff] %v2120_v34  ;;  %933 = vrot.lane.b32.xlu1 %v1928_v52, %s1660_s7 }
 0x111   : >> { %v2122_v43 = vpop.permute.xlu0 %647 }
 0x112   : >> { %1125 = vperm.xlu0 %1579, %v2082_v26   ;;  %v2145_v26 = vld [vmem:[#allocation2 + $0x44] sm:$0xff] }
 0x113   : >> { %v2129_v38 = vpop.permute.xlu1 %561 }
 0x114   : >> { %937 = vrot.lane.b32.xlu1 %v1938_v55, %s1660_s7 }
 0x115   : >> { %v2131_v10 = vpop.permute.xlu0 %662 }
 0x116   : >> { %3119 = vst [vmem:[#allocation52_spill] sm:$0xff] %v2131_v10  ;;  %1140 = vperm.xlu0 %1579, %v2127_v45  }
 0x117   : >> { %v2138_v34 = vpop.permute.xlu1 %569 }
 0x118   : >> { %941 = vrot.lane.b32.xlu1 %v1947_v58, %s1660_s7 }
 0x119   : >> { %v2140_v60 = vpop.permute.xlu0 %672 }
 0x11a   : >> { %3121 = vst [vmem:[#allocation54_spill] sm:$0xff] %v2140_v60  ;;  %1150 = vperm.xlu0 %1579, %v2136_v56  }
 0x11b   : >> { %v2147_v48 = vpop.permute.xlu1 %573 }
 0x11c   : >> { %3122 = vst [vmem:[#allocation55_spill] sm:$0xff] %v2147_v48  ;;  %949 = vperm.xlu1 %1587, %v1918_v49  }
 0x11d   : >> { %v2149_v10 = vpop.permute.xlu0 %682 }
 0x11e   : >> { %3123 = vst [vmem:[#allocation56_spill] sm:$0xff] %v2149_v10  ;;  %1160 = vperm.xlu0 %1579, %v2145_v26  }
 0x11f   : >> { %v2153_v45 = vpop.permute.xlu1 %581 }
 0x120   : >> { %3124 = vst [vmem:[#allocation57_spill] sm:$0xff] %v2153_v45  ;;  %957 = vperm.xlu1 %1587, %v1928_v52  }
 0x121   : >> { %v2155_v37 = vpop.permute.xlu0 %737 }
 0x122   : >> { %3125 = vst [vmem:[#allocation58_spill] sm:$0xff] %v2155_v37  ;;  %1589 = vset.pattern.permute.xlu0 %v3116_v59 }
 0x123   : >> { %395 = vperm.xlu0 %1589, %v1744_v18   ;;  %v2160_v60 = vpop.permute.xlu1 %589 }
 0x124   : >> { %3126 = vst [vmem:[#allocation59_spill] sm:$0xff] %v2160_v60  ;;  %961 = vperm.xlu1 %1587, %v1962_v63  }
 0x125   : >> { %v2162_v56 = vpop.permute.xlu0 %741 }
 0x127   : >> { %407 = vperm.xlu0 %1589, %v1754_v21   ;;  %v2166_v49 = vpop.permute.xlu1 %631 }
 0x128   : >> { %3127 = vst [vmem:[#allocation60_spill] sm:$0xff] %v2166_v49  ;;  %969 = vperm.xlu1 %1587, %v1970_v5  }
 0x129   : >> { %v2168_v10 = vpop.permute.xlu0 %745 }
 0x12b   : >> { %415 = vperm.xlu0 %1589, %v1762_v23   ;;  %v2172_v37 = vpop.permute.xlu1 %635 }
 0x12c   : >> { %977 = vperm.xlu1 %1587, %v1979_v8  }
 0x12d   : >> { %v2174_v52 = vpop.permute.xlu0 %749 }
 0x12f   : >> { %565 = vperm.xlu0 %1589, %v1815_v29   ;;  %v2178_v18 = vpop.permute.xlu1 %639 }
 0x130   : >> { %1011 = vrot.lane.b32.xlu1 %v1815_v29, %s1659_s6 }
 0x131   : >> { %v821_v63 = vpop.permute.xlu0 %820  ;;  %1588 = vset.pattern.permute.xlu1 %v3099_v4 }
 0x133   : >> { %577 = vperm.xlu0 %1589, %v1803_v27   ;;  %v2184_v21 = vpop.permute.xlu1 %643 }
 0x134   : >> { %1015 = vrot.lane.b32.xlu1 %v1817_v30, %s1659_s6 }
 0x135   : >> { %v2186_v23 = vpop.permute.xlu0 %824 }
 0x137   : >> { %585 = vperm.xlu0 %1589, %v1808_v28   ;;  %v2191_v49 = vpop.permute.xlu1 %652 }
 0x138   : >> { %3128 = vst [vmem:[#allocation61_spill] sm:$0xff] %v2191_v49  ;;  %1019 = vrot.lane.b32.xlu1 %v1822_v31, %s1659_s6  ;;  %v2252_v49 = vld [vmem:[%s1711_s21 + $0x10] sm:$0xff] }
 0x139   : >> { %v2193_v8 = vpop.permute.xlu0 %828  ;;  %3137 = vst [vmem:[#allocation70_spill] sm:$0xff] %v2252_v49 }
 0x13a   : >> { %3129 = vst [vmem:[#allocation62_spill] sm:$0xff] %v2193_v8 }
 0x13b   : >> { %756 = vperm.xlu0 %1589, %v1889_v42   ;;  %v2198_v27 = vpop.permute.xlu1 %657 }
 0x13c   : >> { %1023 = vrot.lane.b32.xlu1 %v1828_v32, %s1659_s6 }
 0x13d   : >> { %v2200_v4 = vpop.permute.xlu0 %832 }
 0x13e   : >> { %3130 = vst [vmem:[#allocation63_spill] sm:$0xff] %v2200_v4 }
 0x13f   : >> { %768 = vperm.xlu0 %1589, %v1857_v35   ;;  %v2206_v28 = vpop.permute.xlu1 %667 }
 0x140   : >> { %3131 = vst [vmem:[#allocation64_spill] sm:$0xff] %v2206_v28  ;;  %1056 = vrot.lane.b32.xlu1 %v1815_v29, %s1660_s7  ;;  %v2229_v29 = vld [vmem:[%s1711_s21 + $0x20] sm:$0xff] }
 0x141   : >> { %v842_v8 = vpop.permute.xlu0 %841  ;;  %3133 = vst [vmem:[#allocation66_spill] sm:$0xff] %v2229_v29 }
 0x142   : >> { %v2210_v42 = vsel %vm836_vm0, %v842_v8, %v821_v63  ;;  %v321_v63 = vsel %vm278_vm1, %v1922_v51, %v1879_v39  ;;  %v2235_v8 = vld [vmem:[%s1711_s21 + $0x40] sm:$0xff]  ;;  %v2245_v51 = vld [vmem:[%s1711_s21 + $0x30] sm:$0xff] }
 0x143   : >> { %776 = vperm.xlu0 %1589, %v1864_v36   ;;  %v2217_v35 = vpop.permute.xlu1 %677  ;;  %v2232_v36 = vld [vmem:[%s1711_s21] sm:$0xff]  ;;  %3135 = vst [vmem:[#allocation68_spill] sm:$0xff] %v2235_v8  ;;  %3136 = vst [vmem:[#allocation69_spill] sm:$0xff] %v2245_v51 }
 0x144   : >> { %3132 = vst [vmem:[#allocation65_spill] sm:$0xff] %v2217_v35  ;;  %1060 = vrot.lane.b32.xlu1 %v1817_v30, %s1660_s7  ;;  %3134 = vst [vmem:[#allocation67_spill] sm:$0xff] %v2232_v36  ;;  %v422_v35 = vsel %vm387_vm2, %v1991_v12, %v1956_v61  ;;  %v329_v39 = vmul.f32 %v321_v63, %v2232_v36  ;;  %v350_v30 = vmul.f32 %v2229_v29, %v1736_v16  ;;  %v2259_v12 = vld [vmem:[%s1711_s21 + $0x60] sm:$0xff]  ;;  %v1463_v63 = vld [vmem:[%s1711_s21 + $0x38] sm:$0xff] }
 0x145   : >> { %v2219_v4 = vpop.permute.xlu0 %856  ;;  %v323_v61 = vsel %vm278_vm1, %v1930_v53, %v1883_v40  ;;  %3138 = vst [vmem:[#allocation71_spill] sm:$0xff] %v2259_v12  ;;  %v515_v16 = vsel %vm278_vm1, %v2023_v47, %v1993_v13  ;;  %v430_v36 = vmul.f32 %v2235_v8, %v422_v35  ;;  %v352_v40 = vmul.f32 %v2245_v51, %v1734_v15  ;;  %v2277_v29 = vld [vmem:[%s1711_s21 + $0x80] sm:$0xff]  ;;  %v2425_v8 = vld [vmem:[%s1711_s21 + $0xb8] sm:$0xff] }
 0x146   : >> { %v592_v53 = vsel %vm387_vm2, %v2129_v38, %v2093_v25  ;;  %3139 = vst [vmem:[#allocation72_spill] sm:$0xff] %v2277_v29  ;;  %v358_v13 = vadd.f32 %v350_v30, %v329_v39  ;;  %v331_v5 = vmul.f32 %v323_v61, %v2252_v49  ;;  %v523_v35 = vmul.f32 %v2259_v12, %v515_v16  ;;  %v2293_v25 = vld [vmem:[%s1711_s21 + $0xc0] sm:$0xff]  ;;  %v2296_v39 = vld [vmem:[%s1711_s21 + $0x28] sm:$0xff]  ;;  %v253_v61 = vld [vmem:[%s1711_s21 + $0x18] sm:$0xff] }
 0x147   : >> { %953 = vperm.xlu0 %1589, %v1989_v11   ;;  %v2247_v11 = vpop.permute.xlu1 %735  ;;  %3141 = vst [vmem:[#allocation74_spill] sm:$0xff] %v2293_v25  ;;  %3142 = vst [vmem:[#allocation75_spill] sm:$0xff] %v2296_v39  ;;  %v353_v30 = vmul.f32 %v1463_v63, %v1742_v17  ;;  %v326_v16 = vsel %vm278_vm1, %v1942_v57, %v1903_v46  ;;  %v2313_v12 = vld [vmem:[#allocation2 + $0xc] sm:$0xff]  ;;  %v600_v49 = vmul.f32 %v2277_v29, %v592_v53 }
 0x148   : >> { %1064 = vrot.lane.b32.xlu1 %v1822_v31, %s1660_s7  ;;  %v2281_v31 = vld [vmem:[%s1711_s21 + $0x50] sm:$0xff]  ;;  %v438_v17 = vadd.f32 %v430_v36, %v358_v13  ;;  %3143 = vst [vmem:[#allocation76_spill] sm:$0xff] %v2313_v12  ;;  %v517_v46 = vsel %vm278_vm1, %v2067_v62, %v2001_v24  ;;  %v2332_v57 = vmul.f32 %v2293_v25, %v1846_v33  ;;  %v2350_v25 = vld [vmem:[%s1711_s21 + $0x48] sm:$0xff] }
 0x149   : >> { %v2249_v28 = vpop.permute.xlu0 %866  ;;  %3140 = vst [vmem:[#allocation73_spill] sm:$0xff] %v2281_v31  ;;  %v425_v53 = vsel %vm387_vm2, %v2007_v19, %v1966_v2  ;;  %3148 = vst [vmem:[#allocation81_spill] sm:$0xff] %v2350_v25  ;;  %v685_v19 = vsel %vm278_vm1, %v2122_v43, %v2086_v50  ;;  %v594_v2 = vsel %vm387_vm2, %v2138_v34, %v2102_v41  ;;  %v3151_v50 = vld [vmem:[#allocation6_spill] sm:$0xff] }
 0x14a   : >> { %v531_v24 = vadd.f32 %v523_v35, %v438_v17  ;;  %v2370_v35 = vld [vmem:[%s1711_s21 + $0x90] sm:$0xff]  ;;  %v3153_v17 = vld [vmem:[#allocation18_spill] sm:$0xff] }
 0x14b   : >> { %965 = vperm.xlu0 %1589, %v1938_v55   ;;  %v424_v55 = vsel %vm387_vm2, %v1999_v14, %v1964_v0  ;;  %v2288_v15 = vpop.permute.xlu1 %739  ;;  %v324_v0 = vsel %vm278_vm1, %v1932_v54, %v1893_v44  ;;  %v355_v14 = vmul.f32 %v2296_v39, %v1752_v20  ;;  %v2317_v44 = vmul.f32 %v1463_v63, %v1760_v22  ;;  %v2321_v20 = vld [vmem:[%s1711_s21 + $0x70] sm:$0xff]  ;;  %v2328_v54 = vld [vmem:[%s1711_s21 + $0xd8] sm:$0xff]  ;;  %v3164_v39 = vld [vmem:[#allocation25_spill] sm:$0xff] }
 0x14c   : >> { %1068 = vrot.lane.b32.xlu1 %v1828_v32, %s1660_s7  ;;  %v432_v32 = vmul.f32 %v2281_v31, %v424_v55  ;;  %3144 = vst [vmem:[#allocation77_spill] sm:$0xff] %v2321_v20  ;;  %v360_v22 = vadd.f32 %v352_v40, %v331_v5  ;;  %v332_v36 = vmul.f32 %v324_v0, %v253_v61  ;;  %v2338_v63 = vld [vmem:[%s1711_s21 + $0x58] sm:$0xff]  ;;  %v2357_v40 = vld [vmem:[%s1711_s21 + $0xa0] sm:$0xff]  ;;  %3150 = vst [vmem:[#allocation83_spill] sm:$0xff] %v2370_v35 }
 0x14d   : >> { %v2290_v51 = vpop.permute.xlu0 %876  ;;  %v427_v5 = vsel %vm387_vm2, %v2014_v3, %v1974_v7  ;;  %3149 = vst [vmem:[#allocation82_spill] sm:$0xff] %v2357_v40  ;;  %v2373_v0 = vld [vmem:[%s1711_s21 + $0x78] sm:$0xff]  ;;  %v518_v3 = vsel %vm278_vm1, %v2030_v6, %v2035_v9  ;;  %v525_v43 = vmul.f32 %v2321_v20, %v517_v46  ;;  %v2383_v41 = vmul.f32 %v2328_v54, %v3151_v50  ;;  %v2391_v9 = vld [vmem:[%s1711_s21 + $0xb0] sm:$0xff]  ;;  %v3155_v6 = vld [vmem:[#allocation37_spill] sm:$0xff] }
 0x14e   : >> { %v608_v7 = vadd.f32 %v600_v49, %v531_v24  ;;  %v433_v29 = vmul.f32 %v2338_v63, %v425_v53  ;;  %v3154_v46 = vld [vmem:[#allocation44_spill] sm:$0xff]  ;;  %v435_v50 = vmul.f32 %v2350_v25, %v427_v5  ;;  %v693_v49 = vmul.f32 %v2357_v40, %v685_v19  ;;  %v3159_v31 = vld [vmem:[#allocation31_spill] sm:$0xff] }
 0x14f   : >> { %973 = vperm.xlu0 %1589, %v1947_v58   ;;  %v2335_v58 = vld [vmem:[%s1711_s21 + $0x8] sm:$0xff]  ;;  %v2344_v13 = vpop.permute.xlu1 %743  ;;  %v687_v20 = vsel %vm278_vm1, %v2198_v27, %v3154_v46  ;;  %v2400_v24 = vld [vmem:[%s1711_s21 + $0x98] sm:$0xff]  ;;  %v361_v27 = vadd.f32 %v353_v30, %v332_v36  ;;  %v526_v19 = vmul.f32 %v2373_v0, %v518_v3  ;;  %v3162_v36 = vld [vmem:[#allocation45_spill] sm:$0xff] }
 0x150   : >> { %3145 = vst [vmem:[#allocation78_spill] sm:$0xff] %v2335_v58  ;;  %3146 = vst [vmem:[#allocation79_spill] sm:$0xff] %v2344_v13  ;;  %v334_v33 = vmul.f32 %v326_v16, %v2335_v58  ;;  %1109 = vrot.lane.b32.xlu1 %v2313_v12, %s1659_s6  ;;  %v3152_v16 = vld [vmem:[#allocation12_spill] sm:$0xff]  ;;  %v440_v13 = vadd.f32 %v432_v32, %v360_v22  ;;  %v595_v32 = vsel %vm387_vm2, %v2147_v48, %v3155_v6  ;;  %v2416_v46 = vld [vmem:[%s1711_s21 + $0x68] sm:$0xff] }
 0x151   : >> { %v2346_v55 = vpop.permute.xlu0 %931  ;;  %v3158_v40 = vld [vmem:[#allocation32_spill] sm:$0xff]  ;;  %v3160_v48 = vld [vmem:[#allocation51_spill] sm:$0xff] }
 0x152   : >> { %3147 = vst [vmem:[#allocation80_spill] sm:$0xff] %v2346_v55  ;;  %v328_v55 = vsel %vm278_vm1, %v3153_v17, %v3152_v16  ;;  %v602_v16 = vmul.f32 %v2370_v35, %v594_v2  ;;  %v2412_v17 = vld [vmem:[%s1711_s21 + $0xd0] sm:$0xff]  ;;  %v363_v5 = vadd.f32 %v355_v14, %v334_v33  ;;  %v520_v6 = vsel %vm278_vm1, %v3159_v31, %v3158_v40  ;;  %v3161_v2 = vld [vmem:[#allocation52_spill] sm:$0xff]  ;;  %v2435_v31 = vld [vmem:[%s1711_s21 + $0xe0] sm:$0xff] }
 0x153   : >> { %1234 = vperm.xlu0 %1589, %v2313_v12   ;;  %v2406_v22 = vpop.permute.xlu1 %747  ;;  %3157 = vst [vmem:[#allocation12_spill] sm:$0xff] %v2412_v17  ;;  %v688_v30 = vsel %vm278_vm1, %v3161_v2, %v2172_v37  ;;  %v695_v14 = vmul.f32 %v2391_v9, %v687_v20  ;;  %v701_v33 = vadd.f32 %v693_v49, %v608_v7  ;;  %v3165_v58 = vld [vmem:[#allocation28_spill] sm:$0xff] }
 0x154   : >> { %3156 = vst [vmem:[#allocation6_spill] sm:$0xff] %v2406_v22  ;;  %1113 = vrot.lane.b32.xlu1 %v3160_v48, %s1659_s6  ;;  %v533_v22 = vadd.f32 %v525_v43, %v440_v13  ;;  %v336_v3 = vmul.f32 %v328_v55, %v253_v61  ;;  %v441_v35 = vadd.f32 %v433_v29, %v361_v27  ;;  %v3163_v13 = vld [vmem:[#allocation5_spill] sm:$0xff]  ;;  %v3166_v55 = vld [vmem:[#allocation38_spill] sm:$0xff] }
 0x155   : >> { %v2408_v53 = vpop.permute.xlu0 %935  ;;  %v603_v40 = vmul.f32 %v2400_v24, %v595_v32  ;;  %v716_v43 = vmul.f32 %v2412_v17, %v3163_v13  ;;  %v443_v25 = vadd.f32 %v435_v50, %v363_v5  ;;  %v429_v37 = vsel %vm387_vm2, %v3165_v58, %v3164_v39  ;;  %v2452_v32 = vld [vmem:[%s1711_s21 + $0x100] sm:$0xff]  ;;  %v2479_v17 = vld [vmem:[%s1711_s21 + $0xf0] sm:$0xff] }
 0x156   : >> { %v528_v20 = vmul.f32 %v2416_v46, %v520_v6  ;;  %v610_v29 = vadd.f32 %v602_v16, %v533_v22  ;;  %v534_v61 = vadd.f32 %v526_v19, %v441_v35  ;;  %v597_v49 = vsel %vm387_vm2, %v2153_v45, %v3166_v55  ;;  %v3167_v58 = vld [vmem:[#allocation53_spill] sm:$0xff]  ;;  %v2460_v22 = vld [vmem:[%s1711_s21 + $0x88] sm:$0xff]  ;;  %v3170_v19 = vld [vmem:[#allocation47_spill] sm:$0xff] }
 0x157   : >> { %1246 = vperm.xlu0 %1589, %v3162_v36   ;;  %v753_v2 = vpop.permute.xlu1 %752  ;;  %v696_v50 = vmul.f32 %v2425_v8, %v688_v30  ;;  %v3168_v35 = vld [vmem:[#allocation34_spill] sm:$0xff]  ;;  %v3169_v16 = vld [vmem:[#allocation33_spill] sm:$0xff]  ;;  %v722_v6 = vadd.f32 %v2332_v57, %v701_v33  ;;  %v365_v13 = vadd.f32 %v2317_v44, %v336_v3  ;;  %v887_v57 = vmul.f32 %v2452_v32, %v2210_v42 }
 0x158   : >> { %v783_v39 = vsel %vm387_vm2, %v753_v2, %v2247_v11  ;;  %1117 = vrot.lane.b32.xlu1 %v3167_v58, %s1659_s6  ;;  %v522_v27 = vsel %vm278_vm1, %v3169_v16, %v3168_v35  ;;  %v703_v30 = vadd.f32 %v695_v14, %v610_v29  ;;  %v437_v11 = vmul.f32 %v2338_v63, %v429_v37  ;;  %v2472_v55 = vld [vmem:[%s1711_s21 + $0xa8] sm:$0xff] }
 0x159   : >> { %v2444_v7 = vpop.permute.xlu0 %939  ;;  %v791_v5 = vmul.f32 %v2435_v31, %v783_v39  ;;  %v611_v2 = vadd.f32 %v603_v40, %v534_v61  ;;  %v3171_v45 = vld [vmem:[#allocation54_spill] sm:$0xff]  ;;  %v536_v39 = vadd.f32 %v528_v20, %v443_v25  ;;  %v605_v44 = vmul.f32 %v2460_v22, %v597_v49  ;;  %v3172_v40 = vld [vmem:[#allocation40_spill] sm:$0xff] }
 0x15a   : >> { %v690_v35 = vsel %vm278_vm1, %v3171_v45, %v2178_v18  ;;  %v530_v3 = vmul.f32 %v2373_v0, %v522_v27  ;;  %v599_v45 = vsel %vm387_vm2, %v2160_v60, %v3172_v40  ;;  %v2497_v42 = vld [vmem:[%s1711_s21 + $0xc8] sm:$0xff]  ;;  %v3173_v0 = vld [vmem:[#allocation41_spill] sm:$0xff]  ;;  %v724_v61 = vadd.f32 %v716_v43, %v703_v30  ;;  %v1487_v27 = vld [vmem:[%s1711_s21 + $0xf8] sm:$0xff] }
 0x15b   : >> { %1254 = vperm.xlu0 %1589, %v3170_v19   ;;  %v761_v14 = vpop.permute.xlu1 %760  ;;  %v799_v63 = vadd.f32 %v791_v5, %v722_v6  ;;  %v704_v18 = vadd.f32 %v696_v50, %v611_v2  ;;  %v698_v37 = vmul.f32 %v2472_v55, %v690_v35  ;;  %v445_v49 = vadd.f32 %v437_v11, %v365_v13  ;;  %v3174_v50 = vld [vmem:[#allocation56_spill] sm:$0xff]  ;;  %v3175_v40 = vld [vmem:[#allocation7_spill] sm:$0xff]  ;;  %v3191_v60 = vld [vmem:[#allocation14_spill] sm:$0xff] }
 0x15c   : >> { %v785_v25 = vsel %vm387_vm2, %v761_v14, %v2288_v15  ;;  %1121 = vrot.lane.b32.xlu1 %v2145_v26, %s1659_s6  ;;  %v692_v15 = vsel %vm278_vm1, %v3174_v50, %v2184_v21  ;;  %v607_v5 = vmul.f32 %v2400_v24, %v599_v45  ;;  %v613_v35 = vadd.f32 %v605_v44, %v536_v39  ;;  %v3176_v11 = vld [vmem:[#allocation43_spill] sm:$0xff]  ;;  %v2526_v44 = vld [vmem:[%s1711_s21 + $0xe8] sm:$0xff] }
 0x15d   : >> { %v2483_v33 = vpop.permute.xlu0 %943  ;;  %v793_v20 = vmul.f32 %v2479_v17, %v785_v25  ;;  %v2503_v29 = vadd.f32 %v887_v57, %v799_v63  ;;  %v719_v57 = vmul.f32 %v2497_v42, %v3175_v40  ;;  %v538_v43 = vadd.f32 %v530_v3, %v445_v49  ;;  %v1491_v40 = vld [vmem:[%s1711_s21 + $0x118] sm:$0xff] }
 0x15e   : >> { %v700_v21 = vmul.f32 %v2425_v8, %v692_v15  ;;  %v725_v24 = vadd.f32 %v2383_v41, %v704_v18  ;;  %v706_v39 = vadd.f32 %v698_v37, %v613_v35  ;;  %v3177_v18 = vld [vmem:[#allocation8_spill] sm:$0xff] }
 0x15f   : >> { %1213 = vrot.lane.b32.xlu0 %v3173_v0, %s1660_s7  ;;  %v765_v6 = vpop.permute.xlu1 %764  ;;  %v2513_v14 = vadd.f32 %v793_v20, %v724_v61  ;;  %v615_v63 = vadd.f32 %v607_v5, %v538_v43  ;;  %v721_v37 = vmul.f32 %v2328_v54, %v3177_v18 }
 0x160   : >> { %v786_v30 = vsel %vm387_vm2, %v765_v6, %v2162_v56  ;;  %1130 = vperm.xlu1 %1588, %v2313_v12   ;;  %v727_v20 = vadd.f32 %v719_v57, %v706_v39 }
 0x161   : >> { %v2511_v2 = vpop.permute.xlu0 %1009  ;;  %v794_v13 = vmul.f32 %v1487_v27, %v786_v30  ;;  %v708_v8 = vadd.f32 %v700_v21, %v615_v63 }
 0x163   : >> { %1217 = vrot.lane.b32.xlu0 %v3176_v11, %s1660_s7  ;;  %v802_v45 = vadd.f32 %v794_v13, %v725_v24  ;;  %v773_v3 = vpop.permute.xlu1 %772  ;;  %v729_v15 = vadd.f32 %v721_v37, %v708_v8 }
 0x164   : >> { %v788_v56 = vsel %vm387_vm2, %v773_v3, %v2168_v10  ;;  %1135 = vperm.xlu1 %1588, %v3176_v11  }
 0x165   : >> { %v2528_v25 = vpop.permute.xlu0 %1013  ;;  %v796_v41 = vmul.f32 %v2526_v44, %v788_v56  ;;  %v2586_v56 = vld [vmem:[%s1711_s21 + $0x110] sm:$0xff] }
 0x167   : >> { %1221 = vrot.lane.b32.xlu0 %v3162_v36, %s1660_s7  ;;  %v781_v61 = vpop.permute.xlu1 %780  ;;  %v804_v50 = vadd.f32 %v796_v41, %v727_v20 }
 0x168   : >> { %v790_v10 = vsel %vm387_vm2, %v781_v61, %v2174_v52  ;;  %1145 = vperm.xlu1 %1588, %v3162_v36  }
 0x169   : >> { %v2539_v49 = vpop.permute.xlu0 %1017  ;;  %v798_v5 = vmul.f32 %v1487_v27, %v790_v10  ;;  %v2557_v27 = vld [vmem:[%s1711_s21 + $0x108] sm:$0xff] }
 0x16b   : >> { %1225 = vrot.lane.b32.xlu0 %v3170_v19, %s1660_s7  ;;  %v806_v54 = vadd.f32 %v798_v5, %v729_v15  ;;  %v823_v6 = vpop.permute.xlu1 %822 }
 0x16c   : >> { %1155 = vperm.xlu1 %1588, %v3170_v19  }
 0x16d   : >> { %v2547_v35 = vpop.permute.xlu0 %1021 }
 0x16f   : >> { %v827_v57 = vpop.permute.xlu1 %826 }
 0x170   : >> { %v882_v52 = vsel %vm836_vm0, %v2219_v4, %v827_v57  ;;  %1590 = vset.pattern.permute.xlu1 %v3116_v59 }
 0x171   : >> { %v1055_v43 = vpop.permute.xlu0 %1054  ;;  %v890_v36 = vmul.f32 %v1491_v40, %v882_v52  ;;  %1230 = vperm.xlu1 %1590, %v3173_v0   ;;  %v3183_v52 = vld [vmem:[#allocation13_spill] sm:$0xff] }
 0x173   : >> { %v2559_v30 = vadd.f32 %v890_v36, %v802_v45  ;;  %v831_v21 = vpop.permute.xlu1 %830 }
 0x174   : >> { %v884_v19 = vsel %vm836_vm0, %v2249_v28, %v831_v21  ;;  %v2629_v21 = vld [vmem:[%s1711_s21 + $0x140] sm:$0xff] }
 0x175   : >> { %v2561_v24 = vpop.permute.xlu0 %1058  ;;  %v892_v13 = vmul.f32 %v2557_v27, %v884_v19  ;;  %1238 = vperm.xlu1 %1590, %v3176_v11  }
 0x177   : >> { %v835_v59 = vpop.permute.xlu1 %834  ;;  %v2570_v0 = vadd.f32 %v892_v13, %v804_v50 }
 0x178   : >> { %v886_v39 = vsel %vm836_vm0, %v2290_v51, %v835_v59  ;;  %v2637_v59 = vld [vmem:[%s1711_s21 + $0x160] sm:$0xff] }
 0x179   : >> { %v2568_v4 = vpop.permute.xlu0 %1062  ;;  %v894_v63 = vmul.f32 %v1491_v40, %v886_v39  ;;  %1242 = vperm.xlu1 %1590, %v3160_v48   ;;  %v2619_v40 = vld [vmem:[%s1711_s21 + $0x120] sm:$0xff]  ;;  %v1025_v39 = vsel %vm836_vm0, %v2023_v47, %v2511_v2  ;;  %v2657_v47 = vld [vmem:[%s1711_s21 + $0x150] sm:$0xff] }
 0x17a   : >> { %v908_v36 = vmul.f32 %v2619_v40, %v3183_v52  ;;  %v1033_v2 = vmul.f32 %v2637_v59, %v1025_v39 }
 0x17b   : >> { %v2576_v45 = vadd.f32 %v894_v63, %v806_v54  ;;  %v847_v3 = vpop.permute.xlu1 %846 }
 0x17c   : >> { %v2582_v11 = vsel %vm836_vm0, %v847_v3, %v823_v6  ;;  %v2646_v3 = vld [vmem:[%s1711_s21 + $0x180] sm:$0xff]  ;;  %v916_v52 = vadd.f32 %v908_v36, %v2503_v29 }
 0x17d   : >> { %v2578_v28 = vpop.permute.xlu0 %1066  ;;  %1250 = vperm.xlu1 %1590, %v3167_v58  }
 0x17f   : >> { %v852_v8 = vpop.permute.xlu1 %851 }
 0x180   : >> { %v881_v51 = vsel %vm836_vm0, %v852_v8, %v2186_v23  ;;  %v1070_v8 = vsel %vm945_vm3, %v2129_v38, %v1055_v43  ;;  %v1027_v38 = vsel %vm836_vm0, %v2067_v62, %v2528_v25  ;;  %v2683_v62 = vld [vmem:[%s1711_s21 + $0x128] sm:$0xff] }
 0x181   : >> { %v1108_v41 = vpop.permute.xlu0 %1107  ;;  %v889_v18 = vmul.f32 %v2586_v56, %v881_v51  ;;  %1258 = vperm.xlu1 %1590, %v2145_v26   ;;  %v1495_v51 = vld [vmem:[%s1711_s21 + $0x138] sm:$0xff]  ;;  %v1078_v43 = vmul.f32 %v2646_v3, %v1070_v8 }
 0x183   : >> { %v2593_v37 = vpop.permute.xlu1 %861  ;;  %v897_v61 = vadd.f32 %v889_v18, %v2513_v14  ;;  %v3185_v18 = vld [vmem:[#allocation15_spill] sm:$0xff] }
 0x185   : >> { %v2595_v20 = vpop.permute.xlu0 %1111  ;;  %1215 = vrot.lane.b32.xlu1 %v2313_v12, %s1660_s7 }
 0x186   : >> { %3178 = vst [vmem:[#allocation18_spill] sm:$0xff] %v2595_v20  ;;  %v2675_v20 = vld [vmem:[%s1711_s21 + $0x190] sm:$0xff] }
 0x187   : >> { %v2600_v50 = vpop.permute.xlu1 %871  ;;  %3189 = vst [vmem:[#allocation25_spill] sm:$0xff] %v2675_v20 }
 0x189   : >> { %v2602_v10 = vpop.permute.xlu0 %1115  ;;  %1219 = vrot.lane.b32.xlu1 %v3160_v48, %s1660_s7 }
 0x18a   : >> { %3179 = vst [vmem:[#allocation44_spill] sm:$0xff] %v2602_v10  ;;  %v1499_v10 = vld [vmem:[%s1711_s21 + $0x158] sm:$0xff] }
 0x18b   : >> { %v930_v23 = vpop.permute.xlu1 %929 }
 0x18d   : >> { %v2606_v15 = vpop.permute.xlu0 %1119  ;;  %1223 = vrot.lane.b32.xlu1 %v3167_v58, %s1660_s7 }
 0x18e   : >> { %3180 = vst [vmem:[#allocation37_spill] sm:$0xff] %v2606_v15  ;;  %v2661_v15 = vld [vmem:[%s1711_s21 + $0x170] sm:$0xff] }
 0x18f   : >> { %v934_v14 = vpop.permute.xlu1 %933  ;;  %3186 = vst [vmem:[#allocation45_spill] sm:$0xff] %v2661_v15 }
 0x191   : >> { %v1126_v5 = vpop.permute.xlu0 %1125  ;;  %1227 = vrot.lane.b32.xlu1 %v2145_v26, %s1660_s7  ;;  %v2632_v26 = vld [vmem:[%s1711_s21 + $0x130] sm:$0xff] }
 0x192   : >> { %v1163_v54 = vsel %vm836_vm0, %v1126_v5, %v1108_v41  ;;  %v910_v5 = vmul.f32 %v2632_v26, %v3185_v18  ;;  %v3188_v18 = vld [vmem:[#allocation20_spill] sm:$0xff] }
 0x193   : >> { %v2614_v6 = vpop.permute.xlu1 %937  ;;  %v911_v39 = vmul.f32 %v1495_v51, %v3188_v18 }
 0x194   : >> { %v918_v25 = vadd.f32 %v910_v5, %v897_v61 }
 0x195   : >> { %v2616_v48 = vpop.permute.xlu0 %1140 }
 0x196   : >> { %3181 = vst [vmem:[#allocation32_spill] sm:$0xff] %v2616_v48 }
 0x197   : >> { %v2621_v57 = vpop.permute.xlu1 %941 }
 0x199   : >> { %v2623_v58 = vpop.permute.xlu0 %1150 }
 0x19a   : >> { %3182 = vst [vmem:[#allocation51_spill] sm:$0xff] %v2623_v58  ;;  %v3190_v58 = vld [vmem:[#allocation9_spill] sm:$0xff] }
 0x19b   : >> { %v950_v19 = vpop.permute.xlu1 %949 }
 0x19c   : >> { %v980_v63 = vsel %vm945_vm3, %v950_v19, %v930_v23 }
 0x19d   : >> { %v2634_v13 = vpop.permute.xlu0 %1160  ;;  %v988_v41 = vmul.f32 %v2629_v21, %v980_v63  ;;  %v2669_v63 = vld [vmem:[%s1711_s21 + $0x1a0] sm:$0xff] }
 0x19e   : >> { %3184 = vst [vmem:[#allocation52_spill] sm:$0xff] %v2634_v13  ;;  %3187 = vst [vmem:[#allocation5_spill] sm:$0xff] %v2669_v63 }
 0x19f   : >> { %v958_v23 = vpop.permute.xlu1 %957  ;;  %v996_v19 = vadd.f32 %v988_v41, %v916_v52  ;;  %v1072_v41 = vsel %vm945_vm3, %v2138_v34, %v2561_v24  ;;  %v322_v34 = vsel %vm278_vm1, %v3191_v60, %v3190_v58 }
 0x1a0   : >> { %v982_v29 = vsel %vm945_vm3, %v958_v23, %v934_v14  ;;  %v1035_v14 = vmul.f32 %v2661_v15, %v1027_v38  ;;  %v1171_v23 = vmul.f32 %v2669_v63, %v1163_v54  ;;  %v1080_v24 = vmul.f32 %v2675_v20, %v1072_v41  ;;  %v1591_v63 = vld [vmem:[#allocation2 + $0x9] sm:$0xff] }
 0x1a1   : >> { %v990_v52 = vmul.f32 %v2657_v47, %v982_v29  ;;  %v1041_v8 = vadd.f32 %v1033_v2, %v996_v19  ;;  %v3192_v2 = vld [vmem:[#allocation21_spill] sm:$0xff]  ;;  %v919_v54 = vadd.f32 %v911_v39, %v2559_v30  ;;  %v3199_v39 = vld [vmem:[#allocation16_spill] sm:$0xff]  ;;  %v2796_v15 = vld [vmem:[%s1711_s21 + $0x168] sm:$0xff] }
 0x1a2   : >> { %v396_v36 = vpop.permute.xlu0 %395  ;;  %v913_v19 = vmul.f32 %v2683_v62, %v3192_v2  ;;  %v3197_v2 = vld [vmem:[#allocation75_spill] sm:$0xff] }
 0x1a3   : >> { %v962_v18 = vpop.permute.xlu1 %961  ;;  %v998_v12 = vadd.f32 %v990_v52, %v918_v25  ;;  %v1086_v13 = vadd.f32 %v1078_v43, %v1041_v8  ;;  %v2702_v52 = vld [vmem:[%s1711_s21 + $0x148] sm:$0xff]  ;;  %v3194_v25 = vld [vmem:[#allocation19_spill] sm:$0xff]  ;;  %v351_v48 = vmul.f32 %v1591_v63, %v3197_v2 }
 0x1a4   : >> { %v983_v61 = vsel %vm945_vm3, %v962_v18, %v2408_v53  ;;  %v423_v60 = vsel %vm387_vm2, %v396_v36, %v3194_v25  ;;  %v3196_v53 = vld [vmem:[#allocation78_spill] sm:$0xff] }
 0x1a5   : >> { %v991_v38 = vmul.f32 %v1499_v10, %v983_v61  ;;  %v1043_v29 = vadd.f32 %v1035_v14, %v998_v12  ;;  %v2699_v43 = vadd.f32 %v1171_v23, %v1086_v13  ;;  %v330_v18 = vmul.f32 %v322_v34, %v3196_v53  ;;  %v3198_v13 = vld [vmem:[#allocation10_spill] sm:$0xff]  ;;  %v3200_v23 = vld [vmem:[#allocation23_spill] sm:$0xff]  ;;  %v3201_v34 = vld [vmem:[#allocation81_spill] sm:$0xff] }
 0x1a6   : >> { %v408_v5 = vpop.permute.xlu0 %407  ;;  %v325_v14 = vsel %vm278_vm1, %v3199_v39, %v3198_v13  ;;  %v921_v61 = vadd.f32 %v913_v19, %v2570_v0  ;;  %v3202_v63 = vld [vmem:[#allocation66_spill] sm:$0xff]  ;;  %v3205_v39 = vld [vmem:[#allocation11_spill] sm:$0xff] }
 0x1a7   : >> { %3193 = vst [vmem:[#allocation28_spill] sm:$0xff] %v2699_v43  ;;  %v999_v58 = vadd.f32 %v991_v38, %v919_v54  ;;  %v970_v41 = vpop.permute.xlu1 %969  ;;  %v2707_v8 = vadd.f32 %v1080_v24, %v1043_v29  ;;  %v915_v24 = vmul.f32 %v1495_v51, %v3200_v23  ;;  %v431_v54 = vmul.f32 %v3201_v34, %v423_v60  ;;  %v1592_v38 = vld [vmem:[#allocation2 + $0x29] sm:$0xff]  ;;  %v3207_v60 = vld [vmem:[#allocation29_spill] sm:$0xff]  ;;  %v3208_v23 = vld [vmem:[#allocation36_spill] sm:$0xff] }
 0x1a8   : >> { %v985_v12 = vsel %vm945_vm3, %v970_v41, %v2444_v7  ;;  %v354_v29 = vmul.f32 %v1592_v38, %v3202_v63  ;;  %v3203_v25 = vld [vmem:[#allocation22_spill] sm:$0xff]  ;;  %v359_v2 = vadd.f32 %v351_v48, %v330_v18  ;;  %v3204_v43 = vld [vmem:[#allocation67_spill] sm:$0xff]  ;;  %v3211_v38 = vld [vmem:[#allocation69_spill] sm:$0xff] }
 0x1a9   : >> { %3195 = vst [vmem:[#allocation38_spill] sm:$0xff] %v2707_v8  ;;  %v993_v36 = vmul.f32 %v2702_v52, %v985_v12  ;;  %v426_v7 = vsel %vm387_vm2, %v408_v5, %v3203_v25  ;;  %v333_v13 = vmul.f32 %v325_v14, %v3204_v43  ;;  %v3206_v12 = vld [vmem:[#allocation17_spill] sm:$0xff]  ;;  %v516_v5 = vsel %vm278_vm1, %v3208_v23, %v3207_v60  ;;  %v3209_v43 = vld [vmem:[#allocation35_spill] sm:$0xff]  ;;  %v3212_v25 = vld [vmem:[#allocation70_spill] sm:$0xff] }
 0x1aa   : >> { %v416_v30 = vpop.permute.xlu0 %415  ;;  %v327_v51 = vsel %vm278_vm1, %v3206_v12, %v3205_v39  ;;  %v923_v48 = vadd.f32 %v915_v24, %v2576_v45  ;;  %v3213_v39 = vld [vmem:[#allocation24_spill] sm:$0xff]  ;;  %v3214_v60 = vld [vmem:[#allocation26_spill] sm:$0xff] }
 0x1ab   : >> { %v978_v41 = vpop.permute.xlu1 %977  ;;  %v1001_v53 = vadd.f32 %v993_v36, %v921_v61  ;;  %v439_v36 = vadd.f32 %v431_v54, %v359_v2  ;;  %v3210_v61 = vld [vmem:[#allocation68_spill] sm:$0xff]  ;;  %v428_v12 = vsel %vm387_vm2, %v416_v30, %v3213_v39  ;;  %v362_v24 = vadd.f32 %v354_v29, %v333_v13  ;;  %v3215_v54 = vld [vmem:[#allocation39_spill] sm:$0xff] }
 0x1ac   : >> { %v987_v0 = vsel %vm945_vm3, %v978_v41, %v2483_v33  ;;  %v434_v34 = vmul.f32 %v3210_v61, %v426_v7  ;;  %v1593_v33 = vld [vmem:[#allocation2 + $0x39] sm:$0xff]  ;;  %v335_v41 = vmul.f32 %v327_v51, %v3212_v25  ;;  %v519_v7 = vsel %vm278_vm1, %v3215_v54, %v3214_v60  ;;  %v3221_v39 = vld [vmem:[#allocation27_spill] sm:$0xff]  ;;  %v3222_v60 = vld [vmem:[#allocation42_spill] sm:$0xff] }
 0x1ad   : >> { %v995_v18 = vmul.f32 %v1499_v10, %v987_v0  ;;  %v356_v63 = vmul.f32 %v1593_v33, %v3211_v38  ;;  %v524_v0 = vmul.f32 %v2416_v46, %v516_v5  ;;  %v3216_v51 = vld [vmem:[#allocation48_spill] sm:$0xff]  ;;  %v3218_v5 = vld [vmem:[#allocation71_spill] sm:$0xff]  ;;  %v3220_v25 = vld [vmem:[#allocation61_spill] sm:$0xff]  ;;  %v521_v8 = vsel %vm278_vm1, %v3222_v60, %v3221_v39 }
 0x1ae   : >> { %v2734_v19 = vpop.permute.xlu0 %565  ;;  %v1503_v13 = vld [vmem:[%s1711_s21 + $0x178] sm:$0xff]  ;;  %v527_v33 = vmul.f32 %v3218_v5, %v519_v7 }
 0x1af   : >> { %v593_v14 = vsel %vm387_vm2, %v2734_v19, %v3209_v43  ;;  %v1003_v45 = vadd.f32 %v995_v18, %v923_v48  ;;  %v2751_v10 = vpop.permute.xlu1 %1011  ;;  %v442_v48 = vadd.f32 %v434_v34, %v362_v24  ;;  %v3217_v18 = vld [vmem:[#allocation73_spill] sm:$0xff]  ;;  %v532_v29 = vadd.f32 %v524_v0, %v439_v36  ;;  %v3219_v38 = vld [vmem:[#allocation60_spill] sm:$0xff]  ;;  %v3224_v36 = vld [vmem:[#allocation30_spill] sm:$0xff] }
 0x1b0   : >> { %v601_v2 = vmul.f32 %v2460_v22, %v593_v14  ;;  %v436_v61 = vmul.f32 %v3217_v18, %v428_v12  ;;  %v364_v46 = vadd.f32 %v356_v63, %v335_v41  ;;  %v686_v22 = vsel %vm278_vm1, %v3220_v25, %v3219_v38  ;;  %v3223_v34 = vld [vmem:[#allocation72_spill] sm:$0xff]  ;;  %v3225_v0 = vld [vmem:[#allocation50_spill] sm:$0xff] }
 0x1b1   : >> { %v694_v18 = vmul.f32 %v2472_v55, %v686_v22  ;;  %v535_v38 = vadd.f32 %v527_v33, %v442_v48  ;;  %v3227_v25 = vld [vmem:[#allocation46_spill] sm:$0xff]  ;;  %v3229_v55 = vld [vmem:[#allocation83_spill] sm:$0xff] }
 0x1b2   : >> { %v2759_v43 = vpop.permute.xlu0 %577  ;;  %v444_v5 = vadd.f32 %v436_v61, %v364_v46  ;;  %v3230_v48 = vld [vmem:[#allocation31_spill] sm:$0xff]  ;;  %v3231_v22 = vld [vmem:[#allocation58_spill] sm:$0xff] }
 0x1b3   : >> { %v596_v30 = vsel %vm387_vm2, %v2759_v43, %v3216_v51  ;;  %v1016_v14 = vpop.permute.xlu1 %1015  ;;  %v609_v51 = vadd.f32 %v601_v2, %v532_v29  ;;  %v3226_v2 = vld [vmem:[#allocation77_spill] sm:$0xff] }
 0x1b4   : >> { %v604_v12 = vmul.f32 %v3223_v34, %v596_v30  ;;  %v1028_v63 = vsel %vm836_vm0, %v3224_v36, %v1016_v14  ;;  %v529_v29 = vmul.f32 %v3226_v2, %v521_v8  ;;  %v3228_v30 = vld [vmem:[#allocation64_spill] sm:$0xff]  ;;  %v1594_v36 = vld [vmem:[#allocation2 + $0xb] sm:$0xff] }
 0x1b5   : >> { %v1036_v24 = vmul.f32 %v1503_v13, %v1028_v63  ;;  %v689_v39 = vsel %vm278_vm1, %v3228_v30, %v3227_v25  ;;  %v715_v63 = vmul.f32 %v1594_v36, %v2497_v42  ;;  %v702_v20 = vadd.f32 %v694_v18, %v609_v51  ;;  %v3233_v18 = vld [vmem:[#allocation49_spill] sm:$0xff]  ;;  %v1595_v30 = vld [vmem:[#allocation2 + $0x2b] sm:$0xff] }
 0x1b6   : >> { %v2780_v41 = vpop.permute.xlu0 %585  ;;  %v537_v42 = vadd.f32 %v529_v29, %v444_v5 }
 0x1b7   : >> { %v598_v7 = vsel %vm387_vm2, %v2780_v41, %v3225_v0  ;;  %v2792_v14 = vadd.f32 %v1036_v24, %v999_v58  ;;  %v1020_v34 = vpop.permute.xlu1 %1019  ;;  %v612_v0 = vadd.f32 %v604_v12, %v535_v38  ;;  %v3232_v24 = vld [vmem:[#allocation82_spill] sm:$0xff]  ;;  %v3234_v12 = vld [vmem:[#allocation65_spill] sm:$0xff] }
 0x1b8   : >> { %v606_v61 = vmul.f32 %v3229_v55, %v598_v7  ;;  %v1030_v8 = vsel %vm836_vm0, %v3230_v48, %v1020_v34  ;;  %v697_v2 = vmul.f32 %v3232_v24, %v689_v39  ;;  %v691_v7 = vsel %vm278_vm1, %v3234_v12, %v3233_v18  ;;  %v3235_v34 = vld [vmem:[#allocation74_spill] sm:$0xff]  ;;  %v3236_v39 = vld [vmem:[#allocation79_spill] sm:$0xff] }
 0x1b9   : >> { %v1038_v33 = vmul.f32 %v2796_v15, %v1030_v8  ;;  %v718_v36 = vmul.f32 %v1595_v30, %v3235_v34  ;;  %v723_v8 = vadd.f32 %v715_v63, %v702_v20  ;;  %v888_v20 = vmul.f32 %v2557_v27, %v2582_v11  ;;  %v2837_v27 = vld [vmem:[%s1711_s21 + $0x198] sm:$0xff]  ;;  %v1597_v11 = vld [vmem:[#allocation2 + $0x8] sm:$0xff] }
 0x1ba   : >> { %v757_v46 = vpop.permute.xlu0 %756  ;;  %v705_v55 = vadd.f32 %v697_v2, %v612_v0  ;;  %v614_v48 = vadd.f32 %v606_v61, %v537_v42  ;;  %v1596_v61 = vld [vmem:[#allocation2 + $0x3b] sm:$0xff]  ;;  %v3238_v42 = vld [vmem:[#allocation62_spill] sm:$0xff] }
 0x1bb   : >> { %v784_v58 = vsel %vm387_vm2, %v757_v46, %v3231_v22  ;;  %v2812_v38 = vadd.f32 %v1038_v33, %v1001_v53  ;;  %v1024_v25 = vpop.permute.xlu1 %1023  ;;  %v699_v53 = vmul.f32 %v2391_v9, %v691_v7  ;;  %v883_v9 = vsel %vm836_vm0, %v2593_v37, %v3238_v42  ;;  %v1598_v30 = vld [vmem:[#allocation2 + $0x28] sm:$0xff] }
 0x1bc   : >> { %v792_v51 = vmul.f32 %v2526_v44, %v784_v58  ;;  %v1032_v5 = vsel %vm836_vm0, %v3169_v16, %v1024_v25  ;;  %v726_v16 = vadd.f32 %v718_v36, %v705_v55  ;;  %v909_v7 = vmul.f32 %v1597_v11, %v2683_v62  ;;  %v3240_v36 = vld [vmem:[#allocation63_spill] sm:$0xff] }
 0x1bd   : >> { %v1040_v44 = vmul.f32 %v1503_v13, %v1032_v5  ;;  %v707_v63 = vadd.f32 %v699_v53, %v614_v48  ;;  %v3237_v13 = vld [vmem:[#allocation12_spill] sm:$0xff]  ;;  %v912_v34 = vmul.f32 %v1598_v30, %v2619_v40  ;;  %v891_v37 = vmul.f32 %v2452_v32, %v883_v9 }
 0x1be   : >> { %v769_v29 = vpop.permute.xlu0 %768  ;;  %v800_v33 = vadd.f32 %v792_v51, %v723_v8  ;;  %v720_v24 = vmul.f32 %v1596_v61, %v3237_v13  ;;  %v3239_v51 = vld [vmem:[#allocation6_spill] sm:$0xff]  ;;  %v885_v55 = vsel %vm836_vm0, %v2600_v50, %v3240_v36  ;;  %v3241_v8 = vld [vmem:[#allocation55_spill] sm:$0xff]  ;;  %v1026_v62 = vsel %vm836_vm0, %v3208_v23, %v2751_v10  ;;  %v1599_v23 = vld [vmem:[#allocation2 + $0x38] sm:$0xff] }
 0x1bf   : >> { %v787_v46 = vsel %vm387_vm2, %v769_v29, %v3236_v39  ;;  %v2823_v58 = vadd.f32 %v1040_v44, %v1003_v45  ;;  %v1057_v0 = vpop.permute.xlu1 %1056  ;;  %v3242_v29 = vld [vmem:[#allocation80_spill] sm:$0xff]  ;;  %v1505_v39 = vld [vmem:[%s1711_s21 + $0x188] sm:$0xff]  ;;  %v914_v10 = vmul.f32 %v1599_v23, %v2632_v26  ;;  %v1074_v9 = vsel %vm945_vm3, %v2759_v43, %v2568_v4 }
 0x1c0   : >> { %v795_v22 = vmul.f32 %v2435_v31, %v787_v46  ;;  %v896_v45 = vadd.f32 %v888_v20, %v800_v33  ;;  %v728_v48 = vadd.f32 %v720_v24, %v707_v63  ;;  %v1071_v32 = vsel %vm945_vm3, %v2734_v19, %v1057_v0 }
 0x1c1   : >> { %v893_v19 = vmul.f32 %v2586_v56, %v885_v55  ;;  %v1034_v0 = vmul.f32 %v2796_v15, %v1026_v62  ;;  %v1082_v4 = vmul.f32 %v2646_v3, %v1074_v9  ;;  %v3246_v55 = vld [vmem:[#allocation32_spill] sm:$0xff]  ;;  %v1600_v9 = vld [vmem:[#allocation2 + $0x2c] sm:$0xff] }
 0x1c2   : >> { %v777_v2 = vpop.permute.xlu0 %776  ;;  %v803_v18 = vadd.f32 %v795_v22, %v726_v16  ;;  %v917_v53 = vadd.f32 %v909_v7, %v896_v45  ;;  %v3243_v16 = vld [vmem:[#allocation57_spill] sm:$0xff] }
 0x1c3   : >> { %v789_v31 = vsel %vm387_vm2, %v777_v2, %v3239_v51  ;;  %v1061_v25 = vpop.permute.xlu1 %1060  ;;  %v3244_v7 = vld [vmem:[#allocation45_spill] sm:$0xff] }
 0x1c4   : >> { %v797_v12 = vmul.f32 %v2479_v17, %v789_v31  ;;  %v1073_v17 = vsel %vm945_vm3, %v3241_v8, %v1061_v25  ;;  %v899_v44 = vadd.f32 %v891_v37, %v803_v18  ;;  %v1511_v37 = vld [vmem:[%s1711_s21 + $0x1b8] sm:$0xff] }
 0x1c5   : >> { %v1081_v40 = vmul.f32 %v2837_v27, %v1073_v17 }
 0x1c6   : >> { %v954_v5 = vpop.permute.xlu0 %953  ;;  %v805_v46 = vadd.f32 %v797_v12, %v728_v48  ;;  %v920_v15 = vadd.f32 %v912_v34, %v899_v44 }
 0x1c7   : >> { %v981_v50 = vsel %vm945_vm3, %v954_v5, %v3242_v29  ;;  %v1089_v22 = vadd.f32 %v1081_v40, %v2792_v14  ;;  %v1065_v20 = vpop.permute.xlu1 %1064  ;;  %v1079_v14 = vmul.f32 %v1505_v39, %v1071_v32  ;;  %v1509_v5 = vld [vmem:[%s1711_s21 + $0x1a8] sm:$0xff]  ;;  %v3248_v40 = vld [vmem:[#allocation51_spill] sm:$0xff] }
 0x1c8   : >> { %v989_v33 = vmul.f32 %v2702_v52, %v981_v50  ;;  %v1075_v61 = vsel %vm945_vm3, %v3243_v16, %v1065_v20  ;;  %v1029_v52 = vsel %vm836_vm0, %v3215_v54, %v2539_v49  ;;  %v901_v56 = vadd.f32 %v893_v19, %v805_v46  ;;  %v2925_v16 = vld [vmem:[%s1711_s21 + $0x1c8] sm:$0xff] }
 0x1c9   : >> { %v1083_v24 = vmul.f32 %v1505_v39, %v1075_v61  ;;  %v1037_v49 = vmul.f32 %v2637_v59, %v1029_v52  ;;  %v1076_v59 = vsel %vm945_vm3, %v2780_v41, %v2578_v28  ;;  %v3247_v28 = vld [vmem:[#allocation59_spill] sm:$0xff] }
 0x1ca   : >> { %v997_v63 = vadd.f32 %v989_v33, %v917_v53  ;;  %v966_v13 = vpop.permute.xlu0 %965  ;;  %v3249_v33 = vld [vmem:[#allocation52_spill] sm:$0xff] }
 0x1cb   : >> { %v984_v26 = vsel %vm945_vm3, %v966_v13, %v2614_v6  ;;  %v1091_v51 = vadd.f32 %v1083_v24, %v2812_v38  ;;  %v1069_v31 = vpop.permute.xlu1 %1068  ;;  %v1031_v6 = vsel %vm836_vm0, %v3222_v60, %v2547_v35  ;;  %v922_v38 = vadd.f32 %v914_v10, %v901_v56  ;;  %v3250_v13 = vld [vmem:[#allocation76_spill] sm:$0xff] }
 0x1cc   : >> { %v1042_v2 = vadd.f32 %v1034_v0, %v997_v63  ;;  %v992_v42 = vmul.f32 %v2629_v21, %v984_v26  ;;  %v1039_v25 = vmul.f32 %v3244_v7, %v1031_v6  ;;  %v1077_v41 = vsel %vm945_vm3, %v3247_v28, %v1069_v31  ;;  %v3252_v31 = vld [vmem:[#allocation5_spill] sm:$0xff]  ;;  %v3253_v6 = vld [vmem:[#allocation18_spill] sm:$0xff] }
 0x1cd   : >> { %v1085_v44 = vmul.f32 %v2837_v27, %v1077_v41  ;;  %v1193_v52 = vmul.f32 %v2925_v16, %v3250_v13 }
 0x1ce   : >> { %v1000_v54 = vadd.f32 %v992_v42, %v920_v15  ;;  %v974_v45 = vpop.permute.xlu0 %973  ;;  %v1087_v18 = vadd.f32 %v1079_v14, %v1042_v2  ;;  %v1512_v2 = vld [vmem:[%s1711_s21 + $0x1c0] sm:$0xff]  ;;  %v3251_v15 = vld [vmem:[#allocation44_spill] sm:$0xff] }
 0x1cf   : >> { %v986_v21 = vsel %vm945_vm3, %v974_v45, %v2621_v57  ;;  %v1110_v11 = vpop.permute.xlu1 %1109  ;;  %v3245_v57 = vld [vmem:[#allocation25_spill] sm:$0xff]  ;;  %v1093_v23 = vadd.f32 %v1085_v44, %v2823_v58 }
 0x1d0   : >> { %v1045_v43 = vadd.f32 %v1037_v49, %v1000_v54  ;;  %v994_v12 = vmul.f32 %v2657_v47, %v986_v21  ;;  %v1084_v34 = vmul.f32 %v3245_v57, %v1076_v59  ;;  %v1516_v54 = vld [vmem:[%s1711_s21 + $0x1e0] sm:$0xff] }
 0x1d1   : >> { %v3254_v59 = vld [vmem:[#allocation37_spill] sm:$0xff] }
 0x1d2   : >> { %v1002_v35 = vadd.f32 %v994_v12, %v922_v38  ;;  %v2897_v60 = vpop.permute.xlu0 %1234  ;;  %v1090_v30 = vadd.f32 %v1082_v4, %v1045_v43  ;;  %v1514_v12 = vld [vmem:[%s1711_s21 + $0x1d0] sm:$0xff] }
 0x1d3   : >> { %v1114_v36 = vpop.permute.xlu1 %1113 }
 0x1d4   : >> { %v1047_v3 = vadd.f32 %v1039_v25, %v1002_v35  ;;  %v1166_v47 = vsel %vm836_vm0, %v3246_v55, %v1114_v36  ;;  %v1601_v35 = vld [vmem:[#allocation2 + $0x3c] sm:$0xff]  ;;  %v1602_v55 = vld [vmem:[#allocation2 + $0x4] sm:$0xff] }
 0x1d5   : >> { %v1174_v17 = vmul.f32 %v1511_v37, %v1166_v47  ;;  %v1198_v57 = vmul.f32 %v1601_v35, %v1514_v12  ;;  %v1192_v47 = vmul.f32 %v1602_v55, %v1512_v2 }
 0x1d6   : >> { %v1247_v48 = vpop.permute.xlu0 %1246  ;;  %v1092_v8 = vadd.f32 %v1084_v34, %v1047_v3 }
 0x1d7   : >> { %v2908_v62 = vadd.f32 %v1174_v17, %v1089_v22  ;;  %v1118_v32 = vpop.permute.xlu1 %1117 }
 0x1d8   : >> { %v1168_v29 = vsel %vm836_vm0, %v3248_v40, %v1118_v32  ;;  %v3255_v32 = vld [vmem:[#allocation38_spill] sm:$0xff] }
 0x1d9   : >> { %v1176_v39 = vmul.f32 %v1509_v5, %v1168_v29  ;;  %v3256_v29 = vld [vmem:[#allocation28_spill] sm:$0xff] }
 0x1da   : >> { %v1255_v50 = vpop.permute.xlu0 %1254  ;;  %v1200_v44 = vadd.f32 %v1192_v47, %v3256_v29 }
 0x1db   : >> { %v2914_v46 = vadd.f32 %v1176_v39, %v1091_v51  ;;  %v1122_v53 = vpop.permute.xlu1 %1121  ;;  %v1196_v51 = vmul.f32 %v1600_v9, %v1512_v2  ;;  %v1604_v2 = vld [vmem:[#allocation2 + $0x1c] sm:$0xff] }
 0x1dc   : >> { %v1170_v20 = vsel %vm836_vm0, %v3249_v33, %v1122_v53  ;;  %v1603_v53 = vld [vmem:[#allocation2 + $0x14] sm:$0xff] }
 0x1dd   : >> { %v1178_v10 = vmul.f32 %v1511_v37, %v1170_v20  ;;  %v1518_v37 = vld [vmem:[%s1711_s21 + $0x1f0] sm:$0xff] }
 0x1de   : >> { %v1214_v22 = vpop.permute.xlu0 %1213 }
 0x1df   : >> { %v2920_v19 = vadd.f32 %v1178_v10, %v1093_v23  ;;  %v1131_v0 = vpop.permute.xlu1 %1130 }
 0x1e0   : >> { %v1164_v27 = vsel %vm836_vm0, %v1131_v0, %v1110_v11 }
 0x1e1   : >> { %v1172_v61 = vmul.f32 %v1509_v5, %v1164_v27 }
 0x1e2   : >> { %v1218_v63 = vpop.permute.xlu0 %1217 }
 0x1e3   : >> { %v1180_v14 = vadd.f32 %v1172_v61, %v1087_v18  ;;  %v1136_v24 = vpop.permute.xlu1 %1135  ;;  %v1510_v18 = vld [vmem:[%s1711_s21 + $0x1b0] sm:$0xff] }
 0x1e4   : >> { %v1165_v21 = vsel %vm836_vm0, %v1136_v24, %v3253_v6 }
 0x1e5   : >> { %v1201_v26 = vadd.f32 %v1193_v52, %v1180_v14  ;;  %v1173_v3 = vmul.f32 %v1510_v18, %v1165_v21  ;;  %v1517_v52 = vld [vmem:[%s1711_s21 + $0x1e8] sm:$0xff]  ;;  %v1515_v14 = vld [vmem:[%s1711_s21 + $0x1d8] sm:$0xff] }
 0x1e6   : >> { %v1222_v58 = vpop.permute.xlu0 %1221 }
 0x1e7   : >> { %v1146_v56 = vpop.permute.xlu1 %1145  ;;  %v1265_v45 = vsel %vm945_vm3, %v1247_v48, %v1222_v58  ;;  %v1181_v40 = vadd.f32 %v1173_v3, %v3255_v32 }
 0x1e8   : >> { %v1167_v42 = vsel %vm836_vm0, %v1146_v56, %v3251_v15  ;;  %v1273_v7 = vmul.f32 %v1516_v54, %v1265_v45  ;;  %v1195_v15 = vmul.f32 %v1604_v2, %v1515_v14 }
 0x1e9   : >> { %v1175_v49 = vmul.f32 %v3252_v31, %v1167_v42  ;;  %v1519_v42 = vld [vmem:[%s1711_s21 + $0x1f8] sm:$0xff] }
 0x1ea   : >> { %v1226_v43 = vpop.permute.xlu0 %1225  ;;  %v1203_v31 = vadd.f32 %v1195_v15, %v2908_v62 }
 0x1eb   : >> { %v1183_v4 = vadd.f32 %v1175_v49, %v1090_v30  ;;  %v1156_v38 = vpop.permute.xlu1 %1155  ;;  %v1267_v36 = vsel %vm945_vm3, %v1255_v50, %v1226_v43  ;;  %v1194_v50 = vmul.f32 %v1603_v53, %v1514_v12  ;;  %v1606_v43 = vld [vmem:[#allocation2 + $0x44] sm:$0xff] }
 0x1ec   : >> { %v1169_v11 = vsel %vm836_vm0, %v1156_v38, %v3254_v59  ;;  %v1275_v28 = vmul.f32 %v1518_v37, %v1267_v36 }
 0x1ed   : >> { %v1204_v25 = vadd.f32 %v1196_v51, %v1183_v4  ;;  %v1177_v34 = vmul.f32 %v1510_v18, %v1169_v11  ;;  %v1202_v10 = vadd.f32 %v1194_v50, %v1181_v40 }
 0x1ef   : >> { %v2948_v30 = vadd.f32 %v1273_v7, %v1204_v25  ;;  %v1185_v48 = vadd.f32 %v1177_v34, %v1092_v8 }
 0x1f0   : >> { %v1231_v17 = vpop.permute.xlu1 %1230 }
 0x1f1   : >> { %v1206_v41 = vadd.f32 %v1198_v57, %v1185_v48  ;;  %v1261_v5 = vsel %vm945_vm3, %v1231_v17, %v1214_v22  ;;  %1293 = vst [vmem:[%s1723_s30 + $0x20] sm:$0xff] (!%p1520_p7), %v2948_v30 }
 0x1f2   : >> { %v1269_v39 = vmul.f32 %v1516_v54, %v1261_v5  ;;  %v1605_v54 = vld [vmem:[#allocation2 + $0x34] sm:$0xff] }
 0x1f3   : >> { %v1283_v33 = vadd.f32 %v1275_v28, %v1206_v41  ;;  %v1197_v45 = vmul.f32 %v1605_v54, %v2925_v16 }
 0x1f4   : >> { %v1277_v20 = vadd.f32 %v1269_v39, %v1200_v44  ;;  %v1239_v23 = vpop.permute.xlu1 %1238 }
 0x1f5   : >> { %v1263_v8 = vsel %vm945_vm3, %v1239_v23, %v1218_v63  ;;  %v1205_v21 = vadd.f32 %v1197_v45, %v2914_v46  ;;  %1295 = vst [vmem:[%s1723_s30 + $0x30] sm:$0xff] (!%p1520_p7), %v1283_v33 }
 0x1f6   : >> { %v1271_v0 = vmul.f32 %v1518_v37, %v1263_v8  ;;  %1289 = vst [vmem:[%s1723_s30] sm:$0xff] (!%p1520_p7), %v1277_v20 }
 0x1f8   : >> { %v1279_v27 = vadd.f32 %v1271_v0, %v1202_v10  ;;  %v1243_v22 = vpop.permute.xlu1 %1242 }
 0x1fa   : >> { %1291 = vst [vmem:[%s1723_s30 + $0x10] sm:$0xff] (!%p1520_p7), %v1279_v27 }
 0x1fc   : >> { %v1251_v61 = vpop.permute.xlu1 %1250 }
 0x200   : >> { %v1259_v13 = vpop.permute.xlu1 %1258 }
 0x204   : >> { %v1216_v24 = vpop.permute.xlu1 %1215 }
 0x205   : >> { %v1262_v58 = vsel %vm945_vm3, %v2897_v60, %v1216_v24 }
 0x206   : >> { %v1270_v56 = vmul.f32 %v1517_v52, %v1262_v58 }
 0x208   : >> { %v1278_v9 = vadd.f32 %v1270_v56, %v1201_v26  ;;  %v1220_v51 = vpop.permute.xlu1 %1219  ;;  %v1199_v26 = vmul.f32 %v1606_v43, %v1515_v14 }
 0x209   : >> { %v1264_v63 = vsel %vm945_vm3, %v1243_v22, %v1220_v51 }
 0x20a   : >> { %v1272_v49 = vmul.f32 %v1519_v42, %v1264_v63  ;;  %v1207_v62 = vadd.f32 %v1199_v26, %v2920_v19  ;;  %1290 = vst [vmem:[%s1723_s30 + $0x8] sm:$0xff] (!%p1520_p7), %v1278_v9 }
 0x20c   : >> { %v1280_v18 = vadd.f32 %v1272_v49, %v1203_v31  ;;  %v1224_v6 = vpop.permute.xlu1 %1223 }
 0x20d   : >> { %v1266_v60 = vsel %vm945_vm3, %v1251_v61, %v1224_v6 }
 0x20e   : >> { %v1274_v4 = vmul.f32 %v1517_v52, %v1266_v60  ;;  %1288 = sbr.rel (%p1520_p7) target bundleno = 535 (0x217), region = 39  ;;  %1292 = vst [vmem:[%s1723_s30 + $0x18] sm:$0xff] (!%p1520_p7), %v1280_v18 }
 0x210   : >> { %v1282_v38 = vadd.f32 %v1274_v4, %v1205_v21  ;;  %v1228_v12 = vpop.permute.xlu1 %1227 }
 0x211   : >> { %v1268_v59 = vsel %vm945_vm3, %v1259_v13, %v1228_v12 }
 0x212   : >> { %v1276_v11 = vmul.f32 %v1519_v42, %v1268_v59  ;;  %1294 = vst [vmem:[%s1723_s30 + $0x28] sm:$0xff] (!%p1520_p7), %v1282_v38 }
 0x214   : >> { %v1284_v7 = vadd.f32 %v1276_v11, %v1207_v62 }
 0x216   : >> { %1296 = vst [vmem:[%s1723_s30 + $0x38] sm:$0xff] %v1284_v7 }
 0x217 PF: >> { %p1521_p8 = scmp.ge.s32.totalorder %s1653_s3, 1 }
 0x218   : >> { %1301 = vst [vmem:[#allocation2 + $0x2] sm:$0xff] (!%p1521_p8), %v1277_v20  ;;  %1302 = vst [vmem:[#allocation2 + $0xa] sm:$0xff] (!%p1521_p8), %v1278_v9  ;;  %v3257_v46 = vld [vmem:[#allocation3_spill] sm:$0xff] (!%p1521_p8)  ;;  %v3258_v25 = vld [vmem:[#allocation4_spill] sm:$0xff] (!%p1521_p8) }
 0x219   : >> { %1300 = sbr.rel (%p1521_p8) target bundleno = 544 (0x220), region = 43  ;;  %1303 = vst [vmem:[#allocation2 + $0x12] sm:$0xff] (!%p1521_p8), %v1279_v27  ;;  %1304 = vst [vmem:[#allocation2 + $0x2a] sm:$0xff] (!%p1521_p8), %v2948_v30  ;;  %v1310_v19 = vrot.slane (!%p1521_p8), %v1277_v20, %v3257_v46  ;;  %v1314_v16 = vrot.slane (!%p1521_p8), %v2948_v30, %v3257_v46  ;;  %v1320_v35 = vrot.slane (!%p1521_p8), %v1279_v27, %v3258_v25 }
 0x21a   : >> { %1305 = vst [vmem:[#allocation2 + $0x32] sm:$0xff] (!%p1521_p8), %v1282_v38  ;;  %1306 = vst [vmem:[#allocation2 + $0x3a] sm:$0xff] (!%p1521_p8), %v1283_v33  ;;  %v1324_v57 = vrot.slane (!%p1521_p8), %v1283_v33, %v3258_v25 }
 0x21b   : >> { %1315 = vst [vmem:[#allocation2] sm:$0x3] (!%p1521_p8), %v1310_v19  ;;  %1316 = vst [vmem:[#allocation2 + $0x28] sm:$0x3] (!%p1521_p8), %v1314_v16 }
 0x21c   : >> { %1325 = vst [vmem:[#allocation2 + $0x1a] sm:$0xff] (!%p1521_p8), %v1320_v35  ;;  %1326 = vst [vmem:[#allocation2 + $0x22] sm:$0x3] (!%p1521_p8), %v1320_v35 }
 0x21d   : >> { %1327 = vst [vmem:[#allocation2 + $0x42] sm:$0xff] (!%p1521_p8), %v1324_v57  ;;  %1328 = vst [vmem:[#allocation2 + $0x4a] sm:$0x3] (!%p1521_p8), %v1324_v57 }
 0x220 PF: >> { %s249_s3 = sadd.s32 1, %s1653_s3  }
 0x221   : >> { %p246_p9 = scmp.ge.s32.totalorder %s249_s3, 2  }
 0x223   : > { %248 = sbr.rel (!%p246_p9) target bundleno = 29 (0x1d), region = 91 }
 0x22a PF: > { %s12_s13 = sadd.s32 1, %s1649_s13   ;;  %s3259_s9 = smov %s1641_s11 }
 0x22b   : > { %p9_p10 = scmp.ge.s32.totalorder %s12_s13, 6   ;;  %s3260_s10 = smov %s1645_s12 }
 0x22c   : > { %s3261_s11 = smov %s3264_s14  ;;  %s3262_s12 = smov %s3268_s15 }
 0x22d   :  { %11 = sbr.rel (!%p9_p10) target bundleno = 3 (0x3), region = 102 }

// kernel: pamr_pallas.2
= control target key start
LH: loop header
LB: loop body
LE: loop exit
PB: predicated region body
PF: predicated region fallthrough
CT: control target
= control target key end

     0   :  { %s3137_s6 = smov 0   ;;  %s3139_s7 = smov 0   ;;  %s6276_s0 = inlined_call_operand.vmem [shape: f32[2,4,36,128], index: 0, kind: input, shape index: {}]   ;;  %s6277_s1 = inlined_call_operand.vmem [shape: f32[2,16,32,128], index: 1, kind: output, shape index: {}]  }
   0x1   :  { %s3141_s8 = smov 0   ;;  %s3143_s9 = smov 0  }
   0x2   :  { %s3145_s10 = smov 0   ;;  %s3147_s11 = smov 0  }
   0x3   :  { %s3149_s12 = smov 0  }
   0x4 LB: > { %s20_s13 = sadd.s32 1, %s3111_s10  ;;  %s23_s14 = sadd.s32 1, %s3115_s11  ;;  %s3119_s12 = sphi %s3149_s12, %s11_s12   ;;  %s3115_s11 = sphi %s3147_s11, %s7180_s11   ;;  %s3111_s10 = sphi %s3145_s10, %s7179_s10   ;;  %s3107_s9 = sphi %s3143_s9, %s7178_s9   ;;  %s3103_s8 = sphi %s3141_s8, %s7177_s8   ;;  %s3099_s7 = sphi %s3139_s7, %s7176_s7   ;;  %s3095_s6 = sphi %s3137_s6, %s7175_s6  }
   0x5   : > { %p21_p0 = scmp.ge.s32.totalorder %s20_s13, 2  ;;  %s2784_s15 = sadd.s32 4294967295, %s3119_s12  }
   0x6   : > { %p68_p1 = scmp.ne.s32.totalorder %s3099_s7, %s3095_s6  ;;  %p69_p2 = scmp.eq.s32.totalorder %s2784_s15, 3 }
   0x7   : > { %s7182_s13 = smov (%p21_p0, %s20_s13), 0  ;;  %s7184_s14 = smov (!%p21_p0, %s23_s14), %s3115_s11 }
   0x8   : > { %s54_s16 = ssub.s32 %s3111_s10, %s7182_s13  ;;  %p25_p3 = scmp.ge.s32.totalorder %s7184_s14, 2 }
   0x9   : > { %p2788_p4 = scmp.ge.s32.totalorder %s3119_s12, 1  ;;  %p3183_p5 = por %p69_p2, %p68_p1 }
   0xa   : > { %p101_p6 = scmp.lt.s32.totalorder %s3119_s12, 5  ;;  %s7186_s14 = smov (%p25_p3, %s7184_s14), 0 }
   0xb   : > { %s53_s18 = ssub.s32 %s3115_s11, %s7186_s14  ;;  %s58_s20 = sadd.s32 1, %s3099_s7 }
   0xc   : > { %p102_p7 = pnand %p2788_p4, %p101_p6  ;;  %s55_s19 = sor.u32 %s54_s16, %s53_s18 }
   0xd   : > { %p56_p8 = scmp.eq.s32.totalorder %s55_s19, 0 }
   0xe   : > { %105 = sbr.rel (%p102_p7) target bundleno = 783 (0x30f), region = 24 }
   0xf   : > { %s3194_s21 = scalar_select %p56_p8, %s3099_s7, %s58_s20  }
  0x15   : > { %p120_p9 = scmp.lt.s32.totalorder %s3107_s9, 1  ;;  %v6280_v0 = vmov 0   ;;  %s2791_s24 = sshll.u32 %s3103_s8, 4  ;;  %v6278_v9 = vmov 23  }
  0x16   : > { %2928 = vset.pattern.permute.xlu1 %v6280_v0  ;;  %2927 = vset.pattern.permute.xlu0 %v6280_v0  ;;  %s3122_s29 = smov 1   ;;  %s3123_s30 = smov 127  }
  0x17   : > { %s121_s22 = scalar_select %p120_p9, %s3107_s9, 1 }
  0x18   : > { %s3125_s2 = smov 2   ;;  %s3126_s3 = smov 126  }
  0x19   : > { %s2864_s23 = smul.u32 160, %s121_s22  ;;  %s117_s4 = sand.u32 1, %s3095_s6  }
  0x1a   : > { %s2789_s5 = sshll.u32 %s117_s4, 8  ;;  %s2859_s15 = sshll.u32 (%p3183_p5), %s3103_s8, 1 }
  0x1b   : > { %s124_s27 = scalar_lea.vmem %s6276_s0, %s2864_s23  ;;  %s6034_s6 = scalar_lea.vmem [#allocation4], %s2789_s5 }
  0x1c   : > { %s3204_s28 = scalar_lea.vmem %s124_s27, %s2791_s24  ;;  %s2860_s16 = sshll.u32 (%p3183_p5), %s3107_s9, 6 }
  0x1d   : > { %v3207_v1 = vld [vmem:[%s3204_s28 + $0x29] sm:$0xff]  ;;  %v3210_v2 = vld [vmem:[%s3204_s28 + $0x1] sm:$0xff]  ;;  %v3217_v3 = vld [vmem:[%s3204_s28 + $0x31] sm:$0xff]  ;;  %s2546_s17 = sadd.s32 (%p3183_p5), %s2860_s16, %s2859_s15 }
  0x1e   : > { %153 = vrot.lane.b32.xlu1 %v3207_v1, %s3122_s29  ;;  %149 = vrot.lane.b32.xlu0 %v3210_v2, %s3122_s29  ;;  %v3220_v4 = vld [vmem:[%s3204_s28 + $0x9] sm:$0xff]  ;;  %v3227_v5 = vld [vmem:[%s3204_s28 + $0x59] sm:$0xff]  ;;  %s2861_s18 = sshll.u32 (%p3183_p5), %s2546_s17, 3 }
  0x1f   : > { %v3230_v6 = vld [vmem:[%s3204_s28 + $0x51] sm:$0xff]  ;;  %v3237_v7 = vld [vmem:[%s3204_s28 + $0x81] sm:$0xff]  ;;  %v3240_v8 = vld [vmem:[%s3204_s28 + $0x79] sm:$0xff]  ;;  %s6198_s22 = scalar_lea.vmem (%p3183_p5), %s6277_s1, %s2861_s18 }
  0x20   : > { %v3272_v10 = vld [vmem:[%s3204_s28 + $0x2] sm:$0xff]  ;;  %v3278_v11 = vld [vmem:[%s3204_s28 + $0x2a] sm:$0xff]  ;;  %v3284_v12 = vld [vmem:[%s3204_s28 + $0x52] sm:$0xff] }
  0x21   : > { %v3290_v13 = vld [vmem:[%s3204_s28 + $0x7a] sm:$0xff]  ;;  %v3298_v14 = vld [vmem:[%s3204_s28 + $0xa] sm:$0xff]  ;;  %v3301_v15 = vld [vmem:[%s3204_s28 + $0x32] sm:$0xff] }
  0x22   : > { %155 = vrot.lane.b32.xlu1 %v3217_v3, %s3122_s29  ;;  %151 = vrot.lane.b32.xlu0 %v3220_v4, %s3122_s29  ;;  %v3307_v16 = vld [vmem:[%s3204_s28 + $0x5a] sm:$0xff]  ;;  %v3314_v17 = vld [vmem:[%s3204_s28 + $0x82] sm:$0xff] }
  0x23   : > { %v3333_v18 = vld [vmem:[%s3204_s28 + $0x3] sm:$0xff]  ;;  %v3339_v19 = vld [vmem:[%s3204_s28 + $0x2b] sm:$0xff]  ;;  %v3346_v20 = vld [vmem:[%s3204_s28 + $0x53] sm:$0xff] }
  0x24   : > { %v3354_v21 = vld [vmem:[%s3204_s28 + $0x7b] sm:$0xff]  ;;  %v3364_v22 = vld [vmem:[%s3204_s28 + $0x33] sm:$0xff]  ;;  %v3378_v26 = vld [vmem:[%s3204_s28 + $0x83] sm:$0xff] }
  0x25   : > { %v3369_v23 = vld [vmem:[%s3204_s28 + $0x5b] sm:$0xff]  ;;  %v3383_v27 = vld [vmem:[%s3204_s28 + $0xb] sm:$0xff] }
  0x26   : > { %159 = vrot.lane.b32.xlu1 %v3227_v5, %s3122_s29  ;;  %157 = vrot.lane.b32.xlu0 %v3230_v6, %s3122_s29  ;;  %v3413_v34 = vld [vmem:[%s3204_s28] sm:$0xff]  ;;  %v3423_v37 = vld [vmem:[%s3204_s28 + $0x30] sm:$0xff] }
  0x27   : > { %v3433_v40 = vld [vmem:[%s3204_s28 + $0x78] sm:$0xff]  ;;  %v3449_v45 = vld [vmem:[%s3204_s28 + $0x28] sm:$0xff]  ;;  %v3459_v48 = vld [vmem:[%s3204_s28 + $0x50] sm:$0xff] }
  0x28   : > { %v3469_v51 = vld [vmem:[%s3204_s28 + $0x4] sm:$0xff]  ;;  %v3479_v54 = vld [vmem:[%s3204_s28 + $0x34] sm:$0xff] }
  0x29   : > { %v3490_v57 = vld [vmem:[%s3204_s28 + $0x80] sm:$0xff]  ;;  %v3501_v60 = vld [vmem:[%s3204_s28 + $0x8] sm:$0xff] }
  0x2a   : > { %163 = vrot.lane.b32.xlu1 %v3237_v7, %s3122_s29  ;;  %161 = vrot.lane.b32.xlu0 %v3240_v8, %s3122_s29 }
  0x2e   : > { %175 = vperm.xlu1 %2928, %v3220_v4   ;;  %170 = vperm.xlu0 %2927, %v3210_v2  }
  0x32   : > { %180 = vperm.xlu1 %2928, %v3207_v1   ;;  %185 = vperm.xlu0 %2927, %v3217_v3  }
  0x36   : > { %190 = vperm.xlu1 %2928, %v3230_v6   ;;  %195 = vperm.xlu0 %2927, %v3227_v5  }
  0x3a   : > { %200 = vperm.xlu1 %2928, %v3240_v8   ;;  %205 = vperm.xlu0 %2927, %v3237_v7  }
  0x3e   : > { %297 = vrot.lane.b32.xlu1 %v3210_v2, %s3123_s30  ;;  %299 = vrot.lane.b32.xlu0 %v3220_v4, %s3123_s30 }
  0x3f   : > { %2929 = vset.pattern.permute.xlu1 %v6278_v9 }
  0x42   : > { %301 = vrot.lane.b32.xlu1 %v3207_v1, %s3123_s30  ;;  %303 = vrot.lane.b32.xlu0 %v3217_v3, %s3123_s30 }
  0x46   : > { %305 = vrot.lane.b32.xlu1 %v3230_v6, %s3123_s30  ;;  %307 = vrot.lane.b32.xlu0 %v3227_v5, %s3123_s30 }
  0x4a   : > { %309 = vrot.lane.b32.xlu1 %v3240_v8, %s3123_s30  ;;  %311 = vrot.lane.b32.xlu0 %v3237_v7, %s3123_s30 }
  0x4e   : > { %317 = vperm.xlu1 %2929, %v3210_v2   ;;  %397 = vrot.lane.b32.xlu0 %v3272_v10, %s3122_s29 }
  0x52   : > { %325 = vperm.xlu1 %2929, %v3207_v1   ;;  %401 = vrot.lane.b32.xlu0 %v3278_v11, %s3122_s29 }
  0x56   : > { %329 = vperm.xlu1 %2929, %v3217_v3   ;;  %405 = vrot.lane.b32.xlu0 %v3284_v12, %s3122_s29 }
  0x5a   : > { %337 = vperm.xlu1 %2929, %v3227_v5   ;;  %409 = vrot.lane.b32.xlu0 %v3290_v13, %s3122_s29 }
  0x5e   : > { %345 = vperm.xlu1 %2929, %v3237_v7   ;;  %415 = vperm.xlu0 %2927, %v3272_v10  }
  0x62   : > { %399 = vrot.lane.b32.xlu1 %v3298_v14, %s3122_s29  ;;  %430 = vperm.xlu0 %2927, %v3301_v15  }
  0x63   : > { %2930 = vset.pattern.permute.xlu1 %v6280_v0 }
  0x66   : > { %403 = vrot.lane.b32.xlu1 %v3301_v15, %s3122_s29  ;;  %440 = vperm.xlu0 %2927, %v3307_v16  }
  0x6a   : > { %407 = vrot.lane.b32.xlu1 %v3307_v16, %s3122_s29  ;;  %450 = vperm.xlu0 %2927, %v3314_v17  }
  0x6e   : > { %411 = vrot.lane.b32.xlu1 %v3314_v17, %s3122_s29  ;;  %504 = vrot.lane.b32.xlu0 %v3298_v14, %s3123_s30 }
  0x72   : > { %420 = vperm.xlu1 %2930, %v3298_v14   ;;  %508 = vrot.lane.b32.xlu0 %v3301_v15, %s3123_s30 }
  0x76   : > { %425 = vperm.xlu1 %2930, %v3278_v11   ;;  %512 = vrot.lane.b32.xlu0 %v3307_v16, %s3123_s30 }
  0x7a   : > { %435 = vperm.xlu1 %2930, %v3284_v12   ;;  %516 = vrot.lane.b32.xlu0 %v3314_v17, %s3123_s30 }
  0x7e   : > { %445 = vperm.xlu1 %2930, %v3290_v13   ;;  %609 = vrot.lane.b32.xlu0 %v3333_v18, %s3122_s29 }
  0x82   : > { %502 = vrot.lane.b32.xlu1 %v3272_v10, %s3123_s30  ;;  %613 = vrot.lane.b32.xlu0 %v3339_v19, %s3122_s29 }
  0x83   : > { %2931 = vset.pattern.permute.xlu1 %v6278_v9 }
  0x86   : > { %506 = vrot.lane.b32.xlu1 %v3278_v11, %s3123_s30  ;;  %617 = vrot.lane.b32.xlu0 %v3346_v20, %s3122_s29 }
  0x8a   : > { %510 = vrot.lane.b32.xlu1 %v3284_v12, %s3123_s30  ;;  %621 = vrot.lane.b32.xlu0 %v3354_v21, %s3122_s29 }
  0x8e   : > { %514 = vrot.lane.b32.xlu1 %v3290_v13, %s3123_s30  ;;  %627 = vperm.xlu0 %2927, %v3333_v18  }
  0x90   : > { %v3371_v24 = vpop.permute.xlu0 %149  ;;  %v3375_v25 = vpop.permute.xlu1 %153 }
  0x92   : > { %519 = vperm.xlu1 %2931, %v3272_v10   ;;  %642 = vperm.xlu0 %2927, %v3364_v22  }
  0x94   : > { %v3385_v28 = vpop.permute.xlu0 %151  ;;  %v3387_v29 = vpop.permute.xlu1 %155 }
  0x96   : > { %527 = vperm.xlu1 %2931, %v3278_v11   ;;  %652 = vperm.xlu0 %2927, %v3369_v23  }
  0x98   : > { %v3392_v30 = vpop.permute.xlu0 %157  ;;  %v3397_v31 = vpop.permute.xlu1 %159 }
  0x99   : > { %6528 = vst [vmem:[#allocation5_spill] sm:$0xff] %v3397_v31 }
  0x9a   : > { %531 = vperm.xlu1 %2931, %v3301_v15   ;;  %662 = vperm.xlu0 %2927, %v3378_v26  }
  0x9c   : > { %v3403_v32 = vpop.permute.xlu0 %161  ;;  %v3406_v33 = vpop.permute.xlu1 %163 }
  0x9d   : > { %6529 = vst [vmem:[#allocation6_spill] sm:$0xff] %v3403_v32  ;;  %6530 = vst [vmem:[#allocation7_spill] sm:$0xff] %v3406_v33 }
  0x9e   : > { %539 = vperm.xlu1 %2931, %v3307_v16   ;;  %757 = vrot.lane.b32.xlu0 %v3383_v27, %s3123_s30 }
  0xa2   : > { %547 = vperm.xlu1 %2931, %v3314_v17   ;;  %761 = vrot.lane.b32.xlu0 %v3364_v22, %s3123_s30 }
  0xa6   : > { %611 = vrot.lane.b32.xlu1 %v3383_v27, %s3122_s29  ;;  %765 = vrot.lane.b32.xlu0 %v3369_v23, %s3123_s30 }
  0xa7   : > { %2932 = vset.pattern.permute.xlu1 %v6280_v0  ;;  %v3519_v0 = vld [vmem:[%s3204_s28 + $0x5c] sm:$0xff] }
  0xa8   : > { %6543 = vst [vmem:[#allocation20_spill] sm:$0xff] %v3519_v0 }
  0xaa   : > { %615 = vrot.lane.b32.xlu1 %v3364_v22, %s3122_s29  ;;  %769 = vrot.lane.b32.xlu0 %v3378_v26, %s3123_s30 }
  0xad   : > { %v3415_v35 = vpop.permute.xlu1 %175  ;;  %v3417_v36 = vpop.permute.xlu0 %170 }
  0xae   : > { %619 = vrot.lane.b32.xlu1 %v3369_v23, %s3122_s29  ;;  %882 = vperm.xlu0 %2927, %v3413_v34  }
  0xb1   : > { %v3425_v38 = vpop.permute.xlu1 %180  ;;  %v3427_v39 = vpop.permute.xlu0 %185 }
  0xb2   : > { %623 = vrot.lane.b32.xlu1 %v3378_v26, %s3122_s29  ;;  %897 = vperm.xlu0 %2927, %v3423_v37  }
  0xb5   : > { %v3435_v41 = vpop.permute.xlu1 %190  ;;  %v3437_v42 = vpop.permute.xlu0 %195 }
  0xb6   : > { %6531 = vst [vmem:[#allocation8_spill] sm:$0xff] %v3435_v41  ;;  %6532 = vst [vmem:[#allocation9_spill] sm:$0xff] %v3437_v42  ;;  %632 = vperm.xlu1 %2932, %v3383_v27   ;;  %912 = vperm.xlu0 %2927, %v3433_v40  }
  0xb9   : > { %v3441_v43 = vpop.permute.xlu1 %200  ;;  %v3443_v44 = vpop.permute.xlu0 %205 }
  0xba   : > { %6533 = vst [vmem:[#allocation10_spill] sm:$0xff] %v3441_v43  ;;  %6534 = vst [vmem:[#allocation11_spill] sm:$0xff] %v3443_v44  ;;  %637 = vperm.xlu1 %2932, %v3339_v19   ;;  %861 = vrot.lane.b32.xlu0 %v3413_v34, %s3125_s2 }
  0xbd   : > { %v3451_v46 = vpop.permute.xlu1 %297  ;;  %v3453_v47 = vpop.permute.xlu0 %299 }
  0xbe   : > { %6535 = vst [vmem:[#allocation12_spill] sm:$0xff] %v3453_v47  ;;  %647 = vperm.xlu1 %2932, %v3346_v20   ;;  %865 = vrot.lane.b32.xlu0 %v3449_v45, %s3125_s2  ;;  %v3528_v47 = vld [vmem:[%s3204_s28 + $0x58] sm:$0xff] }
  0xc1   : > { %v3461_v49 = vpop.permute.xlu1 %301  ;;  %v3463_v50 = vpop.permute.xlu0 %303 }
  0xc2   : > { %6536 = vst [vmem:[#allocation13_spill] sm:$0xff] %v3463_v50  ;;  %657 = vperm.xlu1 %2932, %v3354_v21   ;;  %869 = vrot.lane.b32.xlu0 %v3459_v48, %s3125_s2  ;;  %v6558_v50 = vmov 23  }
  0xc5   : > { %v3471_v52 = vpop.permute.xlu1 %305  ;;  %v3473_v53 = vpop.permute.xlu0 %307 }
  0xc6   : > { %6537 = vst [vmem:[#allocation14_spill] sm:$0xff] %v3471_v52  ;;  %6538 = vst [vmem:[#allocation15_spill] sm:$0xff] %v3473_v53  ;;  %755 = vrot.lane.b32.xlu1 %v3333_v18, %s3123_s30  ;;  %1268 = vperm.xlu0 %2927, %v3469_v51  }
  0xc7   : > { %2933 = vset.pattern.permute.xlu1 %v6278_v9 }
  0xc9   : > { %v3482_v55 = vpop.permute.xlu1 %309  ;;  %v3484_v56 = vpop.permute.xlu0 %311 }
  0xca   : > { %6539 = vst [vmem:[#allocation16_spill] sm:$0xff] %v3482_v55  ;;  %6540 = vst [vmem:[#allocation17_spill] sm:$0xff] %v3484_v56  ;;  %759 = vrot.lane.b32.xlu1 %v3339_v19, %s3123_s30  ;;  %1283 = vperm.xlu0 %2927, %v3479_v54  }
  0xcd   : > { %v3492_v58 = vpop.permute.xlu1 %317  ;;  %v3494_v59 = vpop.permute.xlu0 %397 }
  0xce   : > { %763 = vrot.lane.b32.xlu1 %v3346_v20, %s3123_s30  ;;  %875 = vrot.lane.b32.xlu0 %v3490_v57, %s3125_s2 }
  0xd1   : > { %v3503_v61 = vpop.permute.xlu1 %325  ;;  %v3505_v62 = vpop.permute.xlu0 %401 }
  0xd2   : > { %767 = vrot.lane.b32.xlu1 %v3354_v21, %s3123_s30  ;;  %1012 = vrot.lane.b32.xlu0 %v3501_v60, %s3126_s3 }
  0xd5   : > { %v3511_v63 = vpop.permute.xlu1 %329  ;;  %v3513_v9 = vpop.permute.xlu0 %405 }
  0xd6   : > { %6541 = vst [vmem:[#allocation18_spill] sm:$0xff] %v3511_v63  ;;  %6542 = vst [vmem:[#allocation19_spill] sm:$0xff] %v3513_v9  ;;  %772 = vperm.xlu1 %2933, %v3333_v18   ;;  %1016 = vrot.lane.b32.xlu0 %v3423_v37, %s3126_s3  ;;  %v3553_v63 = vld [vmem:[%s3204_s28 + $0x84] sm:$0xff] }
  0xd7   : > { %6553 = vst [vmem:[#allocation29_spill] sm:$0xff] %v3553_v63 }
  0xd9   : > { %v3521_v55 = vpop.permute.xlu1 %337  ;;  %v3523_v52 = vpop.permute.xlu0 %409 }
  0xda   : > { %6544 = vst [vmem:[#allocation21_spill] sm:$0xff] %v3521_v55  ;;  %6545 = vst [vmem:[#allocation22_spill] sm:$0xff] %v3523_v52  ;;  %780 = vperm.xlu1 %2933, %v3339_v19   ;;  %1293 = vperm.xlu0 %2927, %v3519_v0  }
  0xdd   : > { %v3530_v56 = vpop.permute.xlu1 %345  ;;  %v3532_v9 = vpop.permute.xlu0 %415 }
  0xde   : > { %6546 = vst [vmem:[#allocation23_spill] sm:$0xff] %v3530_v56  ;;  %6547 = vst [vmem:[#allocation24_spill] sm:$0xff] %v3532_v9  ;;  %784 = vperm.xlu1 %2933, %v3364_v22   ;;  %1020 = vrot.lane.b32.xlu0 %v3528_v47, %s3126_s3  ;;  %v6552_v56 = vmov 0  }
  0xe1   : > { %v3537_v53 = vpop.permute.xlu1 %399  ;;  %v3539_v55 = vpop.permute.xlu0 %430 }
  0xe2   : > { %6548 = vst [vmem:[#allocation25_spill] sm:$0xff] %v3537_v53  ;;  %6549 = vst [vmem:[#allocation26_spill] sm:$0xff] %v3539_v55  ;;  %792 = vperm.xlu1 %2933, %v3369_v23   ;;  %1112 = vrot.lane.b32.xlu0 %v3298_v14, %s3125_s2 }
  0xe5   : > { %v3544_v52 = vpop.permute.xlu1 %403  ;;  %v3546_v0 = vpop.permute.xlu0 %440 }
  0xe6   : > { %6550 = vst [vmem:[#allocation27_spill] sm:$0xff] %v3544_v52  ;;  %6551 = vst [vmem:[#allocation28_spill] sm:$0xff] %v3546_v0  ;;  %2934 = vset.pattern.permute.xlu1 %v6552_v56  ;;  %1116 = vrot.lane.b32.xlu0 %v3301_v15, %s3125_s2 }
  0xe7   : > { %887 = vperm.xlu1 %2934, %v3501_v60  }
  0xe9   : > { %v3555_v53 = vpop.permute.xlu1 %407  ;;  %v3557_v55 = vpop.permute.xlu0 %450 }
  0xea   : > { %6554 = vst [vmem:[#allocation30_spill] sm:$0xff] %v3555_v53  ;;  %6555 = vst [vmem:[#allocation31_spill] sm:$0xff] %v3557_v55  ;;  %1303 = vperm.xlu0 %2927, %v3553_v63  }
  0xeb   : > { %892 = vperm.xlu1 %2934, %v3449_v45  }
  0xed   : > { %v3561_v52 = vpop.permute.xlu1 %411  ;;  %v3563_v0 = vpop.permute.xlu0 %504 }
  0xee   : > { %6556 = vst [vmem:[#allocation32_spill] sm:$0xff] %v3561_v52  ;;  %6557 = vst [vmem:[#allocation33_spill] sm:$0xff] %v3563_v0  ;;  %2939 = vset.pattern.permute.xlu0 %v6558_v50 }
  0xef   : > { %2935 = vset.pattern.permute.xlu1 %v6558_v50  ;;  %321 = vperm.xlu0 %2939, %v3220_v4  }
  0xf0   : > { %796 = vperm.xlu1 %2935, %v3354_v21  }
  0xf1   : > { %v3569_v44 = vpop.permute.xlu1 %420  ;;  %v3571_v53 = vpop.permute.xlu0 %508 }
  0xf2   : > { %6559 = vst [vmem:[#allocation34_spill] sm:$0xff] %v3569_v44  ;;  %6560 = vst [vmem:[#allocation35_spill] sm:$0xff] %v3571_v53 }
  0xf3   : > { %333 = vperm.xlu0 %2939, %v3230_v6  }
  0xf4   : > { %2936 = vset.pattern.permute.xlu1 %v6552_v56 }
  0xf5   : > { %v3575_v63 = vpop.permute.xlu1 %425  ;;  %902 = vperm.xlu1 %2936, %v3459_v48   ;;  %v3578_v0 = vpop.permute.xlu0 %512 }
  0xf6   : > { %6561 = vst [vmem:[#allocation36_spill] sm:$0xff] %v3575_v63  ;;  %6562 = vst [vmem:[#allocation37_spill] sm:$0xff] %v3578_v0 }
  0xf7   : > { %341 = vperm.xlu0 %2939, %v3240_v8  }
  0xf9   : > { %v3581_v55 = vpop.permute.xlu1 %435  ;;  %907 = vperm.xlu1 %2936, %v3528_v47   ;;  %v3584_v52 = vpop.permute.xlu0 %516 }
  0xfa   : > { %6563 = vst [vmem:[#allocation38_spill] sm:$0xff] %v3581_v55  ;;  %6564 = vst [vmem:[#allocation39_spill] sm:$0xff] %v3584_v52 }
  0xfb   : > { %523 = vperm.xlu0 %2939, %v3298_v14  }
  0xfd   : > { %v3587_v53 = vpop.permute.xlu1 %445  ;;  %917 = vperm.xlu1 %2936, %v3490_v57   ;;  %v3590_v44 = vpop.permute.xlu0 %609 }
  0xfe   : > { %6565 = vst [vmem:[#allocation40_spill] sm:$0xff] %v3587_v53 }
  0xff   : > { %535 = vperm.xlu0 %2939, %v3284_v12  }
 0x101   : > { %2937 = vset.pattern.permute.xlu1 %v6558_v50  ;;  %v3594_v0 = vpop.permute.xlu1 %502  ;;  %v3596_v33 = vpop.permute.xlu0 %613 }
 0x102   : > { %6566 = vst [vmem:[#allocation41_spill] sm:$0xff] %v3596_v33  ;;  %1030 = vperm.xlu1 %2937, %v3413_v34  }
 0x103   : > { %543 = vperm.xlu0 %2939, %v3290_v13  }
 0x105   : > { %v3600_v52 = vpop.permute.xlu1 %506  ;;  %v3602_v55 = vpop.permute.xlu0 %617 }
 0x106   : > { %6567 = vst [vmem:[#allocation42_spill] sm:$0xff] %v3600_v52  ;;  %6568 = vst [vmem:[#allocation43_spill] sm:$0xff] %v3602_v55  ;;  %1038 = vperm.xlu1 %2937, %v3449_v45  }
 0x107   : > { %776 = vperm.xlu0 %2939, %v3383_v27  }
 0x109   : > { %v3606_v53 = vpop.permute.xlu1 %510  ;;  %v3608_v43 = vpop.permute.xlu0 %621 }
 0x10a   : > { %6569 = vst [vmem:[#allocation44_spill] sm:$0xff] %v3606_v53  ;;  %6570 = vst [vmem:[#allocation45_spill] sm:$0xff] %v3608_v43  ;;  %1042 = vperm.xlu1 %2937, %v3423_v37  }
 0x10b   : > { %788 = vperm.xlu0 %2939, %v3346_v20  }
 0x10d   : > { %v3612_v32 = vpop.permute.xlu1 %514  ;;  %v3614_v33 = vpop.permute.xlu0 %627 }
 0x10e   : > { %6571 = vst [vmem:[#allocation46_spill] sm:$0xff] %v3612_v32  ;;  %1050 = vperm.xlu1 %2937, %v3528_v47  }
 0x10f   : > { %800 = vperm.xlu0 %2939, %v3378_v26  }
 0x111   : > { %v3618_v55 = vpop.permute.xlu1 %519  ;;  %v3620_v42 = vpop.permute.xlu0 %642 }
 0x112   : > { %6572 = vst [vmem:[#allocation47_spill] sm:$0xff] %v3618_v55  ;;  %6573 = vst [vmem:[#allocation48_spill] sm:$0xff] %v3620_v42  ;;  %863 = vrot.lane.b32.xlu1 %v3501_v60, %s3125_s2  ;;  %v3639_v42 = vld [vmem:[%s3204_s28 + $0xc] sm:$0xff] }
 0x113   : > { %1034 = vperm.xlu0 %2939, %v3501_v60   ;;  %6578 = vst [vmem:[#allocation53_spill] sm:$0xff] %v3639_v42 }
 0x115   : > { %v3625_v53 = vpop.permute.xlu1 %527  ;;  %v3627_v43 = vpop.permute.xlu0 %652 }
 0x116   : > { %6574 = vst [vmem:[#allocation49_spill] sm:$0xff] %v3625_v53  ;;  %6575 = vst [vmem:[#allocation50_spill] sm:$0xff] %v3627_v43  ;;  %867 = vrot.lane.b32.xlu1 %v3423_v37, %s3125_s2 }
 0x117   : > { %1046 = vperm.xlu0 %2939, %v3459_v48  }
 0x119   : > { %v3632_v32 = vpop.permute.xlu1 %531  ;;  %v3634_v31 = vpop.permute.xlu0 %662 }
 0x11a   : > { %6576 = vst [vmem:[#allocation51_spill] sm:$0xff] %v3632_v32  ;;  %6577 = vst [vmem:[#allocation52_spill] sm:$0xff] %v3634_v31  ;;  %1058 = vperm.xlu1 %2937, %v3490_v57  }
 0x11b   : > { %1054 = vperm.xlu0 %2939, %v3433_v40  }
 0x11d   : > { %v3641_v52 = vpop.permute.xlu1 %539  ;;  %v3643_v53 = vpop.permute.xlu0 %757 }
 0x11e   : > { %6579 = vst [vmem:[#allocation54_spill] sm:$0xff] %v3641_v52  ;;  %6580 = vst [vmem:[#allocation55_spill] sm:$0xff] %v3643_v53  ;;  %871 = vrot.lane.b32.xlu1 %v3528_v47, %s3125_s2  ;;  %v3657_v52 = vld [vmem:[%s3204_s28 + $0x2c] sm:$0xff] }
 0x11f   : > { %1417 = vperm.xlu0 %2939, %v3639_v42   ;;  %2938 = vset.pattern.permute.xlu1 %v6552_v56 }
 0x121   : > { %v3649_v43 = vpop.permute.xlu1 %547  ;;  %v3651_v31 = vpop.permute.xlu0 %761 }
 0x122   : > { %6581 = vst [vmem:[#allocation56_spill] sm:$0xff] %v3649_v43  ;;  %6582 = vst [vmem:[#allocation57_spill] sm:$0xff] %v3651_v31  ;;  %1273 = vperm.xlu1 %2938, %v3639_v42  }
 0x123   : > { %1022 = vrot.lane.b32.xlu0 %v3433_v40, %s3126_s3 }
 0x125   : > { %v3659_v53 = vpop.permute.xlu1 %611  ;;  %v3661_v32 = vpop.permute.xlu0 %765 }
 0x126   : > { %6583 = vst [vmem:[#allocation58_spill] sm:$0xff] %v3659_v53  ;;  %6584 = vst [vmem:[#allocation59_spill] sm:$0xff] %v3661_v32  ;;  %1278 = vperm.xlu1 %2938, %v3657_v52   ;;  %v3681_v32 = vld [vmem:[%s3204_s28 + $0x54] sm:$0xff] }
 0x127   : > { %1118 = vrot.lane.b32.xlu0 %v3284_v12, %s3125_s2 }
 0x129   : > { %v3666_v56 = vpop.permute.xlu1 %615  ;;  %v3668_v43 = vpop.permute.xlu0 %769 }
 0x12a   : > { %6585 = vst [vmem:[#allocation60_spill] sm:$0xff] %v3666_v56  ;;  %6586 = vst [vmem:[#allocation61_spill] sm:$0xff] %v3668_v43  ;;  %873 = vrot.lane.b32.xlu1 %v3433_v40, %s3125_s2  ;;  %v128_v56 = vlaneseq }
 0x12b   : > { %1175 = vrot.lane.b32.xlu0 %v3272_v10, %s3126_s3 }
 0x12c   : > { %v3690_v40 = vand.u32 127, %v128_v56 }
 0x12d   : > { %v3674_v42 = vpop.permute.xlu1 %619  ;;  %v883_v53 = vpop.permute.xlu0 %882 }
 0x12e   : > { %6587 = vst [vmem:[#allocation62_spill] sm:$0xff] %v3674_v42  ;;  %1010 = vrot.lane.b32.xlu1 %v3413_v34, %s3126_s3  ;;  %6590 = vst [vmem:[#allocation65_spill] sm:$0xff] %v3690_v40  ;;  %vm877_vm0 = vcmp.lt.s32.totalorder %v3690_v40, 2  ;;  %vm165_vm1 = vcmp.lt.s32.totalorder %v3690_v40, 1  ;;  %vm313_vm2 = vcmp.ge.s32.totalorder %v3690_v40, 23  ;;  %vm1026_vm3 = vcmp.ge.s32.totalorder %v3690_v40, 22 }
 0x12f   : > { %1179 = vrot.lane.b32.xlu0 %v3278_v11, %s3126_s3 }
 0x131   : > { %v3683_v31 = vpop.permute.xlu1 %623  ;;  %v3685_v43 = vpop.permute.xlu0 %897 }
 0x132   : > { %6588 = vst [vmem:[#allocation63_spill] sm:$0xff] %v3683_v31  ;;  %6589 = vst [vmem:[#allocation64_spill] sm:$0xff] %v3685_v43  ;;  %1014 = vrot.lane.b32.xlu1 %v3449_v45, %s3126_s3 }
 0x133   : > { %1429 = vperm.xlu0 %2939, %v3681_v32  }
 0x135   : > { %v3692_v42 = vpop.permute.xlu1 %632  ;;  %v3694_v34 = vpop.permute.xlu0 %912 }
 0x136   : > { %6591 = vst [vmem:[#allocation66_spill] sm:$0xff] %v3692_v42  ;;  %6592 = vst [vmem:[#allocation67_spill] sm:$0xff] %v3694_v34  ;;  %1288 = vperm.xlu1 %2938, %v3681_v32  }
 0x137   : > { %1122 = vrot.lane.b32.xlu0 %v3290_v13, %s3125_s2 }
 0x139   : > { %v3700_v31 = vpop.permute.xlu1 %637  ;;  %v862_v43 = vpop.permute.xlu0 %861 }
 0x13a   : > { %6593 = vst [vmem:[#allocation68_spill] sm:$0xff] %v3700_v31  ;;  %v3704_v45 = vsel %vm877_vm0, %v883_v53, %v862_v43  ;;  %1018 = vrot.lane.b32.xlu1 %v3459_v48, %s3126_s3  ;;  %v208_v43 = vsel %vm165_vm1, %v3417_v36, %v3371_v24  ;;  %v3744_v24 = vld [vmem:[%s3204_s28 + $0x7c] sm:$0xff]  ;;  %v453_v36 = vsel %vm165_vm1, %v3532_v9, %v3494_v59 }
 0x13b   : > { %1183 = vrot.lane.b32.xlu0 %v3284_v12, %s3126_s3  ;;  %v3735_v42 = vsub.f32 %v208_v43, %v3272_v10  ;;  %6600 = vst [vmem:[#allocation75_spill] sm:$0xff] %v3744_v24 }
 0x13d   : > { %v3710_v56 = vpop.permute.xlu1 %647  ;;  %v3712_v34 = vpop.permute.xlu0 %865  ;;  %6598 = vst [vmem:[#allocation73_spill] sm:$0xff] %v3735_v42 }
 0x13e   : > { %6594 = vst [vmem:[#allocation69_spill] sm:$0xff] %v3710_v56  ;;  %6595 = vst [vmem:[#allocation70_spill] sm:$0xff] %v3712_v34  ;;  %1110 = vrot.lane.b32.xlu1 %v3272_v10, %s3125_s2  ;;  %v348_v56 = vsel %vm313_vm2, %v3492_v58, %v3451_v46  ;;  %v3739_v34 = vsub.f32 %v3210_v2, %v3272_v10  ;;  %v550_v2 = vsel %vm313_vm2, %v3618_v55, %v3594_v0 }
 0x13f   : > { %1250 = vrot.lane.b32.xlu0 %v3469_v51, %s3125_s2  ;;  %v3751_v46 = vsub.f32 %v348_v56, %v3272_v10  ;;  %v3767_v56 = vsub.f32 %v453_v36, %v3272_v10  ;;  %v3775_v0 = vsub.f32 %v550_v2, %v3272_v10  ;;  %v3790_v2 = vsub.f32 %v3333_v18, %v3272_v10 }
 0x140   : > { %6599 = vst [vmem:[#allocation74_spill] sm:$0xff] %v3739_v34  ;;  %v281_v59 = vmul.f32 %v3739_v34, %v3739_v34 }
 0x141   : > { %v3724_v48 = vpop.permute.xlu1 %657  ;;  %v3726_v53 = vpop.permute.xlu0 %869  ;;  %6601 = vst [vmem:[#allocation76_spill] sm:$0xff] %v3751_v46  ;;  %6603 = vst [vmem:[#allocation78_spill] sm:$0xff] %v3767_v56  ;;  %v381_v9 = vmul.f32 %v3751_v46, %v3751_v46  ;;  %v486_v41 = vmul.f32 %v3767_v56, %v3767_v56 }
 0x142   : > { %6596 = vst [vmem:[#allocation71_spill] sm:$0xff] %v3724_v48  ;;  %6597 = vst [vmem:[#allocation72_spill] sm:$0xff] %v3726_v53  ;;  %1114 = vrot.lane.b32.xlu1 %v3278_v11, %s3125_s2  ;;  %v240_v48 = vmul.f32 %v3735_v42, %v3735_v42 }
 0x143   : > { %1254 = vrot.lane.b32.xlu0 %v3657_v52, %s3125_s2  ;;  %6604 = vst [vmem:[#allocation79_spill] sm:$0xff] %v3775_v0  ;;  %6606 = vst [vmem:[#allocation81_spill] sm:$0xff] %v3790_v2 }
 0x144   : > { %v289_v31 = vadd.f32 %v281_v59, %v240_v48  ;;  %v665_v48 = vsel %vm165_vm1, %v3614_v33, %v3590_v44  ;;  %v3821_v33 = vsub.f32 %v3220_v4, %v3298_v14  ;;  %v3840_v4 = vsub.f32 %v3230_v6, %v3284_v12 }
 0x145   : > { %v3753_v58 = vpop.permute.xlu1 %755  ;;  %v3755_v43 = vpop.permute.xlu0 %1268  ;;  %v3832_v44 = vsub.f32 %v665_v48, %v3272_v10  ;;  %v3860_v6 = vsub.f32 %v3378_v26, %v3314_v17 }
 0x146   : > { %6602 = vst [vmem:[#allocation77_spill] sm:$0xff] %v3755_v43  ;;  %1298 = vperm.xlu1 %2938, %v3744_v24   ;;  %v273_v43 = vadd.f32 %v3739_v34, %v3735_v42  ;;  %v389_v59 = vadd.f32 %v381_v9, %v289_v31  ;;  %6612 = vst [vmem:[#allocation87_spill] sm:$0xff] %v3821_v33  ;;  %v3825_v9 = vsub.f32 %v3207_v1, %v3278_v11 }
 0x147   : > { %1437 = vperm.xlu0 %2939, %v3744_v24   ;;  %6615 = vst [vmem:[#allocation90_spill] sm:$0xff] %v3832_v44  ;;  %6616 = vst [vmem:[#allocation91_spill] sm:$0xff] %v3840_v4  ;;  %v3844_v1 = vsub.f32 %v3227_v5, %v3307_v16  ;;  %v3864_v5 = vsub.f32 %v3383_v27, %v3298_v14  ;;  %v3882_v27 = vsub.f32 %v3423_v37, %v3301_v15 }
 0x148   : > { %v373_v36 = vadd.f32 %v3751_v46, %v273_v43  ;;  %v3806_v43 = vsub.f32 %v3354_v21, %v3290_v13  ;;  %6613 = vst [vmem:[#allocation88_spill] sm:$0xff] %v3825_v9  ;;  %v3829_v21 = vsub.f32 %v3217_v3, %v3301_v15  ;;  %v494_v31 = vadd.f32 %v486_v41, %v389_v59 }
 0x149   : > { %v3777_v55 = vpop.permute.xlu1 %759  ;;  %v3779_v53 = vpop.permute.xlu0 %1283  ;;  %6617 = vst [vmem:[#allocation92_spill] sm:$0xff] %v3844_v1  ;;  %v3848_v3 = vsub.f32 %v3240_v8, %v3290_v13  ;;  %v3856_v41 = vsub.f32 %v3369_v23, %v3307_v16  ;;  %6621 = vst [vmem:[#allocation96_spill] sm:$0xff] %v3860_v6  ;;  %v283_v23 = vmul.f32 %v3825_v9, %v3825_v9 }
 0x14a   : > { %6605 = vst [vmem:[#allocation80_spill] sm:$0xff] %v3779_v53  ;;  %2940 = vset.pattern.permute.xlu1 %v6558_v50  ;;  %v3794_v53 = vsub.f32 %v3339_v19, %v3278_v11  ;;  %v3798_v50 = vsub.f32 %v3346_v20, %v3284_v12  ;;  %6609 = vst [vmem:[#allocation84_spill] sm:$0xff] %v3806_v43  ;;  %v478_v18 = vadd.f32 %v3767_v56, %v373_v36 }
 0x14b   : > { %1413 = vperm.xlu1 %2940, %v3469_v51   ;;  %1187 = vrot.lane.b32.xlu0 %v3290_v13, %s3126_s3  ;;  %v583_v19 = vmul.f32 %v3775_v0, %v3775_v0  ;;  %v3817_v20 = vsub.f32 %v3364_v22, %v3301_v15  ;;  %6614 = vst [vmem:[#allocation89_spill] sm:$0xff] %v3829_v21  ;;  %6618 = vst [vmem:[#allocation93_spill] sm:$0xff] %v3848_v3 }
 0x14c   : > { %6607 = vst [vmem:[#allocation82_spill] sm:$0xff] %v3794_v53  ;;  %6608 = vst [vmem:[#allocation83_spill] sm:$0xff] %v3798_v50  ;;  %v575_v36 = vadd.f32 %v3775_v0, %v478_v18  ;;  %v3852_v22 = vsub.f32 %v3237_v7, %v3314_v17  ;;  %v3872_v7 = vmul.f32 %v3821_v33, %v3821_v33 }
 0x14d   : > { %v3811_v46 = vpop.permute.xlu1 %763  ;;  %v3813_v42 = vpop.permute.xlu0 %875  ;;  %6611 = vst [vmem:[#allocation86_spill] sm:$0xff] %v3817_v20  ;;  %6620 = vst [vmem:[#allocation95_spill] sm:$0xff] %v3856_v41  ;;  %v591_v48 = vadd.f32 %v583_v19, %v494_v31  ;;  %v3878_v26 = vmul.f32 %v3829_v21, %v3829_v21  ;;  %v210_v18 = vsel %vm165_vm1, %v3425_v38, %v3375_v25 }
 0x14e   : > { %6610 = vst [vmem:[#allocation85_spill] sm:$0xff] %v3811_v46  ;;  %6619 = vst [vmem:[#allocation94_spill] sm:$0xff] %v3852_v22  ;;  %v698_v19 = vmul.f32 %v3832_v44, %v3832_v44  ;;  %v690_v31 = vadd.f32 %v3832_v44, %v575_v36  ;;  %v3896_v0 = vmul.f32 %v3840_v4, %v3840_v4 }
 0x14f   : > { %1421 = vperm.xlu1 %2940, %v3657_v52   ;;  %1258 = vrot.lane.b32.xlu0 %v3681_v32, %s3125_s2  ;;  %6622 = vst [vmem:[#allocation97_spill] sm:$0xff] %v3864_v5  ;;  %6624 = vst [vmem:[#allocation99_spill] sm:$0xff] %v3882_v27  ;;  %v3900_v37 = vmul.f32 %v3844_v1, %v3844_v1  ;;  %v3904_v25 = vmul.f32 %v3848_v3, %v3848_v3 }
 0x150   : > { %v3908_v38 = vmul.f32 %v3852_v22, %v3852_v22  ;;  %v209_v36 = vsel %vm165_vm1, %v3415_v35, %v3385_v28  ;;  %v211_v44 = vsel %vm165_vm1, %v3427_v39, %v3387_v29  ;;  %v706_v56 = vadd.f32 %v698_v19, %v591_v48  ;;  %v6634_v19 = vld [vmem:[#allocation8_spill] sm:$0xff] }
 0x151   : > { %v3866_v59 = vpop.permute.xlu1 %767  ;;  %v3868_v8 = vpop.permute.xlu0 %1012  ;;  %v739_v41 = vmul.f32 %v3790_v2, %v3790_v2  ;;  %v3923_v46 = vsub.f32 %v210_v18, %v3278_v11  ;;  %v350_v28 = vsel %vm313_vm2, %v3503_v61, %v3461_v49  ;;  %v3931_v35 = vsub.f32 %v3501_v60, %v3298_v14 }
 0x152   : > { %6623 = vst [vmem:[#allocation98_spill] sm:$0xff] %v3868_v8  ;;  %v3938_v39 = vsub.f32 %v3704_v45, %v3272_v10  ;;  %v731_v48 = vadd.f32 %v3790_v2, %v690_v31  ;;  %v3949_v49 = vsub.f32 %v209_v36, %v3298_v14  ;;  %v3952_v60 = vsub.f32 %v211_v44, %v3301_v15 }
 0x153   : > { %1425 = vperm.xlu1 %2940, %v3479_v54   ;;  %1262 = vrot.lane.b32.xlu0 %v3744_v24, %s3125_s2  ;;  %6625 = vst [vmem:[#allocation100_spill] sm:$0xff] %v3923_v46  ;;  %6626 = vst [vmem:[#allocation101_spill] sm:$0xff] %v3931_v35  ;;  %v3956_v61 = vsub.f32 %v3528_v47, %v3307_v16  ;;  %v242_v47 = vmul.f32 %v3923_v46, %v3923_v46 }
 0x154   : > { %6627 = vst [vmem:[#allocation102_spill] sm:$0xff] %v3938_v39  ;;  %6629 = vst [vmem:[#allocation104_spill] sm:$0xff] %v3949_v49  ;;  %v212_v31 = vsel %vm165_vm1, %v6634_v19, %v3392_v30  ;;  %v3978_v36 = vsub.f32 %v350_v28, %v3278_v11  ;;  %v241_v30 = vmul.f32 %v3949_v49, %v3949_v49  ;;  %v6639_v19 = vld [vmem:[#allocation5_spill] sm:$0xff] }
 0x155   : > { %v773_v34 = vpop.permute.xlu1 %772  ;;  %v3920_v8 = vpop.permute.xlu0 %1016  ;;  %6630 = vst [vmem:[#allocation105_spill] sm:$0xff] %v3952_v60  ;;  %6631 = vst [vmem:[#allocation106_spill] sm:$0xff] %v3956_v61  ;;  %v3997_v28 = vadd.f32 %v3821_v33, %v3949_v49  ;;  %v6690_v61 = vld [vmem:[#allocation12_spill] sm:$0xff] }
 0x156   : > { %v803_v29 = vsel %vm313_vm2, %v773_v34, %v3753_v58  ;;  %6635 = vst [vmem:[#allocation8_spill] sm:$0xff] %v3978_v36 }
 0x157   : > { %v3942_v18 = vsub.f32 %v803_v29, %v3272_v10  ;;  %1024 = vrot.lane.b32.xlu1 %v3490_v57, %s3126_s3  ;;  %1396 = vrot.lane.b32.xlu0 %v3469_v51, %s3126_s3  ;;  %v3960_v10 = vmul.f32 %v3817_v20, %v3817_v20  ;;  %v455_v57 = vsel %vm165_vm1, %v3575_v63, %v3505_v62  ;;  %v6636_v62 = vld [vmem:[#allocation42_spill] sm:$0xff] }
 0x158   : > { %v747_v51 = vadd.f32 %v739_v41, %v706_v56  ;;  %v6637_v56 = vld [vmem:[#allocation49_spill] sm:$0xff]  ;;  %v953_v29 = vmul.f32 %v3938_v39, %v3938_v39 }
 0x159   : > { %6628 = vst [vmem:[#allocation103_spill] sm:$0xff] %v3942_v18  ;;  %6632 = vst [vmem:[#allocation107_spill] sm:$0xff] %v3960_v10  ;;  %v828_v34 = vadd.f32 %v3942_v18, %v731_v48  ;;  %v836_v45 = vmul.f32 %v3942_v18, %v3942_v18  ;;  %v781_v58 = vpop.permute.xlu1 %780  ;;  %v3969_v44 = vpop.permute.xlu0 %1293  ;;  %v552_v41 = vsel %vm313_vm2, %v6637_v56, %v6636_v62  ;;  %v6640_v62 = vld [vmem:[#allocation9_spill] sm:$0xff]  ;;  %v6692_v10 = vld [vmem:[#allocation40_spill] sm:$0xff] }
 0x15a   : > { %6633 = vst [vmem:[#allocation108_spill] sm:$0xff] %v3969_v44  ;;  %v6643_v18 = vld [vmem:[#allocation41_spill] sm:$0xff] }
 0x15b   : > { %v844_v48 = vadd.f32 %v836_v45, %v747_v51  ;;  %v3987_v44 = vadd.f32 %v3938_v39, %v828_v34  ;;  %1120 = vrot.lane.b32.xlu1 %v3307_v16, %s3125_s2  ;;  %1400 = vrot.lane.b32.xlu0 %v3657_v52, %s3126_s3  ;;  %v213_v51 = vsel %vm165_vm1, %v6640_v62, %v6639_v19  ;;  %v6644_v39 = vld [vmem:[#allocation68_spill] sm:$0xff]  ;;  %v6646_v19 = vld [vmem:[#allocation6_spill] sm:$0xff] }
 0x15c   : > { %v4004_v34 = vsub.f32 %v455_v57, %v3278_v11  ;;  %v275_v45 = vadd.f32 %v3825_v9, %v3923_v46  ;;  %v4009_v52 = vsub.f32 %v212_v31, %v3284_v12  ;;  %v667_v49 = vsel %vm165_vm1, %v6644_v39, %v6643_v18  ;;  %v6647_v62 = vld [vmem:[#allocation10_spill] sm:$0xff]  ;;  %v6649_v9 = vld [vmem:[#allocation57_spill] sm:$0xff] }
 0x15d   : > { %6638 = vst [vmem:[#allocation42_spill] sm:$0xff] %v3987_v44  ;;  %v4015_v33 = vadd.f32 %v953_v29, %v844_v48  ;;  %v785_v56 = vpop.permute.xlu1 %784  ;;  %v4017_v63 = vpop.permute.xlu0 %1020  ;;  %v214_v57 = vsel %vm165_vm1, %v6647_v62, %v6646_v19  ;;  %v383_v46 = vmul.f32 %v3978_v36, %v3978_v36  ;;  %v4026_v31 = vsub.f32 %v552_v41, %v3278_v11  ;;  %v6651_v41 = vld [vmem:[#allocation7_spill] sm:$0xff] }
 0x15e   : > { %6641 = vst [vmem:[#allocation5_spill] sm:$0xff] %v4004_v34  ;;  %6642 = vst [vmem:[#allocation9_spill] sm:$0xff] %v4009_v52  ;;  %v4031_v39 = vsel %vm313_vm2, %v785_v56, %v6649_v9  ;;  %v291_v18 = vadd.f32 %v283_v23, %v242_v47  ;;  %v243_v29 = vmul.f32 %v3952_v60, %v3952_v60  ;;  %v6652_v19 = vld [vmem:[#allocation11_spill] sm:$0xff] }
 0x15f   : > { %6645 = vst [vmem:[#allocation41_spill] sm:$0xff] %v4015_v33  ;;  %6648 = vst [vmem:[#allocation68_spill] sm:$0xff] %v4026_v31  ;;  %v4036_v48 = vsub.f32 %v213_v51, %v3307_v16  ;;  %1177 = vrot.lane.b32.xlu1 %v3298_v14, %s3126_s3  ;;  %1404 = vrot.lane.b32.xlu0 %v3681_v32, %s3126_s3  ;;  %v215_v62 = vsel %vm165_vm1, %v6652_v19, %v6651_v41 }
 0x160   : > { %v375_v9 = vadd.f32 %v3978_v36, %v275_v45  ;;  %v488_v23 = vmul.f32 %v4004_v34, %v4004_v34  ;;  %v4050_v47 = vsub.f32 %v667_v49, %v3278_v11  ;;  %v4053_v56 = vadd.f32 %v3872_v7, %v241_v30  ;;  %v6655_v7 = vld [vmem:[#allocation59_spill] sm:$0xff] }
 0x161   : > { %6650 = vst [vmem:[#allocation6_spill] sm:$0xff] %v4036_v48  ;;  %v276_v51 = vadd.f32 %v3829_v21, %v3952_v60  ;;  %v244_v32 = vmul.f32 %v4009_v52, %v4009_v52  ;;  %v4060_v2 = vsub.f32 %v214_v57, %v3290_v13  ;;  %v793_v41 = vpop.permute.xlu1 %792  ;;  %v4062_v45 = vpop.permute.xlu0 %1112  ;;  %v391_v19 = vadd.f32 %v383_v46, %v291_v18  ;;  %v6659_v21 = vld [vmem:[#allocation18_spill] sm:$0xff] }
 0x162   : > { %6653 = vst [vmem:[#allocation10_spill] sm:$0xff] %v4050_v47  ;;  %v480_v36 = vadd.f32 %v4004_v34, %v375_v9  ;;  %v585_v49 = vmul.f32 %v4026_v31, %v4026_v31  ;;  %v4070_v30 = vsel %vm313_vm2, %v793_v41, %v6655_v7  ;;  %v245_v60 = vmul.f32 %v4036_v48, %v4036_v48 }
 0x163   : > { %6654 = vst [vmem:[#allocation57_spill] sm:$0xff] %v4060_v2  ;;  %6656 = vst [vmem:[#allocation7_spill] sm:$0xff] %v4070_v30  ;;  %v4075_v57 = vsub.f32 %v215_v62, %v3314_v17  ;;  %v805_v46 = vsel %vm313_vm2, %v781_v58, %v3777_v55  ;;  %1181 = vrot.lane.b32.xlu1 %v3301_v15, %s3126_s3  ;;  %1408 = vrot.lane.b32.xlu0 %v3744_v24, %s3126_s3  ;;  %v6658_v58 = vld [vmem:[#allocation13_spill] sm:$0xff] }
 0x164   : > { %v292_v18 = vadd.f32 %v3878_v26, %v243_v29  ;;  %v496_v9 = vadd.f32 %v488_v23, %v391_v19  ;;  %v577_v41 = vadd.f32 %v4026_v31, %v480_v36  ;;  %v700_v7 = vmul.f32 %v4050_v47, %v4050_v47  ;;  %v6661_v36 = vld [vmem:[#allocation15_spill] sm:$0xff]  ;;  %v6662_v29 = vld [vmem:[#allocation21_spill] sm:$0xff] }
 0x165   : > { %6657 = vst [vmem:[#allocation11_spill] sm:$0xff] %v4075_v57  ;;  %v4090_v62 = vadd.f32 %v3840_v4, %v4009_v52  ;;  %v246_v55 = vmul.f32 %v4060_v2, %v4060_v2  ;;  %v351_v34 = vsel %vm313_vm2, %v6659_v21, %v6658_v58  ;;  %v4098_v24 = vpop.permute.xlu0 %1116  ;;  %v4102_v26 = vmul.f32 %v3860_v6, %v3860_v6 }
 0x166   : > { %6660 = vst [vmem:[#allocation59_spill] sm:$0xff] %v4098_v24  ;;  %v353_v23 = vsel %vm313_vm2, %v6662_v29, %v6661_v36  ;;  %v593_v19 = vadd.f32 %v585_v49, %v496_v9  ;;  %v692_v31 = vadd.f32 %v4050_v47, %v577_v41  ;;  %v4110_v52 = vsub.f32 %v805_v46, %v3278_v11  ;;  %v4112_v4 = vpop.permute.xlu1 %887  ;;  %v6664_v36 = vld [vmem:[#allocation20_spill] sm:$0xff]  ;;  %v6665_v49 = vld [vmem:[#allocation17_spill] sm:$0xff]  ;;  %v6666_v9 = vld [vmem:[#allocation23_spill] sm:$0xff] }
 0x167   : > { %v4115_v21 = vadd.f32 %v3896_v0, %v244_v32  ;;  %v278_v58 = vadd.f32 %v3844_v1, %v4036_v48  ;;  %v294_v33 = vadd.f32 %v3900_v37, %v245_v60  ;;  %v247_v44 = vmul.f32 %v4075_v57, %v4075_v57  ;;  %1433 = vperm.xlu1 %2940, %v6664_v36   ;;  %v6667_v41 = vld [vmem:[#allocation27_spill] sm:$0xff]  ;;  %v6668_v29 = vld [vmem:[#allocation26_spill] sm:$0xff] }
 0x168   : > { %6663 = vst [vmem:[#allocation13_spill] sm:$0xff] %v4110_v52  ;;  %v355_v46 = vsel %vm313_vm2, %v6666_v9, %v6665_v49  ;;  %v456_v0 = vsel %vm165_vm1, %v6668_v29, %v6667_v41  ;;  %v708_v32 = vadd.f32 %v700_v7, %v593_v19  ;;  %v741_v48 = vmul.f32 %v3794_v53, %v3794_v53  ;;  %v6672_v19 = vld [vmem:[#allocation30_spill] sm:$0xff]  ;;  %v6673_v41 = vld [vmem:[#allocation28_spill] sm:$0xff] }
 0x169   : > { %v4135_v37 = vadd.f32 %v3848_v3, %v4060_v2  ;;  %v280_v60 = vadd.f32 %v3852_v22, %v4075_v57  ;;  %v4140_v1 = vsub.f32 %v351_v34, %v3301_v15  ;;  %v4143_v49 = vsub.f32 %v353_v23, %v3307_v16  ;;  %v4145_v9 = vpop.permute.xlu0 %1303  ;;  %v6678_v3 = vld [vmem:[#allocation70_spill] sm:$0xff] }
 0x16a   : > { %6671 = vst [vmem:[#allocation21_spill] sm:$0xff] %v4145_v9  ;;  %v4148_v7 = vadd.f32 %v3904_v25, %v246_v55  ;;  %v458_v47 = vsel %vm165_vm1, %v6673_v41, %v6672_v19  ;;  %v733_v2 = vadd.f32 %v3794_v53, %v692_v31  ;;  %v838_v57 = vmul.f32 %v4110_v52, %v4110_v52  ;;  %v893_v34 = vpop.permute.xlu1 %892  ;;  %v6676_v9 = vld [vmem:[#allocation32_spill] sm:$0xff]  ;;  %v6677_v25 = vld [vmem:[#allocation31_spill] sm:$0xff]  ;;  %v6691_v24 = vld [vmem:[#allocation22_spill] sm:$0xff] }
 0x16b   : > { %6669 = vst [vmem:[#allocation18_spill] sm:$0xff] %v4140_v1  ;;  %6670 = vst [vmem:[#allocation15_spill] sm:$0xff] %v4143_v49  ;;  %v4158_v22 = vsub.f32 %v355_v46, %v3314_v17  ;;  %v4161_v23 = vsub.f32 %v456_v0, %v3301_v15  ;;  %v460_v55 = vsel %vm165_vm1, %v6677_v25, %v6676_v9  ;;  %1124 = vrot.lane.b32.xlu1 %v3314_v17, %s3125_s2 }
 0x16c   : > { %v922_v19 = vsel %vm877_vm0, %v893_v34, %v6678_v3  ;;  %v296_v31 = vadd.f32 %v3908_v38, %v247_v44  ;;  %v749_v41 = vadd.f32 %v741_v48, %v708_v32  ;;  %v830_v46 = vadd.f32 %v4110_v52, %v733_v2  ;;  %v6683_v32 = vld [vmem:[#allocation25_spill] sm:$0xff] }
 0x16d   : > { %6674 = vst [vmem:[#allocation20_spill] sm:$0xff] %v4158_v22  ;;  %6675 = vst [vmem:[#allocation17_spill] sm:$0xff] %v4161_v23  ;;  %v4175_v0 = vsub.f32 %v922_v19, %v3278_v11  ;;  %v376_v53 = vadd.f32 %v4140_v1, %v276_v51  ;;  %v384_v9 = vmul.f32 %v4140_v1, %v4140_v1  ;;  %v6685_v19 = vld [vmem:[#allocation19_spill] sm:$0xff] }
 0x16e   : > { %v386_v25 = vmul.f32 %v4143_v49, %v4143_v49  ;;  %v4183_v3 = vsub.f32 %v458_v47, %v3307_v16  ;;  %v4186_v34 = vsub.f32 %v460_v55, %v3314_v17  ;;  %v846_v38 = vadd.f32 %v838_v57, %v749_v41  ;;  %v322_v44 = vpop.permute.xlu0 %321  ;;  %v6684_v47 = vld [vmem:[#allocation34_spill] sm:$0xff]  ;;  %v6687_v1 = vld [vmem:[#allocation35_spill] sm:$0xff] }
 0x16f   : > { %6679 = vst [vmem:[#allocation23_spill] sm:$0xff] %v4175_v0  ;;  %v4189_v2 = vadd.f32 %v4175_v0, %v830_v46  ;;  %v955_v11 = vmul.f32 %v4175_v0, %v4175_v0  ;;  %v388_v48 = vmul.f32 %v4158_v22, %v4158_v22  ;;  %v489_v51 = vmul.f32 %v4161_v23, %v4161_v23  ;;  %v6686_v57 = vld [vmem:[#allocation38_spill] sm:$0xff]  ;;  %v797_v46 = vpop.permute.xlu1 %796  ;;  %v6688_v0 = vld [vmem:[#allocation51_spill] sm:$0xff] }
 0x170   : > { %6680 = vst [vmem:[#allocation27_spill] sm:$0xff] %v4183_v3  ;;  %6681 = vst [vmem:[#allocation30_spill] sm:$0xff] %v4186_v34  ;;  %v454_v55 = vsel %vm165_vm1, %v6684_v47, %v6683_v32  ;;  %v457_v41 = vsel %vm165_vm1, %v6686_v57, %v6685_v19  ;;  %1185 = vrot.lane.b32.xlu1 %v3307_v16, %s3126_s3  ;;  %v553_v52 = vsel %vm313_vm2, %v6688_v0, %v6687_v1 }
 0x171   : > { %6682 = vst [vmem:[#allocation32_spill] sm:$0xff] %v4189_v2  ;;  %v4211_v2 = vadd.f32 %v955_v11, %v846_v38  ;;  %v349_v32 = vsel %vm313_vm2, %v322_v44, %v6690_v61  ;;  %v4219_v30 = vsel %vm313_vm2, %v797_v46, %v3866_v59  ;;  %v392_v19 = vadd.f32 %v384_v9, %v292_v18 }
 0x172   : > { %v378_v57 = vadd.f32 %v4143_v49, %v278_v58  ;;  %v491_v29 = vmul.f32 %v4183_v3, %v4183_v3  ;;  %v459_v1 = vsel %vm165_vm1, %v6692_v10, %v6691_v24  ;;  %v394_v38 = vadd.f32 %v386_v25, %v294_v33  ;;  %v334_v18 = vpop.permute.xlu0 %333  ;;  %v6697_v24 = vld [vmem:[#allocation14_spill] sm:$0xff] }
 0x173   : > { %6689 = vst [vmem:[#allocation70_spill] sm:$0xff] %v4211_v2  ;;  %v380_v11 = vadd.f32 %v4158_v22, %v280_v60  ;;  %v493_v61 = vmul.f32 %v4186_v34, %v4186_v34  ;;  %v4232_v59 = vsub.f32 %v454_v55, %v3298_v14  ;;  %v4235_v58 = vsub.f32 %v457_v41, %v3284_v12  ;;  %v6698_v60 = vld [vmem:[#allocation53_spill] sm:$0xff]  ;;  %v6701_v49 = vld [vmem:[#allocation54_spill] sm:$0xff] }
 0x174   : > { %v4238_v9 = vsub.f32 %v553_v52, %v3301_v15  ;;  %v4241_v44 = vsub.f32 %v349_v32, %v3298_v14  ;;  %v352_v33 = vsel %vm313_vm2, %v334_v18, %v6697_v24  ;;  %1252 = vrot.lane.b32.xlu1 %v6698_v60, %s3125_s2  ;;  %v396_v25 = vadd.f32 %v388_v48, %v296_v31  ;;  %v903_v22 = vpop.permute.xlu1 %902  ;;  %v6700_v32 = vld [vmem:[#allocation37_spill] sm:$0xff]  ;;  %v6702_v24 = vld [vmem:[#allocation72_spill] sm:$0xff] }
 0x175   : > { %6693 = vst [vmem:[#allocation25_spill] sm:$0xff] %v4232_v59  ;;  %6694 = vst [vmem:[#allocation34_spill] sm:$0xff] %v4235_v58  ;;  %v481_v55 = vadd.f32 %v4161_v23, %v376_v53  ;;  %v497_v46 = vadd.f32 %v489_v51, %v392_v19  ;;  %v4250_v41 = vsub.f32 %v459_v1, %v3290_v13  ;;  %v6710_v23 = vld [vmem:[#allocation66_spill] sm:$0xff] }
 0x176   : > { %6695 = vst [vmem:[#allocation19_spill] sm:$0xff] %v4238_v9  ;;  %6696 = vst [vmem:[#allocation35_spill] sm:$0xff] %v4241_v44  ;;  %v4253_v15 = vadd.f32 %v4183_v3, %v378_v57  ;;  %v4255_v52 = vadd.f32 %v491_v29, %v394_v38  ;;  %v555_v18 = vsel %vm313_vm2, %v6701_v49, %v6700_v32  ;;  %v342_v57 = vpop.permute.xlu0 %341  ;;  %v6704_v38 = vld [vmem:[#allocation16_spill] sm:$0xff]  ;;  %v6709_v3 = vld [vmem:[#allocation58_spill] sm:$0xff] }
 0x177   : > { %6699 = vst [vmem:[#allocation12_spill] sm:$0xff] %v4250_v41  ;;  %v4264_v31 = vsel %vm877_vm0, %v903_v22, %v6702_v24  ;;  %v4267_v53 = vadd.f32 %v4186_v34, %v380_v11  ;;  %v4269_v48 = vadd.f32 %v493_v61, %v396_v25  ;;  %v487_v51 = vmul.f32 %v4232_v59, %v4232_v59  ;;  %v6707_v24 = vld [vmem:[#allocation39_spill] sm:$0xff] }
 0x178   : > { %v4274_v29 = vsub.f32 %v352_v33, %v3284_v12  ;;  %v490_v19 = vmul.f32 %v4235_v58, %v4235_v58  ;;  %v586_v1 = vmul.f32 %v4238_v9, %v4238_v9  ;;  %v382_v22 = vmul.f32 %v4241_v44, %v4241_v44  ;;  %1256 = vrot.lane.b32.xlu1 %v3479_v54, %s3125_s2  ;;  %v4294_v33 = vpop.permute.xlu1 %907 }
 0x179   : > { %v354_v11 = vsel %vm313_vm2, %v342_v57, %v6704_v38  ;;  %v4289_v12 = vmul.f32 %v4250_v41, %v4250_v41  ;;  %v4292_v61 = vsub.f32 %v555_v18, %v3307_v16  ;;  %6706 = vst [vmem:[#allocation53_spill] sm:$0xff] %v4294_v33  ;;  %v4298_v25 = vmul.f32 %v3864_v5, %v3864_v5  ;;  %v6708_v57 = vld [vmem:[#allocation56_spill] sm:$0xff]  ;;  %v6714_v33 = vld [vmem:[#allocation33_spill] sm:$0xff] }
 0x17a   : > { %6703 = vst [vmem:[#allocation22_spill] sm:$0xff] %v4274_v29  ;;  %v4302_v32 = vmul.f32 %v3798_v50, %v3798_v50  ;;  %v557_v38 = vsel %vm313_vm2, %v6708_v57, %v6707_v24  ;;  %v374_v34 = vadd.f32 %v4241_v44, %v3997_v28  ;;  %v4312_v16 = vmul.f32 %v3931_v35, %v3931_v35  ;;  %v4327_v28 = vpop.permute.xlu0 %523 }
 0x17b   : > { %6705 = vst [vmem:[#allocation14_spill] sm:$0xff] %v4292_v61  ;;  %v4316_v18 = vmul.f32 %v3806_v43, %v3806_v43  ;;  %v666_v49 = vsel %vm165_vm1, %v6710_v23, %v6709_v3  ;;  %v385_v0 = vmul.f32 %v4274_v29, %v4274_v29  ;;  %v4325_v24 = vsub.f32 %v354_v11, %v3290_v13  ;;  %v6715_v3 = vld [vmem:[#allocation29_spill] sm:$0xff] }
 0x17c   : > { %6712 = vst [vmem:[#allocation72_spill] sm:$0xff] %v4327_v28  ;;  %v4331_v44 = vmul.f32 %v3882_v27, %v3882_v27  ;;  %v578_v57 = vadd.f32 %v4238_v9, %v481_v55  ;;  %v4334_v10 = vadd.f32 %v586_v1, %v497_v46  ;;  %v390_v2 = vadd.f32 %v382_v22, %v4053_v56  ;;  %v6718_v55 = vld [vmem:[#allocation48_spill] sm:$0xff]  ;;  %v918_v1 = vpop.permute.xlu1 %917 }
 0x17d   : > { %6711 = vst [vmem:[#allocation37_spill] sm:$0xff] %v4325_v24  ;;  %v551_v23 = vsel %vm313_vm2, %v4327_v28, %v6714_v33  ;;  %1441 = vperm.xlu1 %2940, %v6715_v3   ;;  %v4344_v13 = vmul.f32 %v4292_v61, %v4292_v61  ;;  %v4347_v11 = vsub.f32 %v557_v38, %v3314_v17  ;;  %v6721_v28 = vld [vmem:[#allocation43_spill] sm:$0xff] }
 0x17e   : > { %6713 = vst [vmem:[#allocation16_spill] sm:$0xff] %v4331_v44  ;;  %v6717_v44 = vld [vmem:[#allocation60_spill] sm:$0xff]  ;;  %v4354_v56 = vsub.f32 %v551_v23, %v3298_v14  ;;  %v4357_v22 = vsub.f32 %v666_v49, %v3298_v14  ;;  %v377_v33 = vadd.f32 %v4274_v29, %v4090_v62  ;;  %v479_v9 = vadd.f32 %v4232_v59, %v374_v34  ;;  %v4376_v49 = vpop.permute.xlu0 %535  ;;  %v6724_v34 = vld [vmem:[#allocation45_spill] sm:$0xff]  ;;  %v6725_v59 = vld [vmem:[#allocation71_spill] sm:$0xff] }
 0x17f   : > { %6716 = vst [vmem:[#allocation39_spill] sm:$0xff] %v4347_v11  ;;  %v668_v46 = vsel %vm165_vm1, %v6718_v55, %v6717_v44  ;;  %v4365_v38 = vsel %vm877_vm0, %v918_v1, %v3813_v42  ;;  %v6722_v44 = vld [vmem:[#allocation69_spill] sm:$0xff]  ;;  %v393_v55 = vadd.f32 %v385_v0, %v4115_v21  ;;  %v387_v14 = vmul.f32 %v4325_v24, %v4325_v24 }
 0x180   : > { %6719 = vst [vmem:[#allocation58_spill] sm:$0xff] %v4354_v56  ;;  %6720 = vst [vmem:[#allocation66_spill] sm:$0xff] %v4357_v22  ;;  %v669_v23 = vsel %vm165_vm1, %v6722_v44, %v6721_v28  ;;  %v584_v62 = vmul.f32 %v4354_v56, %v4354_v56  ;;  %v671_v42 = vsel %vm165_vm1, %v6725_v59, %v6724_v34  ;;  %v6726_v28 = vld [vmem:[#allocation44_spill] sm:$0xff] }
 0x181   : > { %6723 = vst [vmem:[#allocation33_spill] sm:$0xff] %v4376_v49  ;;  %v495_v1 = vadd.f32 %v487_v51, %v390_v2  ;;  %v576_v29 = vadd.f32 %v4354_v56, %v479_v9  ;;  %v554_v21 = vsel %vm313_vm2, %v4376_v49, %v6726_v28  ;;  %1189 = vrot.lane.b32.xlu1 %v3314_v17, %s3126_s3  ;;  %v4392_v44 = vld [vmem:[%s3204_s28 + $0x32] sm:$0xff]  ;;  %v4413_v49 = vpop.permute.xlu1 %1030 }
 0x182   : > { %v590_v0 = vmul.f32 %v4347_v11, %v4347_v11  ;;  %6727 = vst [vmem:[#allocation29_spill] sm:$0xff] %v4392_v44  ;;  %v4395_v27 = vsub.f32 %v668_v46, %v4392_v44  ;;  %v6729_v2 = vld [vmem:[#allocation63_spill] sm:$0xff]  ;;  %v6730_v59 = vld [vmem:[#allocation52_spill] sm:$0xff]  ;;  %v379_v51 = vadd.f32 %v4325_v24, %v4135_v37  ;;  %v699_v17 = vmul.f32 %v4357_v22, %v4357_v22 }
 0x183   : > { %v672_v9 = vsel %vm165_vm1, %v6730_v59, %v6729_v2  ;;  %v592_v34 = vadd.f32 %v584_v62, %v495_v1  ;;  %v482_v28 = vadd.f32 %v4235_v58, %v377_v33  ;;  %v4408_v56 = vld [vmem:[%s3204_s28 + $0x52] sm:$0xff]  ;;  %6732 = vst [vmem:[#allocation43_spill] sm:$0xff] %v4413_v49  ;;  %v4419_v37 = vld [vmem:[%s3204_s28 + $0x7a] sm:$0xff]  ;;  %v395_v62 = vadd.f32 %v387_v14, %v4148_v7  ;;  %v4425_v33 = vpop.permute.xlu0 %543 }
 0x184   : > { %6728 = vst [vmem:[#allocation60_spill] sm:$0xff] %v4395_v27  ;;  %v4411_v46 = vsub.f32 %v554_v21, %v4408_v56  ;;  %v4416_v2 = vsub.f32 %v669_v23, %v4408_v56  ;;  %v4422_v59 = vsub.f32 %v671_v42, %v4419_v37  ;;  %v498_v1 = vadd.f32 %v490_v19, %v393_v55  ;;  %v6734_v23 = vld [vmem:[#allocation46_spill] sm:$0xff] }
 0x185   : > { %v691_v24 = vadd.f32 %v4357_v22, %v576_v29  ;;  %v556_v49 = vsel %vm313_vm2, %v4425_v33, %v6734_v23  ;;  %1260 = vrot.lane.b32.xlu1 %v6664_v36, %s3125_s2  ;;  %v582_v7 = vadd.f32 %v4347_v11, %v4267_v53  ;;  %v598_v19 = vadd.f32 %v590_v0, %v4269_v48  ;;  %v4448_v42 = vld [vmem:[%s3204_s28 + $0x82] sm:$0xff] }
 0x186   : > { %6731 = vst [vmem:[#allocation48_spill] sm:$0xff] %v4411_v46  ;;  %6733 = vst [vmem:[#allocation69_spill] sm:$0xff] %v4422_v59  ;;  %v579_v21 = vadd.f32 %v4411_v46, %v482_v28  ;;  %v587_v58 = vmul.f32 %v4411_v46, %v4411_v46  ;;  %v484_v29 = vadd.f32 %v4250_v41, %v379_v51  ;;  %v4453_v46 = vpop.permute.xlu1 %1038  ;;  %v6737_v53 = vld [vmem:[#allocation62_spill] sm:$0xff] }
 0x187   : > { %v4442_v55 = vsub.f32 %v556_v49, %v4419_v37  ;;  %v4445_v14 = vadd.f32 %v4395_v27, %v578_v57  ;;  %v4451_v28 = vsub.f32 %v672_v9, %v4448_v42  ;;  %v707_v23 = vadd.f32 %v699_v17, %v592_v34  ;;  %v6738_v48 = vld [vmem:[#allocation50_spill] sm:$0xff]  ;;  %v777_v11 = vpop.permute.xlu0 %776  ;;  %v6739_v34 = vld [vmem:[#allocation55_spill] sm:$0xff] }
 0x188   : > { %v595_v22 = vadd.f32 %v587_v58, %v498_v1  ;;  %v670_v0 = vsel %vm165_vm1, %v6738_v48, %v6737_v53  ;;  %v500_v49 = vadd.f32 %v4289_v12, %v395_v62  ;;  %v702_v9 = vmul.f32 %v4416_v2, %v4416_v2  ;;  %v4476_v53 = vld [vmem:[%s3204_s28 + $0xa] sm:$0xff] }
 0x189   : > { %6735 = vst [vmem:[#allocation45_spill] sm:$0xff] %v4442_v55  ;;  %6736 = vst [vmem:[#allocation71_spill] sm:$0xff] %v4451_v28  ;;  %v581_v57 = vadd.f32 %v4442_v55, %v484_v29  ;;  %v589_v51 = vmul.f32 %v4442_v55, %v4442_v55  ;;  %v704_v58 = vmul.f32 %v4422_v59, %v4422_v59  ;;  %1264 = vrot.lane.b32.xlu1 %v6715_v3, %s3125_s2 }
 0x18a   : > { %v732_v17 = vadd.f32 %v3864_v5, %v691_v24  ;;  %v804_v1 = vsel %vm313_vm2, %v777_v11, %v6739_v34  ;;  %v694_v12 = vadd.f32 %v4416_v2, %v579_v21  ;;  %6740 = vst [vmem:[#allocation44_spill] sm:$0xff] %v4476_v53  ;;  %v697_v55 = vadd.f32 %v4451_v28, %v582_v7  ;;  %v1043_v21 = vpop.permute.xlu1 %1042 }
 0x18b   : > { %v597_v62 = vadd.f32 %v589_v51, %v500_v49  ;;  %v696_v29 = vadd.f32 %v4422_v59, %v581_v57  ;;  %v4479_v48 = vsub.f32 %v804_v1, %v4476_v53  ;;  %v705_v24 = vmul.f32 %v4451_v28, %v4451_v28  ;;  %v789_v5 = vpop.permute.xlu0 %788  ;;  %v6767_v28 = vld [vmem:[#allocation16_spill] sm:$0xff] }
 0x18c   : > { %v4486_v11 = vsub.f32 %v4219_v30, %v4419_v37  ;;  %v748_v34 = vadd.f32 %v4298_v25, %v707_v23  ;;  %v710_v49 = vadd.f32 %v702_v9, %v595_v22  ;;  %v4494_v7 = vsub.f32 %v4264_v31, %v4408_v56  ;;  %v6744_v25 = vld [vmem:[#allocation85_spill] sm:$0xff] }
 0x18d   : > { %6741 = vst [vmem:[#allocation63_spill] sm:$0xff] %v4479_v48  ;;  %v712_v57 = vadd.f32 %v704_v58, %v597_v62  ;;  %v829_v51 = vadd.f32 %v4479_v48, %v732_v17  ;;  %v837_v1 = vmul.f32 %v4479_v48, %v4479_v48  ;;  %v4499_v30 = vsel %vm1026_vm3, %v1043_v21, %v3920_v8  ;;  %v4515_v62 = vld [vmem:[%s3204_s28 + $0x5a] sm:$0xff] }
 0x18e   : > { %6742 = vst [vmem:[#allocation52_spill] sm:$0xff] %v4486_v11  ;;  %6743 = vst [vmem:[#allocation46_spill] sm:$0xff] %v4494_v7  ;;  %v807_v22 = vsel %vm313_vm2, %v789_v5, %v6744_v25  ;;  %1398 = vrot.lane.b32.xlu1 %v6698_v60, %s3126_s3  ;;  %v737_v23 = vadd.f32 %v3806_v43, %v696_v29  ;;  %v735_v58 = vadd.f32 %v3798_v50, %v694_v12  ;;  %v1051_v29 = vpop.permute.xlu1 %1050  ;;  %v4794_v50 = vld [vmem:[%s3204_s28 + $0x2a] sm:$0xff] }
 0x18f   : > { %v845_v9 = vadd.f32 %v837_v1, %v748_v34  ;;  %v4509_v31 = vsub.f32 %v807_v22, %v4408_v56  ;;  %v753_v17 = vadd.f32 %v4316_v18, %v712_v57  ;;  %v701_v8 = vmul.f32 %v4395_v27, %v4395_v27  ;;  %6745 = vst [vmem:[#allocation62_spill] sm:$0xff] %v4515_v62  ;;  %v801_v1 = vpop.permute.xlu0 %800  ;;  %v6747_v22 = vld [vmem:[#allocation61_spill] sm:$0xff] }
 0x190   : > { %v4518_v5 = vsub.f32 %v670_v0, %v4515_v62  ;;  %v842_v60 = vmul.f32 %v4486_v11, %v4486_v11  ;;  %v4523_v34 = vadd.f32 %v4486_v11, %v737_v23  ;;  %v713_v12 = vadd.f32 %v705_v24, %v598_v19 }
 0x191   : > { %v751_v21 = vadd.f32 %v4302_v32, %v710_v49  ;;  %v832_v18 = vadd.f32 %v4509_v31, %v735_v58  ;;  %v840_v57 = vmul.f32 %v4509_v31, %v4509_v31  ;;  %v4532_v0 = vsel %vm1026_vm3, %v1051_v29, %v4017_v63 }
 0x192   : > { %6746 = vst [vmem:[#allocation50_spill] sm:$0xff] %v4518_v5  ;;  %v738_v25 = vadd.f32 %v3860_v6, %v697_v55  ;;  %v810_v23 = vsel %vm313_vm2, %v801_v1, %v6747_v22  ;;  %1402 = vrot.lane.b32.xlu1 %v3479_v54, %s3126_s3  ;;  %v4540_v32 = vadd.f32 %v842_v60, %v753_v17  ;;  %v864_v60 = vpop.permute.xlu1 %863  ;;  %v3050_v6 = vld [vmem:[%s3204_s28 + $0x78] sm:$0xff] }
 0x193   : > { %v957_v19 = vmul.f32 %v4494_v7, %v4494_v7  ;;  %v848_v24 = vadd.f32 %v840_v57, %v751_v21  ;;  %v4545_v49 = vadd.f32 %v4494_v7, %v832_v18  ;;  %v4548_v63 = vsub.f32 %v810_v23, %v4448_v42  ;;  %v1035_v57 = vpop.permute.xlu0 %1034 }
 0x194   : > { %v580_v55 = vadd.f32 %v4292_v61, %v4253_v15  ;;  %v596_v58 = vadd.f32 %v4344_v13, %v4255_v52  ;;  %v4556_v54 = vsub.f32 %v4031_v39, %v4392_v44  ;;  %v4560_v17 = vsub.f32 %v4365_v38, %v4448_v42  ;;  %v6751_v38 = vld [vmem:[#allocation98_spill] sm:$0xff] }
 0x195   : > { %6748 = vst [vmem:[#allocation55_spill] sm:$0xff] %v4548_v63  ;;  %v709_v29 = vadd.f32 %v701_v8, %v4334_v10  ;;  %v734_v21 = vadd.f32 %v3817_v20, %v4445_v14  ;;  %v4565_v18 = vadd.f32 %v957_v19, %v848_v24  ;;  %v835_v15 = vadd.f32 %v4548_v63, %v738_v25 }
 0x196   : > { %6749 = vst [vmem:[#allocation85_spill] sm:$0xff] %v4556_v54  ;;  %6750 = vst [vmem:[#allocation61_spill] sm:$0xff] %v4560_v17  ;;  %v754_v52 = vadd.f32 %v4102_v26, %v713_v12  ;;  %v843_v39 = vmul.f32 %v4548_v63, %v4548_v63  ;;  %v921_v13 = vsel %vm877_vm0, %v4112_v4, %v864_v60  ;;  %1406 = vrot.lane.b32.xlu1 %v6664_v36, %s3126_s3  ;;  %v868_v22 = vpop.permute.xlu1 %867  ;;  %v6862_v11 = vld [vmem:[#allocation62_spill] sm:$0xff] }
 0x197   : > { %v1062_v10 = vsel %vm1026_vm3, %v1035_v57, %v6751_v38  ;;  %v695_v14 = vadd.f32 %v4518_v5, %v580_v55  ;;  %v1127_v26 = vsel %vm877_vm0, %v6684_v47, %v4062_v45  ;;  %v4585_v8 = vadd.f32 %v4560_v17, %v835_v15  ;;  %v6754_v47 = vld [vmem:[#allocation107_spill] sm:$0xff]  ;;  %v4603_v55 = vpop.permute.xlu0 %1046 }
 0x198   : > { %v4588_v12 = vsub.f32 %v921_v13, %v4476_v53  ;;  %v839_v4 = vmul.f32 %v4556_v54, %v4556_v54  ;;  %v960_v1 = vmul.f32 %v4560_v17, %v4560_v17  ;;  %v851_v36 = vadd.f32 %v843_v39, %v754_v52  ;;  %v6756_v52 = vld [vmem:[#allocation64_spill] sm:$0xff] }
 0x199   : > { %v4595_v25 = vsub.f32 %v1062_v10, %v4476_v53  ;;  %v703_v45 = vmul.f32 %v4518_v5, %v4518_v5  ;;  %v750_v23 = vadd.f32 %v6754_v47, %v709_v29  ;;  %v831_v60 = vadd.f32 %v4556_v54, %v734_v21  ;;  %v6758_v29 = vld [vmem:[#allocation26_spill] sm:$0xff] }
 0x19a   : > { %6752 = vst [vmem:[#allocation98_spill] sm:$0xff] %v4588_v12  ;;  %v946_v19 = vadd.f32 %v4588_v12, %v829_v51  ;;  %v954_v24 = vmul.f32 %v4588_v12, %v4588_v12  ;;  %v4607_v15 = vsub.f32 %v1127_v26, %v4476_v53  ;;  %v4609_v57 = vadd.f32 %v960_v1, %v851_v36  ;;  %v6757_v51 = vld [vmem:[#allocation59_spill] sm:$0xff]  ;;  %v4634_v47 = vpop.permute.xlu1 %1058 }
 0x19b   : > { %6753 = vst [vmem:[#allocation109_spill] sm:$0xff] %v4595_v25  ;;  %v923_v39 = vsel %vm877_vm0, %v6756_v52, %v868_v22  ;;  %1410 = vrot.lane.b32.xlu1 %v6715_v3, %s3126_s3  ;;  %v1129_v13 = vsel %vm877_vm0, %v6758_v29, %v6757_v51  ;;  %v847_v26 = vadd.f32 %v839_v4, %v750_v23  ;;  %v6760_v1 = vld [vmem:[#allocation7_spill] sm:$0xff]  ;;  %v4641_v23 = vpop.permute.xlu0 %1054 }
 0x19c   : > { %6755 = vst [vmem:[#allocation107_spill] sm:$0xff] %v4607_v15  ;;  %v962_v38 = vadd.f32 %v954_v24, %v845_v9  ;;  %v987_v21 = vadd.f32 %v3931_v35, %v946_v19  ;;  %v4622_v10 = vsub.f32 %v923_v39, %v4392_v44  ;;  %v4626_v36 = vsub.f32 %v6760_v1, %v4515_v62  ;;  %v6763_v39 = vld [vmem:[#allocation95_spill] sm:$0xff]  ;;  %v6788_v35 = vld [vmem:[#allocation33_spill] sm:$0xff] }
 0x19d   : > { %v4630_v22 = vsub.f32 %v4499_v30, %v4392_v44  ;;  %v1095_v3 = vmul.f32 %v4595_v25, %v4595_v25  ;;  %v711_v52 = vadd.f32 %v703_v45, %v596_v58  ;;  %v744_v30 = vmul.f32 %v6763_v39, %v6763_v39 }
 0x19e   : > { %6759 = vst [vmem:[#allocation64_spill] sm:$0xff] %v4622_v10  ;;  %6761 = vst [vmem:[#allocation59_spill] sm:$0xff] %v4626_v36  ;;  %v1003_v9 = vadd.f32 %v4312_v16, %v962_v38  ;;  %v1087_v19 = vadd.f32 %v4595_v25, %v987_v21  ;;  %v948_v24 = vadd.f32 %v4622_v10, %v831_v60  ;;  %v6765_v21 = vld [vmem:[#allocation99_spill] sm:$0xff]  ;;  %v872_v17 = vpop.permute.xlu1 %871 }
 0x19f   : > { %6762 = vst [vmem:[#allocation26_spill] sm:$0xff] %v4630_v22  ;;  %v956_v4 = vmul.f32 %v4622_v10, %v4622_v10  ;;  %v1160_v51 = vmul.f32 %v4607_v15, %v4607_v15  ;;  %v4648_v29 = vsub.f32 %v1129_v13, %v4392_v44  ;;  %v736_v63 = vadd.f32 %v6763_v39, %v695_v14  ;;  %v6768_v13 = vld [vmem:[#allocation53_spill] sm:$0xff] }
 0x1a0   : > { %v1103_v16 = vadd.f32 %v1095_v3, %v1003_v9  ;;  %v989_v1 = vadd.f32 %v6765_v21, %v948_v24  ;;  %v4652_v60 = vadd.f32 %v4607_v15, %v1087_v19  ;;  %v841_v58 = vmul.f32 %v4626_v36, %v4626_v36  ;;  %v4663_v3 = vpop.permute.xlu0 %1417 }
 0x1a1   : > { %6764 = vst [vmem:[#allocation7_spill] sm:$0xff] %v4648_v29  ;;  %v964_v38 = vadd.f32 %v956_v4, %v847_v26  ;;  %v1097_v45 = vmul.f32 %v4630_v22, %v4630_v22  ;;  %v925_v26 = vsel %vm877_vm0, %v6768_v13, %v872_v17  ;;  %6769 = vst [vmem:[#allocation16_spill] sm:$0xff] %v4663_v3 }
 0x1a2   : > { %6766 = vst [vmem:[#allocation110_spill] sm:$0xff] %v4652_v60  ;;  %v4665_v9 = vadd.f32 %v1160_v51, %v1103_v16  ;;  %v1089_v19 = vadd.f32 %v4630_v22, %v989_v1  ;;  %v752_v14 = vadd.f32 %v744_v30, %v711_v52  ;;  %v833_v24 = vadd.f32 %v4626_v36, %v736_v63  ;;  %v4686_v16 = vpop.permute.xlu1 %1273  ;;  %v3048_v36 = vld [vmem:[%s3204_s28] sm:$0xff] }
 0x1a3   : > { %v1005_v5 = vadd.f32 %v6767_v28, %v964_v38  ;;  %v4670_v4 = vsub.f32 %v925_v26, %v4515_v62  ;;  %v1162_v10 = vmul.f32 %v4648_v29, %v4648_v29  ;;  %v6772_v28 = vld [vmem:[#allocation106_spill] sm:$0xff]  ;;  %v4681_v52 = vsub.f32 %v4532_v0, %v4515_v62  ;;  %6775 = vst [vmem:[#allocation114_spill] sm:$0xff] %v4686_v16 }
 0x1a4   : > { %6770 = vst [vmem:[#allocation53_spill] sm:$0xff] %v4665_v9  ;;  %v999_v38 = vmul.f32 %v6772_v28, %v6772_v28  ;;  %v4677_v17 = vadd.f32 %v4648_v29, %v1089_v19  ;;  %v849_v51 = vadd.f32 %v841_v58, %v752_v14  ;;  %v4688_v1 = vpop.permute.xlu0 %1022 }
 0x1a5   : > { %6771 = vst [vmem:[#allocation111_spill] sm:$0xff] %v4670_v4  ;;  %v1105_v25 = vadd.f32 %v1097_v45, %v1005_v5  ;;  %6774 = vst [vmem:[#allocation113_spill] sm:$0xff] %v4681_v52  ;;  %v950_v63 = vadd.f32 %v4670_v4, %v833_v24  ;;  %v958_v30 = vmul.f32 %v4670_v4, %v4670_v4  ;;  %v4703_v4 = vld [vmem:[%s3204_s28 + $0x2] sm:$0xff] }
 0x1a6   : > { %6773 = vst [vmem:[#allocation112_spill] sm:$0xff] %v4677_v17  ;;  %v1099_v58 = vmul.f32 %v4681_v52, %v4681_v52  ;;  %v4695_v0 = vpop.permute.xlu1 %1278  ;;  %v6800_v17 = vld [vmem:[#allocation24_spill] sm:$0xff] }
 0x1a7   : > { %v4690_v5 = vadd.f32 %v1162_v10, %v1105_v25  ;;  %v966_v45 = vadd.f32 %v958_v30, %v849_v51  ;;  %v991_v13 = vadd.f32 %v6772_v28, %v950_v63  ;;  %v4707_v25 = vsub.f32 %v3048_v36, %v4703_v4  ;;  %v6780_v30 = vld [vmem:[#allocation43_spill] sm:$0xff] }
 0x1a8   : > { %v1119_v14 = vpop.permute.xlu0 %1118 }
 0x1a9   : > { %6776 = vst [vmem:[#allocation115_spill] sm:$0xff] %v4690_v5  ;;  %v1007_v26 = vadd.f32 %v999_v38, %v966_v45  ;;  %v4698_v19 = vadd.f32 %v4681_v52, %v991_v13  ;;  %6779 = vst [vmem:[#allocation118_spill] sm:$0xff] %v4707_v25  ;;  %v994_v63 = vmul.f32 %v4707_v25, %v4707_v25  ;;  %v6783_v52 = vld [vmem:[#allocation41_spill] sm:$0xff]  ;;  %v3059_v5 = vld [vmem:[%s3204_s28 + $0x54] sm:$0xff] }
 0x1aa   : > { %v4709_v10 = vpop.permute.xlu1 %873  ;;  %v4842_v60 = vsub.f32 %v3059_v5, %v4408_v56  ;;  %v6819_v5 = vld [vmem:[#allocation47_spill] sm:$0xff] }
 0x1ab   : > { %6777 = vst [vmem:[#allocation116_spill] sm:$0xff] %v4698_v19  ;;  %v4700_v24 = vadd.f32 %v1099_v58, %v1007_v26  ;;  %v6781_v58 = vld [vmem:[#allocation42_spill] sm:$0xff]  ;;  %v1002_v12 = vadd.f32 %v994_v63, %v6783_v52 }
 0x1ac   : > { %v4711_v51 = vpop.permute.xlu0 %1175  ;;  %v986_v26 = vadd.f32 %v4707_v25, %v6781_v58  ;;  %v6785_v52 = vld [vmem:[#allocation38_spill] sm:$0xff]  ;;  %6806 = vst [vmem:[#allocation126_spill] sm:$0xff] %v4842_v60 }
 0x1ad   : > { %6778 = vst [vmem:[#allocation117_spill] sm:$0xff] %v4700_v24  ;;  %v1130_v63 = vsel %vm877_vm0, %v6785_v52, %v1119_v14  ;;  %v1191_v19 = vsel %vm1026_vm3, %v6819_v5, %v4711_v51 }
 0x1ae   : > { %v1011_v38 = vpop.permute.xlu1 %1010 }
 0x1af   : > { %v1061_v45 = vsel %vm1026_vm3, %v6780_v30, %v1011_v38  ;;  %v3049_v30 = vld [vmem:[%s3204_s28 + $0x50] sm:$0xff] }
 0x1b0   : > { %v4718_v13 = vpop.permute.xlu0 %1179  ;;  %v4723_v36 = vsub.f32 %v1061_v45, %v4703_v4  ;;  %v4739_v58 = vsub.f32 %v3049_v30, %v4408_v56  ;;  %v4754_v30 = vsub.f32 %v1130_v63, %v4408_v56 }
 0x1b2   : > { %6782 = vst [vmem:[#allocation43_spill] sm:$0xff] %v4723_v36  ;;  %v4727_v22 = vadd.f32 %v4723_v36, %v986_v26  ;;  %v1094_v48 = vmul.f32 %v4723_v36, %v4723_v36  ;;  %v4731_v29 = vpop.permute.xlu1 %1014  ;;  %6784 = vst [vmem:[#allocation42_spill] sm:$0xff] %v4739_v58  ;;  %v998_v26 = vmul.f32 %v4739_v58, %v4739_v58 }
 0x1b3   : > { %6786 = vst [vmem:[#allocation41_spill] sm:$0xff] %v4754_v30  ;;  %v990_v61 = vadd.f32 %v4739_v58, %v4545_v49  ;;  %v4783_v49 = vsub.f32 %v3050_v6, %v4419_v37  ;;  %v3052_v6 = vld [vmem:[%s3204_s28 + $0x28] sm:$0xff]  ;;  %v1067_v58 = vsel %vm1026_vm3, %v4641_v23, %v4688_v1 }
 0x1b4   : > { %v4733_v15 = vpop.permute.xlu0 %1429  ;;  %v4735_v38 = vadd.f32 %v1094_v48, %v1002_v12  ;;  %v1006_v52 = vadd.f32 %v998_v26, %v4565_v18  ;;  %v3057_v26 = vld [vmem:[%s3204_s28 + $0x5c] sm:$0xff] }
 0x1b5   : > { %6793 = vst [vmem:[#allocation119_spill] sm:$0xff] %v4783_v49  ;;  %v4830_v43 = vsub.f32 %v3057_v26, %v4515_v62  ;;  %v6808_v26 = vld [vmem:[#allocation75_spill] sm:$0xff] }
 0x1b6   : > { %v4741_v45 = vpop.permute.xlu1 %1288  ;;  %v4849_v16 = vsub.f32 %v6808_v26, %v4419_v37  ;;  %v3060_v62 = vld [vmem:[%s3204_s28 + $0xc] sm:$0xff] }
 0x1b7   : > { %6803 = vst [vmem:[#allocation124_spill] sm:$0xff] %v4830_v43 }
 0x1b8   : > { %v4743_v54 = vpop.permute.xlu0 %1122  ;;  %6809 = vst [vmem:[#allocation75_spill] sm:$0xff] %v4849_v16 }
 0x1ba   : > { %v1019_v27 = vpop.permute.xlu1 %1018 }
 0x1bb   : > { %v1065_v48 = vsel %vm1026_vm3, %v4603_v55, %v1019_v27 }
 0x1bc   : > { %v1184_v12 = vpop.permute.xlu0 %1183  ;;  %v4759_v28 = vsub.f32 %v1065_v48, %v4408_v56 }
 0x1bd   : > { %v1195_v14 = vsel %vm1026_vm3, %v6788_v35, %v1184_v12  ;;  %v1163_v35 = vmul.f32 %v4754_v30, %v4754_v30 }
 0x1be   : > { %6787 = vst [vmem:[#allocation38_spill] sm:$0xff] %v4759_v28  ;;  %v1090_v21 = vadd.f32 %v4759_v28, %v990_v61  ;;  %v1098_v27 = vmul.f32 %v4759_v28, %v4759_v28  ;;  %v4769_v55 = vsub.f32 %v1195_v14, %v4408_v56  ;;  %v1111_v63 = vpop.permute.xlu1 %1110 }
 0x1c0   : > { %6789 = vst [vmem:[#allocation33_spill] sm:$0xff] %v4769_v55  ;;  %v4772_v48 = vpop.permute.xlu0 %1250  ;;  %v1106_v18 = vadd.f32 %v1098_v27, %v1006_v52  ;;  %v1155_v61 = vadd.f32 %v4754_v30, %v1090_v21  ;;  %v1228_v52 = vmul.f32 %v4769_v55, %v4769_v55  ;;  %v3053_v27 = vld [vmem:[%s3204_s28 + $0x4] sm:$0xff] }
 0x1c1   : > { %v4806_v12 = vsub.f32 %v3053_v27, %v4703_v4  ;;  %v3055_v27 = vld [vmem:[%s3204_s28 + $0x34] sm:$0xff] }
 0x1c2   : > { %v1171_v20 = vadd.f32 %v1163_v35, %v1106_v18  ;;  %v4786_v39 = vadd.f32 %v4769_v55, %v1155_v61  ;;  %v1115_v21 = vpop.permute.xlu1 %1114  ;;  %v4798_v35 = vsub.f32 %v3052_v6, %v4794_v50  ;;  %v3054_v6 = vld [vmem:[%s3204_s28 + $0x2c] sm:$0xff]  ;;  %v1126_v61 = vsel %vm877_vm0, %v6800_v17, %v1111_v63  ;;  %v3058_v17 = vld [vmem:[%s3204_s28 + $0x84] sm:$0xff] }
 0x1c3   : > { %6798 = vst [vmem:[#allocation121_spill] sm:$0xff] %v4806_v12  ;;  %v4814_v25 = vsub.f32 %v3054_v6, %v4794_v50  ;;  %v4822_v14 = vsub.f32 %v3055_v27, %v4392_v44  ;;  %v4837_v63 = vsub.f32 %v3058_v17, %v4448_v42  ;;  %v1063_v17 = vsel %vm1026_vm3, %v4453_v46, %v4731_v29  ;;  %v6816_v46 = vld [vmem:[#allocation36_spill] sm:$0xff]  ;;  %v6818_v44 = vld [vmem:[#allocation67_spill] sm:$0xff] }
 0x1c4   : > { %6796 = vst [vmem:[#allocation120_spill] sm:$0xff] %v4798_v35  ;;  %v4800_v18 = vpop.permute.xlu0 %1254  ;;  %v4808_v3 = vadd.f32 %v1228_v52, %v1171_v20  ;;  %v3056_v20 = vld [vmem:[%s3204_s28 + $0x80] sm:$0xff]  ;;  %v4856_v9 = vsub.f32 %v1126_v61, %v4703_v4  ;;  %v1128_v29 = vsel %vm877_vm0, %v6816_v46, %v1115_v21  ;;  %v4881_v28 = vsub.f32 %v1063_v17, %v4794_v50 }
 0x1c5   : > { %6799 = vst [vmem:[#allocation122_spill] sm:$0xff] %v4814_v25  ;;  %6801 = vst [vmem:[#allocation24_spill] sm:$0xff] %v4822_v14  ;;  %v4826_v52 = vsub.f32 %v3056_v20, %v4448_v42  ;;  %v996_v55 = vmul.f32 %v4798_v35, %v4798_v35  ;;  %v4896_v5 = vsub.f32 %v1128_v29, %v4794_v50  ;;  %v6828_v29 = vld [vmem:[#allocation77_spill] sm:$0xff] }
 0x1c6   : > { %v4832_v6 = vpop.permute.xlu1 %1298  ;;  %6805 = vst [vmem:[#allocation125_spill] sm:$0xff] %v4837_v63  ;;  %6810 = vst [vmem:[#allocation127_spill] sm:$0xff] %v4856_v9  ;;  %v4862_v63 = vsub.f32 %v3060_v62, %v4476_v53  ;;  %v926_v62 = vsel %vm877_vm0, %v6818_v44, %v4709_v10  ;;  %v1159_v44 = vmul.f32 %v4856_v9, %v4856_v9  ;;  %v6826_v10 = vld [vmem:[#allocation32_spill] sm:$0xff] }
 0x1c7   : > { %6802 = vst [vmem:[#allocation123_spill] sm:$0xff] %v4826_v52  ;;  %6820 = vst [vmem:[#allocation36_spill] sm:$0xff] %v4881_v28  ;;  %v1151_v17 = vadd.f32 %v4856_v9, %v4727_v22  ;;  %v4903_v21 = vsub.f32 %v926_v62, %v4419_v37  ;;  %v4906_v46 = vsub.f32 %v1191_v19, %v4703_v4 }
 0x1c8   : > { %v4844_v20 = vpop.permute.xlu0 %1437  ;;  %6813 = vst [vmem:[#allocation128_spill] sm:$0xff] %v4862_v63  ;;  %6824 = vst [vmem:[#allocation67_spill] sm:$0xff] %v4896_v5  ;;  %v988_v51 = vadd.f32 %v4798_v35, %v6826_v10  ;;  %v1096_v22 = vmul.f32 %v4881_v28, %v4881_v28  ;;  %v1306_v61 = vsel %vm877_vm0, %v6828_v29, %v4772_v48  ;;  %v6829_v10 = vld [vmem:[#allocation49_spill] sm:$0xff]  ;;  %v6831_v29 = vld [vmem:[#allocation70_spill] sm:$0xff] }
 0x1c9   : > { %6825 = vst [vmem:[#allocation47_spill] sm:$0xff] %v4903_v21  ;;  %v1001_v62 = vmul.f32 %v4826_v52, %v4826_v52  ;;  %v4921_v19 = vmul.f32 %v4783_v49, %v4783_v49  ;;  %v1193_v27 = vsel %vm1026_vm3, %v6829_v10, %v4718_v13  ;;  %v1167_v41 = vadd.f32 %v1159_v44, %v4735_v38 }
 0x1ca   : > { %v1414_v43 = vpop.permute.xlu1 %1413  ;;  %v1088_v35 = vadd.f32 %v4881_v28, %v988_v51  ;;  %v4930_v48 = vsub.f32 %v1067_v58, %v4419_v37  ;;  %v1004_v26 = vadd.f32 %v996_v55, %v6831_v29  ;;  %v1216_v53 = vadd.f32 %v4906_v46, %v1151_v17 }
 0x1cb   : > { %v1161_v9 = vmul.f32 %v4896_v5, %v4896_v5  ;;  %v951_v36 = vadd.f32 %v4903_v21, %v4523_v34  ;;  %v1224_v13 = vmul.f32 %v4906_v46, %v4906_v46  ;;  %v4941_v51 = vsub.f32 %v1306_v61, %v4703_v4 }
 0x1cc   : > { %v4883_v24 = vpop.permute.xlu0 %1187  ;;  %6830 = vst [vmem:[#allocation32_spill] sm:$0xff] %v4930_v48  ;;  %v1153_v38 = vadd.f32 %v4896_v5, %v1088_v35  ;;  %v4945_v58 = vsub.f32 %v1193_v27, %v4794_v50  ;;  %v1104_v55 = vadd.f32 %v1096_v22, %v1004_v26  ;;  %v1380_v10 = vmul.f32 %v4806_v12, %v4806_v12 }
 0x1cd   : > { %v1382_v34 = vmul.f32 %v4814_v25, %v4814_v25  ;;  %v959_v29 = vmul.f32 %v4903_v21, %v4903_v21  ;;  %v1232_v61 = vadd.f32 %v1224_v13, %v1167_v41  ;;  %v1308_v35 = vsel %vm877_vm0, %v4695_v0, %v4800_v18 }
 0x1ce   : > { %v1422_v23 = vpop.permute.xlu1 %1421  ;;  %v4961_v27 = vmul.f32 %v4842_v60, %v4842_v60  ;;  %v1331_v26 = vadd.f32 %v4941_v51, %v1216_v53  ;;  %v1169_v22 = vadd.f32 %v1161_v9, %v1104_v55  ;;  %v1009_v5 = vadd.f32 %v1001_v62, %v4609_v57  ;;  %v6833_v53 = vld [vmem:[#allocation40_spill] sm:$0xff] }
 0x1cf   : > { %v1100_v41 = vmul.f32 %v4930_v48, %v4930_v48  ;;  %v992_v13 = vadd.f32 %v4783_v49, %v951_v36  ;;  %v1339_v0 = vmul.f32 %v4941_v51, %v4941_v51  ;;  %v1218_v18 = vadd.f32 %v4945_v58, %v1153_v38 }
 0x1d0   : > { %v1259_v1 = vpop.permute.xlu0 %1258  ;;  %v1226_v28 = vmul.f32 %v4945_v58, %v4945_v58  ;;  %v4980_v57 = vsub.f32 %v1308_v35, %v4794_v50  ;;  %v967_v55 = vadd.f32 %v959_v29, %v4540_v32 }
 0x1d1   : > { %v1310_v9 = vsel %vm877_vm0, %v4741_v45, %v1259_v1  ;;  %v1347_v38 = vadd.f32 %v1339_v0, %v1232_v61  ;;  %v1092_v1 = vadd.f32 %v4930_v48, %v992_v13 }
 0x1d2   : > { %v4947_v44 = vpop.permute.xlu1 %1425  ;;  %v1333_v29 = vadd.f32 %v4980_v57, %v1218_v18 }
 0x1d3   : > { %6832 = vst [vmem:[#allocation77_spill] sm:$0xff] %v4947_v44  ;;  %v993_v44 = vadd.f32 %v4826_v52, %v4585_v8  ;;  %v1132_v8 = vsel %vm877_vm0, %v6833_v53, %v4743_v54  ;;  %v1234_v54 = vadd.f32 %v1226_v28, %v1169_v22  ;;  %v1372_v53 = vadd.f32 %v4806_v12, %v1331_v26 }
 0x1d4   : > { %v1263_v17 = vpop.permute.xlu0 %1262  ;;  %v5000_v32 = vsub.f32 %v1132_v8, %v4419_v37  ;;  %v1197_v26 = vsel %vm1026_vm3, %v4425_v33, %v4883_v24  ;;  %v1388_v22 = vadd.f32 %v1380_v10, %v1347_v38  ;;  %v1374_v10 = vadd.f32 %v4814_v25, %v1333_v29 }
 0x1d5   : > { %v1312_v24 = vsel %vm877_vm0, %v4832_v6, %v1263_v17 }
 0x1d6   : > { %v1025_v36 = vpop.permute.xlu1 %1024  ;;  %6835 = vst [vmem:[#allocation70_spill] sm:$0xff] %v5000_v32 }
 0x1d7   : > { %v1068_v52 = vsel %vm1026_vm3, %v4634_v47, %v1025_v36  ;;  %v5004_v47 = vsub.f32 %v1310_v9, %v4408_v56 }
 0x1d8   : > { %v1397_v62 = vpop.permute.xlu0 %1396  ;;  %v4992_v35 = vsub.f32 %v1068_v52, %v4448_v42 }
 0x1d9   : > { %v1444_v49 = vsel %vm1026_vm3, %v1414_v43, %v1397_v62  ;;  %6836 = vst [vmem:[#allocation40_spill] sm:$0xff] %v5004_v47  ;;  %v1341_v43 = vmul.f32 %v4980_v57, %v4980_v57  ;;  %v1335_v36 = vadd.f32 %v5004_v47, %v4786_v39  ;;  %v1343_v33 = vmul.f32 %v5004_v47, %v5004_v47 }
 0x1da   : > { %6834 = vst [vmem:[#allocation49_spill] sm:$0xff] %v4992_v35  ;;  %v4996_v45 = vsub.f32 %v1444_v49, %v4703_v4  ;;  %v5009_v28 = vadd.f32 %v4992_v35, %v993_v44  ;;  %v1101_v4 = vmul.f32 %v4992_v35, %v4992_v35  ;;  %v5014_v52 = vpop.permute.xlu1 %1120  ;;  %v1157_v39 = vadd.f32 %v5000_v32, %v1092_v1 }
 0x1db   : > { %v1349_v0 = vadd.f32 %v1341_v43, %v1234_v54  ;;  %v5115_v35 = vmul.f32 %v4862_v63, %v4862_v63 }
 0x1dc   : > { %v1469_v49 = vadd.f32 %v4996_v45, %v1372_v53  ;;  %v1401_v61 = vpop.permute.xlu0 %1400  ;;  %v1477_v13 = vmul.f32 %v4996_v45, %v4996_v45  ;;  %v5024_v18 = vadd.f32 %v1101_v4, %v1009_v5  ;;  %v5039_v5 = vsub.f32 %v1197_v26, %v4419_v37 }
 0x1dd   : > { %v1446_v44 = vsel %vm1026_vm3, %v1422_v23, %v1401_v61  ;;  %v1008_v23 = vadd.f32 %v4921_v19, %v967_v55  ;;  %v1165_v53 = vmul.f32 %v5000_v32, %v5000_v32  ;;  %v5050_v19 = vsub.f32 %v1312_v24, %v4419_v37  ;;  %v6859_v32 = vld [vmem:[#allocation127_spill] sm:$0xff] }
 0x1de   : > { %v1493_v8 = vmul.f32 %v1469_v49, %v1469_v49  ;;  %v5027_v9 = vsub.f32 %v1446_v44, %v4794_v50  ;;  %6837 = vst [vmem:[#allocation129_spill] sm:$0xff] %v5039_v5  ;;  %v1485_v62 = vadd.f32 %v1477_v13, %v1388_v22  ;;  %v5041_v38 = vpop.permute.xlu1 %1177  ;;  %v1390_v55 = vadd.f32 %v1382_v34, %v1349_v0 }
 0x1df   : > { %6838 = vst [vmem:[#allocation130_spill] sm:$0xff] %v5050_v19  ;;  %v1351_v4 = vadd.f32 %v1343_v33, %v4808_v3  ;;  %v1376_v49 = vadd.f32 %v4842_v60, %v1335_v36  ;;  %v1108_v26 = vadd.f32 %v1100_v41, %v1008_v23  ;;  %v1222_v22 = vadd.f32 %v5039_v5, %v1157_v39 }
 0x1e0   : > { %v1501_v50 = vmul.f32 0.055555556, %v1493_v8  ;;  %v1405_v54 = vpop.permute.xlu0 %1404  ;;  %v1471_v43 = vadd.f32 %v5027_v9, %v1374_v10  ;;  %v1479_v6 = vmul.f32 %v5027_v9, %v5027_v9  ;;  %v1230_v13 = vmul.f32 %v5039_v5, %v5039_v5 }
 0x1e1   : > { %v1448_v29 = vsel %vm1026_vm3, %v4733_v15, %v1405_v54  ;;  %v1173_v33 = vadd.f32 %v1165_v53, %v1108_v26  ;;  %v1345_v41 = vmul.f32 %v5050_v19, %v5050_v19  ;;  %v1392_v23 = vadd.f32 %v4961_v27, %v1351_v4  ;;  %v6839_v54 = vld [vmem:[#allocation68_spill] sm:$0xff]  ;;  %v6841_v53 = vld [vmem:[#allocation102_spill] sm:$0xff] }
 0x1e2   : > { %v1509_v17 = vsub.f32 %v1485_v62, %v1501_v50  ;;  %v1495_v1 = vmul.f32 %v1471_v43, %v1471_v43  ;;  %v5058_v61 = vsub.f32 %v1448_v29, %v4408_v56  ;;  %v5063_v34 = vpop.permute.xlu1 %1181  ;;  %v1487_v8 = vadd.f32 %v1479_v6, %v1390_v55  ;;  %v6840_v43 = vld [vmem:[#allocation10_spill] sm:$0xff] }
 0x1e3   : > { %v1337_v56 = vadd.f32 %v5050_v19, %v1222_v22  ;;  %v1238_v29 = vadd.f32 %v1230_v13, %v1173_v33  ;;  %v6844_v13 = vld [vmem:[#allocation103_spill] sm:$0xff]  ;;  %v6852_v33 = vld [vmem:[#allocation36_spill] sm:$0xff] }
 0x1e4   : > { %v1517_v44 = vmul.f32 0.05882353, %v1509_v17  ;;  %v1409_v0 = vpop.permute.xlu0 %1408  ;;  %v1503_v15 = vmul.f32 0.055555556, %v1495_v1  ;;  %v1473_v3 = vadd.f32 %v5058_v61, %v1376_v49  ;;  %v1481_v36 = vmul.f32 %v5058_v61, %v5058_v61  ;;  %v6883_v19 = vld [vmem:[#allocation112_spill] sm:$0xff] }
 0x1e5   : > { %v1450_v50 = vsel %vm1026_vm3, %v4844_v20, %v1409_v0  ;;  %v1378_v20 = vadd.f32 %v4849_v16, %v1337_v56  ;;  %v6847_v56 = vld [vmem:[#allocation22_spill] sm:$0xff]  ;;  %v2201_v30 = vand.u32 2147483647, %v5058_v61 }
 0x1e6   : > { %v5071_v24 = vmax.f32 %v1517_v44, 0.0  ;;  %v1511_v10 = vsub.f32 %v1487_v8, %v1503_v15  ;;  %v1497_v62 = vmul.f32 %v1473_v3, %v1473_v3  ;;  %v5081_v55 = vpop.permute.xlu1 %1433  ;;  %v1489_v49 = vadd.f32 %v1481_v36, %v1392_v23  ;;  %v6845_v36 = vld [vmem:[#allocation13_spill] sm:$0xff]  ;;  %v6849_v23 = vld [vmem:[#allocation48_spill] sm:$0xff] }
 0x1e7   : > { %6842 = vst [vmem:[#allocation68_spill] sm:$0xff] %v5081_v55  ;;  %v5087_v22 = vsub.f32 %v1450_v50, %v4419_v37  ;;  %v1353_v44 = vadd.f32 %v1345_v41, %v1238_v29  ;;  %v1386_v15 = vmul.f32 %v4849_v16, %v4849_v16 }
 0x1e8   : > { %2941 = vrsqrt.f32 %v5071_v24  ;;  %v1519_v1 = vmul.f32 0.05882353, %v1511_v10  ;;  %v1505_v26 = vmul.f32 0.055555556, %v1497_v62  ;;  %v6846_v10 = vld [vmem:[#allocation23_spill] sm:$0xff]  ;;  %vm1535_vm4 = vcmp.eq.f32.partialorder %v5071_v24, inf }
 0x1e9   : > { %6843 = vst [vmem:[#allocation10_spill] sm:$0xff] %v5087_v22  ;;  %v1475_v62 = vadd.f32 %v5087_v22, %v1378_v20  ;;  %v1483_v50 = vmul.f32 %v5087_v22, %v5087_v22  ;;  %v1394_v37 = vadd.f32 %v1386_v15, %v1353_v44  ;;  %vm1537_vm5 = vcmp.eq.f32.partialorder %v5071_v24, 0.0  ;;  %v6870_v20 = vld [vmem:[#allocation114_spill] sm:$0xff] }
 0x1ea   : > { %v5089_v0 = vmax.f32 %v1519_v1, 0.0  ;;  %v1513_v8 = vsub.f32 %v1489_v49, %v1505_v26  ;;  %v5097_v4 = vpop.permute.xlu1 %1124  ;;  %v6855_v49 = vld [vmem:[#allocation28_spill] sm:$0xff] }
 0x1eb   : > { %v1499_v27 = vmul.f32 %v1475_v62, %v1475_v62  ;;  %v1491_v44 = vadd.f32 %v1483_v50, %v1394_v37  ;;  %v6853_v62 = vld [vmem:[#allocation124_spill] sm:$0xff]  ;;  %v1538_v50 = vand.u32 2147483648, %v5071_v24  ;;  %v1131_v39 = vsel %vm877_vm0, %v6855_v49, %v5014_v52 }
 0x1ec   : > { %2943 = vrsqrt.f32 %v5089_v0  ;;  %v1521_v26 = vmul.f32 0.05882353, %v1513_v8  ;;  %v5119_v8 = vmul.f32 %v4822_v14, %v4822_v14  ;;  %v5132_v6 = vmul.f32 %v6853_v62, %v6853_v62 }
 0x1ed   : > { %v1507_v41 = vmul.f32 0.055555556, %v1499_v27  ;;  %vm1549_vm6 = vcmp.eq.f32.partialorder %v5089_v0, inf  ;;  %v1552_v29 = vand.u32 2147483648, %v5089_v0  ;;  %vm1551_vm7 = vcmp.eq.f32.partialorder %v5089_v0, 0.0 }
 0x1ee   : > { %v5109_v17 = vmax.f32 %v1521_v26, 0.0  ;;  %v5111_v3 = vpop.permute.xlu1 %1185  ;;  %v6851_v26 = vld [vmem:[#allocation43_spill] sm:$0xff]  ;;  %6854 = vst [vmem:[#allocation102_spill] sm:$0xff] %v5132_v6 }
 0x1ef   : > { %v1515_v60 = vsub.f32 %v1491_v44, %v1507_v41  ;;  %v6856_v41 = vld [vmem:[#allocation72_spill] sm:$0xff] }
 0x1f0   : > { %2945 = vrsqrt.f32 %v5109_v17  ;;  %v1192_v44 = vsel %vm1026_vm3, %v6856_v41, %v5041_v38  ;;  %v5158_v38 = vsub.f32 %v1131_v39, %v6862_v11  ;;  %v6864_v41 = vld [vmem:[#allocation44_spill] sm:$0xff]  ;;  %v6867_v39 = vld [vmem:[#allocation67_spill] sm:$0xff]  ;;  %vm1563_vm8 = vcmp.eq.f32.partialorder %v5109_v17, inf }
 0x1f1   : > { %v5162_v62 = vsub.f32 %v1192_v44, %v6864_v41  ;;  %vm1565_vm9 = vcmp.eq.f32.partialorder %v5109_v17, 0.0 }
 0x1f2   : > { %v2942_v15 = vpop.eup %2941  ;;  %v1253_v27 = vpop.permute.xlu1 %1252  ;;  %6863 = vst [vmem:[#allocation13_spill] sm:$0xff] %v5158_v38  ;;  %v1164_v59 = vmul.f32 %v5158_v38, %v5158_v38 }
 0x1f3   : > { %v1534_v16 = vmul.f32 %v2942_v15, %v5071_v24  ;;  %v1523_v15 = vmul.f32 0.05882353, %v1515_v60  ;;  %6865 = vst [vmem:[#allocation23_spill] sm:$0xff] %v5162_v62 }
 0x1f5   : > { %v1536_v55 = vsel %vm1535_vm4, %v5071_v24, %v1534_v16  ;;  %v5151_v16 = vmax.f32 %v1523_v15, 0.0  ;;  %v6860_v24 = vld [vmem:[#allocation125_spill] sm:$0xff] }
 0x1f6   : > { %v1539_v21 = vsel %vm1537_vm5, %v1538_v50, %v1536_v55  ;;  %v2944_v25 = vpop.eup %2943  ;;  %v5155_v12 = vmul.f32 %v6860_v24, %v6860_v24  ;;  %v6866_v55 = vld [vmem:[#allocation51_spill] sm:$0xff] }
 0x1f7   : > { %v1589_v49 = vmul.f32 0.1, %v1539_v21  ;;  %v1548_v60 = vmul.f32 %v2944_v25, %v5089_v0  ;;  %v1194_v50 = vsel %vm1026_vm3, %v6866_v55, %v5063_v34  ;;  %v1257_v21 = vpop.permute.xlu1 %1256  ;;  %2947 = vrsqrt.f32 %v5151_v16  ;;  %v6868_v55 = vld [vmem:[#allocation29_spill] sm:$0xff] }
 0x1f8   : > { %6861 = vst [vmem:[#allocation103_spill] sm:$0xff] %v5155_v12  ;;  %vm1577_vm10 = vcmp.eq.f32.partialorder %v5151_v16, inf  ;;  %vm1579_vm11 = vcmp.eq.f32.partialorder %v5151_v16, 0.0 }
 0x1f9   : > { %v1597_v15 = vadd.f32 1e-08, %v1589_v49  ;;  %v1550_v44 = vsel %vm1549_vm6, %v5089_v0, %v1548_v60  ;;  %v5177_v49 = vsub.f32 %v1194_v50, %v6868_v55  ;;  %v1307_v60 = vsel %vm877_vm0, %v6870_v20, %v1253_v27  ;;  %v6873_v20 = vld [vmem:[#allocation54_spill] sm:$0xff] }
 0x1fa   : > { %v1553_v34 = vsel %vm1551_vm7, %v1552_v29, %v1550_v44  ;;  %v2946_v12 = vpop.eup %2945  ;;  %v1225_v0 = vmul.f32 %v5162_v62, %v5162_v62  ;;  %v6871_v29 = vld [vmem:[#allocation31_spill] sm:$0xff]  ;;  %v6872_v44 = vld [vmem:[#allocation80_spill] sm:$0xff]  ;;  %v1196_v27 = vsel %vm1026_vm3, %v6873_v20, %v5111_v3 }
 0x1fb   : > { %2949 = vrcp.f32 %v1597_v15  ;;  %6869 = vst [vmem:[#allocation22_spill] sm:$0xff] %v5177_v49  ;;  %v1591_v52 = vmul.f32 0.1, %v1553_v34  ;;  %v1562_v48 = vmul.f32 %v2946_v12, %v5109_v17  ;;  %v1133_v50 = vsel %vm877_vm0, %v6871_v29, %v5097_v4 }
 0x1fc   : > { %v1309_v24 = vsel %vm877_vm0, %v6872_v44, %v1257_v21  ;;  %v1566_v34 = vand.u32 2147483648, %v5109_v17  ;;  %v5201_v12 = vpop.permute.xlu1 %1441  ;;  %v1227_v4 = vmul.f32 %v5177_v49, %v5177_v49  ;;  %v5211_v29 = vsub.f32 %v1133_v50, %v4448_v42  ;;  %v6881_v50 = vld [vmem:[#allocation110_spill] sm:$0xff] }
 0x1fd   : > { %v1599_v25 = vadd.f32 1e-08, %v1591_v52  ;;  %6874 = vst [vmem:[#allocation48_spill] sm:$0xff] %v5201_v12  ;;  %v1564_v5 = vsel %vm1563_vm8, %v5109_v17, %v1562_v48  ;;  %v5208_v52 = vsub.f32 %v1307_v60, %v6864_v41  ;;  %v5214_v44 = vsub.f32 %v1309_v24, %v6868_v55  ;;  %v6879_v12 = vld [vmem:[#allocation116_spill] sm:$0xff]  ;;  %v6880_v60 = vld [vmem:[#allocation117_spill] sm:$0xff] }
 0x1fe   : > { %v1567_v21 = vsel %vm1565_vm9, %v1566_v34, %v1564_v5  ;;  %6876 = vst [vmem:[#allocation36_spill] sm:$0xff] %v5211_v29  ;;  %v2197_v48 = vand.u32 2147483647, %v4996_v45  ;;  %v5219_v17 = vsub.f32 %v1196_v27, %v6862_v11  ;;  %v1156_v41 = vadd.f32 %v5158_v38, %v6879_v12  ;;  %v6882_v55 = vld [vmem:[#allocation53_spill] sm:$0xff]  ;;  %v6884_v27 = vld [vmem:[#allocation115_spill] sm:$0xff] }
 0x1ff   : > { %6875 = vst [vmem:[#allocation43_spill] sm:$0xff] %v5208_v52  ;;  %2951 = vrcp.f32 %v1599_v25  ;;  %6877 = vst [vmem:[#allocation28_spill] sm:$0xff] %v5214_v44  ;;  %v1593_v20 = vmul.f32 0.1, %v1567_v21  ;;  %v1172_v1 = vadd.f32 %v1164_v59, %v6880_v60  ;;  %v1217_v34 = vadd.f32 %v5162_v62, %v6881_v50 }
 0x200   : > { %6878 = vst [vmem:[#allocation72_spill] sm:$0xff] %v5219_v17  ;;  %v1233_v47 = vadd.f32 %v1225_v0, %v6882_v55  ;;  %v1219_v45 = vadd.f32 %v5177_v49, %v6883_v19  ;;  %v1340_v11 = vmul.f32 %v5208_v52, %v5208_v52  ;;  %v1235_v21 = vadd.f32 %v1227_v4, %v6884_v27  ;;  %v1190_v50 = vpop.permute.xlu1 %1189  ;;  %v6885_v49 = vld [vmem:[#allocation56_spill] sm:$0xff] }
 0x201   : > { %v2948_v24 = vpop.eup %2947  ;;  %v1601_v3 = vadd.f32 1e-08, %v1593_v20  ;;  %v1166_v59 = vmul.f32 %v5211_v29, %v5211_v29  ;;  %v1342_v60 = vmul.f32 %v5214_v44, %v5214_v44  ;;  %v1580_v19 = vand.u32 2147483648, %v5151_v16 }
 0x202   : > { %v1576_v12 = vmul.f32 %v2948_v24, %v5151_v16  ;;  %v1229_v0 = vmul.f32 %v5219_v17, %v5219_v17  ;;  %v1332_v24 = vadd.f32 %v5208_v52, %v1217_v34  ;;  %v1348_v27 = vadd.f32 %v1340_v11, %v1233_v47 }
 0x203   : > { %2953 = vrcp.f32 %v1601_v3  ;;  %v1334_v38 = vadd.f32 %v5214_v44, %v1219_v45  ;;  %v1198_v62 = vsel %vm1026_vm3, %v6885_v49, %v1190_v50  ;;  %v1350_v7 = vadd.f32 %v1342_v60, %v1235_v21 }
 0x204   : > { %v1578_v4 = vsel %vm1577_vm10, %v5151_v16, %v1576_v12  ;;  %v5253_v16 = vadd.f32 %v5211_v29, %v5009_v28  ;;  %v5256_v34 = vadd.f32 %v1166_v59, %v5024_v18  ;;  %v5259_v47 = vadd.f32 %v5219_v17, %v1156_v41  ;;  %v6897_v59 = vld [vmem:[#allocation76_spill] sm:$0xff] }
 0x205   : > { %v2950_v5 = vpop.eup %2949  ;;  %v1581_v55 = vsel %vm1579_vm11, %v1580_v19, %v1578_v4  ;;  %v5265_v61 = vadd.f32 %v1229_v0, %v1172_v1  ;;  %v5268_v21 = vsub.f32 %v1198_v62, %v4448_v42  ;;  %v5271_v28 = vadd.f32 %v4862_v63, %v1332_v24  ;;  %v6894_v1 = vld [vmem:[#allocation73_spill] sm:$0xff]  ;;  %v1261_v42 = vpop.permute.xlu1 %1260  ;;  %v6903_v4 = vld [vmem:[#allocation90_spill] sm:$0xff] }
 0x206   : > { %v1613_v20 = vmul.f32 %v2950_v5, %v1597_v15  ;;  %v1595_v37 = vmul.f32 0.1, %v1581_v55  ;;  %6886 = vst [vmem:[#allocation127_spill] sm:$0xff] %v5253_v16  ;;  %6887 = vst [vmem:[#allocation62_spill] sm:$0xff] %v5256_v34  ;;  %v5274_v18 = vadd.f32 %v5115_v35, %v1348_v27  ;;  %v5277_v41 = vadd.f32 %v4822_v14, %v1334_v38  ;;  %v6899_v38 = vld [vmem:[#allocation78_spill] sm:$0xff] }
 0x207   : > { %6888 = vst [vmem:[#allocation44_spill] sm:$0xff] %v5259_v47  ;;  %6889 = vst [vmem:[#allocation51_spill] sm:$0xff] %v5265_v61  ;;  %v5285_v62 = vadd.f32 %v5119_v8, %v1350_v7  ;;  %v6898_v35 = vand.u32 2147483647, %v6897_v59  ;;  %v6900_v50 = vand.u32 2147483647, %v6899_v38 }
 0x208   : > { %v1621_v6 = vsub.f32 2.0, %v1613_v20  ;;  %v5263_v49 = vadd.f32 1e-08, %v1595_v37  ;;  %6890 = vst [vmem:[#allocation67_spill] sm:$0xff] %v5268_v21  ;;  %6891 = vst [vmem:[#allocation29_spill] sm:$0xff] %v5271_v28 }
 0x209   : > { %v2952_v45 = vpop.eup %2951  ;;  %6892 = vst [vmem:[#allocation114_spill] sm:$0xff] %v5274_v18  ;;  %6893 = vst [vmem:[#allocation31_spill] sm:$0xff] %v5277_v41  ;;  %v6895_v37 = vand.u32 2147483647, %v6894_v1  ;;  %v6904_v24 = vand.u32 2147483647, %v6903_v4  ;;  %v5309_v1 = vmul.f32 %v5268_v21, %v5268_v21  ;;  %v5448_v21 = vpop.permute.xlu1 %1264 }
 0x20a   : > { %v5261_v11 = vmul.f32 %v2950_v5, %v1621_v6  ;;  %v1615_v12 = vmul.f32 %v2952_v45, %v1599_v25  ;;  %2955 = vrcp.f32 %v5263_v49  ;;  %6896 = vst [vmem:[#allocation80_spill] sm:$0xff] %v5285_v62  ;;  %v6905_v7 = vand.u32 2147483647, %v6844_v13  ;;  %v6911_v4 = vld [vmem:[#allocation74_spill] sm:$0xff] }
 0x20b   : > { %v6906_v27 = vand.u32 2147483647, %v6841_v53  ;;  %6907 = vst [vmem:[#allocation54_spill] sm:$0xff] %v5309_v1  ;;  %v6909_v13 = vand.u32 2147483647, %v6859_v32  ;;  %v6910_v53 = vld [vmem:[#allocation108_spill] sm:$0xff] }
 0x20c   : > { %v2205_v6 = vmul.f32 %v2197_v48, %v5261_v11  ;;  %v1653_v5 = vmul.f32 %v6895_v37, %v5261_v11  ;;  %v1623_v25 = vsub.f32 2.0, %v1615_v12  ;;  %v1724_v60 = vmul.f32 %v6898_v35, %v5261_v11  ;;  %v6901_v48 = vld [vmem:[#allocation79_spill] sm:$0xff] }
 0x20d   : > { %v1761_v19 = vmul.f32 %v6900_v50, %v5261_v11  ;;  %v6902_v0 = vand.u32 2147483647, %v6901_v48  ;;  %v1835_v55 = vmul.f32 %v6904_v24, %v5261_v11  ;;  %v1909_v8 = vmul.f32 %v6905_v7, %v5261_v11  ;;  %v2954_v37 = vpop.eup %2953 }
 0x20e   : > { %v5305_v12 = vmul.f32 %v6906_v27, %v5261_v11  ;;  %v5311_v59 = vmul.f32 %v2952_v45, %v1623_v25  ;;  %v6908_v35 = vand.u32 2147483647, %v6851_v26  ;;  %v5321_v50 = vmul.f32 %v6909_v13, %v5261_v11 }
 0x20f   : > { %v1798_v20 = vmul.f32 %v6902_v0, %v5261_v11  ;;  %v5326_v48 = vsel %vm877_vm0, %v6910_v53, %v1261_v42  ;;  %v1617_v0 = vmul.f32 %v2954_v37, %v1601_v3  ;;  %v6912_v45 = vand.u32 2147483647, %v6911_v4  ;;  %v6916_v3 = vld [vmem:[#allocation100_spill] sm:$0xff] }
 0x210   : > { %v5316_v38 = vmul.f32 %v6908_v35, %v5261_v11  ;;  %v6913_v26 = vand.u32 2147483647, %v4906_v46  ;;  %v6914_v32 = vand.u32 2147483647, %v4941_v51  ;;  %v6915_v27 = vand.u32 2147483647, %v5027_v9 }
 0x211   : > { %v1687_v25 = vmul.f32 %v6912_v45, %v5261_v11  ;;  %v6917_v35 = vand.u32 2147483647, %v6916_v3  ;;  %v6918_v53 = vld [vmem:[#allocation8_spill] sm:$0xff]  ;;  %v6920_v46 = vld [vmem:[#allocation81_spill] sm:$0xff]  ;;  %v1625_v17 = vsub.f32 2.0, %v1617_v0 }
 0x212   : > { %v5334_v24 = vmul.f32 %v6913_v26, %v5261_v11  ;;  %v5339_v7 = vmul.f32 %v6914_v32, %v5261_v11  ;;  %v2207_v42 = vmul.f32 %v6915_v27, %v5311_v59  ;;  %v6919_v4 = vand.u32 2147483647, %v6918_v53  ;;  %v6922_v51 = vld [vmem:[#allocation5_spill] sm:$0xff] }
 0x213   : > { %v1655_v13 = vmul.f32 %v6917_v35, %v5311_v59  ;;  %v6921_v26 = vand.u32 2147483647, %v6920_v46  ;;  %v6923_v32 = vand.u32 2147483647, %v6922_v51  ;;  %v6924_v9 = vand.u32 2147483647, %v6839_v54 }
 0x214   : > { %v1726_v45 = vmul.f32 %v6919_v4, %v5311_v59  ;;  %v6925_v3 = vand.u32 2147483647, %v6840_v43  ;;  %v2213_v44 = vadd.f32 %v2207_v42, %v2205_v6  ;;  %v6926_v53 = vand.u32 2147483647, %v6845_v36  ;;  %v6930_v54 = vld [vmem:[#allocation88_spill] sm:$0xff] }
 0x215   : > { %v1872_v15 = vmul.f32 %v6921_v26, %v5261_v11  ;;  %v1763_v29 = vmul.f32 %v6923_v32, %v5311_v59  ;;  %v1800_v27 = vmul.f32 %v6924_v9, %v5311_v59  ;;  %v6927_v0 = vand.u32 2147483647, %v6846_v10  ;;  %v6928_v26 = vld [vmem:[#allocation118_spill] sm:$0xff] }
 0x216   : > { %v1837_v35 = vmul.f32 %v6925_v3, %v5311_v59  ;;  %v1911_v4 = vmul.f32 %v6926_v53, %v5311_v59  ;;  %v6929_v51 = vand.u32 2147483647, %v6928_v26  ;;  %v5371_v52 = vmul.f32 %v2954_v37, %v1625_v17  ;;  %v6934_v10 = vld [vmem:[#allocation82_spill] sm:$0xff] }
 0x217   : > { %v1948_v46 = vmul.f32 %v6927_v0, %v5311_v59  ;;  %v6931_v9 = vand.u32 2147483647, %v6930_v54  ;;  %v6932_v6 = vand.u32 2147483647, %v6852_v33  ;;  %v6933_v36 = vand.u32 2147483647, %v6867_v39  ;;  %v2956_v33 = vpop.eup %2955 }
 0x218   : > { %v1983_v32 = vmul.f32 %v6929_v51, %v5261_v11  ;;  %v6935_v53 = vand.u32 2147483647, %v6934_v10  ;;  %v6936_v17 = vand.u32 2147483647, %v4945_v58  ;;  %v6937_v26 = vand.u32 2147483647, %v4980_v57 }
 0x219   : > { %v1689_v43 = vmul.f32 %v6931_v9, %v5311_v59  ;;  %v2022_v42 = vmul.f32 %v6932_v6, %v5311_v59  ;;  %v2059_v3 = vmul.f32 %v6933_v36, %v5311_v59  ;;  %v1661_v54 = vadd.f32 %v1655_v13, %v1653_v5  ;;  %v6938_v39 = vld [vmem:[#allocation9_spill] sm:$0xff]  ;;  %v6941_v58 = vld [vmem:[#allocation120_spill] sm:$0xff]  ;;  %v6943_v57 = vld [vmem:[#allocation91_spill] sm:$0xff] }
 0x21a   : > { %v1874_v0 = vmul.f32 %v6935_v53, %v5311_v59  ;;  %v2096_v37 = vmul.f32 %v6936_v17, %v5311_v59  ;;  %v5391_v51 = vmul.f32 %v6937_v26, %v5311_v59  ;;  %v2209_v9 = vmul.f32 %v2201_v30, %v5371_v52  ;;  %v6945_v5 = vld [vmem:[#allocation34_spill] sm:$0xff] }
 0x21b   : > { %v6939_v6 = vand.u32 2147483647, %v6938_v39  ;;  %v6940_v10 = vand.u32 2147483647, %v6847_v56  ;;  %v6942_v17 = vand.u32 2147483647, %v6941_v58  ;;  %v1769_v47 = vadd.f32 %v1763_v29, %v1761_v19 }
 0x21c   : > { %v6944_v26 = vand.u32 2147483647, %v6943_v57  ;;  %v6946_v13 = vand.u32 2147483647, %v6945_v5  ;;  %v6947_v39 = vand.u32 2147483647, %v6849_v23  ;;  %v5415_v62 = vadd.f32 %v2213_v44, %v2209_v9 }
 0x21d   : > { %v1657_v36 = vmul.f32 %v6939_v6, %v5371_v52  ;;  %v1728_v53 = vmul.f32 %v6940_v10, %v5371_v52  ;;  %v1985_v63 = vmul.f32 %v6942_v17, %v5311_v59  ;;  %v6948_v56 = vand.u32 2147483647, %v4416_v2  ;;  %v6950_v58 = vld [vmem:[#allocation83_spill] sm:$0xff]  ;;  %v6953_v5 = vld [vmem:[#allocation46_spill] sm:$0xff]  ;;  %v6957_v2 = vld [vmem:[#allocation41_spill] sm:$0xff] }
 0x21e   : > { %v1691_v14 = vmul.f32 %v6944_v26, %v5371_v52  ;;  %v1765_v30 = vmul.f32 %v6946_v13, %v5371_v52  ;;  %v1802_v6 = vmul.f32 %v6947_v39, %v5371_v52  ;;  %6949 = vst [vmem:[#allocation116_spill] sm:$0xff] %v5415_v62  ;;  %v6951_v17 = vand.u32 2147483647, %v6950_v58  ;;  %v6955_v23 = vld [vmem:[#allocation38_spill] sm:$0xff] }
 0x21f   : > { %v1839_v10 = vmul.f32 %v6948_v56, %v5371_v52  ;;  %v6952_v57 = vand.u32 2147483647, %v4509_v31  ;;  %v6954_v13 = vand.u32 2147483647, %v6953_v5  ;;  %v6956_v39 = vand.u32 2147483647, %v6955_v23 }
 0x220   : > { %v1876_v18 = vmul.f32 %v6951_v17, %v5371_v52  ;;  %v6958_v44 = vand.u32 2147483647, %v6957_v2  ;;  %v6959_v56 = vld [vmem:[#allocation33_spill] sm:$0xff]  ;;  %v6961_v31 = vld [vmem:[#allocation40_spill] sm:$0xff]  ;;  %v6964_v5 = vld [vmem:[#allocation42_spill] sm:$0xff]  ;;  %v1662_v62 = vadd.f32 %v1661_v54, %v1657_v36  ;;  %v1695_v2 = vadd.f32 %v1689_v43, %v1687_v25  ;;  %v1399_v36 = vpop.permute.xlu1 %1398 }
 0x221   : > { %v1913_v26 = vmul.f32 %v6952_v57, %v5371_v52  ;;  %v1950_v41 = vmul.f32 %v6954_v13, %v5371_v52  ;;  %v2024_v28 = vmul.f32 %v6956_v39, %v5371_v52  ;;  %v6960_v58 = vand.u32 2147483647, %v6959_v56  ;;  %v6980_v43 = vld [vmem:[#allocation52_spill] sm:$0xff] }
 0x222   : > { %v5432_v9 = vmul.f32 %v6958_v44, %v5371_v52  ;;  %v6962_v57 = vand.u32 2147483647, %v6961_v31  ;;  %v6965_v13 = vand.u32 2147483647, %v6964_v5  ;;  %v1619_v39 = vmul.f32 %v2956_v33, %v5263_v49 }
 0x223   : > { %v5437_v17 = vmul.f32 %v6960_v58, %v5371_v52  ;;  %v1732_v44 = vadd.f32 %v1726_v45, %v1724_v60  ;;  %v1806_v1 = vadd.f32 %v1800_v27, %v1798_v20  ;;  %v1843_v34 = vadd.f32 %v1837_v35, %v1835_v55  ;;  %v6976_v45 = vld [vmem:[#allocation69_spill] sm:$0xff] }
 0x224   : > { %v5442_v61 = vmul.f32 %v6962_v57, %v5371_v52  ;;  %v1987_v23 = vmul.f32 %v6965_v13, %v5371_v52  ;;  %v1627_v56 = vsub.f32 2.0, %v1619_v39  ;;  %v1696_v58 = vadd.f32 %v1695_v2, %v1691_v14  ;;  %v6982_v2 = vld [vmem:[#allocation121_spill] sm:$0xff] }
 0x225   : > { %v1880_v22 = vadd.f32 %v1874_v0, %v1872_v15  ;;  %v1917_v40 = vadd.f32 %v1911_v4, %v1909_v8  ;;  %v1733_v31 = vadd.f32 %v1732_v44, %v1728_v53  ;;  %v1770_v57 = vadd.f32 %v1769_v47, %v1765_v30  ;;  %v6966_v15 = vld [vmem:[#allocation57_spill] sm:$0xff]  ;;  %v6978_v4 = vld [vmem:[#allocation84_spill] sm:$0xff] }
 0x226   : > { %6963 = vst [vmem:[#allocation117_spill] sm:$0xff] %v5442_v61  ;;  %v1807_v61 = vadd.f32 %v1806_v1, %v1802_v6  ;;  %v1844_v16 = vadd.f32 %v1843_v34, %v1839_v10  ;;  %v5450_v5 = vmul.f32 %v2956_v33, %v1627_v56  ;;  %v1954_v25 = vadd.f32 %v1948_v46, %v5305_v12  ;;  %v6968_v47 = vld [vmem:[#allocation93_spill] sm:$0xff] }
 0x227   : > { %v1881_v13 = vadd.f32 %v1880_v22, %v1876_v18  ;;  %v1918_v49 = vadd.f32 %v1917_v40, %v1913_v26  ;;  %v1991_v60 = vadd.f32 %v1985_v63, %v1983_v32  ;;  %v2028_v29 = vadd.f32 %v2022_v42, %v5316_v38  ;;  %v6970_v22 = vld [vmem:[#allocation37_spill] sm:$0xff]  ;;  %v6972_v63 = vld [vmem:[#allocation12_spill] sm:$0xff] }
 0x228   : > { %v2065_v19 = vadd.f32 %v2059_v3, %v5321_v50  ;;  %v2102_v14 = vadd.f32 %v2096_v37, %v5334_v24  ;;  %v6967_v20 = vand.u32 2147483647, %v6966_v15  ;;  %v6969_v34 = vand.u32 2147483647, %v6968_v47  ;;  %v6974_v38 = vld [vmem:[#allocation45_spill] sm:$0xff] }
 0x229   : > { %v6971_v40 = vand.u32 2147483647, %v6970_v22  ;;  %v6973_v12 = vand.u32 2147483647, %v6972_v63  ;;  %v6975_v50 = vand.u32 2147483647, %v6974_v38 }
 0x22a   : > { %v1659_v55 = vmul.f32 %v6967_v20, %v5450_v5  ;;  %v1693_v8 = vmul.f32 %v6969_v34, %v5450_v5  ;;  %v6977_v27 = vand.u32 2147483647, %v6976_v45  ;;  %v6979_v46 = vand.u32 2147483647, %v6978_v4  ;;  %v5488_v15 = vld [vmem:[%s3204_s28 + $0x5a] sm:$0xff]  ;;  %v1403_v4 = vpop.permute.xlu1 %1402 }
 0x22b   : > { %v1730_v18 = vmul.f32 %v6971_v40, %v5450_v5  ;;  %v1767_v1 = vmul.f32 %v6973_v12, %v5450_v5  ;;  %v1804_v24 = vmul.f32 %v6975_v50, %v5450_v5  ;;  %v6981_v42 = vand.u32 2147483647, %v6980_v43 }
 0x22c   : > { %v1841_v35 = vmul.f32 %v6977_v27, %v5450_v5  ;;  %v1878_v32 = vmul.f32 %v6979_v46, %v5450_v5  ;;  %v1663_v0 = vadd.f32 %v1662_v62, %v1659_v55  ;;  %v1697_v37 = vadd.f32 %v1696_v58, %v1693_v8  ;;  %v6984_v58 = vld [vmem:[#allocation122_spill] sm:$0xff]  ;;  %v6988_v55 = vld [vmem:[#allocation47_spill] sm:$0xff] }
 0x22d   : > { %v1915_v3 = vmul.f32 %v6981_v42, %v5450_v5  ;;  %v1734_v54 = vadd.f32 %v1733_v31, %v1730_v18  ;;  %v1771_v33 = vadd.f32 %v1770_v57, %v1767_v1  ;;  %v1808_v53 = vadd.f32 %v1807_v61, %v1804_v24  ;;  %v6986_v31 = vld [vmem:[#allocation126_spill] sm:$0xff]  ;;  %v6990_v8 = vld [vmem:[#allocation119_spill] sm:$0xff]  ;;  %v6992_v18 = vld [vmem:[#allocation32_spill] sm:$0xff] }
 0x22e   : > { %v1845_v30 = vadd.f32 %v1844_v16, %v1841_v35  ;;  %v1882_v6 = vadd.f32 %v1881_v13, %v1878_v32  ;;  %v5480_v26 = vmul.f32 -0.25, %v1663_v0  ;;  %v5482_v39 = vmul.f32 -0.25, %v1697_v37  ;;  %v6994_v1 = vld [vmem:[#allocation70_spill] sm:$0xff]  ;;  %v7000_v37 = vld [vmem:[#allocation127_spill] sm:$0xff] }
 0x22f   : > { %v1919_v10 = vadd.f32 %v1918_v49, %v1915_v3  ;;  %v6983_v44 = vand.u32 2147483647, %v6982_v2  ;;  %v5492_v62 = vsub.f32 %v5326_v48, %v5488_v15  ;;  %v6985_v61 = vand.u32 2147483647, %v6984_v58 }
 0x230   : > { %v6987_v57 = vand.u32 2147483647, %v6986_v31  ;;  %v5500_v49 = vmul.f32 -0.25, %v1734_v54  ;;  %v5502_v20 = vmul.f32 -0.25, %v1771_v33  ;;  %v6989_v47 = vand.u32 2147483647, %v6988_v55 }
 0x231   : > { %v2168_v56 = vmul.f32 %v6983_v44, %v5261_v11  ;;  %v2170_v16 = vmul.f32 %v6985_v61, %v5311_v59  ;;  %v1706_v11 = vmax.f32 %v5480_v26, %v5482_v39  ;;  %v1955_v34 = vadd.f32 %v1954_v25, %v1950_v41  ;;  %v6996_v41 = vld [vmem:[#allocation129_spill] sm:$0xff]  ;;  %v7001_v54 = vld [vmem:[#allocation67_spill] sm:$0xff]  ;;  %v7009_v55 = vld [vmem:[#allocation62_spill] sm:$0xff] }
 0x232   : > { %v2172_v13 = vmul.f32 %v6987_v57, %v5371_v52  ;;  %v1952_v48 = vmul.f32 %v6989_v47, %v5450_v5  ;;  %v6991_v22 = vand.u32 2147483647, %v6990_v8  ;;  %v1992_v40 = vadd.f32 %v1991_v60, %v1987_v23  ;;  %v7005_v61 = vld [vmem:[#allocation75_spill] sm:$0xff]  ;;  %v7010_v47 = vld [vmem:[#allocation54_spill] sm:$0xff] }
 0x233   : > { %v6993_v52 = vand.u32 2147483647, %v6992_v18  ;;  %v2029_v12 = vadd.f32 %v2028_v29, %v2024_v28  ;;  %v6995_v38 = vand.u32 2147483647, %v6994_v1  ;;  %v1743_v24 = vmax.f32 %v1706_v11, %v5500_v49  ;;  %v6998_v28 = vld [vmem:[#allocation130_spill] sm:$0xff]  ;;  %v7012_v18 = vld [vmem:[#allocation116_spill] sm:$0xff] }
 0x234   : > { %v1989_v59 = vmul.f32 %v6991_v22, %v5450_v5  ;;  %v1956_v45 = vadd.f32 %v1955_v34, %v1952_v48  ;;  %v2066_v27 = vadd.f32 %v2065_v19, %v5432_v9  ;;  %v6997_v25 = vand.u32 2147483647, %v6996_v41  ;;  %v7011_v34 = vld [vmem:[#allocation44_spill] sm:$0xff] }
 0x235   : > { %v2026_v63 = vmul.f32 %v6993_v52, %v5450_v5  ;;  %v2063_v50 = vmul.f32 %v6995_v38, %v5450_v5  ;;  %v2103_v46 = vadd.f32 %v2102_v14, %v5437_v17  ;;  %v6999_v29 = vand.u32 2147483647, %v6998_v28  ;;  %v7002_v17 = vld [vmem:[#allocation21_spill] sm:$0xff] }
 0x236   : > { %v2100_v35 = vmul.f32 %v6997_v25, %v5450_v5  ;;  %v1993_v23 = vadd.f32 %v1992_v40, %v1989_v59  ;;  %v1780_v43 = vmax.f32 %v1743_v24, %v5502_v20  ;;  %v5528_v42 = vmul.f32 -0.25, %v1808_v53  ;;  %v7004_v53 = vld [vmem:[#allocation117_spill] sm:$0xff]  ;;  %v1407_v40 = vpop.permute.xlu1 %1406  ;;  %v7016_v25 = vld [vmem:[#allocation51_spill] sm:$0xff] }
 0x237   : > { %v2030_v60 = vadd.f32 %v2029_v12, %v2026_v63  ;;  %v2137_v32 = vmul.f32 %v6999_v29, %v5450_v5  ;;  %v2067_v3 = vadd.f32 %v2066_v27, %v2063_v50  ;;  %v2139_v9 = vadd.f32 %v5391_v51, %v5339_v7  ;;  %v3062_v52 = vld [vmem:[%s3204_s28 + $0x82] sm:$0xff]  ;;  %v7014_v12 = vld [vmem:[#allocation16_spill] sm:$0xff]  ;;  %v3063_v27 = vld [vmem:[%s3204_s28 + $0xa] sm:$0xff] }
 0x238   : > { %v5532_v19 = vmul.f32 -0.25, %v1845_v30  ;;  %v2104_v0 = vadd.f32 %v2103_v46, %v2100_v35  ;;  %v1223_v33 = vadd.f32 %v7001_v54, %v7000_v37  ;;  %v1313_v2 = vsel %vm877_vm0, %v7002_v17, %v5448_v21  ;;  %v7007_v30 = vld [vmem:[#allocation10_spill] sm:$0xff]  ;;  %v7015_v38 = vld [vmem:[#allocation77_spill] sm:$0xff]  ;;  %v3064_v46 = vld [vmem:[%s3204_s28 + $0x32] sm:$0xff] }
 0x239   : > { %v1817_v44 = vmax.f32 %v1780_v43, %v5528_v42  ;;  %v2140_v58 = vadd.f32 %v2139_v9, %v7004_v53  ;;  %v7006_v31 = vand.u32 2147483647, %v7005_v61  ;;  %v2176_v51 = vadd.f32 %v2170_v16, %v2168_v56  ;;  %v7017_v29 = vld [vmem:[#allocation124_spill] sm:$0xff]  ;;  %v7020_v53 = vld [vmem:[#allocation31_spill] sm:$0xff] }
 0x23a   : > { %v7008_v57 = vand.u32 2147483647, %v7007_v30  ;;  %v1239_v48 = vadd.f32 %v7010_v47, %v7009_v55  ;;  %v1336_v21 = vadd.f32 %v5492_v62, %v7011_v34  ;;  %v1344_v8 = vmul.f32 %v5492_v62, %v5492_v62  ;;  %v1411_v30 = vpop.permute.xlu1 %1410 }
 0x23b   : > { %v2174_v7 = vmul.f32 %v7006_v31, %v5450_v5  ;;  %v1854_v22 = vmax.f32 %v1817_v44, %v5532_v19  ;;  %v5555_v59 = vmul.f32 -0.25, %v1882_v6  ;;  %v2141_v56 = vadd.f32 %v2140_v58, %v2137_v32 }
 0x23c   : > { %v2211_v11 = vmul.f32 %v7008_v57, %v5450_v5  ;;  %v2177_v16 = vadd.f32 %v2176_v51, %v2172_v13  ;;  %v5561_v63 = vsub.f32 %v1313_v2, %v3062_v52  ;;  %v1445_v1 = vsel %vm1026_vm3, %v7014_v12, %v1399_v36  ;;  %v7018_v36 = vld [vmem:[#allocation68_spill] sm:$0xff] }
 0x23d   : > { %v1447_v50 = vsel %vm1026_vm3, %v7015_v38, %v1403_v4  ;;  %v1891_v6 = vmax.f32 %v1854_v22, %v5555_v59  ;;  %v5570_v24 = vmul.f32 -0.25, %v1919_v10  ;;  %v5573_v41 = vsub.f32 %v1445_v1, %v3063_v27  ;;  %v7019_v10 = vld [vmem:[#allocation29_spill] sm:$0xff]  ;;  %v7024_v38 = vld [vmem:[#allocation102_spill] sm:$0xff] }
 0x23e   : > { %v5558_v5 = vadd.f32 %v7012_v18, %v2211_v11  ;;  %7013 = vst [vmem:[#allocation110_spill] sm:$0xff] %v5561_v63  ;;  %v2178_v13 = vadd.f32 %v2177_v16, %v2174_v7  ;;  %v1352_v35 = vadd.f32 %v1344_v8, %v7016_v25  ;;  %v5577_v28 = vsub.f32 %v1447_v50, %v3064_v46  ;;  %v7022_v11 = vld [vmem:[#allocation80_spill] sm:$0xff]  ;;  %v7025_v46 = vld [vmem:[#allocation125_spill] sm:$0xff] }
 0x23f   : > { %v1377_v32 = vadd.f32 %v7017_v29, %v1336_v21  ;;  %v1449_v43 = vsel %vm1026_vm3, %v7018_v36, %v1407_v40  ;;  %v1928_v4 = vmax.f32 %v1891_v6, %v5570_v24  ;;  %v5584_v9 = vmul.f32 -0.25, %v1956_v45  ;;  %v7023_v40 = vld [vmem:[#allocation48_spill] sm:$0xff] }
 0x240   : > { %v1470_v37 = vadd.f32 %v5573_v41, %v7019_v10  ;;  %v1478_v17 = vmul.f32 %v5573_v41, %v5573_v41  ;;  %v5590_v2 = vmul.f32 -0.25, %v1993_v23  ;;  %v5592_v44 = vmul.f32 -0.25, %v2030_v60  ;;  %v7021_v60 = vld [vmem:[#allocation114_spill] sm:$0xff] }
 0x241   : > { %v1472_v58 = vadd.f32 %v5577_v28, %v7020_v53  ;;  %v1480_v61 = vmul.f32 %v5577_v28, %v5577_v28  ;;  %v1965_v31 = vmax.f32 %v1928_v4, %v5584_v9  ;;  %v1338_v45 = vadd.f32 %v5561_v63, %v1223_v33 }
 0x242   : > { %v1494_v7 = vmul.f32 %v1470_v37, %v1470_v37  ;;  %v5601_v51 = vsub.f32 %v1449_v43, %v5488_v15  ;;  %v1346_v23 = vmul.f32 %v5561_v63, %v5561_v63  ;;  %v1486_v57 = vadd.f32 %v1478_v17, %v7021_v60  ;;  %v7076_v63 = vld [vmem:[#allocation109_spill] sm:$0xff] }
 0x243   : > { %v1488_v55 = vadd.f32 %v1480_v61, %v7022_v11  ;;  %v1496_v47 = vmul.f32 %v1472_v58, %v1472_v58  ;;  %v2002_v34 = vmax.f32 %v1965_v31, %v5590_v2  ;;  %v5611_v22 = vmul.f32 -0.25, %v2067_v3  ;;  %v7027_v31 = vld [vmem:[#allocation103_spill] sm:$0xff] }
 0x244   : > { %v1502_v21 = vmul.f32 0.055555556, %v1494_v7  ;;  %v1474_v8 = vadd.f32 %v5601_v51, %v1377_v32  ;;  %v1482_v33 = vmul.f32 %v5601_v51, %v5601_v51  ;;  %v5613_v15 = vmul.f32 -0.25, %v2104_v0 }
 0x245   : > { %v1504_v16 = vmul.f32 0.055555556, %v1496_v47  ;;  %v1451_v18 = vsel %vm1026_vm3, %v7023_v40, %v1411_v30  ;;  %v2039_v12 = vmax.f32 %v2002_v34, %v5592_v44  ;;  %v1393_v50 = vadd.f32 %v7024_v38, %v1352_v35  ;;  %v7031_v38 = vld [vmem:[#allocation97_spill] sm:$0xff] }
 0x246   : > { %v1510_v1 = vsub.f32 %v1486_v57, %v1502_v21  ;;  %v1498_v6 = vmul.f32 %v1474_v8, %v1474_v8  ;;  %v1354_v27 = vadd.f32 %v1346_v23, %v1239_v48  ;;  %v1379_v32 = vadd.f32 %v7025_v46, %v1338_v45  ;;  %v7064_v46 = vld [vmem:[#allocation85_spill] sm:$0xff] }
 0x247   : > { %v1512_v25 = vsub.f32 %v1488_v55, %v1504_v16  ;;  %v5621_v36 = vsub.f32 %v1451_v18, %v3062_v52  ;;  %v2076_v3 = vmax.f32 %v2039_v12, %v5611_v22  ;;  %v5624_v43 = vadd.f32 %v1482_v33, %v1393_v50  ;;  %v7028_v33 = vld [vmem:[#allocation86_spill] sm:$0xff]  ;;  %v7032_v50 = vld [vmem:[#allocation87_spill] sm:$0xff]  ;;  %v7078_v12 = vld [vmem:[#allocation64_spill] sm:$0xff] }
 0x248   : > { %v1518_v0 = vmul.f32 0.05882353, %v1510_v1  ;;  %v5626_v4 = vmul.f32 0.055555556, %v1498_v6  ;;  %v5628_v14 = vmul.f32 -0.25, %v2141_v56  ;;  %v5641_v56 = vmul.f32 -0.25, %v2178_v13 }
 0x249   : > { %7026 = vst [vmem:[#allocation53_spill] sm:$0xff] %v5621_v36  ;;  %v1520_v10 = vmul.f32 0.05882353, %v1512_v25  ;;  %v1476_v37 = vadd.f32 %v5621_v36, %v1379_v32  ;;  %v2113_v35 = vmax.f32 %v2076_v3, %v5613_v15  ;;  %v1484_v17 = vmul.f32 %v5621_v36, %v5621_v36  ;;  %v7074_v36 = vld [vmem:[#allocation26_spill] sm:$0xff] }
 0x24a   : > { %v5632_v48 = vmax.f32 %v1518_v0, 0.0  ;;  %v1514_v52 = vsub.f32 %v5624_v43, %v5626_v4  ;;  %v1395_v45 = vadd.f32 %v7027_v31, %v1354_v27  ;;  %v5645_v7 = vmul.f32 -0.25, %v5558_v5  ;;  %v7083_v27 = vld [vmem:[#allocation28_spill] sm:$0xff] }
 0x24b   : > { %v5638_v53 = vmax.f32 %v1520_v10, 0.0  ;;  %v1500_v58 = vmul.f32 %v1476_v37, %v1476_v37  ;;  %v2150_v61 = vmax.f32 %v2113_v35, %v5628_v14  ;;  %v7034_v10 = vld [vmem:[#allocation99_spill] sm:$0xff]  ;;  %v7063_v35 = vld [vmem:[#allocation66_spill] sm:$0xff] }
 0x24c   : > { %2957 = vrsqrt.f32 %v5632_v48  ;;  %v5650_v23 = vadd.f32 %v1484_v17, %v1395_v45  ;;  %v7036_v45 = vld [vmem:[#allocation94_spill] sm:$0xff]  ;;  %vm1542_vm12 = vcmp.eq.f32.partialorder %v5632_v48, inf  ;;  %vm1544_vm13 = vcmp.eq.f32.partialorder %v5632_v48, 0.0 }
 0x24d   : > { %v2187_v30 = vmax.f32 %v2150_v61, %v5641_v56  ;;  %2959 = vrsqrt.f32 %v5638_v53  ;;  %v5652_v60 = vmul.f32 0.055555556, %v1500_v58  ;;  %v7035_v58 = vld [vmem:[#allocation92_spill] sm:$0xff]  ;;  %vm1556_vm14 = vcmp.eq.f32.partialorder %v5638_v53, inf }
 0x24e   : > { %vm1558_vm15 = vcmp.eq.f32.partialorder %v5638_v53, 0.0 }
 0x24f   : > { %v5655_v57 = vmax.f32 %v2187_v30, %v5645_v7  ;;  %v1516_v13 = vsub.f32 %v5650_v23, %v5652_v60  ;;  %v7061_v23 = vld [vmem:[#allocation60_spill] sm:$0xff] }
 0x251   : > { %v2228_v5 = vsub.f32 %v5480_v26, %v5655_v57  ;;  %v2240_v11 = vsub.f32 %v5482_v39, %v5655_v57  ;;  %v2252_v55 = vsub.f32 %v5500_v49, %v5655_v57  ;;  %v2264_v47 = vsub.f32 %v5502_v20, %v5655_v57 }
 0x252   : > { %v2276_v34 = vsub.f32 %v5528_v42, %v5655_v57  ;;  %v2288_v21 = vsub.f32 %v5532_v19, %v5655_v57  ;;  %v2300_v8 = vsub.f32 %v5555_v59, %v5655_v57  ;;  %v2312_v26 = vsub.f32 %v5570_v24, %v5655_v57  ;;  %v7033_v24 = vld [vmem:[#allocation89_spill] sm:$0xff] }
 0x253   : > { %v2230_v16 = vmul.f32 1.442695, %v2228_v5  ;;  %v2242_v40 = vmul.f32 1.442695, %v2240_v11  ;;  %v2324_v49 = vsub.f32 %v5584_v9, %v5655_v57  ;;  %v2254_v1 = vmul.f32 1.442695, %v2252_v55 }
 0x254   : > { %v2336_v19 = vsub.f32 %v5590_v2, %v5655_v57  ;;  %v2266_v32 = vmul.f32 1.442695, %v2264_v47  ;;  %v2348_v9 = vsub.f32 %v5592_v44, %v5655_v57  ;;  %v2360_v3 = vsub.f32 %v5611_v22, %v5655_v57  ;;  %v7037_v5 = vld [vmem:[#allocation24_spill] sm:$0xff]  ;;  %v7040_v59 = vld [vmem:[#allocation101_spill] sm:$0xff] }
 0x255   : > { %2961 = vpow2.f32 %v2230_v16  ;;  %v2372_v2 = vsub.f32 %v5613_v15, %v5655_v57  ;;  %v2278_v31 = vmul.f32 1.442695, %v2276_v34  ;;  %v2290_v55 = vmul.f32 1.442695, %v2288_v21  ;;  %v7071_v21 = vld [vmem:[#allocation63_spill] sm:$0xff] }
 0x256   : > { %v2958_v25 = vpop.eup %2957  ;;  %2963 = vpow2.f32 %v2242_v40  ;;  %v1545_v40 = vand.u32 2147483648, %v5632_v48  ;;  %v1559_v34 = vand.u32 2147483648, %v5638_v53  ;;  %v2314_v30 = vmul.f32 1.442695, %v2312_v26 }
 0x257   : > { %v2960_v0 = vpop.eup %2959  ;;  %2965 = vpow2.f32 %v2254_v1  ;;  %v1541_v47 = vmul.f32 %v2958_v25, %v5632_v48  ;;  %v2302_v1 = vmul.f32 1.442695, %v2300_v8  ;;  %v2338_v6 = vmul.f32 1.442695, %v2336_v19 }
 0x258   : > { %2967 = vpow2.f32 %v2266_v32  ;;  %v1555_v16 = vmul.f32 %v2960_v0, %v5638_v53  ;;  %v2326_v0 = vmul.f32 1.442695, %v2324_v49  ;;  %v2350_v26 = vmul.f32 1.442695, %v2348_v9  ;;  %v7075_v32 = vld [vmem:[#allocation98_spill] sm:$0xff] }
 0x259   : > { %2969 = vpow2.f32 %v2278_v31  ;;  %v1543_v42 = vsel %vm1542_vm12, %v5632_v48, %v1541_v47  ;;  %v1522_v48 = vmul.f32 0.05882353, %v1514_v52  ;;  %v1524_v49 = vmul.f32 0.05882353, %v1516_v13  ;;  %v7044_v52 = vld [vmem:[#allocation128_spill] sm:$0xff] }
 0x25a   : > { %v1557_v18 = vsel %vm1556_vm14, %v5638_v53, %v1555_v16  ;;  %v1546_v25 = vsel %vm1544_vm13, %v1545_v40, %v1543_v42  ;;  %2971 = vpow2.f32 %v2290_v55  ;;  %v7045_v55 = vld [vmem:[#allocation104_spill] sm:$0xff]  ;;  %v7048_v16 = vld [vmem:[#allocation6_spill] sm:$0xff]  ;;  %v2374_v22 = vmul.f32 1.442695, %v2372_v2  ;;  %v7067_v42 = vld [vmem:[#allocation107_spill] sm:$0xff] }
 0x25b   : > { %v1560_v61 = vsel %vm1558_vm15, %v1559_v34, %v1557_v18  ;;  %v1590_v11 = vmul.f32 0.1, %v1546_v25  ;;  %2973 = vpow2.f32 %v2302_v1  ;;  %v5737_v13 = vmax.f32 %v1522_v48, 0.0  ;;  %v7049_v1 = vld [vmem:[#allocation11_spill] sm:$0xff]  ;;  %v7053_v53 = vld [vmem:[#allocation20_spill] sm:$0xff] }
 0x25c   : > { %v1592_v37 = vmul.f32 0.1, %v1560_v61  ;;  %2975 = vpow2.f32 %v2314_v30  ;;  %v7047_v30 = vld [vmem:[#allocation105_spill] sm:$0xff]  ;;  %v5743_v34 = vmax.f32 %v1524_v49, 0.0  ;;  %v7052_v48 = vld [vmem:[#allocation15_spill] sm:$0xff]  ;;  %v7065_v15 = vsub.f32 %v5628_v14, %v5655_v57 }
 0x25d   : > { %v5727_v19 = vadd.f32 1e-08, %v1590_v11  ;;  %2977 = vpow2.f32 %v2326_v0  ;;  %v7054_v49 = vld [vmem:[#allocation17_spill] sm:$0xff]  ;;  %v7068_v40 = vld [vmem:[#allocation7_spill] sm:$0xff]  ;;  %v7072_v14 = vsub.f32 %v5641_v56, %v5655_v57  ;;  %v7080_v56 = vsub.f32 %v5645_v7, %v5655_v57 }
 0x25e   : > { %v5733_v9 = vadd.f32 1e-08, %v1592_v37  ;;  %2979 = vpow2.f32 %v2338_v6  ;;  %v7050_v37 = vld [vmem:[#allocation18_spill] sm:$0xff]  ;;  %v7058_v0 = vld [vmem:[#allocation25_spill] sm:$0xff]  ;;  %v2386_v2 = vmul.f32 1.442695, %v7065_v15 }
 0x25f   : > { %v5712_v39 = vpop.eup %2961  ;;  %2981 = vpow2.f32 %v2350_v26  ;;  %v2362_v26 = vmul.f32 1.442695, %v2360_v3  ;;  %v7059_v3 = vld [vmem:[#allocation19_spill] sm:$0xff]  ;;  %v2398_v15 = vmul.f32 1.442695, %v7072_v14  ;;  %vm1570_vm0 = vcmp.eq.f32.partialorder %v5737_v13, inf }
 0x260   : > { %7039 = vst [vmem:[#allocation112_spill] sm:$0xff] %v5712_v39  ;;  %v5718_v8 = vpop.eup %2963  ;;  %2983 = vrcp.f32 %v5727_v19  ;;  %v2410_v14 = vmul.f32 1.442695, %v7080_v56  ;;  %v7082_v11 = vld [vmem:[#allocation43_spill] sm:$0xff]  ;;  %vm1572_vm1 = vcmp.eq.f32.partialorder %v5737_v13, 0.0  ;;  %vm1584_vm2 = vcmp.eq.f32.partialorder %v5743_v34, inf }
 0x261   : > { %7041 = vst [vmem:[#allocation115_spill] sm:$0xff] %v5718_v8  ;;  %v2248_v61 = vadd.f32 %v5718_v8, %v5712_v39  ;;  %v5729_v43 = vpop.eup %2965  ;;  %2985 = vrcp.f32 %v5733_v9  ;;  %v7081_v39 = vld [vmem:[#allocation22_spill] sm:$0xff]  ;;  %vm1586_vm3 = vcmp.eq.f32.partialorder %v5743_v34, 0.0 }
 0x262   : > { %7043 = vst [vmem:[#allocation56_spill] sm:$0xff] %v5729_v43  ;;  %v5739_v47 = vpop.eup %2967  ;;  %2987 = vrsqrt.f32 %v5737_v13 }
 0x263   : > { %v2260_v60 = vadd.f32 %v5729_v43, %v2248_v61  ;;  %7046 = vst [vmem:[#allocation73_spill] sm:$0xff] %v5739_v47  ;;  %v5749_v6 = vpop.eup %2969  ;;  %2989 = vrsqrt.f32 %v5743_v34  ;;  %v7070_v61 = vld [vmem:[#allocation58_spill] sm:$0xff] }
 0x264   : > { %7051 = vst [vmem:[#allocation76_spill] sm:$0xff] %v5749_v6  ;;  %v5761_v31 = vpop.eup %2971  ;;  %2991 = vpow2.f32 %v2362_v26  ;;  %v7079_v26 = vld [vmem:[#allocation23_spill] sm:$0xff] }
 0x265   : > { %v2272_v4 = vadd.f32 %v5739_v47, %v2260_v60  ;;  %7056 = vst [vmem:[#allocation78_spill] sm:$0xff] %v5761_v31  ;;  %v5773_v17 = vpop.eup %2973  ;;  %2993 = vpow2.f32 %v2374_v22  ;;  %v2198_v22 = vand.u32 2147483647, %v5573_v41 }
 0x266   : > { %7062 = vst [vmem:[#allocation79_spill] sm:$0xff] %v5773_v17  ;;  %v5780_v29 = vpop.eup %2975  ;;  %2995 = vpow2.f32 %v2386_v2  ;;  %v2200_v2 = vand.u32 2147483647, %v5577_v28 }
 0x267   : > { %v2284_v60 = vadd.f32 %v5749_v6, %v2272_v4  ;;  %7066 = vst [vmem:[#allocation90_spill] sm:$0xff] %v5780_v29  ;;  %v7069_v4 = vld [vmem:[#allocation35_spill] sm:$0xff]  ;;  %v5786_v18 = vpop.eup %2977  ;;  %2997 = vpow2.f32 %v2398_v15 }
 0x268   : > { %v5793_v20 = vpop.eup %2979  ;;  %2999 = vpow2.f32 %v2410_v14 }
 0x269   : > { %v2296_v44 = vadd.f32 %v5761_v31, %v2284_v60  ;;  %7073 = vst [vmem:[#allocation108_spill] sm:$0xff] %v5793_v20 }
 0x26b   : > { %v2308_v60 = vadd.f32 %v5773_v17, %v2296_v44  ;;  %v5799_v17 = vpop.eup %2981 }
 0x26c   : > { %7077 = vst [vmem:[#allocation74_spill] sm:$0xff] %v5799_v17  ;;  %v2984_v8 = vpop.eup %2983 }
 0x26d   : > { %v2320_v44 = vadd.f32 %v5780_v29, %v2308_v60  ;;  %v2986_v29 = vpop.eup %2985  ;;  %v1614_v43 = vmul.f32 %v2984_v8, %v5727_v19  ;;  %v1573_v19 = vand.u32 2147483648, %v5737_v13 }
 0x26e   : > { %v2988_v25 = vpop.eup %2987  ;;  %v1616_v57 = vmul.f32 %v2986_v29, %v5733_v9 }
 0x26f   : > { %v2332_v6 = vadd.f32 %v5786_v18, %v2320_v44  ;;  %v2990_v44 = vpop.eup %2989  ;;  %v1622_v56 = vsub.f32 2.0, %v1614_v43  ;;  %v1569_v15 = vmul.f32 %v2988_v25, %v5737_v13  ;;  %v1587_v43 = vand.u32 2147483648, %v5743_v34 }
 0x270   : > { %v1624_v60 = vsub.f32 2.0, %v1616_v57  ;;  %v1583_v28 = vmul.f32 %v2990_v44, %v5743_v34 }
 0x271   : > { %v2344_v7 = vadd.f32 %v5793_v20, %v2332_v6  ;;  %v5822_v6 = vpop.eup %2991  ;;  %v5824_v9 = vmul.f32 %v2984_v8, %v1622_v56  ;;  %v1571_v47 = vsel %vm1570_vm0, %v5737_v13, %v1569_v15  ;;  %v7084_v15 = vand.u32 2147483647, %v7045_v55 }
 0x272   : > { %v5830_v14 = vmul.f32 %v2986_v29, %v1624_v60  ;;  %v1585_v57 = vsel %vm1584_vm2, %v5743_v34, %v1583_v28  ;;  %v5835_v44 = vpop.eup %2993  ;;  %v7085_v13 = vand.u32 2147483647, %v7047_v30  ;;  %v7087_v55 = vand.u32 2147483647, %v7033_v24 }
 0x273   : > { %v2356_v41 = vadd.f32 %v5799_v17, %v2344_v7  ;;  %v1574_v7 = vsel %vm1572_vm1, %v1573_v19, %v1571_v47  ;;  %v2206_v8 = vmul.f32 %v2198_v22, %v5824_v9  ;;  %v1588_v31 = vsel %vm1586_vm3, %v1587_v43, %v1585_v57  ;;  %v5846_v34 = vpop.eup %2995 }
 0x274   : > { %v1594_v56 = vmul.f32 0.1, %v1574_v7  ;;  %v1654_v17 = vmul.f32 %v7084_v15, %v5824_v9  ;;  %v2208_v29 = vmul.f32 %v2200_v2, %v5830_v14  ;;  %v1596_v60 = vmul.f32 0.1, %v1588_v31  ;;  %v5862_v57 = vpop.eup %2997 }
 0x275   : > { %v2368_v25 = vadd.f32 %v5822_v6, %v2356_v41  ;;  %v1656_v47 = vmul.f32 %v7085_v13, %v5830_v14  ;;  %v7086_v22 = vand.u32 2147483647, %v7032_v50  ;;  %v1690_v28 = vmul.f32 %v7087_v55, %v5830_v14  ;;  %v5879_v13 = vpop.eup %2999 }
 0x276   : > { %v1602_v19 = vadd.f32 1e-08, %v1594_v56  ;;  %v7088_v43 = vand.u32 2147483647, %v7069_v4  ;;  %v1604_v30 = vadd.f32 1e-08, %v1596_v60 }
 0x277   : > { %v2380_v20 = vadd.f32 %v5835_v44, %v2368_v25  ;;  %v1688_v41 = vmul.f32 %v7086_v22, %v5824_v9  ;;  %v5858_v25 = vadd.f32 %v2208_v29, %v2206_v8  ;;  %v5860_v7 = vadd.f32 %v1656_v47, %v1654_v17 }
 0x278   : > { %v1725_v2 = vmul.f32 %v7088_v43, %v5824_v9  ;;  %3001 = vrcp.f32 %v1602_v19  ;;  %v7089_v24 = vand.u32 2147483647, %v7050_v37  ;;  %v7090_v4 = vand.u32 2147483647, %v7058_v0 }
 0x279   : > { %v2392_v31 = vadd.f32 %v5846_v34, %v2380_v20  ;;  %v5864_v50 = vadd.f32 %v1690_v28, %v1688_v41  ;;  %3003 = vrcp.f32 %v1604_v30  ;;  %v7091_v17 = vand.u32 2147483647, %v7054_v49 }
 0x27a   : > { %v1727_v56 = vmul.f32 %v7089_v24, %v5830_v14  ;;  %v1762_v15 = vmul.f32 %v7090_v4, %v5824_v9  ;;  %v7092_v29 = vand.u32 2147483647, %v7070_v61  ;;  %v7093_v37 = vand.u32 2147483647, %v7059_v3 }
 0x27b   : > { %v2404_v20 = vadd.f32 %v5862_v57, %v2392_v31  ;;  %v1764_v8 = vmul.f32 %v7091_v17, %v5830_v14  ;;  %v7094_v22 = vand.u32 2147483647, %v7063_v35  ;;  %v7095_v49 = vand.u32 2147483647, %v7061_v23 }
 0x27c   : > { %v1799_v60 = vmul.f32 %v7092_v29, %v5824_v9  ;;  %v5881_v47 = vadd.f32 %v1727_v56, %v1725_v2  ;;  %v1801_v0 = vmul.f32 %v7093_v37, %v5830_v14  ;;  %v7096_v43 = vand.u32 2147483647, %v7031_v38 }
 0x27d   : > { %v1836_v41 = vmul.f32 %v7094_v22, %v5824_v9  ;;  %v1838_v55 = vmul.f32 %v7095_v49, %v5830_v14  ;;  %v2416_v28 = vadd.f32 %v5879_v13, %v2404_v20  ;;  %v5893_v61 = vadd.f32 %v1764_v8, %v1762_v15 }
 0x27e   : > { %v1873_v2 = vmul.f32 %v7096_v43, %v5824_v9  ;;  %v7097_v3 = vand.u32 2147483647, %v7028_v33  ;;  %v5901_v24 = vadd.f32 %v1801_v0, %v1799_v60  ;;  %v7098_v23 = vand.u32 2147483647, %v7071_v21 }
 0x27f   : > { %v5903_v35 = vadd.f32 %v1838_v55, %v1836_v41  ;;  %v7099_v4 = vand.u32 2147483647, %v7064_v46  ;;  %3005 = vrcp.f32 %v2416_v28  ;;  %v7100_v38 = vand.u32 2147483647, %v7075_v32 }
 0x280   : > { %v1875_v31 = vmul.f32 %v7097_v3, %v5830_v14  ;;  %v1910_v56 = vmul.f32 %v7098_v23, %v5824_v9  ;;  %v7101_v17 = vand.u32 2147483647, %v7078_v12  ;;  %v7102_v21 = vand.u32 2147483647, %v7040_v59 }
 0x281   : > { %v1912_v15 = vmul.f32 %v7099_v4, %v5830_v14  ;;  %v1947_v33 = vmul.f32 %v7100_v38, %v5824_v9  ;;  %v7103_v46 = vand.u32 2147483647, %v7034_v10  ;;  %v7104_v0 = vand.u32 2147483647, %v7076_v63 }
 0x282   : > { %v5911_v20 = vadd.f32 %v1875_v31, %v1873_v2  ;;  %v1949_v8 = vmul.f32 %v7101_v17, %v5830_v14  ;;  %v1984_v60 = vmul.f32 %v7102_v21, %v5824_v9  ;;  %v7105_v12 = vand.u32 2147483647, %v7074_v36  ;;  %v7144_v17 = vld [vmem:[#allocation79_spill] sm:$0xff] }
 0x283   : > { %v5919_v29 = vadd.f32 %v1912_v15, %v1910_v56  ;;  %v1986_v37 = vmul.f32 %v7103_v46, %v5830_v14  ;;  %v2021_v22 = vmul.f32 %v7104_v0, %v5824_v9  ;;  %v7106_v49 = vand.u32 2147483647, %v7067_v42  ;;  %v7111_v42 = vld [vmem:[#allocation39_spill] sm:$0xff] }
 0x284   : > { %v5930_v32 = vadd.f32 %v1949_v8, %v1947_v33  ;;  %v2023_v41 = vmul.f32 %v7105_v12, %v5830_v14  ;;  %v7107_v59 = vand.u32 2147483647, %v7068_v40  ;;  %v7108_v63 = vand.u32 2147483647, %v7079_v26  ;;  %v3002_v26 = vpop.eup %3001  ;;  %v7113_v33 = vld [vmem:[#allocation50_spill] sm:$0xff] }
 0x285   : > { %v2058_v55 = vmul.f32 %v7106_v49, %v5824_v9  ;;  %v5941_v10 = vadd.f32 %v1986_v37, %v1984_v60  ;;  %v7109_v3 = vand.u32 2147483647, %v7081_v39  ;;  %v7110_v36 = vand.u32 2147483647, %v7082_v11  ;;  %v3004_v46 = vpop.eup %3003  ;;  %v7116_v37 = vld [vmem:[#allocation71_spill] sm:$0xff]  ;;  %v7118_v49 = vld [vmem:[#allocation61_spill] sm:$0xff] }
 0x286   : > { %v2060_v43 = vmul.f32 %v7107_v59, %v5830_v14  ;;  %v2095_v2 = vmul.f32 %v7108_v63, %v5824_v9  ;;  %v1797_v56 = vand.u32 2147483647, %v7111_v42  ;;  %v5953_v4 = vadd.f32 %v2023_v41, %v2021_v22  ;;  %v7117_v22 = vld [vmem:[#allocation59_spill] sm:$0xff]  ;;  %v7119_v59 = vld [vmem:[#allocation113_spill] sm:$0xff] }
 0x287   : > { %v2097_v31 = vmul.f32 %v7109_v3, %v5830_v14  ;;  %v2132_v23 = vmul.f32 %v7110_v36, %v5824_v9  ;;  %v7112_v15 = vand.u32 2147483647, %v7083_v27  ;;  %v7114_v39 = vand.u32 2147483647, %v7044_v52  ;;  %v7123_v42 = vld [vmem:[#allocation13_spill] sm:$0xff]  ;;  %v7142_v27 = vld [vmem:[#allocation76_spill] sm:$0xff] }
 0x288   : > { %v5955_v40 = vadd.f32 %v2060_v43, %v2058_v55  ;;  %v7115_v21 = vand.u32 2147483647, %v7037_v5  ;;  %v1618_v12 = vmul.f32 %v3002_v26, %v1602_v19  ;;  %v1620_v63 = vmul.f32 %v3004_v46, %v1604_v30  ;;  %v7121_v5 = vld [vmem:[#allocation111_spill] sm:$0xff] }
 0x289   : > { %v2134_v38 = vmul.f32 %v7112_v15, %v5830_v14  ;;  %v5961_v8 = vadd.f32 %v2097_v31, %v2095_v2  ;;  %v2169_v11 = vmul.f32 %v7114_v39, %v5824_v9  ;;  %v7120_v9 = vld [vmem:[#allocation55_spill] sm:$0xff]  ;;  %v7122_v31 = vld [vmem:[#allocation49_spill] sm:$0xff]  ;;  %v2202_v30 = vand.u32 2147483647, %v5601_v51 }
 0x28a   : > { %v2171_v60 = vmul.f32 %v7115_v21, %v5830_v14  ;;  %v1626_v14 = vsub.f32 2.0, %v1618_v12  ;;  %v1628_v19 = vsub.f32 2.0, %v1620_v63  ;;  %v7125_v21 = vld [vmem:[#allocation72_spill] sm:$0xff]  ;;  %v7126_v63 = vand.u32 2147483647, %v7048_v16 }
 0x28b   : > { %v5971_v41 = vadd.f32 %v2134_v38, %v2132_v23  ;;  %v3006_v23 = vpop.eup %3005  ;;  %v7124_v38 = vld [vmem:[#allocation36_spill] sm:$0xff]  ;;  %v7127_v55 = vand.u32 2147483647, %v7035_v58  ;;  %v7128_v51 = vand.u32 2147483647, %v7052_v48 }
 0x28c   : > { %v5975_v52 = vadd.f32 %v2171_v60, %v2169_v11  ;;  %v5984_v43 = vmul.f32 %v3002_v26, %v1626_v14  ;;  %v2420_v11 = vmul.f32 %v3006_v23, %v2416_v28  ;;  %v5989_v3 = vmul.f32 %v3004_v46, %v1628_v19 }
 0x28d   : > { %v7129_v46 = vand.u32 2147483647, %v7049_v1  ;;  %v7131_v16 = vand.u32 2147483647, %v7053_v53  ;;  %v7132_v1 = vld [vmem:[#allocation27_spill] sm:$0xff]  ;;  %v7136_v53 = vld [vmem:[#allocation14_spill] sm:$0xff] }
 0x28e   : > { %v2210_v15 = vmul.f32 %v2202_v30, %v5984_v43  ;;  %v1658_v36 = vmul.f32 %v7126_v63, %v5984_v43  ;;  %v1692_v26 = vmul.f32 %v7127_v55, %v5984_v43  ;;  %v1729_v28 = vmul.f32 %v7128_v51, %v5984_v43 }
 0x28f   : > { %v2422_v14 = vsub.f32 2.0, %v2420_v11  ;;  %v1660_v19 = vmul.f32 %v7129_v46, %v5989_v3  ;;  %v7130_v30 = vand.u32 2147483647, %v7036_v45  ;;  %v1731_v63 = vmul.f32 %v7131_v16, %v5989_v3  ;;  %v7134_v45 = vld [vmem:[#allocation30_spill] sm:$0xff] }
 0x290   : > { %v6011_v58 = vadd.f32 %v5858_v25, %v2210_v15  ;;  %v1665_v48 = vadd.f32 %v5860_v7, %v1658_v36  ;;  %v1699_v55 = vadd.f32 %v5864_v50, %v1692_v26  ;;  %v1736_v11 = vadd.f32 %v5881_v47, %v1729_v28  ;;  %v7138_v36 = vld [vmem:[#allocation112_spill] sm:$0xff] }
 0x291   : > { %v1694_v12 = vmul.f32 %v7130_v30, %v5989_v3  ;;  %v2424_v51 = vmul.f32 %v3006_v23, %v2422_v14  ;;  %v7133_v46 = vand.u32 2147483647, %v7132_v1  ;;  %v7135_v30 = vand.u32 2147483647, %v7134_v45  ;;  %v7139_v23 = vld [vmem:[#allocation115_spill] sm:$0xff]  ;;  %v7140_v28 = vld [vmem:[#allocation56_spill] sm:$0xff] }
 0x292   : > { %v7137_v16 = vand.u32 2147483647, %v7136_v53  ;;  %v1666_v15 = vadd.f32 %v1665_v48, %v1660_v19  ;;  %v1737_v7 = vadd.f32 %v1736_v11, %v1731_v63  ;;  %v1805_v50 = vmul.f32 %v1797_v56, %v5989_v3  ;;  %v7141_v1 = vld [vmem:[#allocation73_spill] sm:$0xff] }
 0x293   : > { %v1766_v60 = vmul.f32 %v7133_v46, %v5984_v43  ;;  %v1768_v39 = vmul.f32 %v7135_v30, %v5989_v3  ;;  %v1700_v2 = vadd.f32 %v1699_v55, %v1694_v12  ;;  %v2428_v47 = vmul.f32 %v7138_v36, %v2424_v51  ;;  %v7143_v30 = vld [vmem:[#allocation78_spill] sm:$0xff] }
 0x294   : > { %v1803_v25 = vmul.f32 %v7137_v16, %v5984_v43  ;;  %v2434_v26 = vmul.f32 %v7139_v23, %v2424_v51  ;;  %v2441_v14 = vmul.f32 %v7140_v28, %v2424_v51  ;;  %v2448_v46 = vmul.f32 %v7141_v1, %v2424_v51  ;;  %v7145_v16 = vld [vmem:[#allocation90_spill] sm:$0xff] }
 0x295   : > { %v2455_v45 = vmul.f32 %v7142_v27, %v2424_v51  ;;  %v2462_v0 = vmul.f32 %v7143_v30, %v2424_v51  ;;  %v2469_v53 = vmul.f32 %v7144_v17, %v2424_v51  ;;  %v2476_v19 = vmul.f32 %v7145_v16, %v2424_v51  ;;  %2430 = vst [vmem:[%s6034_s6] sm:$0xff] %v2428_v47  ;;  %v7146_v17 = vld [vmem:[#allocation108_spill] sm:$0xff]  ;;  %v7147_v12 = vld [vmem:[#allocation74_spill] sm:$0xff] }
 0x296   : > { %2828 = vst [vmem:[%s6034_s6 + $0x10] sm:$0xff] %v2434_v26  ;;  %2830 = vst [vmem:[%s6034_s6 + $0x20] sm:$0xff] %v2441_v14  ;;  %v2483_v56 = vmul.f32 %v5786_v18, %v2424_v51  ;;  %v2490_v27 = vmul.f32 %v7146_v17, %v2424_v51  ;;  %v2497_v63 = vmul.f32 %v7147_v12, %v2424_v51  ;;  %v6060_v47 = vmul.f32 -0.25, %v1737_v7  ;;  %v7152_v26 = vld [vmem:[#allocation96_spill] sm:$0xff]  ;;  %v7158_v12 = vld [vmem:[#allocation106_spill] sm:$0xff] }
 0x297   : > { %2832 = vst [vmem:[%s6034_s6 + $0x30] sm:$0xff] %v2448_v46  ;;  %v2504_v48 = vmul.f32 %v5822_v6, %v2424_v51  ;;  %2834 = vst [vmem:[%s6034_s6 + $0x40] sm:$0xff] %v2455_v45  ;;  %v2511_v55 = vmul.f32 %v5835_v44, %v2424_v51  ;;  %v2518_v11 = vmul.f32 %v5846_v34, %v2424_v51  ;;  %v6056_v6 = vmul.f32 -0.25, %v1666_v15 }
 0x298   : > { %2836 = vst [vmem:[%s6034_s6 + $0x50] sm:$0xff] %v2462_v0  ;;  %2838 = vst [vmem:[%s6034_s6 + $0x60] sm:$0xff] %v2469_v53  ;;  %v2525_v18 = vmul.f32 %v5862_v57, %v2424_v51  ;;  %v2532_v36 = vmul.f32 %v5879_v13, %v2424_v51  ;;  %v6058_v0 = vmul.f32 -0.25, %v1700_v2  ;;  %v1773_v23 = vadd.f32 %v5893_v61, %v1766_v60  ;;  %v7150_v2 = vld [vmem:[#allocation95_spill] sm:$0xff] }
 0x299   : > { %2840 = vst [vmem:[%s6034_s6 + $0x70] sm:$0xff] %v2476_v19  ;;  %2842 = vst [vmem:[%s6034_s6 + $0x80] sm:$0xff] %v2483_v56  ;;  %v1810_v44 = vadd.f32 %v5901_v24, %v1803_v25  ;;  %v7148_v34 = vand.u32 2147483647, %v7113_v33  ;;  %v7149_v13 = vand.u32 2147483647, %v7116_v37 }
 0x29a   : > { %2844 = vst [vmem:[%s6034_s6 + $0x90] sm:$0xff] %v2490_v27  ;;  %2846 = vst [vmem:[%s6034_s6 + $0xa0] sm:$0xff] %v2497_v63  ;;  %v7151_v15 = vand.u32 2147483647, %v7150_v2  ;;  %v1707_v61 = vmax.f32 %v6056_v6, %v6058_v0  ;;  %v1774_v60 = vadd.f32 %v1773_v23, %v1768_v39  ;;  %v7153_v28 = vand.u32 2147483647, %v7152_v26 }
 0x29b   : > { %2848 = vst [vmem:[%s6034_s6 + $0xb0] sm:$0xff] %v2504_v48  ;;  %2850 = vst [vmem:[%s6034_s6 + $0xc0] sm:$0xff] %v2511_v55  ;;  %v1840_v57 = vmul.f32 %v7148_v34, %v5984_v43  ;;  %v1842_v51 = vmul.f32 %v7149_v13, %v5989_v3  ;;  %v7154_v33 = vand.u32 2147483647, %v7117_v22  ;;  %v1811_v14 = vadd.f32 %v1810_v44, %v1805_v50  ;;  %v7160_v48 = vld [vmem:[#allocation110_spill] sm:$0xff]  ;;  %v7161_v55 = vld [vmem:[#allocation123_spill] sm:$0xff] }
 0x29c   : > { %2852 = vst [vmem:[%s6034_s6 + $0xd0] sm:$0xff] %v2518_v11  ;;  %2854 = vst [vmem:[%s6034_s6 + $0xe0] sm:$0xff] %v2525_v18  ;;  %v1877_v7 = vmul.f32 %v7151_v15, %v5984_v43  ;;  %v1879_v24 = vmul.f32 %v7153_v28, %v5989_v3  ;;  %v7155_v46 = vand.u32 2147483647, %v7120_v9  ;;  %v1744_v30 = vmax.f32 %v1707_v61, %v6060_v47  ;;  %v7164_v23 = vld [vmem:[#allocation53_spill] sm:$0xff] }
 0x29d   : > { %2856 = vst [vmem:[%s6034_s6 + $0xf0] sm:$0xff] %v2532_v36  ;;  %v1914_v25 = vmul.f32 %v7154_v33, %v5984_v43  ;;  %v1847_v37 = vadd.f32 %v5903_v35, %v1840_v57  ;;  %v6091_v39 = vmul.f32 -0.25, %v1774_v60  ;;  %v7156_v16 = vand.u32 2147483647, %v7121_v5 }
 0x29e   : > { %v1884_v1 = vadd.f32 %v5911_v20, %v1877_v7  ;;  %v1916_v45 = vmul.f32 %v7155_v46, %v5989_v3  ;;  %v6097_v19 = vmul.f32 -0.25, %v1811_v14  ;;  %v7157_v20 = vand.u32 2147483647, %v7118_v49 }
 0x29f   : > { %v1921_v53 = vadd.f32 %v5919_v29, %v1914_v25  ;;  %v1951_v22 = vmul.f32 %v7156_v16, %v5984_v43  ;;  %v1848_v50 = vadd.f32 %v1847_v37, %v1842_v51  ;;  %v1781_v9 = vmax.f32 %v1744_v30, %v6091_v39 }
 0x2a0   : > { %v1885_v35 = vadd.f32 %v1884_v1, %v1879_v24  ;;  %v1953_v56 = vmul.f32 %v7157_v20, %v5989_v3  ;;  %v7159_v29 = vand.u32 2147483647, %v7158_v12  ;;  %v2130_v5 = vand.u32 2147483647, %v7160_v48 }
 0x2a1   : > { %v1922_v17 = vadd.f32 %v1921_v53, %v1916_v45  ;;  %v1958_v27 = vadd.f32 %v5930_v32, %v1951_v22  ;;  %v7162_v11 = vand.u32 2147483647, %v7161_v55  ;;  %v7163_v36 = vand.u32 2147483647, %v7119_v59 }
 0x2a2   : > { %v1988_v63 = vmul.f32 %v7159_v29, %v5984_v43  ;;  %v2204_v44 = vand.u32 2147483647, %v7164_v23  ;;  %v1818_v34 = vmax.f32 %v1781_v9, %v6097_v19  ;;  %v6116_v57 = vmul.f32 -0.25, %v1848_v50 }
 0x2a3   : > { %v1990_v18 = vmul.f32 %v7162_v11, %v5989_v3  ;;  %v2025_v49 = vmul.f32 %v7163_v36, %v5984_v43  ;;  %v1959_v32 = vadd.f32 %v1958_v27, %v1953_v56  ;;  %v7165_v51 = vand.u32 2147483647, %v7122_v31 }
 0x2a4   : > { %v1995_v13 = vadd.f32 %v5941_v10, %v1988_v63  ;;  %v7166_v7 = vand.u32 2147483647, %v7123_v42  ;;  %v7167_v61 = vand.u32 2147483647, %v7124_v38  ;;  %v1855_v26 = vmax.f32 %v1818_v34, %v6116_v57 }
 0x2a5   : > { %v2027_v2 = vmul.f32 %v7165_v51, %v5989_v3  ;;  %v2032_v15 = vadd.f32 %v5953_v4, %v2025_v49  ;;  %v6130_v28 = vmul.f32 -0.25, %v1885_v35  ;;  %v7168_v10 = vand.u32 2147483647, %v7125_v21 }
 0x2a6   : > { %v2062_v59 = vmul.f32 %v7166_v7, %v5984_v43  ;;  %v2064_v60 = vmul.f32 %v7167_v61, %v5989_v3  ;;  %v1996_v24 = vadd.f32 %v1995_v13, %v1990_v18  ;;  %v7169_v42 = vand.u32 2147483647, %v7001_v54 }
 0x2a7   : > { %v2099_v31 = vmul.f32 %v7168_v10, %v5984_v43  ;;  %v2033_v33 = vadd.f32 %v2032_v15, %v2027_v2  ;;  %v7170_v38 = vand.u32 2147483647, %v5492_v62  ;;  %v1892_v37 = vmax.f32 %v1855_v26, %v6130_v28  ;;  %v7173_v62 = vld [vmem:[#allocation125_spill] sm:$0xff] }
 0x2a8   : > { %v2069_v4 = vadd.f32 %v5955_v40, %v2062_v59  ;;  %v2101_v25 = vmul.f32 %v7169_v42, %v5989_v3  ;;  %v1924_v1 = vmul.f32 -0.25, %v1922_v17  ;;  %v2138_v45 = vmul.f32 %v2130_v5, %v5989_v3  ;;  %v7171_v40 = vld [vmem:[#allocation124_spill] sm:$0xff] }
 0x2a9   : > { %v2136_v14 = vmul.f32 %v7170_v38, %v5984_v43  ;;  %v2106_v46 = vadd.f32 %v5961_v8, %v2099_v31  ;;  %v1961_v21 = vmul.f32 -0.25, %v1959_v32  ;;  %v7172_v16 = vand.u32 2147483647, %v7171_v40 }
 0x2aa   : > { %v2070_v30 = vadd.f32 %v2069_v4, %v2064_v60  ;;  %v1929_v22 = vmax.f32 %v1892_v37, %v1924_v1  ;;  %v7174_v35 = vand.u32 2147483647, %v7173_v62  ;;  %v2212_v56 = vmul.f32 %v2204_v44, %v5989_v3 }
 0x2ab   : > { %v2143_v53 = vadd.f32 %v5971_v41, %v2136_v14  ;;  %v2173_v54 = vmul.f32 %v7172_v16, %v5984_v43  ;;  %v2107_v50 = vadd.f32 %v2106_v46, %v2101_v25  ;;  %v1998_v27 = vmul.f32 -0.25, %v1996_v24 }
 0x2ac   : > { %v2175_v20 = vmul.f32 %v7174_v35, %v5989_v3  ;;  %v1966_v17 = vmax.f32 %v1929_v22, %v1961_v21  ;;  %v2218_v12 = vadd.f32 %v6011_v58, %v2212_v56  ;;  %v2035_v63 = vmul.f32 -0.25, %v2033_v33 }
 0x2ad   : > { %v2144_v9 = vadd.f32 %v2143_v53, %v2138_v45  ;;  %v2180_v8 = vadd.f32 %v5975_v52, %v2173_v54  ;;  %v2072_v43 = vmul.f32 -0.25, %v2070_v30  ;;  %v2109_v55 = vmul.f32 -0.25, %v2107_v50 }
 0x2ae   : > { %v2003_v29 = vmax.f32 %v1966_v17, %v1998_v27  ;;  %v6155_v3 = vmul.f32 -0.25, %v2218_v12 }
 0x2af   : > { %v2181_v41 = vadd.f32 %v2180_v8, %v2175_v20  ;;  %v2146_v18 = vmul.f32 -0.25, %v2144_v9 }
 0x2b0   : > { %v2040_v48 = vmax.f32 %v2003_v29, %v2035_v63 }
 0x2b1   : > { %v2183_v49 = vmul.f32 -0.25, %v2181_v41 }
 0x2b2   : > { %v2077_v5 = vmax.f32 %v2040_v48, %v2072_v43 }
 0x2b4   : > { %v2114_v11 = vmax.f32 %v2077_v5, %v2109_v55 }
 0x2b6   : > { %v2151_v36 = vmax.f32 %v2114_v11, %v2146_v18 }
 0x2b8   : > { %v2188_v23 = vmax.f32 %v2151_v36, %v2183_v49 }
 0x2ba   : > { %v2225_v52 = vmax.f32 %v2188_v23, %v6155_v3 }
 0x2bc   : > { %v2229_v44 = vsub.f32 %v6056_v6, %v2225_v52  ;;  %v2241_v58 = vsub.f32 %v6058_v0, %v2225_v52  ;;  %v2253_v34 = vsub.f32 %v6060_v47, %v2225_v52  ;;  %v2265_v32 = vsub.f32 %v6091_v39, %v2225_v52 }
 0x2bd   : > { %v2277_v13 = vsub.f32 %v6097_v19, %v2225_v52  ;;  %v2289_v51 = vsub.f32 %v6116_v57, %v2225_v52  ;;  %v2301_v2 = vsub.f32 %v6130_v28, %v2225_v52  ;;  %v2313_v15 = vsub.f32 %v1924_v1, %v2225_v52 }
 0x2be   : > { %v2232_v7 = vmul.f32 1.442695, %v2229_v44  ;;  %v2244_v59 = vmul.f32 1.442695, %v2241_v58  ;;  %v2325_v61 = vsub.f32 %v1961_v21, %v2225_v52  ;;  %v2256_v60 = vmul.f32 1.442695, %v2253_v34 }
 0x2bf   : > { %v2337_v26 = vsub.f32 %v1998_v27, %v2225_v52  ;;  %v2268_v6 = vmul.f32 1.442695, %v2265_v32  ;;  %v2349_v0 = vsub.f32 %v2035_v63, %v2225_v52  ;;  %v2361_v24 = vsub.f32 %v2072_v43, %v2225_v52 }
 0x2c0   : > { %3007 = vpow2.f32 %v2232_v7  ;;  %v2373_v47 = vsub.f32 %v2109_v55, %v2225_v52  ;;  %v2385_v10 = vsub.f32 %v2146_v18, %v2225_v52  ;;  %v2397_v39 = vsub.f32 %v2183_v49, %v2225_v52 }
 0x2c1   : > { %3009 = vpow2.f32 %v2244_v59  ;;  %v2280_v19 = vmul.f32 1.442695, %v2277_v13  ;;  %v2409_v57 = vsub.f32 %v6155_v3, %v2225_v52  ;;  %v2292_v28 = vmul.f32 1.442695, %v2289_v51 }
 0x2c2   : > { %3011 = vpow2.f32 %v2256_v60  ;;  %v2304_v31 = vmul.f32 1.442695, %v2301_v2  ;;  %v2316_v33 = vmul.f32 1.442695, %v2313_v15  ;;  %v2328_v25 = vmul.f32 1.442695, %v2325_v61 }
 0x2c3   : > { %3013 = vpow2.f32 %v2268_v6  ;;  %v2340_v37 = vmul.f32 1.442695, %v2337_v26  ;;  %v2352_v45 = vmul.f32 1.442695, %v2349_v0  ;;  %v2364_v53 = vmul.f32 1.442695, %v2361_v24 }
 0x2c4   : > { %3015 = vpow2.f32 %v2280_v19  ;;  %v2376_v54 = vmul.f32 1.442695, %v2373_v47  ;;  %v2388_v62 = vmul.f32 1.442695, %v2385_v10  ;;  %v2400_v56 = vmul.f32 1.442695, %v2397_v39 }
 0x2c5   : > { %3017 = vpow2.f32 %v2292_v28  ;;  %v2412_v17 = vmul.f32 1.442695, %v2409_v57  ;;  %v2638_v19 = vld [vmem:[%s6034_s6] sm:$0xff] (%p3183_p5)  ;;  %v2642_v28 = vld [vmem:[%s6034_s6 + $0x10] sm:$0xff] (%p3183_p5) }
 0x2c6   : > { %3019 = vpow2.f32 %v2304_v31  ;;  %2639 = vst [vmem:[%s6198_s22] sm:$0xff] (%p3183_p5), %v2638_v19  ;;  %2643 = vst [vmem:[%s6198_s22 + $0x20] sm:$0xff] (%p3183_p5), %v2642_v28 }
 0x2c7   : > { %3021 = vpow2.f32 %v2316_v33  ;;  %v2646_v33 = vld [vmem:[%s6034_s6 + $0x20] sm:$0xff] (%p3183_p5) }
 0x2c8   : > { %3023 = vpow2.f32 %v2328_v25  ;;  %2647 = vst [vmem:[%s6198_s22 + $0x40] sm:$0xff] (%p3183_p5), %v2646_v33 }
 0x2c9   : > { %3025 = vpow2.f32 %v2340_v37  ;;  %v2658_v37 = vld [vmem:[%s6034_s6 + $0x50] sm:$0xff] (%p3183_p5) }
 0x2ca   : > { %v3008_v4 = vpop.eup %3007  ;;  %3027 = vpow2.f32 %v2352_v45  ;;  %2659 = vst [vmem:[%s6198_s22 + $0xa0] sm:$0xff] (%p3183_p5), %v2658_v37 }
 0x2cb   : > { %v3010_v42 = vpop.eup %3009  ;;  %3029 = vpow2.f32 %v2364_v53  ;;  %v2670_v53 = vld [vmem:[%s6034_s6 + $0x80] sm:$0xff] (%p3183_p5) }
 0x2cc   : > { %v2249_v38 = vadd.f32 %v3010_v42, %v3008_v4  ;;  %v3012_v14 = vpop.eup %3011  ;;  %3031 = vpow2.f32 %v2376_v54  ;;  %2671 = vst [vmem:[%s6198_s22 + $0x100] sm:$0xff] (%p3183_p5), %v2670_v53 }
 0x2cd   : > { %v3014_v46 = vpop.eup %3013  ;;  %3033 = vpow2.f32 %v2388_v62  ;;  %v2682_v62 = vld [vmem:[%s6034_s6 + $0xb0] sm:$0xff] (%p3183_p5) }
 0x2ce   : > { %v2261_v1 = vadd.f32 %v3012_v14, %v2249_v38  ;;  %v3016_v30 = vpop.eup %3015  ;;  %3035 = vpow2.f32 %v2400_v56  ;;  %v2654_v38 = vld [vmem:[%s6034_s6 + $0x40] sm:$0xff] (%p3183_p5)  ;;  %2683 = vst [vmem:[%s6198_s22 + $0x160] sm:$0xff] (%p3183_p5), %v2682_v62 }
 0x2cf   : > { %v3018_v16 = vpop.eup %3017  ;;  %3037 = vpow2.f32 %v2412_v17  ;;  %2655 = vst [vmem:[%s6198_s22 + $0x80] sm:$0xff] (%p3183_p5), %v2654_v38  ;;  %v2694_v17 = vld [vmem:[%s6034_s6 + $0xe0] sm:$0xff] (%p3183_p5) }
 0x2d0   : > { %v2273_v21 = vadd.f32 %v3014_v46, %v2261_v1  ;;  %v3020_v50 = vpop.eup %3019  ;;  %2695 = vst [vmem:[%s6198_s22 + $0x1c0] sm:$0xff] (%p3183_p5), %v2694_v17 }
 0x2d1   : > { %v3022_v20 = vpop.eup %3021 }
 0x2d2   : > { %v2285_v40 = vadd.f32 %v3016_v30, %v2273_v21  ;;  %v3024_v8 = vpop.eup %3023  ;;  %v2666_v21 = vld [vmem:[%s6034_s6 + $0x70] sm:$0xff] (%p3183_p5) }
 0x2d3   : > { %v3026_v12 = vpop.eup %3025  ;;  %2667 = vst [vmem:[%s6198_s22 + $0xe0] sm:$0xff] (%p3183_p5), %v2666_v21 }
 0x2d4   : > { %v2297_v22 = vadd.f32 %v3018_v16, %v2285_v40  ;;  %v3028_v29 = vpop.eup %3027 }
 0x2d5   : > { %v3030_v48 = vpop.eup %3029 }
 0x2d6   : > { %v2309_v35 = vadd.f32 %v3020_v50, %v2297_v22  ;;  %v3032_v5 = vpop.eup %3031  ;;  %v2678_v22 = vld [vmem:[%s6034_s6 + $0xa0] sm:$0xff] (%p3183_p5) }
 0x2d7   : > { %v3034_v11 = vpop.eup %3033  ;;  %2679 = vst [vmem:[%s6198_s22 + $0x140] sm:$0xff] (%p3183_p5), %v2678_v22 }
 0x2d8   : > { %v2321_v9 = vadd.f32 %v3022_v20, %v2309_v35  ;;  %v3036_v36 = vpop.eup %3035 }
 0x2d9   : > { %v3038_v23 = vpop.eup %3037 }
 0x2da   : > { %v2333_v27 = vadd.f32 %v3024_v8, %v2321_v9  ;;  %v2690_v9 = vld [vmem:[%s6034_s6 + $0xd0] sm:$0xff] (%p3183_p5) }
 0x2db   : > { %2691 = vst [vmem:[%s6198_s22 + $0x1a0] sm:$0xff] (%p3183_p5), %v2690_v9 }
 0x2dc   : > { %v2345_v41 = vadd.f32 %v3026_v12, %v2333_v27 }
 0x2de   : > { %v2357_v63 = vadd.f32 %v3028_v29, %v2345_v41 }
 0x2e0   : > { %v2369_v43 = vadd.f32 %v3030_v48, %v2357_v63 }
 0x2e2   : > { %v2381_v55 = vadd.f32 %v3032_v5, %v2369_v43 }
 0x2e4   : > { %v2393_v18 = vadd.f32 %v3034_v11, %v2381_v55 }
 0x2e6   : > { %v2405_v49 = vadd.f32 %v3036_v36, %v2393_v18 }
 0x2e8   : > { %v2417_v3 = vadd.f32 %v3038_v23, %v2405_v49 }
 0x2ea   : > { %3039 = vrcp.f32 %v2417_v3 }
 0x2f4   : > { %v3040_v52 = vpop.eup %3039 }
 0x2f5   : > { %v2421_v44 = vmul.f32 %v3040_v52, %v2417_v3 }
 0x2f7   : > { %v2423_v58 = vsub.f32 2.0, %v2421_v44 }
 0x2f9   : > { %v2425_v34 = vmul.f32 %v3040_v52, %v2423_v58 }
 0x2fb   : > { %v2429_v32 = vmul.f32 %v3008_v4, %v2425_v34  ;;  %v2435_v13 = vmul.f32 %v3010_v42, %v2425_v34  ;;  %v2442_v51 = vmul.f32 %v3012_v14, %v2425_v34  ;;  %v2449_v2 = vmul.f32 %v3014_v46, %v2425_v34  ;;  %v2650_v42 = vld [vmem:[%s6034_s6 + $0x30] sm:$0xff] (%p3183_p5)  ;;  %v2662_v46 = vld [vmem:[%s6034_s6 + $0x60] sm:$0xff] (%p3183_p5) }
 0x2fc   : > { %v2456_v15 = vmul.f32 %v3016_v30, %v2425_v34  ;;  %v2463_v7 = vmul.f32 %v3018_v16, %v2425_v34  ;;  %v2470_v59 = vmul.f32 %v3020_v50, %v2425_v34  ;;  %v2477_v61 = vmul.f32 %v3022_v20, %v2425_v34  ;;  %2651 = vst [vmem:[%s6198_s22 + $0x60] sm:$0xff] (%p3183_p5), %v2650_v42  ;;  %v2674_v16 = vld [vmem:[%s6034_s6 + $0x90] sm:$0xff] (%p3183_p5)  ;;  %v2686_v20 = vld [vmem:[%s6034_s6 + $0xc0] sm:$0xff] (%p3183_p5) }
 0x2fd   : > { %2431 = vst [vmem:[%s6034_s6 + $0x8] sm:$0xff] %v2429_v32  ;;  %2829 = vst [vmem:[%s6034_s6 + $0x18] sm:$0xff] %v2435_v13  ;;  %v2484_v60 = vmul.f32 %v3024_v8, %v2425_v34  ;;  %v2491_v26 = vmul.f32 %v3026_v12, %v2425_v34  ;;  %v2498_v6 = vmul.f32 %v3028_v29, %v2425_v34  ;;  %v2698_v12 = vld [vmem:[%s6034_s6 + $0xf0] sm:$0xff] (%p3183_p5) }
 0x2fe   : > { %2831 = vst [vmem:[%s6034_s6 + $0x28] sm:$0xff] %v2442_v51  ;;  %2833 = vst [vmem:[%s6034_s6 + $0x38] sm:$0xff] %v2449_v2  ;;  %v2505_v0 = vmul.f32 %v3030_v48, %v2425_v34  ;;  %v2512_v24 = vmul.f32 %v3032_v5, %v2425_v34  ;;  %v2519_v47 = vmul.f32 %v3034_v11, %v2425_v34  ;;  %2543 = sbr.rel (!%p3183_p5) target bundleno = 783 (0x30f), region = 28 }
 0x2ff   : > { %2835 = vst [vmem:[%s6034_s6 + $0x48] sm:$0xff] %v2456_v15  ;;  %2837 = vst [vmem:[%s6034_s6 + $0x58] sm:$0xff] %v2463_v7  ;;  %v2526_v10 = vmul.f32 %v3036_v36, %v2425_v34  ;;  %v2533_v39 = vmul.f32 %v3038_v23, %v2425_v34 }
 0x300   : > { %2839 = vst [vmem:[%s6034_s6 + $0x68] sm:$0xff] %v2470_v59  ;;  %2841 = vst [vmem:[%s6034_s6 + $0x78] sm:$0xff] %v2477_v61 }
 0x301   : > { %2843 = vst [vmem:[%s6034_s6 + $0x88] sm:$0xff] %v2484_v60  ;;  %2845 = vst [vmem:[%s6034_s6 + $0x98] sm:$0xff] %v2491_v26 }
 0x302   : > { %2847 = vst [vmem:[%s6034_s6 + $0xa8] sm:$0xff] %v2498_v6  ;;  %2849 = vst [vmem:[%s6034_s6 + $0xb8] sm:$0xff] %v2505_v0 }
 0x303   : > { %2851 = vst [vmem:[%s6034_s6 + $0xc8] sm:$0xff] %v2512_v24  ;;  %2853 = vst [vmem:[%s6034_s6 + $0xd8] sm:$0xff] %v2519_v47 }
 0x304   : > { %2855 = vst [vmem:[%s6034_s6 + $0xe8] sm:$0xff] %v2526_v10  ;;  %2857 = vst [vmem:[%s6034_s6 + $0xf8] sm:$0xff] %v2533_v39  ;;  %v2640_v57 = vld [vmem:[%s6034_s6 + $0x8] sm:$0xff] (%p3183_p5)  ;;  %v2644_v31 = vld [vmem:[%s6034_s6 + $0x18] sm:$0xff] (%p3183_p5) }
 0x305   : > { %v2648_v4 = vld [vmem:[%s6034_s6 + $0x28] sm:$0xff]  ;;  %v2652_v25 = vld [vmem:[%s6034_s6 + $0x38] sm:$0xff]  ;;  %2641 = vst [vmem:[%s6198_s22 + $0x8] sm:$0xff] %v2640_v57  ;;  %2645 = vst [vmem:[%s6198_s22 + $0x28] sm:$0xff] %v2644_v31 }
 0x306   : > { %v2656_v14 = vld [vmem:[%s6034_s6 + $0x48] sm:$0xff]  ;;  %v2660_v1 = vld [vmem:[%s6034_s6 + $0x58] sm:$0xff]  ;;  %2649 = vst [vmem:[%s6198_s22 + $0x48] sm:$0xff] %v2648_v4  ;;  %2653 = vst [vmem:[%s6198_s22 + $0x68] sm:$0xff] %v2652_v25 }
 0x307   : > { %2657 = vst [vmem:[%s6198_s22 + $0x88] sm:$0xff] %v2656_v14  ;;  %2661 = vst [vmem:[%s6198_s22 + $0xa8] sm:$0xff] %v2660_v1  ;;  %v2664_v45 = vld [vmem:[%s6034_s6 + $0x68] sm:$0xff]  ;;  %v2668_v30 = vld [vmem:[%s6034_s6 + $0x78] sm:$0xff] }
 0x308   : > { %2663 = vst [vmem:[%s6198_s22 + $0xc0] sm:$0xff] %v2662_v46  ;;  %2665 = vst [vmem:[%s6198_s22 + $0xc8] sm:$0xff] %v2664_v45  ;;  %v2672_v40 = vld [vmem:[%s6034_s6 + $0x88] sm:$0xff]  ;;  %v2676_v54 = vld [vmem:[%s6034_s6 + $0x98] sm:$0xff] }
 0x309   : > { %2669 = vst [vmem:[%s6198_s22 + $0xe8] sm:$0xff] %v2668_v30  ;;  %2673 = vst [vmem:[%s6198_s22 + $0x108] sm:$0xff] %v2672_v40  ;;  %v2680_v50 = vld [vmem:[%s6034_s6 + $0xa8] sm:$0xff]  ;;  %v2684_v35 = vld [vmem:[%s6034_s6 + $0xb8] sm:$0xff] }
 0x30a   : > { %2675 = vst [vmem:[%s6198_s22 + $0x120] sm:$0xff] %v2674_v16  ;;  %2677 = vst [vmem:[%s6198_s22 + $0x128] sm:$0xff] %v2676_v54  ;;  %v2688_v56 = vld [vmem:[%s6034_s6 + $0xc8] sm:$0xff]  ;;  %v2692_v8 = vld [vmem:[%s6034_s6 + $0xd8] sm:$0xff] }
 0x30b   : > { %2681 = vst [vmem:[%s6198_s22 + $0x148] sm:$0xff] %v2680_v50  ;;  %2685 = vst [vmem:[%s6198_s22 + $0x168] sm:$0xff] %v2684_v35  ;;  %v2696_v27 = vld [vmem:[%s6034_s6 + $0xe8] sm:$0xff]  ;;  %v2700_v41 = vld [vmem:[%s6034_s6 + $0xf8] sm:$0xff] }
 0x30c   : > { %2687 = vst [vmem:[%s6198_s22 + $0x180] sm:$0xff] %v2686_v20  ;;  %2689 = vst [vmem:[%s6198_s22 + $0x188] sm:$0xff] %v2688_v56 }
 0x30d   : > { %2693 = vst [vmem:[%s6198_s22 + $0x1a8] sm:$0xff] %v2692_v8  ;;  %2697 = vst [vmem:[%s6198_s22 + $0x1c8] sm:$0xff] %v2696_v27 }
 0x30e   : > { %2699 = vst [vmem:[%s6198_s22 + $0x1e0] sm:$0xff] %v2698_v12  ;;  %2701 = vst [vmem:[%s6198_s22 + $0x1e8] sm:$0xff] %v2700_v41 }
 0x30f PF: > { %s11_s12 = sadd.s32 1, %s3119_s12   ;;  %s7175_s6 = smov %s3099_s7 }
 0x310   : > { %p8_p10 = scmp.ge.s32.totalorder %s11_s12, 6   ;;  %s7176_s7 = smov %s3194_s21 }
 0x311   : > { %s7177_s8 = smov %s3111_s10  ;;  %s7178_s9 = smov %s3115_s11 }
 0x312   : > { %s7179_s10 = smov %s7182_s13  ;;  %s7180_s11 = smov %s7186_s14 }
 0x313   :  { %10 = sbr.rel (!%p8_p10) target bundleno = 4 (0x4), region = 142 }

</bundles_post_ra>
